<compile_context>
chip_gen: v7x
topology: tpu7x:2x2x1
jax: 0.10.0
libtpu: 0.0.40
codegen_flags: <defaults>
</compile_context>

<pallas_src>
import functools

import numpy as np
import jax
import jax.numpy as jnp
from jax.experimental import pallas as pl
from jax.experimental.pallas import tpu as pltpu


# ----------------------------------------------------------------------------
# Kernel
# ----------------------------------------------------------------------------
def _elu(x):
    # PyTorch ELU (alpha=1): x if x > 0 else exp(x) - 1.
    # min() keeps the discarded exp branch finite for large positive x.
    return jnp.where(x > 0, x, jnp.exp(jnp.minimum(x, 0.0)) - 1.0)


def cnn_fused_kernel(a1_ref, w1_ref, s1_ref, t1_ref, w2_ref, s2_ref, t2_ref,
                     fc1w_ref, fc1b_ref, fc2w_ref, fc2b_ref, fc3w_ref, fc3b_ref,
                     out_ref, apad2_ref, z2s_ref, *, bb, height):
    """One batch block (bb images) of the CNN_USTC forward.

    Row layout of all activation slabs: row = y * bb + b   (b = image within block).

    a1_ref  : (H*bb, 144)     bf16  conv1 LHS, lane = dy*48 + x*3 + c
    w1_ref  : (144, W*16)     bf16  K-concatenated banded conv1 weights
    w2_ref  : (3, W*16, W*32) bf16  banded conv2 weights, output lanes parity-split
    s*/t*   : (1, W*C)        f32   folded BN scale / bias, tiled over x
    fc1w_ref: (8, 256, 1024)  bf16  fc1 weights split per pooled output row yo
    fc3w/b  : zero-padded to 128 output lanes
    """
    f32, bf16 = jnp.float32, jnp.bfloat16
    R = height * bb                                     # conv rows per block

    # ---- conv1 (3x3, pad=1) + BN + ELU: single K=144 MXU matmul ------------------
    z1 = jnp.dot(a1_ref[...], w1_ref[...], preferred_element_type=f32)
    z1 = _elu(z1 * s1_ref[...] + t1_ref[...])                        # (R, W*16) f32

    # ---- re-pad in y for conv2 (write only the two bb-row zero bands) ------------
    wc1 = apad2_ref.shape[1]
    apad2_ref[0:bb, :] = jnp.zeros((bb, wc1), bf16)
    apad2_ref[bb:bb + R, :] = z1.astype(bf16)
    apad2_ref[bb + R:2 * bb + R, :] = jnp.zeros((bb, wc1), bf16)

    # ---- conv2 (3x3, pad=1) + BN + ELU: three bb-aligned y-shifted matmuls -------
    z2 = jnp.dot(apad2_ref[0:R, :], w2_ref[0], preferred_element_type=f32)
    for dy in (1, 2):
        z2 = z2 + jnp.dot(apad2_ref[dy * bb:dy * bb + R, :], w2_ref[dy],
                          preferred_element_type=f32)
    z2s_ref[...] = _elu(z2 * s2_ref[...] + t2_ref[...]).astype(bf16)  # (R, W*32)

    # ---- MaxPool2d(2,2) fused with fc1 (accumulated over pooled row yo) ----------
    # y-pairs are adjacent bb-row groups; x-pairs are the two 256-lane halves
    # (conv2 output lanes were parity-split offline).  No flatten scratch.
    half = z2s_ref.shape[1] // 2
    h = None
    for yo in range(height // 2):
        za = z2s_ref[(2 * yo) * bb:(2 * yo + 1) * bb, :]
        zb = z2s_ref[(2 * yo + 1) * bb:(2 * yo + 2) * bb, :]
        zm = jnp.maximum(za, zb)
        zp = jnp.maximum(zm[:, 0:half], zm[:, half:2 * half])         # (bb, 256) bf16
        d = jnp.dot(zp, fc1w_ref[yo], preferred_element_type=f32)
        h = d if h is None else h + d

    # ---- MLP head -----------------------------------------------------------------
    # TODO(synk): Dropout(p=0.02) is identity here (inference mode, no RNG mask).
    h = _elu(h + fc1b_ref[...])
    h = jnp.dot(h.astype(bf16), fc2w_ref[...], preferred_element_type=f32) + fc2b_ref[...]
    h = _elu(h)
    y = jnp.dot(h.astype(bf16), fc3w_ref[...], preferred_element_type=f32) + fc3b_ref[...]
    out_ref[...] = y.astype(out_ref.dtype)


# ----------------------------------------------------------------------------
# One-time parameter preparation (BN fold, conv banding, fc1 split, fc3 pad)
# ----------------------------------------------------------------------------
def prepare_params(p, height=16, width=16, eps=1e-5):
    c2 = p["w2"].shape[-1]          # 32

    def fold_bn(gamma, beta, mean, var, conv_b):
        s = np.asarray(gamma, np.float64) / np.sqrt(np.asarray(var, np.float64) + eps)
        t = (np.asarray(beta, np.float64)
             + s * (np.asarray(conv_b, np.float64) - np.asarray(mean, np.float64)))
        return s.astype(np.float32), t.astype(np.float32)

    def band(w, block_perm):
        # (ky,kx,Cin,Cout) conv weight -> per-dy banded matmul weight (W*Cin, W*Cout):
        #   Wb[dy, xi*Cin+ci, perm(xo)*Cout+co] = w[dy, xi-xo+1, ci, co], |xi-xo|<=1.
        # The missing out-of-range entries implement the x zero-padding.
        wn = np.asarray(w, np.float32)
        _, _, cin, cout = wn.shape
        wb = np.zeros((3, width * cin, width * cout), np.float32)
        for dy in range(3):
            for dx in range(3):
                for xo in range(width):
                    xi = xo + dx - 1
                    if 0 <= xi < width:
                        bo = block_perm(xo)
                        wb[dy, xi * cin:(xi + 1) * cin, bo * cout:(bo + 1) * cout] = wn[dy, dx]
        return wb

    s1, t1 = fold_bn(*p["bn1"], p["b1"])
    s2, t2 = fold_bn(*p["bn2"], p["b2"])

    # conv1 output lanes: x*16 + c.  conv2 output lanes: parity-split over x so the
    # max-pool x reduction becomes max(first 256 lanes, last 256 lanes).
    w1b = band(p["w1"], lambda x: x)                                # (3, 48, 256)
    w1cat = w1b.reshape(-1, w1b.shape[2])                           # (144, 256) K-concat
    w2b = band(p["w2"], lambda x: (x % 2) * (width // 2) + x // 2)  # (3, 256, 512)

    # fc1 rows: torch flattens pooled (C, H/2, W/2) as (c, yo, xo); ours is (yo, xo, c).
    hp, wp = height // 2, width // 2
    idx = np.empty(c2 * hp * wp, np.int32)
    for yo in range(hp):
        for xo in range(wp):
            for c in range(c2):
                idx[(yo * wp + xo) * c2 + c] = (c * hp + yo) * wp + xo
    fc1p = np.asarray(p["fc1_w"], np.float32)[idx, :]
    fc1p = fc1p.reshape(hp, wp * c2, fc1p.shape[1])                 # (8, 256, 1024)

    # Pad fc3 to 128 output lanes (lane-dense store); wrapper slices back.
    ncls = p["fc3_w"].shape[1]
    npad = -(-ncls // 128) * 128
    fc3w = np.zeros((p["fc3_w"].shape[0], npad), np.float32)
    fc3w[:, :ncls] = np.asarray(p["fc3_w"], np.float32)
    fc3b = np.zeros((1, npad), np.float32)
    fc3b[:, :ncls] = np.asarray(p["fc3_b"], np.float32)

    # TODO(synk): fc1_w could drop below bf16 (int8 on v5e/v6e, fp8 on v7x) to shrink
    # the dominant resident-weight footprint; kept bf16 here for generation portability.
    f32, bf16 = jnp.float32, jnp.bfloat16
    return dict(
        w1cat=jnp.asarray(w1cat, bf16),
        s1=jnp.asarray(np.tile(s1, width)[None, :], f32),
        t1=jnp.asarray(np.tile(t1, width)[None, :], f32),
        w2b=jnp.asarray(w2b, bf16),
        s2=jnp.asarray(np.tile(s2, width)[None, :], f32),
        t2=jnp.asarray(np.tile(t2, width)[None, :], f32),
        fc1_w=jnp.asarray(fc1p, bf16),
        fc1_b=jnp.asarray(p["fc1_b"], f32),
        fc2_w=jnp.asarray(p["fc2_w"], bf16),
        fc2_b=jnp.asarray(p["fc2_b"], f32),
        fc3_w=jnp.asarray(fc3w, bf16),
        fc3_b=jnp.asarray(fc3b, f32),
    )


# ----------------------------------------------------------------------------
# Forward wrapper: input relayout + one pallas_call with a batch-block grid
# ----------------------------------------------------------------------------
def cnn_ustc_forward(x_nchw, prep, *, n_classes, bb=8):
    """Full CNN_USTC forward.  bb = images per grid step (must be a multiple of 8;
    raise it for throughput — weights stay VMEM-resident across the whole grid)."""
    assert bb % 8 == 0
    B, c0, H, W = x_nchw.shape
    nb = -(-B // bb)
    Bp = nb * bb

    # NCHW -> channels-last rows, zero-pad in y, lane-concat the 3 y-windows so
    # conv1 is a single K=144 matmul in-kernel.  Rows are y-major / batch-minor
    # within each grid block so every in-kernel slice is sublane-aligned.
    x = jnp.transpose(x_nchw, (0, 2, 3, 1)).astype(jnp.float32)        # (B,H,W,C0)
    x = x.reshape(B, H, W * c0)
    if Bp != B:
        x = jnp.pad(x, ((0, Bp - B), (0, 0), (0, 0)))
    xp = jnp.pad(x, ((0, 0), (1, 1), (0, 0)))                          # (Bp,H+2,W*C0)
    win = jnp.concatenate([xp[:, 0:H, :], xp[:, 1:H + 1, :], xp[:, 2:H + 2, :]],
                          axis=-1)                                     # (Bp,H,3*W*C0)
    a1 = (win.reshape(nb, bb, H, 3 * W * c0)
             .transpose(0, 2, 1, 3)
             .reshape(nb * H * bb, 3 * W * c0)
             .astype(jnp.bfloat16))

    k1 = prep["w1cat"].shape[0]              # 144
    wc1 = prep["w2b"].shape[1]               # W*16 = 256
    wc2 = prep["w2b"].shape[2]               # W*32 = 512
    hp = prep["fc1_w"].shape[0]              # 8
    nhid1 = prep["fc1_w"].shape[2]           # 1024
    nhid2 = prep["fc2_w"].shape[1]           # 128
    nout = prep["fc3_w"].shape[1]            # 128 (padded classes)

    # Constant index_map => DMA'd once per call, VMEM-resident across the grid.
    def const(shape):
        return pl.BlockSpec(shape, lambda i: (0,) * len(shape))

    kernel = functools.partial(cnn_fused_kernel, bb=bb, height=H)
    out = pl.pallas_call(
        kernel,
        grid=(nb,),
        out_shape=jax.ShapeDtypeStruct((Bp, nout), jnp.float32),
        in_specs=[
            pl.BlockSpec((H * bb, k1), lambda i: (i, 0)),              # a1 (per block)
            const((k1, wc1)),                                          # w1cat
            const((1, wc1)), const((1, wc1)),                          # s1, t1
            const((3, wc1, wc2)),                                      # w2b
            const((1, wc2)), const((1, wc2)),                          # s2, t2
            const((hp, wc1, nhid1)),                                   # fc1_w
            const((1, nhid1)),                                         # fc1_b
            const((nhid1, nhid2)),                                     # fc2_w
            const((1, nhid2)),                                         # fc2_b
            const((nhid2, nout)),                                      # fc3_w (padded)
            const((1, nout)),                                          # fc3_b (padded)
        ],
        out_specs=pl.BlockSpec((bb, nout), lambda i: (i, 0)),
        scratch_shapes=[
            pltpu.VMEM(((H + 2) * bb, wc1), jnp.bfloat16),             # re-padded conv1 out
            pltpu.VMEM((H * bb, wc2), jnp.bfloat16),                   # conv2 out
        ],
        compiler_params=pltpu.CompilerParams(
            dimension_semantics=("parallel",),                         # megacore on v7x
            vmem_limit_bytes=32 * 1024 * 1024),
    )(a1, prep["w1cat"], prep["s1"], prep["t1"], prep["w2b"], prep["s2"], prep["t2"],
      prep["fc1_w"], prep["fc1_b"], prep["fc2_w"], prep["fc2_b"],
      prep["fc3_w"], prep["fc3_b"])

    return out[:B, :n_classes]


# ----------------------------------------------------------------------------
# Deterministic synthetic parameters (shapes from CNN_USTC.__init__)
# ----------------------------------------------------------------------------
def init_params(key, class_nums):
    ks = jax.random.split(key, 18)
    n = lambda k, shape, s: jax.random.normal(k, shape, jnp.float32) * s

    p = {}
    # layer1: Conv2d(3->16, 3x3, pad=1) + BatchNorm2d(16)
    p["w1"] = n(ks[0], (3, 3, 3, 16), 0.10)            # (ky, kx, Cin, Cout)
    p["b1"] = n(ks[1], (16,), 0.10)
    p["bn1"] = (jnp.abs(n(ks[2], (16,), 0.2)) + 0.5,    # gamma
                n(ks[3], (16,), 0.10),                  # beta
                n(ks[4], (16,), 0.10),                  # running_mean
                jnp.abs(n(ks[5], (16,), 0.2)) + 0.5)    # running_var
    # layer2: Conv2d(16->32, 3x3, pad=1) + BatchNorm2d(32)
    p["w2"] = n(ks[6], (3, 3, 16, 32), 0.05)
    p["b2"] = n(ks[7], (32,), 0.05)
    p["bn2"] = (jnp.abs(n(ks[8], (32,), 0.2)) + 0.5,
                n(ks[9], (32,), 0.10),
                n(ks[10], (32,), 0.10),
                jnp.abs(n(ks[11], (32,), 0.2)) + 0.5)
    # out: Linear(2048->1024), Linear(1024->128), Linear(128->class_nums)
    # NOTE: real torch weights are (out,in) / (Cout,Cin,ky,kx) and would need
    # transposes/permutes before prepare_params; these synthetic ones are (in,out).
    p["fc1_w"] = n(ks[12], (32 * 8 * 8, 1024), 0.02)
    p["fc1_b"] = n(ks[13], (1, 1024), 0.02)
    p["fc2_w"] = n(ks[14], (1024, 128), 0.03)
    p["fc2_b"] = n(ks[15], (1, 128), 0.03)
    p["fc3_w"] = n(ks[16], (128, class_nums), 0.05)
    p["fc3_b"] = n(ks[17], (1, class_nums), 0.05)
    return p


if __name__ == "__main__":
    class_nums = 10
    key = jax.random.PRNGKey(0)
    k_x, k_p = jax.random.split(key)

    params = init_params(k_p, class_nums)
    prep = prepare_params(params)        # one-time weight relayout / BN fold / bf16 cast
    x = jax.random.normal(k_x, (2, 3, 16, 16), jnp.float32)   # NCHW, implied 16x16 input

    fwd = jax.jit(cnn_ustc_forward, static_argnames=("n_classes", "bb"))
    logits = fwd(x, prep, n_classes=class_nums)
    jax.block_until_ready(logits)

    assert logits.shape == (2, class_nums), logits.shape
    assert bool(jnp.all(jnp.isfinite(logits)))
    print("KERNEL_OK")
</pallas_src>

<mosaic_0001>
module attributes {stable_mosaic.version = 11 : i64} {
  func.func @cnn_fused_kernel(%arg0: i32, %arg1: memref<128x144xbf16, #tpu.memory_space<vmem>>, %arg2: memref<144x256xbf16, #tpu.memory_space<vmem>>, %arg3: memref<1x256xf32, #tpu.memory_space<vmem>>, %arg4: memref<1x256xf32, #tpu.memory_space<vmem>>, %arg5: memref<3x256x512xbf16, #tpu.memory_space<vmem>>, %arg6: memref<1x512xf32, #tpu.memory_space<vmem>>, %arg7: memref<1x512xf32, #tpu.memory_space<vmem>>, %arg8: memref<8x256x1024xbf16, #tpu.memory_space<vmem>>, %arg9: memref<1x1024xf32, #tpu.memory_space<vmem>>, %arg10: memref<1024x128xbf16, #tpu.memory_space<vmem>>, %arg11: memref<1x128xf32, #tpu.memory_space<vmem>>, %arg12: memref<128x128xbf16, #tpu.memory_space<vmem>>, %arg13: memref<1x128xf32, #tpu.memory_space<vmem>>, %arg14: memref<8x128xf32, #tpu.memory_space<vmem>>, %arg15: memref<144x256xbf16, #tpu.memory_space<vmem>>, %arg16: memref<128x512xbf16, #tpu.memory_space<vmem>>) attributes {dimension_semantics = [#tpu.dimension_semantics<parallel>], iteration_bounds = array<i64: 1>, scalar_prefetch = 0 : i64, scratch_operands = 2 : i64, tpu.core_type = #tpu.core_type<tc>, window_params = [{transform_indices = @transform_0, window_bounds = array<i64: 128, 144>}, {pipeline_mode = #tpu.pipeline_mode<synchronous>, transform_indices = @transform_1, window_bounds = array<i64: 144, 256>}, {pipeline_mode = #tpu.pipeline_mode<synchronous>, transform_indices = @transform_2, window_bounds = array<i64: 1, 256>}, {pipeline_mode = #tpu.pipeline_mode<synchronous>, transform_indices = @transform_3, window_bounds = array<i64: 1, 256>}, {pipeline_mode = #tpu.pipeline_mode<synchronous>, transform_indices = @transform_4, window_bounds = array<i64: 3, 256, 512>}, {pipeline_mode = #tpu.pipeline_mode<synchronous>, transform_indices = @transform_5, window_bounds = array<i64: 1, 512>}, {pipeline_mode = #tpu.pipeline_mode<synchronous>, transform_indices = @transform_6, window_bounds = array<i64: 1, 512>}, {pipeline_mode = #tpu.pipeline_mode<synchronous>, transform_indices = @transform_7, window_bounds = array<i64: 8, 256, 1024>}, {pipeline_mode = #tpu.pipeline_mode<synchronous>, transform_indices = @transform_8, window_bounds = array<i64: 1, 1024>}, {pipeline_mode = #tpu.pipeline_mode<synchronous>, transform_indices = @transform_9, window_bounds = array<i64: 1024, 128>}, {pipeline_mode = #tpu.pipeline_mode<synchronous>, transform_indices = @transform_10, window_bounds = array<i64: 1, 128>}, {pipeline_mode = #tpu.pipeline_mode<synchronous>, transform_indices = @transform_11, window_bounds = array<i64: 128, 128>}, {pipeline_mode = #tpu.pipeline_mode<synchronous>, transform_indices = @transform_12, window_bounds = array<i64: 1, 128>}, {transform_indices = @transform_13, window_bounds = array<i64: 8, 128>}]} {
    %c0 = arith.constant 0 : index
    %c0_0 = arith.constant 0 : index
    %0 = vector.load %arg1[%c0, %c0_0] : memref<128x144xbf16, #tpu.memory_space<vmem>>, vector<128x144xbf16>
    %c0_1 = arith.constant 0 : index
    %c0_2 = arith.constant 0 : index
    %1 = vector.load %arg2[%c0_1, %c0_2] : memref<144x256xbf16, #tpu.memory_space<vmem>>, vector<144x256xbf16>
    %cst = arith.constant dense<0.000000e+00> : vector<128x256xf32>
    %2 = tpu.matmul %0, %1, %cst {dimension_numbers = #tpu.dot_dimension_numbers<[1], [0], [0], [1], [0, 0, 1, 1], [], []>} : vector<128x144xbf16>, vector<144x256xbf16>, vector<128x256xf32> -> vector<128x256xf32>
    %c0_3 = arith.constant 0 : index
    %c0_4 = arith.constant 0 : index
    %3 = vector.load %arg3[%c0_3, %c0_4] : memref<1x256xf32, #tpu.memory_space<vmem>>, vector<1x256xf32>
    %4 = vector.broadcast %3 : vector<1x256xf32> to vector<128x256xf32>
    %5 = arith.mulf %2, %4 : vector<128x256xf32>
    %c0_5 = arith.constant 0 : index
    %c0_6 = arith.constant 0 : index
    %6 = vector.load %arg4[%c0_5, %c0_6] : memref<1x256xf32, #tpu.memory_space<vmem>>, vector<1x256xf32>
    %7 = vector.broadcast %6 : vector<1x256xf32> to vector<128x256xf32>
    %8 = arith.addf %5, %7 : vector<128x256xf32>
    %cst_7 = arith.constant 0.000000e+00 : f32
    %9 = vector.broadcast %cst_7 : f32 to vector<128x256xf32>
    %10 = arith.cmpf ogt, %8, %9 : vector<128x256xf32>
    %cst_8 = arith.constant 0.000000e+00 : f32
    %11 = vector.broadcast %cst_8 : f32 to vector<128x256xf32>
    %12 = arith.minimumf %8, %11 : vector<128x256xf32>
    %13 = math.exp %12 : vector<128x256xf32>
    %cst_9 = arith.constant 1.000000e+00 : f32
    %14 = vector.broadcast %cst_9 : f32 to vector<128x256xf32>
    %15 = arith.subf %13, %14 : vector<128x256xf32>
    %16 = arith.select %10, %8, %15 : vector<128x256xi1>, vector<128x256xf32>
    %cst_10 = arith.constant 0.000000e+00 : bf16
    %17 = vector.broadcast %cst_10 : bf16 to vector<8x256xbf16>
    %c0_11 = arith.constant 0 : index
    %c0_12 = arith.constant 0 : index
    %18 = vector.load %arg15[%c0_11, %c0_12] : memref<144x256xbf16, #tpu.memory_space<vmem>>, vector<8x256xbf16>
    tpu.vector_store %arg15[%c0_11, %c0_12], %17 {strides = array<i32>} : memref<144x256xbf16, #tpu.memory_space<vmem>>, vector<8x256xbf16>,
    %19 = arith.truncf %16 : vector<128x256xf32> to vector<128x256xbf16>
    %c8 = arith.constant 8 : index
    %c0_13 = arith.constant 0 : index
    %20 = vector.load %arg15[%c8, %c0_13] : memref<144x256xbf16, #tpu.memory_space<vmem>>, vector<128x256xbf16>
    tpu.vector_store %arg15[%c8, %c0_13], %19 {strides = array<i32>} : memref<144x256xbf16, #tpu.memory_space<vmem>>, vector<128x256xbf16>,
    %cst_14 = arith.constant 0.000000e+00 : bf16
    %21 = vector.broadcast %cst_14 : bf16 to vector<8x256xbf16>
    %c136 = arith.constant 136 : index
    %c0_15 = arith.constant 0 : index
    %22 = vector.load %arg15[%c136, %c0_15] : memref<144x256xbf16, #tpu.memory_space<vmem>>, vector<8x256xbf16>
    tpu.vector_store %arg15[%c136, %c0_15], %21 {strides = array<i32>} : memref<144x256xbf16, #tpu.memory_space<vmem>>, vector<8x256xbf16>,
    %c0_16 = arith.constant 0 : index
    %c0_17 = arith.constant 0 : index
    %23 = vector.load %arg15[%c0_16, %c0_17] : memref<144x256xbf16, #tpu.memory_space<vmem>>, vector<128x256xbf16>
    %c0_18 = arith.constant 0 : index
    %c0_19 = arith.constant 0 : index
    %c0_20 = arith.constant 0 : index
    %24 = vector.load %arg5[%c0_18, %c0_19, %c0_20] : memref<3x256x512xbf16, #tpu.memory_space<vmem>>, vector<1x256x512xbf16>
    %25 = vector.shape_cast %24 : vector<1x256x512xbf16> to vector<256x512xbf16>
    %cst_21 = arith.constant dense<0.000000e+00> : vector<128x512xf32>
    %26 = tpu.matmul %23, %25, %cst_21 {dimension_numbers = #tpu.dot_dimension_numbers<[1], [0], [0], [1], [0, 0, 1, 1], [], []>} : vector<128x256xbf16>, vector<256x512xbf16>, vector<128x512xf32> -> vector<128x512xf32>
    %c8_22 = arith.constant 8 : index
    %c0_23 = arith.constant 0 : index
    %27 = vector.load %arg15[%c8_22, %c0_23] : memref<144x256xbf16, #tpu.memory_space<vmem>>, vector<128x256xbf16>
    %c1 = arith.constant 1 : index
    %c0_24 = arith.constant 0 : index
    %c0_25 = arith.constant 0 : index
    %28 = vector.load %arg5[%c1, %c0_24, %c0_25] : memref<3x256x512xbf16, #tpu.memory_space<vmem>>, vector<1x256x512xbf16>
    %29 = vector.shape_cast %28 : vector<1x256x512xbf16> to vector<256x512xbf16>
    %cst_26 = arith.constant dense<0.000000e+00> : vector<128x512xf32>
    %30 = tpu.matmul %27, %29, %cst_26 {dimension_numbers = #tpu.dot_dimension_numbers<[1], [0], [0], [1], [0, 0, 1, 1], [], []>} : vector<128x256xbf16>, vector<256x512xbf16>, vector<128x512xf32> -> vector<128x512xf32>
    %31 = arith.addf %26, %30 : vector<128x512xf32>
    %c16 = arith.constant 16 : index
    %c0_27 = arith.constant 0 : index
    %32 = vector.load %arg15[%c16, %c0_27] : memref<144x256xbf16, #tpu.memory_space<vmem>>, vector<128x256xbf16>
    %c2 = arith.constant 2 : index
    %c0_28 = arith.constant 0 : index
    %c0_29 = arith.constant 0 : index
    %33 = vector.load %arg5[%c2, %c0_28, %c0_29] : memref<3x256x512xbf16, #tpu.memory_space<vmem>>, vector<1x256x512xbf16>
    %34 = vector.shape_cast %33 : vector<1x256x512xbf16> to vector<256x512xbf16>
    %cst_30 = arith.constant dense<0.000000e+00> : vector<128x512xf32>
    %35 = tpu.matmul %32, %34, %cst_30 {dimension_numbers = #tpu.dot_dimension_numbers<[1], [0], [0], [1], [0, 0, 1, 1], [], []>} : vector<128x256xbf16>, vector<256x512xbf16>, vector<128x512xf32> -> vector<128x512xf32>
    %36 = arith.addf %31, %35 : vector<128x512xf32>
    %c0_31 = arith.constant 0 : index
    %c0_32 = arith.constant 0 : index
    %37 = vector.load %arg6[%c0_31, %c0_32] : memref<1x512xf32, #tpu.memory_space<vmem>>, vector<1x512xf32>
    %38 = vector.broadcast %37 : vector<1x512xf32> to vector<128x512xf32>
    %39 = arith.mulf %36, %38 : vector<128x512xf32>
    %c0_33 = arith.constant 0 : index
    %c0_34 = arith.constant 0 : index
    %40 = vector.load %arg7[%c0_33, %c0_34] : memref<1x512xf32, #tpu.memory_space<vmem>>, vector<1x512xf32>
    %41 = vector.broadcast %40 : vector<1x512xf32> to vector<128x512xf32>
    %42 = arith.addf %39, %41 : vector<128x512xf32>
    %cst_35 = arith.constant 0.000000e+00 : f32
    %43 = vector.broadcast %cst_35 : f32 to vector<128x512xf32>
    %44 = arith.cmpf ogt, %42, %43 : vector<128x512xf32>
    %cst_36 = arith.constant 0.000000e+00 : f32
    %45 = vector.broadcast %cst_36 : f32 to vector<128x512xf32>
    %46 = arith.minimumf %42, %45 : vector<128x512xf32>
    %47 = math.exp %46 : vector<128x512xf32>
    %cst_37 = arith.constant 1.000000e+00 : f32
    %48 = vector.broadcast %cst_37 : f32 to vector<128x512xf32>
    %49 = arith.subf %47, %48 : vector<128x512xf32>
    %50 = arith.select %44, %42, %49 : vector<128x512xi1>, vector<128x512xf32>
    %51 = arith.truncf %50 : vector<128x512xf32> to vector<128x512xbf16>
    %c0_38 = arith.constant 0 : index
    %c0_39 = arith.constant 0 : index
    %52 = vector.load %arg16[%c0_38, %c0_39] : memref<128x512xbf16, #tpu.memory_space<vmem>>, vector<128x512xbf16>
    tpu.vector_store %arg16[%c0_38, %c0_39], %51 {strides = array<i32>} : memref<128x512xbf16, #tpu.memory_space<vmem>>, vector<128x512xbf16>,
    %c0_40 = arith.constant 0 : index
    %c0_41 = arith.constant 0 : index
    %53 = vector.load %arg16[%c0_40, %c0_41] : memref<128x512xbf16, #tpu.memory_space<vmem>>, vector<8x512xbf16>
    %c8_42 = arith.constant 8 : index
    %c0_43 = arith.constant 0 : index
    %54 = vector.load %arg16[%c8_42, %c0_43] : memref<128x512xbf16, #tpu.memory_space<vmem>>, vector<8x512xbf16>
    %55 = arith.maximumf %53, %54 : vector<8x512xbf16>
    %56 = vector.extract_strided_slice %55 {offsets = [0, 0], sizes = [8, 256], strides = [1, 1]} : vector<8x512xbf16> to vector<8x256xbf16>
    %57 = vector.extract_strided_slice %55 {offsets = [0, 256], sizes = [8, 256], strides = [1, 1]} : vector<8x512xbf16> to vector<8x256xbf16>
    %58 = arith.maximumf %56, %57 : vector<8x256xbf16>
    %c0_44 = arith.constant 0 : index
    %c0_45 = arith.constant 0 : index
    %c0_46 = arith.constant 0 : index
    %59 = vector.load %arg8[%c0_44, %c0_45, %c0_46] : memref<8x256x1024xbf16, #tpu.memory_space<vmem>>, vector<1x256x1024xbf16>
    %60 = vector.shape_cast %59 : vector<1x256x1024xbf16> to vector<256x1024xbf16>
    %cst_47 = arith.constant dense<0.000000e+00> : vector<8x1024xf32>
    %61 = tpu.matmul %58, %60, %cst_47 {dimension_numbers = #tpu.dot_dimension_numbers<[1], [0], [0], [1], [0, 0, 1, 1], [], []>} : vector<8x256xbf16>, vector<256x1024xbf16>, vector<8x1024xf32> -> vector<8x1024xf32>
    %c16_48 = arith.constant 16 : index
    %c0_49 = arith.constant 0 : index
    %62 = vector.load %arg16[%c16_48, %c0_49] : memref<128x512xbf16, #tpu.memory_space<vmem>>, vector<8x512xbf16>
    %c24 = arith.constant 24 : index
    %c0_50 = arith.constant 0 : index
    %63 = vector.load %arg16[%c24, %c0_50] : memref<128x512xbf16, #tpu.memory_space<vmem>>, vector<8x512xbf16>
    %64 = arith.maximumf %62, %63 : vector<8x512xbf16>
    %65 = vector.extract_strided_slice %64 {offsets = [0, 0], sizes = [8, 256], strides = [1, 1]} : vector<8x512xbf16> to vector<8x256xbf16>
    %66 = vector.extract_strided_slice %64 {offsets = [0, 256], sizes = [8, 256], strides = [1, 1]} : vector<8x512xbf16> to vector<8x256xbf16>
    %67 = arith.maximumf %65, %66 : vector<8x256xbf16>
    %c1_51 = arith.constant 1 : index
    %c0_52 = arith.constant 0 : index
    %c0_53 = arith.constant 0 : index
    %68 = vector.load %arg8[%c1_51, %c0_52, %c0_53] : memref<8x256x1024xbf16, #tpu.memory_space<vmem>>, vector<1x256x1024xbf16>
    %69 = vector.shape_cast %68 : vector<1x256x1024xbf16> to vector<256x1024xbf16>
    %cst_54 = arith.constant dense<0.000000e+00> : vector<8x1024xf32>
    %70 = tpu.matmul %67, %69, %cst_54 {dimension_numbers = #tpu.dot_dimension_numbers<[1], [0], [0], [1], [0, 0, 1, 1], [], []>} : vector<8x256xbf16>, vector<256x1024xbf16>, vector<8x1024xf32> -> vector<8x1024xf32>
    %71 = arith.addf %61, %70 : vector<8x1024xf32>
    %c32 = arith.constant 32 : index
    %c0_55 = arith.constant 0 : index
    %72 = vector.load %arg16[%c32, %c0_55] : memref<128x512xbf16, #tpu.memory_space<vmem>>, vector<8x512xbf16>
    %c40 = arith.constant 40 : index
    %c0_56 = arith.constant 0 : index
    %73 = vector.load %arg16[%c40, %c0_56] : memref<128x512xbf16, #tpu.memory_space<vmem>>, vector<8x512xbf16>
    %74 = arith.maximumf %72, %73 : vector<8x512xbf16>
    %75 = vector.extract_strided_slice %74 {offsets = [0, 0], sizes = [8, 256], strides = [1, 1]} : vector<8x512xbf16> to vector<8x256xbf16>
    %76 = vector.extract_strided_slice %74 {offsets = [0, 256], sizes = [8, 256], strides = [1, 1]} : vector<8x512xbf16> to vector<8x256xbf16>
    %77 = arith.maximumf %75, %76 : vector<8x256xbf16>
    %c2_57 = arith.constant 2 : index
    %c0_58 = arith.constant 0 : index
    %c0_59 = arith.constant 0 : index
    %78 = vector.load %arg8[%c2_57, %c0_58, %c0_59] : memref<8x256x1024xbf16, #tpu.memory_space<vmem>>, vector<1x256x1024xbf16>
    %79 = vector.shape_cast %78 : vector<1x256x1024xbf16> to vector<256x1024xbf16>
    %cst_60 = arith.constant dense<0.000000e+00> : vector<8x1024xf32>
    %80 = tpu.matmul %77, %79, %cst_60 {dimension_numbers = #tpu.dot_dimension_numbers<[1], [0], [0], [1], [0, 0, 1, 1], [], []>} : vector<8x256xbf16>, vector<256x1024xbf16>, vector<8x1024xf32> -> vector<8x1024xf32>
    %81 = arith.addf %71, %80 : vector<8x1024xf32>
    %c48 = arith.constant 48 : index
    %c0_61 = arith.constant 0 : index
    %82 = vector.load %arg16[%c48, %c0_61] : memref<128x512xbf16, #tpu.memory_space<vmem>>, vector<8x512xbf16>
    %c56 = arith.constant 56 : index
    %c0_62 = arith.constant 0 : index
    %83 = vector.load %arg16[%c56, %c0_62] : memref<128x512xbf16, #tpu.memory_space<vmem>>, vector<8x512xbf16>
    %84 = arith.maximumf %82, %83 : vector<8x512xbf16>
    %85 = vector.extract_strided_slice %84 {offsets = [0, 0], sizes = [8, 256], strides = [1, 1]} : vector<8x512xbf16> to vector<8x256xbf16>
    %86 = vector.extract_strided_slice %84 {offsets = [0, 256], sizes = [8, 256], strides = [1, 1]} : vector<8x512xbf16> to vector<8x256xbf16>
    %87 = arith.maximumf %85, %86 : vector<8x256xbf16>
    %c3 = arith.constant 3 : index
    %c0_63 = arith.constant 0 : index
    %c0_64 = arith.constant 0 : index
    %88 = vector.load %arg8[%c3, %c0_63, %c0_64] : memref<8x256x1024xbf16, #tpu.memory_space<vmem>>, vector<1x256x1024xbf16>
    %89 = vector.shape_cast %88 : vector<1x256x1024xbf16> to vector<256x1024xbf16>
    %cst_65 = arith.constant dense<0.000000e+00> : vector<8x1024xf32>
    %90 = tpu.matmul %87, %89, %cst_65 {dimension_numbers = #tpu.dot_dimension_numbers<[1], [0], [0], [1], [0, 0, 1, 1], [], []>} : vector<8x256xbf16>, vector<256x1024xbf16>, vector<8x1024xf32> -> vector<8x1024xf32>
    %91 = arith.addf %81, %90 : vector<8x1024xf32>
    %c64 = arith.constant 64 : index
    %c0_66 = arith.constant 0 : index
    %92 = vector.load %arg16[%c64, %c0_66] : memref<128x512xbf16, #tpu.memory_space<vmem>>, vector<8x512xbf16>
    %c72 = arith.constant 72 : index
    %c0_67 = arith.constant 0 : index
    %93 = vector.load %arg16[%c72, %c0_67] : memref<128x512xbf16, #tpu.memory_space<vmem>>, vector<8x512xbf16>
    %94 = arith.maximumf %92, %93 : vector<8x512xbf16>
    %95 = vector.extract_strided_slice %94 {offsets = [0, 0], sizes = [8, 256], strides = [1, 1]} : vector<8x512xbf16> to vector<8x256xbf16>
    %96 = vector.extract_strided_slice %94 {offsets = [0, 256], sizes = [8, 256], strides = [1, 1]} : vector<8x512xbf16> to vector<8x256xbf16>
    %97 = arith.maximumf %95, %96 : vector<8x256xbf16>
    %c4 = arith.constant 4 : index
    %c0_68 = arith.constant 0 : index
    %c0_69 = arith.constant 0 : index
    %98 = vector.load %arg8[%c4, %c0_68, %c0_69] : memref<8x256x1024xbf16, #tpu.memory_space<vmem>>, vector<1x256x1024xbf16>
    %99 = vector.shape_cast %98 : vector<1x256x1024xbf16> to vector<256x1024xbf16>
    %cst_70 = arith.constant dense<0.000000e+00> : vector<8x1024xf32>
    %100 = tpu.matmul %97, %99, %cst_70 {dimension_numbers = #tpu.dot_dimension_numbers<[1], [0], [0], [1], [0, 0, 1, 1], [], []>} : vector<8x256xbf16>, vector<256x1024xbf16>, vector<8x1024xf32> -> vector<8x1024xf32>
    %101 = arith.addf %91, %100 : vector<8x1024xf32>
    %c80 = arith.constant 80 : index
    %c0_71 = arith.constant 0 : index
    %102 = vector.load %arg16[%c80, %c0_71] : memref<128x512xbf16, #tpu.memory_space<vmem>>, vector<8x512xbf16>
    %c88 = arith.constant 88 : index
    %c0_72 = arith.constant 0 : index
    %103 = vector.load %arg16[%c88, %c0_72] : memref<128x512xbf16, #tpu.memory_space<vmem>>, vector<8x512xbf16>
    %104 = arith.maximumf %102, %103 : vector<8x512xbf16>
    %105 = vector.extract_strided_slice %104 {offsets = [0, 0], sizes = [8, 256], strides = [1, 1]} : vector<8x512xbf16> to vector<8x256xbf16>
    %106 = vector.extract_strided_slice %104 {offsets = [0, 256], sizes = [8, 256], strides = [1, 1]} : vector<8x512xbf16> to vector<8x256xbf16>
    %107 = arith.maximumf %105, %106 : vector<8x256xbf16>
    %c5 = arith.constant 5 : index
    %c0_73 = arith.constant 0 : index
    %c0_74 = arith.constant 0 : index
    %108 = vector.load %arg8[%c5, %c0_73, %c0_74] : memref<8x256x1024xbf16, #tpu.memory_space<vmem>>, vector<1x256x1024xbf16>
    %109 = vector.shape_cast %108 : vector<1x256x1024xbf16> to vector<256x1024xbf16>
    %cst_75 = arith.constant dense<0.000000e+00> : vector<8x1024xf32>
    %110 = tpu.matmul %107, %109, %cst_75 {dimension_numbers = #tpu.dot_dimension_numbers<[1], [0], [0], [1], [0, 0, 1, 1], [], []>} : vector<8x256xbf16>, vector<256x1024xbf16>, vector<8x1024xf32> -> vector<8x1024xf32>
    %111 = arith.addf %101, %110 : vector<8x1024xf32>
    %c96 = arith.constant 96 : index
    %c0_76 = arith.constant 0 : index
    %112 = vector.load %arg16[%c96, %c0_76] : memref<128x512xbf16, #tpu.memory_space<vmem>>, vector<8x512xbf16>
    %c104 = arith.constant 104 : index
    %c0_77 = arith.constant 0 : index
    %113 = vector.load %arg16[%c104, %c0_77] : memref<128x512xbf16, #tpu.memory_space<vmem>>, vector<8x512xbf16>
    %114 = arith.maximumf %112, %113 : vector<8x512xbf16>
    %115 = vector.extract_strided_slice %114 {offsets = [0, 0], sizes = [8, 256], strides = [1, 1]} : vector<8x512xbf16> to vector<8x256xbf16>
    %116 = vector.extract_strided_slice %114 {offsets = [0, 256], sizes = [8, 256], strides = [1, 1]} : vector<8x512xbf16> to vector<8x256xbf16>
    %117 = arith.maximumf %115, %116 : vector<8x256xbf16>
    %c6 = arith.constant 6 : index
    %c0_78 = arith.constant 0 : index
    %c0_79 = arith.constant 0 : index
    %118 = vector.load %arg8[%c6, %c0_78, %c0_79] : memref<8x256x1024xbf16, #tpu.memory_space<vmem>>, vector<1x256x1024xbf16>
    %119 = vector.shape_cast %118 : vector<1x256x1024xbf16> to vector<256x1024xbf16>
    %cst_80 = arith.constant dense<0.000000e+00> : vector<8x1024xf32>
    %120 = tpu.matmul %117, %119, %cst_80 {dimension_numbers = #tpu.dot_dimension_numbers<[1], [0], [0], [1], [0, 0, 1, 1], [], []>} : vector<8x256xbf16>, vector<256x1024xbf16>, vector<8x1024xf32> -> vector<8x1024xf32>
    %121 = arith.addf %111, %120 : vector<8x1024xf32>
    %c112 = arith.constant 112 : index
    %c0_81 = arith.constant 0 : index
    %122 = vector.load %arg16[%c112, %c0_81] : memref<128x512xbf16, #tpu.memory_space<vmem>>, vector<8x512xbf16>
    %c120 = arith.constant 120 : index
    %c0_82 = arith.constant 0 : index
    %123 = vector.load %arg16[%c120, %c0_82] : memref<128x512xbf16, #tpu.memory_space<vmem>>, vector<8x512xbf16>
    %124 = arith.maximumf %122, %123 : vector<8x512xbf16>
    %125 = vector.extract_strided_slice %124 {offsets = [0, 0], sizes = [8, 256], strides = [1, 1]} : vector<8x512xbf16> to vector<8x256xbf16>
    %126 = vector.extract_strided_slice %124 {offsets = [0, 256], sizes = [8, 256], strides = [1, 1]} : vector<8x512xbf16> to vector<8x256xbf16>
    %127 = arith.maximumf %125, %126 : vector<8x256xbf16>
    %c7 = arith.constant 7 : index
    %c0_83 = arith.constant 0 : index
    %c0_84 = arith.constant 0 : index
    %128 = vector.load %arg8[%c7, %c0_83, %c0_84] : memref<8x256x1024xbf16, #tpu.memory_space<vmem>>, vector<1x256x1024xbf16>
    %129 = vector.shape_cast %128 : vector<1x256x1024xbf16> to vector<256x1024xbf16>
    %cst_85 = arith.constant dense<0.000000e+00> : vector<8x1024xf32>
    %130 = tpu.matmul %127, %129, %cst_85 {dimension_numbers = #tpu.dot_dimension_numbers<[1], [0], [0], [1], [0, 0, 1, 1], [], []>} : vector<8x256xbf16>, vector<256x1024xbf16>, vector<8x1024xf32> -> vector<8x1024xf32>
    %131 = arith.addf %121, %130 : vector<8x1024xf32>
    %c0_86 = arith.constant 0 : index
    %c0_87 = arith.constant 0 : index
    %132 = vector.load %arg9[%c0_86, %c0_87] : memref<1x1024xf32, #tpu.memory_space<vmem>>, vector<1x1024xf32>
    %133 = vector.broadcast %132 : vector<1x1024xf32> to vector<8x1024xf32>
    %134 = arith.addf %131, %133 : vector<8x1024xf32>
    %cst_88 = arith.constant 0.000000e+00 : f32
    %135 = vector.broadcast %cst_88 : f32 to vector<8x1024xf32>
    %136 = arith.cmpf ogt, %134, %135 : vector<8x1024xf32>
    %cst_89 = arith.constant 0.000000e+00 : f32
    %137 = vector.broadcast %cst_89 : f32 to vector<8x1024xf32>
    %138 = arith.minimumf %134, %137 : vector<8x1024xf32>
    %139 = math.exp %138 : vector<8x1024xf32>
    %cst_90 = arith.constant 1.000000e+00 : f32
    %140 = vector.broadcast %cst_90 : f32 to vector<8x1024xf32>
    %141 = arith.subf %139, %140 : vector<8x1024xf32>
    %142 = arith.select %136, %134, %141 : vector<8x1024xi1>, vector<8x1024xf32>
    %143 = arith.truncf %142 : vector<8x1024xf32> to vector<8x1024xbf16>
    %c0_91 = arith.constant 0 : index
    %c0_92 = arith.constant 0 : index
    %144 = vector.load %arg10[%c0_91, %c0_92] : memref<1024x128xbf16, #tpu.memory_space<vmem>>, vector<1024x128xbf16>
    %cst_93 = arith.constant dense<0.000000e+00> : vector<8x128xf32>
    %145 = tpu.matmul %143, %144, %cst_93 {dimension_numbers = #tpu.dot_dimension_numbers<[1], [0], [0], [1], [0, 0, 1, 1], [], []>} : vector<8x1024xbf16>, vector<1024x128xbf16>, vector<8x128xf32> -> vector<8x128xf32>
    %c0_94 = arith.constant 0 : index
    %c0_95 = arith.constant 0 : index
    %146 = vector.load %arg11[%c0_94, %c0_95] : memref<1x128xf32, #tpu.memory_space<vmem>>, vector<1x128xf32>
    %147 = vector.broadcast %146 : vector<1x128xf32> to vector<8x128xf32>
    %148 = arith.addf %145, %147 : vector<8x128xf32>
    %cst_96 = arith.constant 0.000000e+00 : f32
    %149 = vector.broadcast %cst_96 : f32 to vector<8x128xf32>
    %150 = arith.cmpf ogt, %148, %149 : vector<8x128xf32>
    %cst_97 = arith.constant 0.000000e+00 : f32
    %151 = vector.broadcast %cst_97 : f32 to vector<8x128xf32>
    %152 = arith.minimumf %148, %151 : vector<8x128xf32>
    %153 = math.exp %152 : vector<8x128xf32>
    %cst_98 = arith.constant 1.000000e+00 : f32
    %154 = vector.broadcast %cst_98 : f32 to vector<8x128xf32>
    %155 = arith.subf %153, %154 : vector<8x128xf32>
    %156 = arith.select %150, %148, %155 : vector<8x128xi1>, vector<8x128xf32>
    %157 = arith.truncf %156 : vector<8x128xf32> to vector<8x128xbf16>
    %c0_99 = arith.constant 0 : index
    %c0_100 = arith.constant 0 : index
    %158 = vector.load %arg12[%c0_99, %c0_100] : memref<128x128xbf16, #tpu.memory_space<vmem>>, vector<128x128xbf16>
    %cst_101 = arith.constant dense<0.000000e+00> : vector<8x128xf32>
    %159 = tpu.matmul %157, %158, %cst_101 {dimension_numbers = #tpu.dot_dimension_numbers<[1], [0], [0], [1], [0, 0, 1, 1], [], []>} : vector<8x128xbf16>, vector<128x128xbf16>, vector<8x128xf32> -> vector<8x128xf32>
    %c0_102 = arith.constant 0 : index
    %c0_103 = arith.constant 0 : index
    %160 = vector.load %arg13[%c0_102, %c0_103] : memref<1x128xf32, #tpu.memory_space<vmem>>, vector<1x128xf32>
    %161 = vector.broadcast %160 : vector<1x128xf32> to vector<8x128xf32>
    %162 = arith.addf %159, %161 : vector<8x128xf32>
    %c0_104 = arith.constant 0 : index
    %c0_105 = arith.constant 0 : index
    %163 = vector.load %arg14[%c0_104, %c0_105] : memref<8x128xf32, #tpu.memory_space<vmem>>, vector<8x128xf32>
    tpu.vector_store %arg14[%c0_104, %c0_105], %162 {strides = array<i32>} : memref<8x128xf32, #tpu.memory_space<vmem>>, vector<8x128xf32>,
    return
  }
  func.func @transform_0(%arg0: i32) -> (i32, i32) {
    %c0_i32 = arith.constant 0 : i32
    %c0_i32_0 = arith.constant 0 : i32
    return %arg0, %c0_i32 : i32, i32
  }
  func.func @transform_1(%arg0: i32) -> (i32, i32) {
    %c0_i32 = arith.constant 0 : i32
    %c0_i32_0 = arith.constant 0 : i32
    %c0_i32_1 = arith.constant 0 : i32
    return %c0_i32, %c0_i32_0 : i32, i32
  }
  func.func @transform_2(%arg0: i32) -> (i32, i32) {
    %c0_i32 = arith.constant 0 : i32
    %c0_i32_0 = arith.constant 0 : i32
    %c0_i32_1 = arith.constant 0 : i32
    return %c0_i32, %c0_i32_0 : i32, i32
  }
  func.func @transform_3(%arg0: i32) -> (i32, i32) {
    %c0_i32 = arith.constant 0 : i32
    %c0_i32_0 = arith.constant 0 : i32
    %c0_i32_1 = arith.constant 0 : i32
    return %c0_i32, %c0_i32_0 : i32, i32
  }
  func.func @transform_4(%arg0: i32) -> (i32, i32, i32) {
    %c0_i32 = arith.constant 0 : i32
    %c0_i32_0 = arith.constant 0 : i32
    %c0_i32_1 = arith.constant 0 : i32
    %c0_i32_2 = arith.constant 0 : i32
    return %c0_i32, %c0_i32_0, %c0_i32_1 : i32, i32, i32
  }
  func.func @transform_5(%arg0: i32) -> (i32, i32) {
    %c0_i32 = arith.constant 0 : i32
    %c0_i32_0 = arith.constant 0 : i32
    %c0_i32_1 = arith.constant 0 : i32
    return %c0_i32, %c0_i32_0 : i32, i32
  }
  func.func @transform_6(%arg0: i32) -> (i32, i32) {
    %c0_i32 = arith.constant 0 : i32
    %c0_i32_0 = arith.constant 0 : i32
    %c0_i32_1 = arith.constant 0 : i32
    return %c0_i32, %c0_i32_0 : i32, i32
  }
  func.func @transform_7(%arg0: i32) -> (i32, i32, i32) {
    %c0_i32 = arith.constant 0 : i32
    %c0_i32_0 = arith.constant 0 : i32
    %c0_i32_1 = arith.constant 0 : i32
    %c0_i32_2 = arith.constant 0 : i32
    return %c0_i32, %c0_i32_0, %c0_i32_1 : i32, i32, i32
  }
  func.func @transform_8(%arg0: i32) -> (i32, i32) {
    %c0_i32 = arith.constant 0 : i32
    %c0_i32_0 = arith.constant 0 : i32
    %c0_i32_1 = arith.constant 0 : i32
    return %c0_i32, %c0_i32_0 : i32, i32
  }
  func.func @transform_9(%arg0: i32) -> (i32, i32) {
    %c0_i32 = arith.constant 0 : i32
    %c0_i32_0 = arith.constant 0 : i32
    %c0_i32_1 = arith.constant 0 : i32
    return %c0_i32, %c0_i32_0 : i32, i32
  }
  func.func @transform_10(%arg0: i32) -> (i32, i32) {
    %c0_i32 = arith.constant 0 : i32
    %c0_i32_0 = arith.constant 0 : i32
    %c0_i32_1 = arith.constant 0 : i32
    return %c0_i32, %c0_i32_0 : i32, i32
  }
  func.func @transform_11(%arg0: i32) -> (i32, i32) {
    %c0_i32 = arith.constant 0 : i32
    %c0_i32_0 = arith.constant 0 : i32
    %c0_i32_1 = arith.constant 0 : i32
    return %c0_i32, %c0_i32_0 : i32, i32
  }
  func.func @transform_12(%arg0: i32) -> (i32, i32) {
    %c0_i32 = arith.constant 0 : i32
    %c0_i32_0 = arith.constant 0 : i32
    %c0_i32_1 = arith.constant 0 : i32
    return %c0_i32, %c0_i32_0 : i32, i32
  }
  func.func @transform_13(%arg0: i32) -> (i32, i32) {
    %c0_i32 = arith.constant 0 : i32
    %c0_i32_0 = arith.constant 0 : i32
    return %arg0, %c0_i32 : i32, i32
  }
}

</mosaic_0001>

<bundles_post_ra>
// kernel: cnn_ustc_forward.1
= control target key start
LH: loop header
LB: loop body
LE: loop exit
PB: predicated region body
PF: predicated region fallthrough
CT: control target
= control target key end

     0   :  { %18 = vsyncpa [#allocation5], 0  ;;  %s16574_s0 = inlined_call_operand.vmem [shape: bf16[128,144], index: 0, kind: input, shape index: {}]   ;;  %s16575_s1 = inlined_call_operand.hbm [shape: bf16[144,256], index: 1, kind: input, shape index: {}]   ;;  %s16576_s2 = inlined_call_operand.hbm [shape: f32[1,256], index: 2, kind: input, shape index: {}]   ;;  %s16577_s3 = inlined_call_operand.hbm [shape: f32[1,256], index: 3, kind: input, shape index: {}]   ;;  %s16578_s4 = inlined_call_operand.hbm [shape: bf16[3,256,512], index: 4, kind: input, shape index: {}]   ;;  %s16579_s5 = inlined_call_operand.hbm [shape: f32[1,512], index: 5, kind: input, shape index: {}]   ;;  %s16580_s6 = inlined_call_operand.hbm [shape: f32[1,512], index: 6, kind: input, shape index: {}]   ;;  %s16581_s7 = inlined_call_operand.hbm [shape: bf16[8,256,1024], index: 7, kind: input, shape index: {}]   ;;  %s16582_s8 = inlined_call_operand.hbm [shape: f32[1,1024], index: 8, kind: input, shape index: {}]   ;;  %s16583_s9 = inlined_call_operand.hbm [shape: bf16[1024,128], index: 9, kind: input, shape index: {}]   ;;  %s16584_s10 = inlined_call_operand.hbm [shape: f32[1,128], index: 10, kind: input, shape index: {}]   ;;  %s16585_s11 = inlined_call_operand.hbm [shape: bf16[128,128], index: 11, kind: input, shape index: {}]   ;;  %s16586_s12 = inlined_call_operand.hbm [shape: f32[1,128], index: 12, kind: input, shape index: {}]   ;;  %s16587_s13 = inlined_call_operand.vmem [shape: f32[8,128], index: 13, kind: output, shape index: {}]  }
   0x1   :  { %19 = vsyncpa [#allocation7], 0 }
   0x2   :  { %20 = vsyncpa [#allocation10], 0 }
   0x3   :  { %21 = vsyncpa [#allocation13], 0 }
   0x4   :  { %22 = vsyncpa [#allocation16], 0 }
   0x5   :  { %23 = vsyncpa [#allocation19], 0 }
   0x6   :  { %24 = vsyncpa [#allocation22], 0  ;;  %s14776_s25 = smov [#allocation6]   ;;  %s14777_s27 = smov [#allocation9]  }
   0x7   :  { %s45_s26 = sshll.u32 %s14776_s25, 4  ;;  %s64_s28 = sshll.u32 %s14777_s27, 4  ;;  %s46_s26 = int_to_ptr.vmem [resolvable:$true] %s45_s26  ;;  %s14869_s28 = int_to_ptr.vmem [resolvable:$true] %s64_s28 }
   0x8   :  { %s14498_s14 = scalar_lea.hbm %s16576_s2, 32 }
   0x9   :  { %p14499_p0 = scmp.ne.s32.totalorder %s16576_s2, %s14498_s14  ;;  %p14502_p1 = scmp.lt.u32.totalorder %s14498_s14, %s16576_s2 }
   0xb   :  { %p14504_p2 = pnand %p14502_p1, %p14499_p0 }
   0xd   :  { %14507 = shalt.err (!%p14504_p2)
}
   0xe   :  { %s14508_s19 = scalar_lea.vmem %s46_s26, 32  ;;  %p14513_p4 = scmp.lt.s32.totalorder %s46_s26, %s46_s26 }
   0xf   :  { %p14509_p3 = scmp.ne.s32.totalorder %s46_s26, %s14508_s19  ;;  %p14514_p5 = scmp.lt.s32.totalorder %s14508_s19, %s14508_s19 }
  0x11   :  { %p14515_p6 = por %p14514_p5, %p14513_p4 }
  0x13   :  { %p14516_p7 = pnand %p14515_p6, %p14509_p3 }
  0x15   :  { %14519 = shalt.err (!%p14516_p7)
}
  0x16   :  { %48 = dma.hbm_to_vmem [thread:$0]  %s16576_s2, 32, %s46_s26, [#allocation7]  }
  0x17   :  { %s14520_s24 = scalar_lea.hbm %s16578_s4, 24576 }
  0x18   :  { %p14521_p8 = scmp.ne.s32.totalorder %s16578_s4, %s14520_s24  ;;  %p14524_p9 = scmp.lt.u32.totalorder %s14520_s24, %s16578_s4 }
  0x1a   :  { %p14526_p10 = pnand %p14524_p9, %p14521_p8 }
  0x1c   :  { %14529 = shalt.err (!%p14526_p10)
}
  0x1d   :  { %s14530_s14 = scalar_lea.vmem %s14869_s28, 24576  ;;  %p14535_p12 = scmp.lt.s32.totalorder %s14869_s28, %s14869_s28 }
  0x1e   :  { %p14531_p11 = scmp.ne.s32.totalorder %s14869_s28, %s14530_s14  ;;  %p14536_p13 = scmp.lt.s32.totalorder %s14530_s14, %s14530_s14 }
  0x20   :  { %p14537_p0 = por %p14536_p13, %p14535_p12 }
  0x22   :  { %p14538_p1 = pnand %p14537_p0, %p14531_p11 }
  0x24   :  { %14541 = shalt.err (!%p14538_p1)
}
  0x25   :  { %s14778_s2 = smov 256   ;;  %s14779_s26 = smov 16  }
  0x26   :  { %70 = dma.hbm_to_vmem [thread:$0]  %s16578_s4, 24576, %s14869_s28, [#allocation10], %s14778_s2, %s14778_s2, %s14779_s26  }
  0x27   :  { %s14780_s17 = smov [#allocation12]   ;;  %s14781_s19 = smov [#allocation15]  }
  0x28   :  { %s87_s18 = sshll.u32 %s14780_s17, 4  ;;  %s109_s20 = sshll.u32 %s14781_s19, 4  ;;  %s88_s18 = int_to_ptr.vmem [resolvable:$true] %s87_s18  ;;  %s110_s20 = int_to_ptr.vmem [resolvable:$true] %s109_s20 }
  0x29   :  { %s14542_s23 = scalar_lea.hbm %s16580_s6, 64 }
  0x2a   :  { %p14543_p2 = scmp.ne.s32.totalorder %s16580_s6, %s14542_s23  ;;  %p14546_p3 = scmp.lt.u32.totalorder %s14542_s23, %s16580_s6 }
  0x2c   :  { %p14548_p4 = pnand %p14546_p3, %p14543_p2 }
  0x2e   :  { %14551 = shalt.err (!%p14548_p4)
}
  0x2f   :  { %s14552_s4 = scalar_lea.vmem %s88_s18, 64  ;;  %p14557_p6 = scmp.lt.s32.totalorder %s88_s18, %s88_s18 }
  0x30   :  { %p14553_p5 = scmp.ne.s32.totalorder %s88_s18, %s14552_s4  ;;  %p14558_p7 = scmp.lt.s32.totalorder %s14552_s4, %s14552_s4 }
  0x32   :  { %p14559_p8 = por %p14558_p7, %p14557_p6 }
  0x34   :  { %p14560_p9 = pnand %p14559_p8, %p14553_p5 }
  0x36   :  { %14563 = shalt.err (!%p14560_p9)
}
  0x37   :  { %90 = dma.hbm_to_vmem [thread:$0]  %s16580_s6, 64, %s88_s18, [#allocation13]  }
  0x38   :  { %s14564_s26 = scalar_lea.hbm %s16582_s8, 128 }
  0x39   :  { %p14565_p10 = scmp.ne.s32.totalorder %s16582_s8, %s14564_s26  ;;  %p14568_p11 = scmp.lt.u32.totalorder %s14564_s26, %s16582_s8 }
  0x3b   :  { %p14570_p12 = pnand %p14568_p11, %p14565_p10 }
  0x3d   :  { %14573 = shalt.err (!%p14570_p12)
}
  0x3e   :  { %s14574_s21 = scalar_lea.vmem %s110_s20, 128  ;;  %p14579_p0 = scmp.lt.s32.totalorder %s110_s20, %s110_s20 }
  0x3f   :  { %p14575_p13 = scmp.ne.s32.totalorder %s110_s20, %s14574_s21  ;;  %p14580_p1 = scmp.lt.s32.totalorder %s14574_s21, %s14574_s21 }
  0x41   :  { %p14581_p2 = por %p14580_p1, %p14579_p0 }
  0x43   :  { %p14582_p3 = pnand %p14581_p2, %p14575_p13 }
  0x45   :  { %14585 = shalt.err (!%p14582_p3)
}
  0x46   :  { %112 = dma.hbm_to_vmem [thread:$0]  %s16582_s8, 128, %s110_s20, [#allocation16]  }
  0x47   :  { %s14782_s22 = smov [#allocation18]   ;;  %s14783_s24 = smov [#allocation4]  }
  0x48   :  { %s131_s23 = sshll.u32 %s14782_s22, 4  ;;  %s32_s25 = sshll.u32 %s14783_s24, 4  ;;  %s132_s23 = int_to_ptr.vmem [resolvable:$true] %s131_s23  ;;  %s14924_s25 = int_to_ptr.vmem [resolvable:$true] %s32_s25 }
  0x49   :  { %s14586_s4 = scalar_lea.hbm %s16584_s10, 16 }
  0x4a   :  { %p14587_p4 = scmp.ne.s32.totalorder %s16584_s10, %s14586_s4  ;;  %p14590_p5 = scmp.lt.u32.totalorder %s14586_s4, %s16584_s10 }
  0x4c   :  { %p14592_p6 = pnand %p14590_p5, %p14587_p4 }
  0x4e   :  { %14595 = shalt.err (!%p14592_p6)
}
  0x4f   :  { %s14596_s8 = scalar_lea.vmem %s132_s23, 16  ;;  %s14600_s20 = scalar_lea.vmem %s132_s23, 32 }
  0x50   :  { %p14597_p7 = scmp.ne.s32.totalorder %s132_s23, %s14596_s8  ;;  %p14601_p8 = scmp.lt.s32.totalorder %s132_s23, %s132_s23 }
  0x51   :  { %p14602_p9 = scmp.lt.s32.totalorder %s14600_s20, %s14596_s8 }
  0x53   :  { %p14603_p10 = por %p14602_p9, %p14601_p8 }
  0x55   :  { %p14604_p11 = pnand %p14603_p10, %p14597_p7 }
  0x57   :  { %14607 = shalt.err (!%p14604_p11)
}
  0x58   :  { %134 = dma.hbm_to_vmem [thread:$0]  %s16584_s10, 16, %s132_s23, [#allocation19]  }
  0x59   :  { %s14608_s19 = scalar_lea.hbm %s16575_s1, 2304 }
  0x5a   :  { %p14609_p12 = scmp.ne.s32.totalorder %s16575_s1, %s14608_s19  ;;  %p14612_p13 = scmp.lt.u32.totalorder %s14608_s19, %s16575_s1 }
  0x5c   :  { %p14614_p0 = pnand %p14612_p13, %p14609_p12 }
  0x5e   :  { %14617 = shalt.err (!%p14614_p0)
}
  0x5f   :  { %s14618_s24 = scalar_lea.vmem %s14924_s25, 2304  ;;  %p14623_p2 = scmp.lt.s32.totalorder %s14924_s25, %s14924_s25 }
  0x60   :  { %p14619_p1 = scmp.ne.s32.totalorder %s14924_s25, %s14618_s24  ;;  %p14624_p3 = scmp.lt.s32.totalorder %s14618_s24, %s14618_s24 }
  0x62   :  { %p14625_p4 = por %p14624_p3, %p14623_p2 }
  0x64   :  { %p14626_p5 = pnand %p14625_p4, %p14619_p1 }
  0x66   :  { %14629 = shalt.err (!%p14626_p5)
}
  0x67   :  { %s14784_s10 = smov 128   ;;  %s14785_s23 = smov 8  }
  0x68   :  { %38 = dma.hbm_to_vmem [thread:$0]  %s16575_s1, 2304, %s14924_s25, [#allocation5], %s14784_s10, %s14784_s10, %s14785_s23  }
  0x69   :  { %s14786_s4 = smov [#allocation8]   ;;  %s14787_s30 = smov [#allocation11]  }
  0x6a   :  { %s55_s28 = sshll.u32 %s14786_s4, 4  ;;  %s77_s14 = sshll.u32 %s14787_s30, 4  ;;  %s56_s28 = int_to_ptr.vmem [resolvable:$true] %s55_s28  ;;  %s78_s14 = int_to_ptr.vmem [resolvable:$true] %s77_s14 }
  0x6b   :  { %s14630_s20 = scalar_lea.hbm %s16577_s3, 32 }
  0x6c   :  { %p14631_p6 = scmp.ne.s32.totalorder %s16577_s3, %s14630_s20  ;;  %p14634_p7 = scmp.lt.u32.totalorder %s14630_s20, %s16577_s3 }
  0x6e   :  { %p14636_p8 = pnand %p14634_p7, %p14631_p6 }
  0x70   :  { %14639 = shalt.err (!%p14636_p8)
}
  0x71   :  { %s14640_s1 = scalar_lea.vmem %s56_s28, 32  ;;  %p14645_p10 = scmp.lt.s32.totalorder %s56_s28, %s56_s28 }
  0x72   :  { %p14641_p9 = scmp.ne.s32.totalorder %s56_s28, %s14640_s1  ;;  %p14646_p11 = scmp.lt.s32.totalorder %s14640_s1, %s14640_s1 }
  0x74   :  { %p14647_p12 = por %p14646_p11, %p14645_p10 }
  0x76   :  { %p14648_p13 = pnand %p14647_p12, %p14641_p9 }
  0x78   :  { %14651 = shalt.err (!%p14648_p13)
}
  0x79   :  { %58 = dma.hbm_to_vmem [thread:$0]  %s16577_s3, 32, %s56_s28, [#allocation7]  }
  0x7a   :  { %s14652_s18 = scalar_lea.hbm %s16579_s5, 64 }
  0x7b   :  { %p14653_p0 = scmp.ne.s32.totalorder %s16579_s5, %s14652_s18  ;;  %p14656_p1 = scmp.lt.u32.totalorder %s14652_s18, %s16579_s5 }
  0x7d   :  { %p14658_p2 = pnand %p14656_p1, %p14653_p0 }
  0x7f   :  { %14661 = shalt.err (!%p14658_p2)
}
  0x80   :  { %s14662_s27 = scalar_lea.vmem %s78_s14, 64  ;;  %p14667_p4 = scmp.lt.s32.totalorder %s78_s14, %s78_s14 }
  0x81   :  { %p14663_p3 = scmp.ne.s32.totalorder %s78_s14, %s14662_s27  ;;  %p14668_p5 = scmp.lt.s32.totalorder %s14662_s27, %s14662_s27 }
  0x83   :  { %p14669_p6 = por %p14668_p5, %p14667_p4 }
  0x85   :  { %p14670_p7 = pnand %p14669_p6, %p14663_p3 }
  0x87   :  { %14673 = shalt.err (!%p14670_p7)
}
  0x88   :  { %80 = dma.hbm_to_vmem [thread:$0]  %s16579_s5, 64, %s78_s14, [#allocation10]  }
  0x89   :  { %s14788_s4 = smov [#allocation14]   ;;  %s14674_s8 = scalar_lea.hbm %s16581_s7, 131072 }
  0x8a   :  { %s96_s28 = sshll.u32 %s14788_s4, 4  ;;  %p14675_p8 = scmp.ne.s32.totalorder %s16581_s7, %s14674_s8  ;;  %s97_s28 = int_to_ptr.vmem [resolvable:$true] %s96_s28 }
  0x8b   :  { %p14678_p9 = scmp.lt.u32.totalorder %s14674_s8, %s16581_s7 }
  0x8d   :  { %p14680_p10 = pnand %p14678_p9, %p14675_p8 }
  0x8f   :  { %14683 = shalt.err (!%p14680_p10)
}
  0x90   :  { %s14684_s17 = scalar_lea.vmem %s97_s28, 131072  ;;  %p14689_p12 = scmp.lt.s32.totalorder %s97_s28, %s97_s28 }
  0x91   :  { %p14685_p11 = scmp.ne.s32.totalorder %s97_s28, %s14684_s17  ;;  %p14690_p13 = scmp.lt.s32.totalorder %s14684_s17, %s14684_s17 }
  0x93   :  { %p14691_p0 = por %p14690_p13, %p14689_p12 }
  0x95   :  { %p14692_p1 = pnand %p14691_p0, %p14685_p11 }
  0x97   :  { %14695 = shalt.err (!%p14692_p1)
}
  0x98   :  { %s14789_s5 = smov 512   ;;  %s14790_s14 = smov 32  }
  0x99   :  { %102 = dma.hbm_to_vmem [thread:$0]  %s16581_s7, 131072, %s97_s28, [#allocation13], %s14789_s5, %s14789_s5, %s14790_s14  }
  0x9a   :  { %s14791_s19 = smov [#allocation17]   ;;  %s14696_s22 = scalar_lea.hbm %s16583_s9, 8192 }
  0x9b   :  { %s118_s21 = sshll.u32 %s14791_s19, 4  ;;  %p14697_p2 = scmp.ne.s32.totalorder %s16583_s9, %s14696_s22  ;;  %s119_s21 = int_to_ptr.vmem [resolvable:$true] %s118_s21 }
  0x9c   :  { %p14700_p3 = scmp.lt.u32.totalorder %s14696_s22, %s16583_s9 }
  0x9e   :  { %p14702_p4 = pnand %p14700_p3, %p14697_p2 }
  0xa0   :  { %14705 = shalt.err (!%p14702_p4)
}
  0xa1   :  { %s14706_s3 = scalar_lea.vmem %s119_s21, 8192  ;;  %p14711_p6 = scmp.lt.s32.totalorder %s119_s21, %s119_s21 }
  0xa2   :  { %p14707_p5 = scmp.ne.s32.totalorder %s119_s21, %s14706_s3  ;;  %p14712_p7 = scmp.lt.s32.totalorder %s14706_s3, %s14706_s3 }
  0xa4   :  { %p14713_p8 = por %p14712_p7, %p14711_p6 }
  0xa6   :  { %p14714_p9 = pnand %p14713_p8, %p14707_p5 }
  0xa8   :  { %14717 = shalt.err (!%p14714_p9)
}
  0xa9   :  { %s14792_s7 = smov 64   ;;  %s14793_s29 = smov 4  }
  0xaa   :  { %124 = dma.hbm_to_vmem [thread:$0]  %s16583_s9, 8192, %s119_s21, [#allocation16], %s14792_s7, %s14792_s7, %s14793_s29  }
  0xab   :  { %s14794_s30 = smov [#allocation20]   ;;  %s14795_s8 = smov [#allocation21]  }
  0xac   :  { %s140_s2 = sshll.u32 %s14794_s30, 4  ;;  %s153_s20 = sshll.u32 %s14795_s8, 4  ;;  %s141_s2 = int_to_ptr.vmem [resolvable:$true] %s140_s2  ;;  %s154_s20 = int_to_ptr.vmem [resolvable:$true] %s153_s20 }
  0xad   :  { %s14718_s16 = scalar_lea.hbm %s16585_s11, 1024 }
  0xae   :  { %p14719_p10 = scmp.ne.s32.totalorder %s16585_s11, %s14718_s16  ;;  %p14722_p11 = scmp.lt.u32.totalorder %s14718_s16, %s16585_s11 }
  0xb0   :  { %p14724_p12 = pnand %p14722_p11, %p14719_p10 }
  0xb2   :  { %14727 = shalt.err (!%p14724_p12)
}
  0xb3   :  { %s14728_s9 = scalar_lea.vmem %s141_s2, 1024  ;;  %p14733_p0 = scmp.lt.s32.totalorder %s141_s2, %s141_s2 }
  0xb4   :  { %p14729_p13 = scmp.ne.s32.totalorder %s141_s2, %s14728_s9  ;;  %p14734_p1 = scmp.lt.s32.totalorder %s14728_s9, %s14728_s9 }
  0xb6   :  { %p14735_p2 = por %p14734_p1, %p14733_p0 }
  0xb8   :  { %p14736_p3 = pnand %p14735_p2, %p14729_p13 }
  0xba   :  { %14739 = shalt.err (!%p14736_p3)
}
  0xbb   :  { %146 = dma.hbm_to_vmem [thread:$0]  %s16585_s11, 1024, %s141_s2, [#allocation19], %s14792_s7, %s14792_s7, %s14793_s29  }
  0xbc   :  { %s14740_s18 = scalar_lea.hbm %s16586_s12, 16 }
  0xbd   :  { %p14741_p4 = scmp.ne.s32.totalorder %s16586_s12, %s14740_s18  ;;  %p14744_p5 = scmp.lt.u32.totalorder %s14740_s18, %s16586_s12 }
  0xbf   :  { %p14746_p6 = pnand %p14744_p5, %p14741_p4 }
  0xc1   :  { %14749 = shalt.err (!%p14746_p6)
}
  0xc2   :  { %s14750_s27 = scalar_lea.vmem %s154_s20, 16  ;;  %s14754_s3 = scalar_lea.vmem %s154_s20, 32 }
  0xc3   :  { %p14751_p7 = scmp.ne.s32.totalorder %s154_s20, %s14750_s27  ;;  %p14755_p8 = scmp.lt.s32.totalorder %s154_s20, %s154_s20 }
  0xc4   :  { %p14756_p9 = scmp.lt.s32.totalorder %s14754_s3, %s14750_s27 }
  0xc6   :  { %p14757_p10 = por %p14756_p9, %p14755_p8 }
  0xc8   :  { %p14758_p11 = pnand %p14757_p10, %p14751_p7 }
  0xca   :  { %14761 = shalt.err (!%p14758_p11)
}
  0xcb   :  { %156 = dma.hbm_to_vmem [thread:$0]  %s16586_s12, 16, %s154_s20, [#allocation22]  }
  0xcc   :  { %14762 = dma.done.wait [#allocation5], 2304  }
  0xcd   :  { %14763 = vsyncadd [#allocation5], 4294964992 }
  0xce   :  { %14764 = dma.done.wait [#allocation7], 64  }
  0xcf   :  { %14765 = vsyncadd [#allocation7], 4294967232 }
  0xd0   :  { %14766 = dma.done.wait [#allocation10], 24640  }
  0xd1   :  { %14767 = vsyncadd [#allocation10], 4294942656 }
  0xd2   :  { %14768 = dma.done.wait [#allocation13], 131136  }
  0xd3   :  { %14769 = vsyncadd [#allocation13], 4294836160 }
  0xd4   :  { %14770 = dma.done.wait [#allocation16], 8320  }
  0xd5   :  { %14771 = vsyncadd [#allocation16], 4294958976 }
  0xd6   :  { %14772 = dma.done.wait [#allocation19], 1040  }
  0xd7   :  { %14773 = vsyncadd [#allocation19], 4294966256 }
  0xd8   :  { %14774 = dma.done.wait [#allocation22], 16  }
  0xd9   :  { %14775 = vsyncadd [#allocation22], 4294967280  ;;  %v13870_v0 = vld [vmem:[#allocation4 + $0x4] ss:$8 sps:$4 sm:$0xff]   ;;  %v13872_v1 = vld [vmem:[#allocation4] ss:$8 sps:$4 sm:$0xff]  }
  0xda   :  { %415 = vmatprep.subr.bf16.mxu0 %v13870_v0  ;;  %v13873_v2 = vld [vmem:[#allocation4 + $0x14] ss:$8 sps:$4 sm:$0xff]   ;;  %v13875_v3 = vld [vmem:[#allocation4 + $0x10] ss:$8 sps:$4 sm:$0xff]   ;;  %v13876_v4 = vld [vmem:[#allocation4 + $0x24] ss:$8 sps:$4 sm:$0xff]  }
  0xdb   :  { %416 = vmatpush1.bf16.msra.mxu0 %v13872_v1  ;;  %v13878_v5 = vld [vmem:[#allocation4 + $0x20] ss:$8 sps:$4 sm:$0xff]   ;;  %v13879_v6 = vld [vmem:[#allocation4 + $0x34] ss:$8 sps:$4 sm:$0xff]   ;;  %v13881_v7 = vld [vmem:[#allocation4 + $0x30] ss:$8 sps:$4 sm:$0xff]  }
  0xdc   :  { %417 = vmatprep.subr.bf16.mxu0 %v13873_v2  ;;  %v13882_v8 = vld [vmem:[#allocation4 + $0x44] ss:$8 sps:$4 sm:$0xff]   ;;  %vm390_vm0 = vcmask 130048   ;;  %v13899_v9 = vld [vmem:[%s16574_s0 + $0x4] ss:$8 sps:$4 sm:$0xff]   ;;  %vm842_vm6 = vcmask 1043456  }
  0xdd   :  { %v13884_v10 = vld [vmem:[#allocation4 + $0x40] ss:$8 sps:$4 sm:$0xff]   ;;  %12199 = vmatprep.mubr.msk.bf16.mxu0 %vm390_vm0, %v13899_v9  ;;  %v13885_v11 = vld [vmem:[#allocation4 + $0x54] ss:$8 sps:$4 sm:$0xff]   ;;  %v13887_v12 = vld [vmem:[#allocation4 + $0x50] ss:$8 sps:$4 sm:$0xff]  }
  0xde   :  { %v13888_v13 = vld [vmem:[#allocation4 + $0x64] ss:$8 sps:$4 sm:$0xff]   ;;  %v13890_v14 = vld [vmem:[#allocation4 + $0x60] ss:$8 sps:$4 sm:$0xff]   ;;  %v13891_v16 = vld [vmem:[#allocation4 + $0x74] ss:$8 sps:$4 sm:$0xff]  }
  0xdf   :  { %418 = vmatpush1.bf16.msra.mxu0 %v13875_v3  ;;  %v13921_v15 = vld [vmem:[#allocation9 + $0x204] ss:$16 sps:$4 sm:$0xff]   ;;  %v13926_v17 = vld [vmem:[#allocation9 + $0x200] ss:$16 sps:$4 sm:$0xff]   ;;  %v13925_v26 = vld [vmem:[#allocation9 + $0x20c] ss:$16 sps:$4 sm:$0xff]  }
  0xe0   :  { %419 = vmatprep.subr.bf16.mxu0 %v13876_v4  ;;  %1462 = vmatprep.subr.bf16.mxu1 %v13921_v15  ;;  %v13927_v18 = vld [vmem:[#allocation9 + $0x224] ss:$16 sps:$4 sm:$0xff]   ;;  %v13894_v20 = vld [vmem:[#allocation4 + $0x84] ss:$8 sps:$4 sm:$0xff]   ;;  %v13931_v30 = vld [vmem:[#allocation9 + $0x22c] ss:$16 sps:$4 sm:$0xff]  }
  0xe1   :  { %v13893_v19 = vld [vmem:[#allocation4 + $0x70] ss:$8 sps:$4 sm:$0xff]   ;;  %1463 = vmatpush1.bf16.msra.mxu1 %v13926_v17  ;;  %v13932_v21 = vld [vmem:[#allocation9 + $0x220] ss:$16 sps:$4 sm:$0xff]   ;;  %v13896_v23 = vld [vmem:[#allocation4 + $0x80] ss:$8 sps:$4 sm:$0xff]  }
  0xe2   :  { %1464 = vmatprep.subr.bf16.mxu1 %v13927_v18  ;;  %v13933_v22 = vld [vmem:[#allocation9 + $0x244] ss:$16 sps:$4 sm:$0xff]   ;;  %v13938_v24 = vld [vmem:[#allocation9 + $0x240] ss:$16 sps:$4 sm:$0xff]   ;;  %v13923_v29 = vld [vmem:[#allocation9 + $0x208] ss:$16 sps:$4 sm:$0xff]  }
  0xe3   :  { %420 = vmatpush1.bf16.msra.mxu0 %v13878_v5  ;;  %v13897_v25 = vld [vmem:[%s16574_s0] ss:$8 sps:$4 sm:$0xff]   ;;  %v13900_v28 = vld [vmem:[%s16574_s0 + $0x14] ss:$8 sps:$4 sm:$0xff]   ;;  %v13902_v34 = vld [vmem:[%s16574_s0 + $0x10] ss:$8 sps:$4 sm:$0xff]  }
  0xe4   :  { %421 = vmatprep.subr.bf16.mxu0 %v13879_v6  ;;  %v13939_v27 = vld [vmem:[#allocation9 + $0x264] ss:$16 sps:$4 sm:$0xff]   ;;  %v13944_v31 = vld [vmem:[#allocation9 + $0x260] ss:$16 sps:$4 sm:$0xff]   ;;  %v13929_v32 = vld [vmem:[#allocation9 + $0x228] ss:$16 sps:$4 sm:$0xff]  }
  0xe5   :  { %1465 = vmatpush1.bf16.msra.mxu1 %v13932_v21  ;;  %v13937_v33 = vld [vmem:[#allocation9 + $0x24c] ss:$16 sps:$4 sm:$0xff]   ;;  %v13903_v35 = vld [vmem:[%s16574_s0 + $0x24] ss:$8 sps:$4 sm:$0xff]   ;;  %v13906_v40 = vld [vmem:[%s16574_s0 + $0x34] ss:$8 sps:$4 sm:$0xff]  }
  0xe6   :  { %1466 = vmatprep.subr.bf16.mxu1 %v13933_v22  ;;  %v13935_v36 = vld [vmem:[#allocation9 + $0x248] ss:$16 sps:$4 sm:$0xff]   ;;  %v13943_v37 = vld [vmem:[#allocation9 + $0x26c] ss:$16 sps:$4 sm:$0xff]   ;;  %v13945_v50 = vld [vmem:[#allocation9 + $0x284] ss:$16 sps:$4 sm:$0xff]  }
  0xe7   :  { %422 = vmatpush1.bf16.msra.mxu0 %v13881_v7  ;;  %v13941_v38 = vld [vmem:[#allocation9 + $0x268] ss:$16 sps:$4 sm:$0xff]   ;;  %v13905_v39 = vld [vmem:[%s16574_s0 + $0x20] ss:$8 sps:$4 sm:$0xff]   ;;  %v13908_v41 = vld [vmem:[%s16574_s0 + $0x30] ss:$8 sps:$4 sm:$0xff]  }
  0xe8   :  { %423 = vmatprep.subr.bf16.mxu0 %v13882_v8  ;;  %v13909_v42 = vld [vmem:[%s16574_s0 + $0x44] ss:$8 sps:$4 sm:$0xff]   ;;  %v13911_v43 = vld [vmem:[%s16574_s0 + $0x40] ss:$8 sps:$4 sm:$0xff]   ;;  %v13912_v44 = vld [vmem:[%s16574_s0 + $0x54] ss:$8 sps:$4 sm:$0xff]  }
  0xe9   :  { %1467 = vmatpush1.bf16.msra.mxu1 %v13938_v24  ;;  %v13914_v45 = vld [vmem:[%s16574_s0 + $0x50] ss:$8 sps:$4 sm:$0xff]   ;;  %v13915_v46 = vld [vmem:[%s16574_s0 + $0x64] ss:$8 sps:$4 sm:$0xff]   ;;  %v13917_v47 = vld [vmem:[%s16574_s0 + $0x60] ss:$8 sps:$4 sm:$0xff]  }
  0xea   :  { %1468 = vmatprep.subr.bf16.mxu1 %v13939_v27  ;;  %v13918_v48 = vld [vmem:[%s16574_s0 + $0x74] ss:$8 sps:$4 sm:$0xff]   ;;  %v13920_v49 = vld [vmem:[%s16574_s0 + $0x70] ss:$8 sps:$4 sm:$0xff]  }
  0xeb   :  { %424 = vmatpush1.bf16.msra.mxu0 %v13884_v10  ;;  %v13949_v51 = vld [vmem:[#allocation9 + $0x28c] ss:$16 sps:$4 sm:$0xff]   ;;  %v13947_v52 = vld [vmem:[#allocation9 + $0x288] ss:$16 sps:$4 sm:$0xff]   ;;  %v13950_v53 = vld [vmem:[#allocation9 + $0x280] ss:$16 sps:$4 sm:$0xff]  }
  0xec   :  { %425 = vmatprep.subr.bf16.mxu0 %v13885_v11  ;;  %v13951_v54 = vld [vmem:[#allocation9 + $0x2a4] ss:$16 sps:$4 sm:$0xff]   ;;  %v13955_v55 = vld [vmem:[#allocation9 + $0x2ac] ss:$16 sps:$4 sm:$0xff]   ;;  %v13953_v56 = vld [vmem:[#allocation9 + $0x2a8] ss:$16 sps:$4 sm:$0xff]  }
  0xed   :  { %1469 = vmatpush1.bf16.msra.mxu1 %v13944_v31  ;;  %v13956_v57 = vld [vmem:[#allocation9 + $0x2a0] ss:$16 sps:$4 sm:$0xff]   ;;  %v13957_v58 = vld [vmem:[#allocation9 + $0x2c4] ss:$16 sps:$4 sm:$0xff]   ;;  %v13961_v59 = vld [vmem:[#allocation9 + $0x2cc] ss:$16 sps:$4 sm:$0xff]  }
  0xee   :  { %1470 = vmatprep.subr.bf16.mxu1 %v13945_v50  ;;  %v13959_v60 = vld [vmem:[#allocation9 + $0x2c8] ss:$16 sps:$4 sm:$0xff]   ;;  %v13962_v61 = vld [vmem:[#allocation9 + $0x2c0] ss:$16 sps:$4 sm:$0xff]   ;;  %v13963_v62 = vld [vmem:[#allocation9 + $0x2e4] ss:$16 sps:$4 sm:$0xff]  }
  0xef   :  { %426 = vmatpush1.bf16.msra.mxu0 %v13887_v12  ;;  %v13967_v63 = vld [vmem:[#allocation9 + $0x2ec] ss:$16 sps:$4 sm:$0xff]   ;;  %v13965_v0 = vld [vmem:[#allocation9 + $0x2e8] ss:$16 sps:$4 sm:$0xff]   ;;  %v13968_v1 = vld [vmem:[#allocation9 + $0x2e0] ss:$16 sps:$4 sm:$0xff]  }
  0xf0   :  { %427 = vmatprep.subr.bf16.mxu0 %v13888_v13  ;;  %v13969_v2 = vld [vmem:[#allocation9 + $0x304] ss:$16 sps:$4 sm:$0xff]   ;;  %v13973_v3 = vld [vmem:[#allocation9 + $0x30c] ss:$16 sps:$4 sm:$0xff]   ;;  %v13971_v4 = vld [vmem:[#allocation9 + $0x308] ss:$16 sps:$4 sm:$0xff]  }
  0xf1   :  { %1471 = vmatpush1.bf16.msra.mxu1 %v13950_v53  ;;  %v13974_v5 = vld [vmem:[#allocation9 + $0x300] ss:$16 sps:$4 sm:$0xff]   ;;  %v13975_v6 = vld [vmem:[#allocation9 + $0x324] ss:$16 sps:$4 sm:$0xff]   ;;  %v13979_v7 = vld [vmem:[#allocation9 + $0x32c] ss:$16 sps:$4 sm:$0xff]  }
  0xf2   :  { %1472 = vmatprep.subr.bf16.mxu1 %v13951_v54  ;;  %v13977_v8 = vld [vmem:[#allocation9 + $0x328] ss:$16 sps:$4 sm:$0xff]   ;;  %v13980_v9 = vld [vmem:[#allocation9 + $0x320] ss:$16 sps:$4 sm:$0xff]   ;;  %v13981_v10 = vld [vmem:[#allocation9 + $0x344] ss:$16 sps:$4 sm:$0xff]  }
  0xf3   :  { %428 = vmatpush1.bf16.msra.mxu0 %v13890_v14  ;;  %v13985_v11 = vld [vmem:[#allocation9 + $0x34c] ss:$16 sps:$4 sm:$0xff]   ;;  %v13983_v12 = vld [vmem:[#allocation9 + $0x348] ss:$16 sps:$4 sm:$0xff]   ;;  %v13986_v13 = vld [vmem:[#allocation9 + $0x340] ss:$16 sps:$4 sm:$0xff]  }
  0xf4   :  { %429 = vmatprep.subr.bf16.mxu0 %v13891_v16  ;;  %v13987_v14 = vld [vmem:[#allocation9 + $0x364] ss:$16 sps:$4 sm:$0xff]   ;;  %v13991_v15 = vld [vmem:[#allocation9 + $0x36c] ss:$16 sps:$4 sm:$0xff]   ;;  %v13989_v16 = vld [vmem:[#allocation9 + $0x368] ss:$16 sps:$4 sm:$0xff]  }
  0xf5   :  { %1473 = vmatpush1.bf16.msra.mxu1 %v13956_v57  ;;  %v13992_v17 = vld [vmem:[#allocation9 + $0x360] ss:$16 sps:$4 sm:$0xff]   ;;  %v13993_v18 = vld [vmem:[#allocation9 + $0x384] ss:$16 sps:$4 sm:$0xff]   ;;  %v14001_v24 = vld [vmem:[#allocation9 + $0x3a8] ss:$16 sps:$4 sm:$0xff]  }
  0xf6   :  { %1474 = vmatprep.subr.bf16.mxu1 %v13957_v58  ;;  %v13998_v21 = vld [vmem:[#allocation9 + $0x380] ss:$16 sps:$4 sm:$0xff]   ;;  %v13999_v22 = vld [vmem:[#allocation9 + $0x3a4] ss:$16 sps:$4 sm:$0xff]   ;;  %v14009_v27 = vld [vmem:[#allocation9 + $0x3cc] ss:$16 sps:$4 sm:$0xff]  }
  0xf7   :  { %430 = vmatpush1.bf16.msra.mxu0 %v13893_v19  ;;  %v13997_v19 = vld [vmem:[#allocation9 + $0x38c] ss:$16 sps:$4 sm:$0xff]  }
  0xf8   :  { %431 = vmatprep.subr.bf16.mxu0 %v13894_v20  ;;  %v13995_v20 = vld [vmem:[#allocation9 + $0x388] ss:$16 sps:$4 sm:$0xff]   ;;  %v14015_v31 = vld [vmem:[#allocation9 + $0x3ec] ss:$16 sps:$4 sm:$0xff]  }
  0xf9   :  { %1475 = vmatpush1.bf16.msra.mxu1 %v13962_v61 }
  0xfa   :  { %1476 = vmatprep.subr.bf16.mxu1 %v13963_v62 }
  0xfb   :  { %432 = vmatpush1.bf16.msra.mxu0 %v13896_v23  ;;  %v14003_v23 = vld [vmem:[#allocation9 + $0x3ac] ss:$16 sps:$4 sm:$0xff]  }
  0xfc   :  { %1575 = vmatprep.subr.bf16.mxu0 %v13925_v26  ;;  %v14005_v26 = vld [vmem:[#allocation9 + $0x3c4] ss:$16 sps:$4 sm:$0xff]  }
  0xfd   :  { %1477 = vmatpush1.bf16.msra.mxu1 %v13968_v1 }
  0xfe   :  { %448 = vmatmul.mubr.bf16.vlgmr.msra.gmra.mrb[0].mxu0 %v13897_v25  ;;  %1478 = vmatprep.subr.bf16.mxu1 %v13969_v2  ;;  %v14004_v25 = vld [vmem:[#allocation9 + $0x3a0] ss:$16 sps:$4 sm:$0xff]  }
  0xff   :  { %12200 = vmatprep.mubr.msk.bf16.mxu0 %vm390_vm0, %v13900_v28  ;;  %1576 = vmatpush1.bf16.msra.mxu0 %v13923_v29  ;;  %v14007_v28 = vld [vmem:[#allocation9 + $0x3c8] ss:$16 sps:$4 sm:$0xff]   ;;  %v14010_v29 = vld [vmem:[#allocation9 + $0x3c0] ss:$16 sps:$4 sm:$0xff]  }
 0x100   :  { %1577 = vmatprep.subr.bf16.mxu0 %v13931_v30  ;;  %v14011_v30 = vld [vmem:[#allocation9 + $0x3e4] ss:$16 sps:$4 sm:$0xff]  }
 0x101   :  { %1479 = vmatpush1.bf16.msra.mxu1 %v13974_v5 }
 0x102   :  { %1480 = vmatprep.subr.bf16.mxu1 %v13975_v6 }
 0x103   :  { %1578 = vmatpush1.bf16.msra.mxu0 %v13929_v32  ;;  %v14013_v32 = vld [vmem:[#allocation9 + $0x3e8] ss:$16 sps:$4 sm:$0xff]  }
 0x104   :  { %1579 = vmatprep.subr.bf16.mxu0 %v13937_v33  ;;  %v14016_v33 = vld [vmem:[#allocation9 + $0x3e0] ss:$16 sps:$4 sm:$0xff]  }
 0x105   :  { %1481 = vmatpush1.bf16.msra.mxu1 %v13980_v9 }
 0x106   :  { %458 = vmatmul.mubr.bf16.gmra.mrb[4].mxu0 %v13902_v34  ;;  %1482 = vmatprep.subr.bf16.mxu1 %v13981_v10  ;;  %v14796_v34 = vmov 0  }
 0x107   :  { %12201 = vmatprep.mubr.msk.bf16.mxu0 %vm390_vm0, %v13903_v35  ;;  %1580 = vmatpush1.bf16.msra.mxu0 %v13935_v36  ;;  %809 = vst [vmem:[#allocation2 + $0x8] sm:$0xf] %v14796_v34  ;;  %808 = vst [vmem:[#allocation2] sm:$0xf] %v14796_v34  ;;  %v14019_v35 = vld [vmem:[#allocation9 + $0x4] ss:$16 sps:$4 sm:$0xff]  }
 0x108   :  { %1581 = vmatprep.subr.bf16.mxu0 %v13943_v37  ;;  %909 = vst [vmem:[#allocation2 + $0x80] sm:$0xf0] %v14796_v34  ;;  %910 = vst [vmem:[#allocation2 + $0x88] sm:$0xf0] %v14796_v34  ;;  %v14022_v36 = vld [vmem:[#allocation9 + $0xc] ss:$16 sps:$4 sm:$0xff]   ;;  %v530_v37 = vlaneseq }
 0x109   :  { %1483 = vmatpush1.bf16.msra.mxu1 %v13986_v13 }
 0x10a   :  { %1484 = vmatprep.subr.bf16.mxu1 %v13987_v14 }
 0x10b   :  { %1582 = vmatpush1.bf16.msra.mxu0 %v13941_v38  ;;  %v15083_v38 = vshrl.u32 %v530_v37, 7 }
 0x10c   :  { %1583 = vmatprep.subr.bf16.mxu0 %v13949_v51 }
 0x10d   :  { %1485 = vmatpush1.bf16.msra.mxu1 %v13992_v17  ;;  %16598 = vst [vmem:[#allocation30_spill] sm:$0xff] %v15083_v38 }
 0x10e   :  { %468 = vmatmul.mubr.bf16.gmra.mrb[8].mxu0 %v13905_v39  ;;  %1486 = vmatprep.subr.bf16.mxu1 %v13993_v18  ;;  %v15086_v39 = vsub.s32 0, %v15083_v38 }
 0x10f   :  { %12202 = vmatprep.mubr.msk.bf16.mxu0 %vm390_vm0, %v13906_v40  ;;  %1584 = vmatpush1.bf16.msra.mxu0 %v13947_v52  ;;  %v528_v40 = vld [vmem:[#allocation6] sm:$0x3] }
 0x110   :  { %1585 = vmatprep.subr.bf16.mxu0 %v13955_v55  ;;  %16599 = vst [vmem:[#allocation31_spill] sm:$0xff] %v15086_v39 }
 0x111   :  { %1487 = vmatpush1.bf16.msra.mxu1 %v13998_v21 }
 0x112   :  { %1488 = vmatprep.subr.bf16.mxu1 %v13999_v22 }
 0x113   :  { %1586 = vmatpush1.bf16.msra.mxu0 %v13953_v56 }
 0x114   :  { %1587 = vmatprep.subr.bf16.mxu0 %v13961_v59 }
 0x115   :  { %1489 = vmatpush1.bf16.msra.mxu1 %v14004_v25 }
 0x116   :  { %478 = vmatmul.mubr.bf16.gmra.mrb[12].mxu0 %v13908_v41  ;;  %1490 = vmatprep.subr.bf16.mxu1 %v14005_v26  ;;  %v15089_v41 = vsub.s32 1, %v15083_v38 }
 0x117   :  { %12203 = vmatprep.mubr.msk.bf16.mxu0 %vm390_vm0, %v13909_v42  ;;  %1588 = vmatpush1.bf16.msra.mxu0 %v13959_v60  ;;  %v572_v42 = vld [vmem:[#allocation8] sm:$0x3] }
 0x118   :  { %1589 = vmatprep.subr.bf16.mxu0 %v13967_v63  ;;  %16600 = vst [vmem:[#allocation32_spill] sm:$0xff] %v15089_v41 }
 0x119   :  { %1491 = vmatpush1.bf16.msra.mxu1 %v14010_v29 }
 0x11a   :  { %1492 = vmatprep.subr.bf16.mxu1 %v14011_v30 }
 0x11b   :  { %1590 = vmatpush1.bf16.msra.mxu0 %v13965_v0 }
 0x11c   :  { %1591 = vmatprep.subr.bf16.mxu0 %v13973_v3 }
 0x11d   :  { %1493 = vmatpush1.bf16.msra.mxu1 %v14016_v33 }
 0x11e   :  { %488 = vmatmul.mubr.bf16.gmra.mrb[16].mxu0 %v13911_v43  ;;  %2008 = vmatprep.subr.bf16.mxu1 %v14019_v35  ;;  %v15092_v43 = vrot.slane %v528_v40, %v15086_v39 }
 0x11f   :  { %12204 = vmatprep.mubr.msk.bf16.mxu0 %vm390_vm0, %v13912_v44  ;;  %1592 = vmatpush1.bf16.msra.mxu0 %v13971_v4  ;;  %v15095_v44 = vrot.slane %v528_v40, %v15089_v41 }
 0x120   :  { %1593 = vmatprep.subr.bf16.mxu0 %v13979_v7 }
 0x123   :  { %1594 = vmatpush1.bf16.msra.mxu0 %v13977_v8 }
 0x124   :  { %1595 = vmatprep.subr.bf16.mxu0 %v13985_v11 }
 0x126   :  { %498 = vmatmul.mubr.bf16.gmra.mrb[20].mxu0 %v13914_v45  ;;  %v15098_v45 = vrot.slane %v572_v42, %v15086_v39 }
 0x127   :  { %12205 = vmatprep.mubr.msk.bf16.mxu0 %vm390_vm0, %v13915_v46  ;;  %1596 = vmatpush1.bf16.msra.mxu0 %v13983_v12 }
 0x128   :  { %1597 = vmatprep.subr.bf16.mxu0 %v13991_v15 }
 0x12b   :  { %1598 = vmatpush1.bf16.msra.mxu0 %v13989_v16 }
 0x12c   :  { %1599 = vmatprep.subr.bf16.mxu0 %v13997_v19 }
 0x12e   :  { %508 = vmatmul.mubr.bf16.gmra.mrb[24].mxu0 %v13917_v47  ;;  %v15101_v47 = vrot.slane %v572_v42, %v15089_v41 }
 0x12f   :  { %12206 = vmatprep.mubr.msk.bf16.mxu0 %vm390_vm0, %v13918_v48  ;;  %1600 = vmatpush1.bf16.msra.mxu0 %v13995_v20 }
 0x130   :  { %1601 = vmatprep.subr.bf16.mxu0 %v14003_v23 }
 0x133   :  { %1602 = vmatpush1.bf16.msra.mxu0 %v14001_v24 }
 0x134   :  { %1603 = vmatprep.subr.bf16.mxu0 %v14009_v27 }
 0x136   :  { %518 = vmatmul.mubr.bf16.gmra.mrb[28].mxu0 %v13920_v49 }
 0x137   :  { %1604 = vmatpush1.bf16.msra.mxu0 %v14007_v28 }
 0x138   :  { %1605 = vmatprep.subr.bf16.mxu0 %v14015_v31 }
 0x13b   :  { %1606 = vmatpush1.bf16.msra.mxu0 %v14013_v32 }
 0x13c   :  { %2121 = vmatprep.subr.bf16.mxu0 %v14022_v36 }
 0x1d1   :  { %v449_v46 = vpop.f32.mrb[0].mxu0 }
 0x1d2   :  { %v540_v48 = vmul.f32 %v15092_v43, %v449_v46  ;;  %v451_v49 = vpop.f32.mrb[1].mxu0 }
 0x1d3   :  { %v541_v50 = vmul.f32 %v15095_v44, %v451_v49  ;;  %v453_v51 = vpop.f32.mrb[2].mxu0 }
 0x1d4   :  { %v15106_v52 = vadd.f32 %v15098_v45, %v540_v48  ;;  %v542_v53 = vmul.f32 %v15092_v43, %v453_v51  ;;  %v455_v54 = vpop.f32.mrb[3].mxu0 }
 0x1d5   :  { %v15110_v55 = vadd.f32 %v15101_v47, %v541_v50  ;;  %v543_v56 = vmul.f32 %v15095_v44, %v455_v54 }
 0x1d6   :  { %v648_v57 = vmin.f32 %v15106_v52, 0.0  ;;  %v15115_v58 = vadd.f32 %v15098_v45, %v542_v53  ;;  %vm616_vm1 = vcmp.gt.f32.partialorder %v15106_v52, 0.0 }
 0x1d7   :  { %v649_v59 = vmin.f32 %v15110_v55, 0.0  ;;  %v15119_v60 = vadd.f32 %v15101_v47, %v543_v56  ;;  %vm617_vm2 = vcmp.gt.f32.partialorder %v15110_v55, 0.0 }
 0x1d8   :  { %v680_v61 = vmul.f32 1.442695, %v648_v57  ;;  %v650_v62 = vmin.f32 %v15115_v58, 0.0  ;;  %vm618_vm3 = vcmp.gt.f32.partialorder %v15115_v58, 0.0 }
 0x1d9   :  { %v682_v63 = vmul.f32 1.442695, %v649_v59  ;;  %v651_v0 = vmin.f32 %v15119_v60, 0.0  ;;  %v459_v1 = vpop.f32.mrb[4].mxu0  ;;  %vm619_vm4 = vcmp.gt.f32.partialorder %v15119_v60, 0.0 }
 0x1da   :  { %14281 = vpow2.f32 %v680_v61  ;;  %v684_v2 = vmul.f32 1.442695, %v650_v62  ;;  %v544_v3 = vmul.f32 %v15092_v43, %v459_v1  ;;  %v461_v4 = vpop.f32.mrb[5].mxu0 }
 0x1db   :  { %14283 = vpow2.f32 %v682_v63  ;;  %v686_v5 = vmul.f32 1.442695, %v651_v0  ;;  %v545_v6 = vmul.f32 %v15095_v44, %v461_v4  ;;  %v463_v7 = vpop.f32.mrb[6].mxu0 }
 0x1dc   :  { %14285 = vpow2.f32 %v684_v2  ;;  %v15126_v8 = vadd.f32 %v15098_v45, %v544_v3  ;;  %v546_v9 = vmul.f32 %v15092_v43, %v463_v7  ;;  %v465_v10 = vpop.f32.mrb[7].mxu0 }
 0x1dd   :  { %14287 = vpow2.f32 %v686_v5  ;;  %v15130_v11 = vadd.f32 %v15101_v47, %v545_v6  ;;  %v547_v12 = vmul.f32 %v15095_v44, %v465_v10 }
 0x1de   :  { %v652_v13 = vmin.f32 %v15126_v8, 0.0  ;;  %v15135_v14 = vadd.f32 %v15098_v45, %v546_v9  ;;  %vm620_vm5 = vcmp.gt.f32.partialorder %v15126_v8, 0.0 }
 0x1df   :  { %v653_v15 = vmin.f32 %v15130_v11, 0.0  ;;  %v15139_v16 = vadd.f32 %v15101_v47, %v547_v12  ;;  %vm621_vm7 = vcmp.gt.f32.partialorder %v15130_v11, 0.0 }
 0x1e0   :  { %v688_v17 = vmul.f32 1.442695, %v652_v13  ;;  %v654_v18 = vmin.f32 %v15135_v14, 0.0  ;;  %vm622_vm8 = vcmp.gt.f32.partialorder %v15135_v14, 0.0 }
 0x1e1   :  { %v690_v19 = vmul.f32 1.442695, %v653_v15  ;;  %v655_v20 = vmin.f32 %v15139_v16, 0.0  ;;  %v469_v21 = vpop.f32.mrb[8].mxu0  ;;  %vm623_vm9 = vcmp.gt.f32.partialorder %v15139_v16, 0.0 }
 0x1e2   :  { %14289 = vpow2.f32 %v688_v17  ;;  %v692_v22 = vmul.f32 1.442695, %v654_v18  ;;  %v548_v23 = vmul.f32 %v15092_v43, %v469_v21  ;;  %v471_v24 = vpop.f32.mrb[9].mxu0 }
 0x1e3   :  { %14291 = vpow2.f32 %v690_v19  ;;  %v694_v25 = vmul.f32 1.442695, %v655_v20  ;;  %v549_v26 = vmul.f32 %v15095_v44, %v471_v24  ;;  %v473_v27 = vpop.f32.mrb[10].mxu0 }
 0x1e4   :  { %v14282_v28 = vpop.eup %14281  ;;  %14293 = vpow2.f32 %v692_v22  ;;  %v15147_v29 = vadd.f32 %v15098_v45, %v548_v23  ;;  %v550_v30 = vmul.f32 %v15092_v43, %v473_v27  ;;  %v475_v31 = vpop.f32.mrb[11].mxu0 }
 0x1e5   :  { %v14284_v32 = vpop.eup %14283  ;;  %v12207_v33 = vadd.f32 -1.0, %v14282_v28  ;;  %14295 = vpow2.f32 %v694_v25  ;;  %v15151_v34 = vadd.f32 %v15101_v47, %v549_v26  ;;  %v551_v35 = vmul.f32 %v15095_v44, %v475_v31 }
 0x1e6   :  { %v14286_v36 = vpop.eup %14285  ;;  %v12208_v37 = vadd.f32 -1.0, %v14284_v32  ;;  %v656_v40 = vmin.f32 %v15147_v29, 0.0  ;;  %v15157_v42 = vadd.f32 %v15098_v45, %v550_v30  ;;  %vm624_vm10 = vcmp.gt.f32.partialorder %v15147_v29, 0.0 }
 0x1e7   :  { %v14288_v46 = vpop.eup %14287  ;;  %v12209_v48 = vadd.f32 -1.0, %v14286_v36  ;;  %v657_v49 = vmin.f32 %v15151_v34, 0.0  ;;  %v776_v50 = vsel %vm616_vm1, %v15106_v52, %v12207_v33  ;;  %v15169_v61 = vadd.f32 %v15101_v47, %v551_v35 }
 0x1e8   :  { %v777_v51 = vsel %vm617_vm2, %v15110_v55, %v12208_v37  ;;  %v12210_v53 = vadd.f32 -1.0, %v14288_v46  ;;  %v696_v54 = vmul.f32 1.442695, %v656_v40  ;;  %v658_v59 = vmin.f32 %v15157_v42, 0.0 }
 0x1e9   :  { %v778_v56 = vsel %vm618_vm3, %v15115_v58, %v12209_v48  ;;  %v698_v57 = vmul.f32 1.442695, %v657_v49  ;;  %v479_v62 = vpop.f32.mrb[12].mxu0  ;;  %v659_v5 = vmin.f32 %v15169_v61, 0.0  ;;  %vm625_vm11 = vcmp.gt.f32.partialorder %v15151_v34, 0.0 }
 0x1ea   :  { %v810_v63 = vpack.c.bf16 %v778_v56, %v776_v50  ;;  %v779_v0 = vsel %vm619_vm4, %v15119_v60, %v12210_v53  ;;  %14297 = vpow2.f32 %v696_v54  ;;  %v552_v1 = vmul.f32 %v15092_v43, %v479_v62  ;;  %v481_v52 = vpop.f32.mrb[13].mxu0 }
 0x1eb   :  { %v811_v2 = vpack.c.bf16 %v779_v0, %v777_v51  ;;  %14299 = vpow2.f32 %v698_v57  ;;  %v700_v55 = vmul.f32 1.442695, %v658_v59  ;;  %v483_v58 = vpop.f32.mrb[14].mxu0  ;;  %v553_v60 = vmul.f32 %v15095_v44, %v481_v52 }
 0x1ec   :  { %v14290_v3 = vpop.eup %14289  ;;  %v843_v4 = vrot.slane %v810_v63, 4  ;;  %v15176_v6 = vadd.f32 %v15098_v45, %v552_v1  ;;  %v485_v7 = vpop.f32.mrb[15].mxu0  ;;  %v554_v13 = vmul.f32 %v15092_v43, %v483_v58  ;;  %v702_v18 = vmul.f32 1.442695, %v659_v5 }
 0x1ed   :  { %v14292_v9 = vpop.eup %14291  ;;  %v844_v10 = vrot.slane %v811_v2, 4  ;;  %v12211_v12 = vadd.f32 -1.0, %v14290_v3  ;;  %14301 = vpow2.f32 %v700_v55  ;;  %v15184_v22 = vadd.f32 %v15101_v47, %v553_v60 }
 0x1ee   :  { %v14294_v15 = vpop.eup %14293  ;;  %891 = vst [vmem:[#allocation2] sm:$0xf0] %v843_v4  ;;  %v12212_v17 = vadd.f32 -1.0, %v14292_v9  ;;  %v660_v19 = vmin.f32 %v15176_v6, 0.0  ;;  %v15187_v23 = vadd.f32 %v15098_v45, %v554_v13  ;;  %14303 = vpow2.f32 %v702_v18 }
 0x1ef   :  { %v14296_v20 = vpop.eup %14295  ;;  %892 = vst [vmem:[#allocation2 + $0x8] sm:$0xf0] %v844_v10  ;;  %v12213_v21 = vadd.f32 -1.0, %v14294_v15  ;;  %v780_v26 = vsel %vm620_vm5, %v15126_v8, %v12211_v12  ;;  %v661_v30 = vmin.f32 %v15184_v22, 0.0  ;;  %v555_v46 = vmul.f32 %v15095_v44, %v485_v7 }
 0x1f0   :  { %v12214_v24 = vadd.f32 -1.0, %v14296_v20  ;;  %v704_v25 = vmul.f32 1.442695, %v660_v19  ;;  %v781_v27 = vsel %vm621_vm7, %v15130_v11, %v12212_v17  ;;  %v662_v35 = vmin.f32 %v15187_v23, 0.0 }
 0x1f1   :  { %v782_v28 = vsel %vm622_vm8, %v15135_v14, %v12213_v21  ;;  %v489_v31 = vpop.f32.mrb[16].mxu0  ;;  %v706_v40 = vmul.f32 1.442695, %v661_v30  ;;  %vm626_vm12 = vcmp.gt.f32.partialorder %v15157_v42, 0.0  ;;  %vm627_vm13 = vcmp.gt.f32.partialorder %v15169_v61, 0.0 }
 0x1f2   :  { %v812_v32 = vpack.c.bf16 %v782_v28, %v780_v26  ;;  %v783_v33 = vsel %vm623_vm9, %v15139_v16, %v12214_v24  ;;  %14305 = vpow2.f32 %v704_v25  ;;  %v491_v36 = vpop.f32.mrb[17].mxu0  ;;  %v556_v8 = vmul.f32 %v15092_v43, %v489_v31 }
 0x1f3   :  { %v813_v37 = vpack.c.bf16 %v783_v33, %v781_v27  ;;  %v493_v48 = vpop.f32.mrb[18].mxu0  ;;  %v708_v14 = vmul.f32 1.442695, %v662_v35  ;;  %v557_v50 = vmul.f32 %v15095_v44, %v491_v36  ;;  %14307 = vpow2.f32 %v706_v40 }
 0x1f4   :  { %v14298_v11 = vpop.eup %14297  ;;  %v845_v49 = vrot.slane %v812_v32, 4  ;;  %v495_v51 = vpop.f32.mrb[19].mxu0  ;;  %v15204_v16 = vadd.f32 %v15101_v47, %v555_v46  ;;  %v558_v56 = vmul.f32 %v15092_v43, %v493_v48  ;;  %v15211_v62 = vadd.f32 %v15098_v45, %v556_v8 }
 0x1f5   :  { %v14300_v53 = vpop.eup %14299  ;;  %v15201_v54 = vrot.slane %v813_v37, 4  ;;  %v12215_v59 = vadd.f32 -1.0, %v14298_v11  ;;  %14309 = vpow2.f32 %v708_v14  ;;  %v15225_v3 = vadd.f32 %v15101_v47, %v557_v50 }
 0x1f6   :  { %v15208_v57 = vsel %vm842_vm6, %v843_v4, %v845_v49  ;;  %v663_v1 = vmin.f32 %v15204_v16, 0.0  ;;  %v12216_v52 = vadd.f32 -1.0, %v14300_v53  ;;  %v664_v55 = vmin.f32 %v15211_v62, 0.0 }
 0x1f7   :  { %v14302_v63 = vpop.eup %14301  ;;  %893 = vst [vmem:[#allocation2 + $0x10] sm:$0xff] %v15208_v57  ;;  %v15216_v0 = vsel %vm842_vm6, %v844_v10, %v15201_v54  ;;  %v15228_v4 = vadd.f32 %v15098_v45, %v558_v56  ;;  %v559_v5 = vmul.f32 %v15095_v44, %v495_v51  ;;  %v784_v9 = vsel %vm624_vm10, %v15147_v29, %v12215_v59 }
 0x1f8   :  { %894 = vst [vmem:[#allocation2 + $0x18] sm:$0xff] %v15216_v0  ;;  %v12217_v2 = vadd.f32 -1.0, %v14302_v63  ;;  %v710_v58 = vmul.f32 1.442695, %v663_v1  ;;  %v14304_v7 = vpop.eup %14303  ;;  %v712_v12 = vmul.f32 1.442695, %v664_v55  ;;  %v785_v21 = vsel %vm625_vm11, %v15151_v34, %v12216_v52 }
 0x1f9   :  { %v499_v60 = vpop.f32.mrb[20].mxu0  ;;  %v12218_v18 = vadd.f32 -1.0, %v14304_v7  ;;  %v665_v29 = vmin.f32 %v15225_v3, 0.0  ;;  %v15242_v28 = vadd.f32 %v15101_v47, %v559_v5  ;;  %vm628_vm14 = vcmp.gt.f32.partialorder %v15176_v6, 0.0 }
 0x1fa   :  { %v786_v10 = vsel %vm626_vm12, %v15157_v42, %v12217_v2  ;;  %v560_v13 = vmul.f32 %v15092_v43, %v499_v60  ;;  %v501_v15 = vpop.f32.mrb[21].mxu0  ;;  %14311 = vpow2.f32 %v710_v58  ;;  %v666_v42 = vmin.f32 %v15228_v4, 0.0  ;;  %v15276_v2 = vld [vmem:[#allocation2 + $0x8] sm:$0xf0] }
 0x1fb   :  { %v814_v17 = vpack.c.bf16 %v786_v10, %v784_v9  ;;  %v503_v19 = vpop.f32.mrb[22].mxu0  ;;  %14313 = vpow2.f32 %v712_v12  ;;  %v787_v26 = vsel %vm627_vm13, %v15169_v61, %v12218_v18  ;;  %v714_v31 = vmul.f32 1.442695, %v665_v29 }
 0x1fc   :  { %v14306_v20 = vpop.eup %14305  ;;  %v505_v24 = vpop.f32.mrb[23].mxu0  ;;  %v815_v30 = vpack.c.bf16 %v787_v26, %v785_v21  ;;  %v716_v32 = vmul.f32 1.442695, %v666_v42  ;;  %v15245_v33 = vadd.f32 %v15098_v45, %v560_v13  ;;  %vm629_vm15 = vcmp.gt.f32.partialorder %v15184_v22, 0.0 }
 0x1fd   :  { %v849_v25 = vrot.slane %v814_v17, 4  ;;  %v12219_v27 = vadd.f32 -1.0, %v14306_v20  ;;  %v14308_v34 = vpop.eup %14307  ;;  %v667_v61 = vmin.f32 %v15242_v28, 0.0  ;;  %vm630_vm0 = vcmp.gt.f32.partialorder %v15187_v23, 0.0 }
 0x1fe   :  { %v15254_v37 = vrot.slane %v815_v30, 4  ;;  %14315 = vpow2.f32 %v714_v31  ;;  %v668_v48 = vmin.f32 %v15245_v33, 0.0  ;;  %v12220_v14 = vadd.f32 -1.0, %v14308_v34 }
 0x1ff   :  { %v15248_v35 = vsel %vm842_vm6, %v845_v49, %v849_v25  ;;  %v14310_v36 = vpop.eup %14309  ;;  %v788_v40 = vsel %vm628_vm14, %v15176_v6, %v12219_v27  ;;  %14317 = vpow2.f32 %v716_v32  ;;  %v718_v8 = vmul.f32 1.442695, %v667_v61 }
 0x200   :  { %895 = vst [vmem:[#allocation2 + $0x20] sm:$0xff] %v15248_v35  ;;  %v12221_v46 = vadd.f32 -1.0, %v14310_v36  ;;  %v15262_v49 = vsel %vm842_vm6, %v15201_v54, %v15254_v37  ;;  %v561_v50 = vmul.f32 %v15095_v44, %v501_v15  ;;  %v562_v51 = vmul.f32 %v15092_v43, %v503_v19 }
 0x201   :  { %v509_v11 = vpop.f32.mrb[24].mxu0  ;;  %896 = vst [vmem:[#allocation2 + $0x28] sm:$0xff] %v15262_v49  ;;  %14319 = vpow2.f32 %v718_v8  ;;  %v720_v56 = vmul.f32 1.442695, %v668_v48  ;;  %v563_v59 = vmul.f32 %v15095_v44, %v505_v24  ;;  %vm631_vm1 = vcmp.gt.f32.partialorder %v15204_v16, 0.0 }
 0x202   :  { %v511_v6 = vpop.f32.mrb[25].mxu0  ;;  %v790_v53 = vsel %vm630_vm0, %v15187_v23, %v12221_v46  ;;  %v15271_v54 = vadd.f32 %v15101_v47, %v561_v50  ;;  %v15274_v52 = vadd.f32 %v15098_v45, %v562_v51  ;;  %v564_v5 = vmul.f32 %v15092_v43, %v509_v11 }
 0x203   :  { %v513_v63 = vpop.f32.mrb[26].mxu0  ;;  %v816_v1 = vpack.c.bf16 %v790_v53, %v788_v40  ;;  %14321 = vpow2.f32 %v720_v56  ;;  %v15279_v23 = vadd.f32 %v15101_v47, %v563_v59  ;;  %v565_v60 = vmul.f32 %v15095_v44, %v511_v6 }
 0x204   :  { %v515_v55 = vpop.f32.mrb[27].mxu0  ;;  %v14312_v58 = vpop.eup %14311  ;;  %v669_v12 = vmin.f32 %v15271_v54, 0.0  ;;  %v566_v13 = vmul.f32 %v15092_v43, %v513_v63  ;;  %v789_v15 = vsel %vm629_vm15, %v15184_v22, %v12220_v14  ;;  %vm632_vm2 = vcmp.gt.f32.partialorder %v15211_v62, 0.0 }
 0x205   :  { %v14314_v7 = vpop.eup %14313  ;;  %v15283_v9 = vrot.slane %v816_v1, 4  ;;  %v12222_v10 = vadd.f32 -1.0, %v14312_v58  ;;  %v670_v17 = vmin.f32 %v15274_v52, 0.0  ;;  %v1095_v18 = vrot.slane %v15276_v2, 4  ;;  %v991_v58 = vld [vmem:[#allocation2] sm:$0xf0] }
 0x206   :  { %v722_v21 = vmul.f32 1.442695, %v669_v12  ;;  %v671_v29 = vmin.f32 %v15279_v23, 0.0  ;;  %v12223_v42 = vadd.f32 -1.0, %v14314_v7  ;;  %v15303_v26 = vadd.f32 %v15098_v45, %v564_v5 }
 0x207   :  { %v15295_v19 = vsel %vm842_vm6, %v849_v25, %v15283_v9  ;;  %v791_v20 = vsel %vm631_vm1, %v15204_v16, %v12222_v10  ;;  %v724_v24 = vmul.f32 1.442695, %v670_v17  ;;  %v15306_v31 = vadd.f32 %v15101_v47, %v565_v60  ;;  %v14017_v17 = vld [vmem:[#allocation9] ss:$16 sps:$4 sm:$0xff]  }
 0x208   :  { %897 = vst [vmem:[#allocation2 + $0x30] sm:$0xff] %v15295_v19  ;;  %v817_v22 = vpack.c.bf16 %v791_v20, %v789_v15  ;;  %v14316_v30 = vpop.eup %14315  ;;  %14323 = vpow2.f32 %v722_v21  ;;  %v726_v25 = vmul.f32 1.442695, %v671_v29  ;;  %v15309_v16 = vadd.f32 %v15098_v45, %v566_v13  ;;  %v14020_v20 = vld [vmem:[#allocation9 + $0x8] ss:$16 sps:$4 sm:$0xff]  }
 0x209   :  { %v519_v27 = vpop.f32.mrb[28].mxu0  ;;  %v14318_v34 = vpop.eup %14317  ;;  %vm633_vm3 = vcmp.gt.f32.partialorder %v15225_v3, 0.0  ;;  %v12224_v36 = vadd.f32 -1.0, %v14316_v30  ;;  %14325 = vpow2.f32 %v724_v24  ;;  %vm634_vm4 = vcmp.gt.f32.partialorder %v15228_v4, 0.0  ;;  %v14028_v24 = vld [vmem:[#allocation9 + $0x2c] ss:$16 sps:$4 sm:$0xff]  }
 0x20a   :  { %v521_v32 = vpop.f32.mrb[29].mxu0  ;;  %v855_v61 = vrot.slane %v817_v22, 4  ;;  %v12225_v46 = vadd.f32 -1.0, %v14318_v34  ;;  %14327 = vpow2.f32 %v726_v25  ;;  %v672_v8 = vmin.f32 %v15303_v26, 0.0 }
 0x20b   :  { %v523_v40 = vpop.f32.mrb[30].mxu0  ;;  %v14320_v11 = vpop.eup %14319  ;;  %v792_v50 = vsel %vm632_vm2, %v15211_v62, %v12223_v42  ;;  %vm635_vm5 = vcmp.gt.f32.partialorder %v15242_v28, 0.0  ;;  %v673_v51 = vmin.f32 %v15306_v31, 0.0  ;;  %v674_v59 = vmin.f32 %v15309_v16, 0.0  ;;  %v14025_v42 = vld [vmem:[#allocation9 + $0x24] ss:$16 sps:$4 sm:$0xff]  }
 0x20c   :  { %v15314_v48 = vpop.f32.mrb[31].mxu0  ;;  %v15318_v14 = vsel %vm842_vm6, %v15254_v37, %v855_v61  ;;  %v794_v6 = vsel %vm634_vm4, %v15228_v4, %v12225_v46  ;;  %v12226_v53 = vadd.f32 -1.0, %v14320_v11  ;;  %v728_v56 = vmul.f32 1.442695, %v672_v8 }
 0x20d   :  { %898 = vst [vmem:[#allocation2 + $0x38] sm:$0xff] %v15318_v14  ;;  %v14322_v63 = vpop.eup %14321  ;;  %v793_v37 = vsel %vm633_vm3, %v15225_v3, %v12224_v36  ;;  %v818_v1 = vpack.c.bf16 %v794_v6, %v792_v50  ;;  %vm636_vm7 = vcmp.gt.f32.partialorder %v15245_v33, 0.0  ;;  %v1096_v62 = vrot.slane %v15216_v0, 4 }
 0x20e   :  { %v567_v2 = vmul.f32 %v15095_v44, %v515_v55  ;;  %v795_v5 = vsel %vm635_vm5, %v15242_v28, %v12226_v53  ;;  %14329 = vpow2.f32 %v728_v56  ;;  %v730_v4 = vmul.f32 1.442695, %v673_v51  ;;  %v14026_v51 = vld [vmem:[#allocation9 + $0x28] ss:$16 sps:$4 sm:$0xff]  }
 0x20f   :  { %v732_v60 = vmul.f32 1.442695, %v674_v59  ;;  %v15335_v7 = vrot.slane %v818_v1, 4  ;;  %v819_v10 = vpack.c.bf16 %v795_v5, %v793_v37  ;;  %vm637_vm8 = vcmp.gt.f32.partialorder %v15271_v54, 0.0  ;;  %v14031_v59 = vld [vmem:[#allocation9 + $0x44] ss:$16 sps:$4 sm:$0xff]  }
 0x210   :  { %v1097_v3 = vsel %vm842_vm6, %v1095_v18, %v1096_v62  ;;  %v12227_v12 = vadd.f32 -1.0, %v14322_v63  ;;  %v15342_v55 = vadd.f32 %v15101_v47, %v567_v2  ;;  %v1092_v28 = vrot.slane %v991_v58, 4  ;;  %v14034_v63 = vld [vmem:[#allocation9 + $0x4c] ss:$16 sps:$4 sm:$0xff]  }
 0x211   :  { %14331 = vpow2.f32 %v732_v60  ;;  %1494 = vmatprep.mubr.bf16.mxu1 %v1097_v3  ;;  %1607 = vmatprep.mubr.bf16.mxu0 %v1097_v3  ;;  %v15347_v13 = vsel %vm842_vm6, %v15283_v9, %v15335_v7  ;;  %v15349_v15 = vrot.slane %v819_v10, 4  ;;  %v1093_v21 = vrot.slane %v15208_v57, 4  ;;  %v14029_v60 = vld [vmem:[#allocation9 + $0x40] ss:$16 sps:$4 sm:$0xff]   ;;  %v14032_v10 = vld [vmem:[#allocation9 + $0x48] ss:$16 sps:$4 sm:$0xff]  }
 0x212   :  { %v568_v18 = vmul.f32 %v15092_v43, %v519_v27  ;;  %v14324_v29 = vpop.eup %14323  ;;  %899 = vst [vmem:[#allocation2 + $0x40] sm:$0xff] %v15347_v13  ;;  %14333 = vpow2.f32 %v730_v4  ;;  %v675_v22 = vmin.f32 %v15342_v55, 0.0  ;;  %v569_v30 = vmul.f32 %v15095_v44, %v521_v32 }
 0x213   :  { %v570_v9 = vmul.f32 %v15092_v43, %v523_v40  ;;  %v14326_v25 = vpop.eup %14325  ;;  %v15359_v34 = vsel %vm842_vm6, %v855_v61, %v15349_v15  ;;  %v12228_v36 = vadd.f32 -1.0, %v14324_v29  ;;  %v1094_v27 = vsel %vm842_vm6, %v1092_v28, %v1093_v21  ;;  %v14023_v43 = vld [vmem:[#allocation9 + $0x20] ss:$16 sps:$4 sm:$0xff]   ;;  %v14037_v28 = vld [vmem:[#allocation9 + $0x64] ss:$16 sps:$4 sm:$0xff]  }
 0x214   :  { %v15365_v46 = vadd.f32 %v15098_v45, %v568_v18  ;;  %v14328_v8 = vpop.eup %14327  ;;  %900 = vst [vmem:[#allocation2 + $0x48] sm:$0xff] %v15359_v34  ;;  %v12229_v11 = vadd.f32 -1.0, %v14326_v25  ;;  %v734_v32 = vmul.f32 1.442695, %v675_v22  ;;  %1495 = vmatmul.mubr.bf16.vlgmr.msra.gmra.mrb[0].mxu1 %v1094_v27  ;;  %1608 = vmatmul.mubr.bf16.vlgmr.msra.gmra.mrb[32].mxu0 %v1094_v27  ;;  %v15369_v40 = vadd.f32 %v15101_v47, %v569_v30  ;;  %v14038_v30 = vld [vmem:[#allocation9 + $0x68] ss:$16 sps:$4 sm:$0xff]  }
 0x215   :  { %v15372_v61 = vadd.f32 %v15098_v45, %v570_v9  ;;  %vm638_vm9 = vcmp.gt.f32.partialorder %v15274_v52, 0.0  ;;  %vm639_vm10 = vcmp.gt.f32.partialorder %v15279_v23, 0.0  ;;  %v12230_v50 = vadd.f32 -1.0, %v14328_v8  ;;  %2009 = vmatpush1.bf16.msra.mxu1 %v14017_v17  ;;  %2122 = vmatpush1.bf16.msra.mxu0 %v14020_v20  ;;  %v14040_v17 = vld [vmem:[#allocation9 + $0x6c] ss:$16 sps:$4 sm:$0xff]  }
 0x216   :  { %v676_v6 = vmin.f32 %v15365_v46, 0.0  ;;  %v796_v53 = vsel %vm636_vm7, %v15245_v33, %v12227_v12  ;;  %v798_v56 = vsel %vm638_vm9, %v15274_v52, %v12229_v11  ;;  %14335 = vpow2.f32 %v734_v32  ;;  %2010 = vmatprep.subr.bf16.mxu1 %v14025_v42  ;;  %2123 = vmatprep.subr.bf16.mxu0 %v14028_v24  ;;  %v14046_v27 = vld [vmem:[#allocation9 + $0x8c] ss:$16 sps:$4 sm:$0xff]  }
 0x217   :  { %v677_v45 = vmin.f32 %v15369_v40, 0.0  ;;  %v797_v37 = vsel %vm637_vm8, %v15271_v54, %v12228_v36  ;;  %v820_v1 = vpack.c.bf16 %v798_v56, %v796_v53  ;;  %v799_v2 = vsel %vm639_vm10, %v15279_v23, %v12230_v50  ;;  %v14044_v50 = vld [vmem:[#allocation9 + $0x88] ss:$16 sps:$4 sm:$0xff]  }
 0x218   :  { %v736_v58 = vmul.f32 1.442695, %v676_v6  ;;  %v14330_v33 = vpop.eup %14329  ;;  %v821_v5 = vpack.c.bf16 %v799_v2, %v797_v37  ;;  %v678_v52 = vmin.f32 %v15372_v61, 0.0  ;;  %v1100_v4 = vrot.slane %v15262_v49, 4  ;;  %v14050_v2 = vld [vmem:[#allocation9 + $0xa8] ss:$16 sps:$4 sm:$0xff]  }
 0x219   :  { %v861_v3 = vrot.slane %v820_v1, 4  ;;  %v12231_v12 = vadd.f32 -1.0, %v14330_v33  ;;  %2011 = vmatpush1.bf16.msra.mxu1 %v14023_v43  ;;  %2124 = vmatpush1.bf16.msra.mxu0 %v14026_v51  ;;  %v571_v54 = vmul.f32 %v15095_v44, %v15314_v48  ;;  %v738_v18 = vmul.f32 1.442695, %v677_v45  ;;  %v14041_v43 = vld [vmem:[#allocation9 + $0x80] ss:$16 sps:$4 sm:$0xff]  }
 0x21a   :  { %14337 = vpow2.f32 %v736_v58  ;;  %v15392_v20 = vrot.slane %v821_v5, 4  ;;  %v740_v29 = vmul.f32 1.442695, %v678_v52  ;;  %2012 = vmatprep.subr.bf16.mxu1 %v14031_v59  ;;  %2125 = vmatprep.subr.bf16.mxu0 %v14034_v63  ;;  %vm640_vm11 = vcmp.gt.f32.partialorder %v15303_v26, 0.0  ;;  %v14052_v51 = vld [vmem:[#allocation9 + $0xac] ss:$16 sps:$4 sm:$0xff]  }
 0x21b   :  { %v14332_v23 = vpop.eup %14331  ;;  %v15396_v49 = vsel %vm842_vm6, %v15335_v7, %v861_v3  ;;  %v1101_v44 = vsel %vm842_vm6, %v1096_v62, %v1100_v4  ;;  %vm642_vm12 = vcmp.gt.f32.partialorder %v15309_v16, 0.0  ;;  %v15410_v7 = vadd.f32 %v15101_v47, %v571_v54  ;;  %v14047_v1 = vld [vmem:[#allocation9 + $0xa0] ss:$16 sps:$4 sm:$0xff]   ;;  %v14055_v52 = vld [vmem:[#allocation9 + $0xc4] ss:$16 sps:$4 sm:$0xff]  }
 0x21c   :  { %v12233_v22 = vadd.f32 -1.0, %v14332_v23  ;;  %v14334_v48 = vpop.eup %14333  ;;  %901 = vst [vmem:[#allocation2 + $0x50] sm:$0xff] %v15396_v49  ;;  %v15406_v42 = vsel %vm842_vm6, %v15349_v15, %v15392_v20  ;;  %14339 = vpow2.f32 %v740_v29  ;;  %1504 = vmatprep.mubr.bf16.mxu1 %v1101_v44  ;;  %1617 = vmatprep.mubr.bf16.mxu0 %v1101_v44  ;;  %v800_v0 = vsel %vm640_vm11, %v15303_v26, %v12231_v12  ;;  %v14035_v15 = vld [vmem:[#allocation9 + $0x60] ss:$16 sps:$4 sm:$0xff]   ;;  %v14056_v54 = vld [vmem:[#allocation9 + $0xc8] ss:$16 sps:$4 sm:$0xff]  }
 0x21d   :  { %902 = vst [vmem:[#allocation2 + $0x58] sm:$0xff] %v15406_v42  ;;  %v1098_v24 = vrot.slane %v15248_v35, 4  ;;  %2013 = vmatpush1.bf16.msra.mxu1 %v14029_v60  ;;  %2126 = vmatpush1.bf16.msra.mxu0 %v14032_v10  ;;  %v1104_v9 = vrot.slane %v15318_v14, 4  ;;  %14341 = vpow2.f32 %v738_v18  ;;  %v679_v36 = vmin.f32 %v15410_v7, 0.0  ;;  %v14043_v35 = vld [vmem:[#allocation9 + $0x84] ss:$16 sps:$4 sm:$0xff]  }
 0x21e   :  { %v802_v62 = vsel %vm642_vm12, %v15309_v16, %v12233_v22  ;;  %2014 = vmatprep.subr.bf16.mxu1 %v14037_v28  ;;  %2127 = vmatprep.subr.bf16.mxu0 %v14040_v17  ;;  %v12232_v47 = vadd.f32 -1.0, %v14334_v48  ;;  %vm641_vm13 = vcmp.gt.f32.partialorder %v15306_v31, 0.0  ;;  %vm643_vm14 = vcmp.gt.f32.partialorder %v15342_v55, 0.0  ;;  %v14053_v12 = vld [vmem:[#allocation9 + $0xc0] ss:$16 sps:$4 sm:$0xff]  }
 0x21f   :  { %v822_v25 = vpack.c.bf16 %v802_v62, %v800_v0  ;;  %v1099_v26 = vsel %vm842_vm6, %v1093_v21, %v1098_v24  ;;  %v1105_v16 = vsel %vm842_vm6, %v1100_v4, %v1104_v9  ;;  %v742_v32 = vmul.f32 1.442695, %v679_v36  ;;  %v14049_v21 = vld [vmem:[#allocation9 + $0xa4] ss:$16 sps:$4 sm:$0xff]   ;;  %v14064_v23 = vld [vmem:[#allocation9 + $0xec] ss:$16 sps:$4 sm:$0xff]  }
 0x220   :  { %v14336_v8 = vpop.eup %14335  ;;  %1505 = vmatmul.mubr.bf16.gmra.mrb[4].mxu1 %v1099_v26  ;;  %1618 = vmatmul.mubr.bf16.gmra.mrb[36].mxu0 %v1099_v26  ;;  %v801_v53 = vsel %vm641_vm13, %v15306_v31, %v12232_v47  ;;  %v1102_v45 = vrot.slane %v15295_v19, 4  ;;  %v1108_v59 = vrot.slane %v15359_v34, 4  ;;  %v14058_v19 = vld [vmem:[#allocation9 + $0xcc] ss:$16 sps:$4 sm:$0xff]   ;;  %vm644_vm15 = vcmp.gt.f32.partialorder %v15365_v46, 0.0 }
 0x221   :  { %v15422_v11 = vrot.slane %v822_v25, 4  ;;  %v12234_v14 = vadd.f32 -1.0, %v14336_v8  ;;  %2015 = vmatpush1.bf16.msra.mxu1 %v14035_v15  ;;  %2128 = vmatpush1.bf16.msra.mxu0 %v14038_v30  ;;  %14343 = vpow2.f32 %v742_v32  ;;  %vm646_vm0 = vcmp.gt.f32.partialorder %v15372_v61, 0.0  ;;  %v14061_v17 = vld [vmem:[#allocation9 + $0xe4] ss:$16 sps:$4 sm:$0xff]  }
 0x222   :  { %1514 = vmatprep.mubr.bf16.mxu1 %v1105_v16  ;;  %1627 = vmatprep.mubr.bf16.mxu0 %v1105_v16  ;;  %v1109_v5 = vsel %vm842_vm6, %v1104_v9, %v1108_v59  ;;  %v1106_v18 = vrot.slane %v15347_v13, 4  ;;  %v1112_v29 = vrot.slane %v15406_v42, 4  ;;  %v14062_v48 = vld [vmem:[#allocation9 + $0xe8] ss:$16 sps:$4 sm:$0xff]   ;;  %vm645_vm1 = vcmp.gt.f32.partialorder %v15369_v40, 0.0 }
 0x223   :  { %v15427_v57 = vsel %vm842_vm6, %v861_v3, %v15422_v11  ;;  %v803_v56 = vsel %vm643_vm14, %v15342_v55, %v12234_v14  ;;  %2016 = vmatprep.subr.bf16.mxu1 %v14043_v35  ;;  %2129 = vmatprep.subr.bf16.mxu0 %v14046_v27  ;;  %v1103_v55 = vsel %vm842_vm6, %v1098_v24, %v1102_v45  ;;  %vm647_vm2 = vcmp.gt.f32.partialorder %v15410_v7, 0.0  ;;  %v14067_v30 = vld [vmem:[#allocation9 + $0x104] ss:$16 sps:$4 sm:$0xff]   ;;  %v14070_v9 = vld [vmem:[#allocation9 + $0x10c] ss:$16 sps:$4 sm:$0xff]  }
 0x224   :  { %v14338_v6 = vpop.eup %14337  ;;  %903 = vst [vmem:[#allocation2 + $0x60] sm:$0xff] %v15427_v57  ;;  %v823_v63 = vpack.c.bf16 %v803_v56, %v801_v53  ;;  %v1107_v24 = vsel %vm842_vm6, %v1102_v45, %v1106_v18  ;;  %v1113_v15 = vsel %vm842_vm6, %v1108_v59, %v1112_v29  ;;  %v14065_v36 = vld [vmem:[#allocation9 + $0x100] ss:$16 sps:$4 sm:$0xff]   ;;  %v14068_v47 = vld [vmem:[#allocation9 + $0x108] ss:$16 sps:$4 sm:$0xff]   ;;  %v1114_v56 = vrot.slane %v15427_v57, 4 }
 0x225   :  { %v12235_v37 = vadd.f32 -1.0, %v14338_v6  ;;  %2017 = vmatpush1.bf16.msra.mxu1 %v14041_v43  ;;  %2130 = vmatpush1.bf16.msra.mxu0 %v14044_v50  ;;  %v14073_v16 = vld [vmem:[#allocation9 + $0x124] ss:$16 sps:$4 sm:$0xff]   ;;  %v14071_v8 = vld [vmem:[#allocation9 + $0x120] ss:$16 sps:$4 sm:$0xff]  }
 0x226   :  { %v14340_v58 = vpop.eup %14339  ;;  %v15435_v33 = vrot.slane %v823_v63, 4  ;;  %2018 = vmatprep.subr.bf16.mxu1 %v14049_v21  ;;  %2131 = vmatprep.subr.bf16.mxu0 %v14052_v51  ;;  %v14079_v43 = vld [vmem:[#allocation9 + $0x144] ss:$16 sps:$4 sm:$0xff]   ;;  %v14082_v50 = vld [vmem:[#allocation9 + $0x14c] ss:$16 sps:$4 sm:$0xff]  }
 0x227   :  { %v12237_v31 = vadd.f32 -1.0, %v14340_v58  ;;  %v14342_v4 = vpop.eup %14341  ;;  %v804_v10 = vsel %vm644_vm15, %v15365_v46, %v12235_v37  ;;  %v14077_v21 = vld [vmem:[#allocation9 + $0x140] ss:$16 sps:$4 sm:$0xff]   ;;  %v14080_v51 = vld [vmem:[#allocation9 + $0x148] ss:$16 sps:$4 sm:$0xff]  }
 0x228   :  { %v15442_v60 = vsel %vm842_vm6, %v15392_v20, %v15435_v33  ;;  %1515 = vmatmul.mubr.bf16.gmra.mrb[8].mxu1 %v1103_v55  ;;  %1628 = vmatmul.mubr.bf16.gmra.mrb[40].mxu0 %v1103_v55  ;;  %v12236_v20 = vadd.f32 -1.0, %v14342_v4  ;;  %v14085_v6 = vld [vmem:[#allocation9 + $0x164] ss:$16 sps:$4 sm:$0xff]   ;;  %v14088_v53 = vld [vmem:[#allocation9 + $0x16c] ss:$16 sps:$4 sm:$0xff]  }
 0x229   :  { %v806_v3 = vsel %vm646_vm0, %v15372_v61, %v12237_v31  ;;  %2019 = vmatpush1.bf16.msra.mxu1 %v14047_v1  ;;  %2132 = vmatpush1.bf16.msra.mxu0 %v14050_v2  ;;  %v14059_v61 = vld [vmem:[#allocation9 + $0xe0] ss:$16 sps:$4 sm:$0xff]   ;;  %v1116_v35 = vrot.slane %v15442_v60, 4  ;;  %v14086_v63 = vld [vmem:[#allocation9 + $0x168] ss:$16 sps:$4 sm:$0xff]  }
 0x22a   :  { %v824_v28 = vpack.c.bf16 %v806_v3, %v804_v10  ;;  %1524 = vmatprep.mubr.bf16.mxu1 %v1109_v5  ;;  %1637 = vmatprep.mubr.bf16.mxu0 %v1109_v5  ;;  %v805_v13 = vsel %vm645_vm1, %v15369_v40, %v12236_v20  ;;  %v14076_v40 = vld [vmem:[#allocation9 + $0x12c] ss:$16 sps:$4 sm:$0xff]   ;;  %v14083_v59 = vld [vmem:[#allocation9 + $0x160] ss:$16 sps:$4 sm:$0xff]   ;;  %v14091_v2 = vld [vmem:[#allocation9 + $0x184] ss:$16 sps:$4 sm:$0xff]  }
 0x22b   :  { %2020 = vmatprep.subr.bf16.mxu1 %v14055_v52  ;;  %2133 = vmatprep.subr.bf16.mxu0 %v14058_v19  ;;  %v14344_v22 = vpop.eup %14343  ;;  %v1117_v14 = vsel %vm842_vm6, %v1112_v29, %v1116_v35  ;;  %v14094_v58 = vld [vmem:[#allocation9 + $0x18c] ss:$16 sps:$4 sm:$0xff]   ;;  %v14089_v31 = vld [vmem:[#allocation9 + $0x180] ss:$16 sps:$4 sm:$0xff]   ;;  %v14092_v55 = vld [vmem:[#allocation9 + $0x188] ss:$16 sps:$4 sm:$0xff]  }
 0x22c   :  { %v869_v46 = vrot.slane %v824_v28, 4  ;;  %v12238_v44 = vadd.f32 -1.0, %v14344_v22  ;;  %v14097_v52 = vld [vmem:[#allocation9 + $0x1a4] ss:$16 sps:$4 sm:$0xff]   ;;  %v14100_v19 = vld [vmem:[#allocation9 + $0x1ac] ss:$16 sps:$4 sm:$0xff]  }
 0x22d   :  { %2021 = vmatpush1.bf16.msra.mxu1 %v14053_v12  ;;  %2134 = vmatpush1.bf16.msra.mxu0 %v14056_v54  ;;  %v14095_v3 = vld [vmem:[#allocation9 + $0x1a0] ss:$16 sps:$4 sm:$0xff]   ;;  %v14098_v12 = vld [vmem:[#allocation9 + $0x1a8] ss:$16 sps:$4 sm:$0xff]   ;;  %v14103_v28 = vld [vmem:[#allocation9 + $0x1c4] ss:$16 sps:$4 sm:$0xff]  }
 0x22e   :  { %v15453_v0 = vsel %vm842_vm6, %v15422_v11, %v869_v46  ;;  %907 = vst [vmem:[#allocation2 + $0x80] sm:$0xf] %v869_v46  ;;  %2022 = vmatprep.subr.bf16.mxu1 %v14061_v17  ;;  %2135 = vmatprep.subr.bf16.mxu0 %v14064_v23  ;;  %v807_v62 = vsel %vm647_vm2, %v15410_v7, %v12238_v44  ;;  %v1110_v7 = vrot.slane %v15396_v49, 4  ;;  %v14074_v11 = vld [vmem:[#allocation9 + $0x128] ss:$16 sps:$4 sm:$0xff]  }
 0x22f   :  { %v825_v25 = vpack.c.bf16 %v807_v62, %v805_v13  ;;  %v1118_v4 = vrot.slane %v15453_v0, 4  ;;  %v14106_v17 = vld [vmem:[#allocation9 + $0x1cc] ss:$16 sps:$4 sm:$0xff]   ;;  %v14101_v20 = vld [vmem:[#allocation9 + $0x1c0] ss:$16 sps:$4 sm:$0xff]  }
 0x230   :  { %1525 = vmatmul.mubr.bf16.gmra.mrb[12].mxu1 %v1107_v24  ;;  %1638 = vmatmul.mubr.bf16.gmra.mrb[44].mxu0 %v1107_v24  ;;  %v1111_v32 = vsel %vm842_vm6, %v1106_v18, %v1110_v7  ;;  %v1115_v37 = vsel %vm842_vm6, %v1110_v7, %v1114_v56  ;;  %v14104_v18 = vld [vmem:[#allocation9 + $0x1c8] ss:$16 sps:$4 sm:$0xff]   ;;  %v14109_v22 = vld [vmem:[#allocation9 + $0x1e4] ss:$16 sps:$4 sm:$0xff]   ;;  %v14112_v46 = vld [vmem:[#allocation9 + $0x1ec] ss:$16 sps:$4 sm:$0xff]  }
 0x231   :  { %2023 = vmatpush1.bf16.msra.mxu1 %v14059_v61  ;;  %2136 = vmatpush1.bf16.msra.mxu0 %v14062_v48  ;;  %v871_v26 = vrot.slane %v825_v25, 4  ;;  %v1119_v54 = vsel %vm842_vm6, %v1114_v56, %v1118_v4  ;;  %v14107_v44 = vld [vmem:[#allocation9 + $0x1e0] ss:$16 sps:$4 sm:$0xff]   ;;  %v14110_v61 = vld [vmem:[#allocation9 + $0x1e8] ss:$16 sps:$4 sm:$0xff]  }
 0x232   :  { %1534 = vmatprep.mubr.bf16.mxu1 %v1113_v15  ;;  %1647 = vmatprep.mubr.bf16.mxu0 %v1113_v15  ;;  %v14115_v13 = vld [vmem:[#allocation9 + $0x404] ss:$16 sps:$4 sm:$0xff]   ;;  %v14118_v62 = vld [vmem:[#allocation9 + $0x40c] ss:$16 sps:$4 sm:$0xff]   ;;  %v14113_v15 = vld [vmem:[#allocation9 + $0x400] ss:$16 sps:$4 sm:$0xff]  }
 0x233   :  { %2024 = vmatprep.subr.bf16.mxu1 %v14067_v30  ;;  %2137 = vmatprep.subr.bf16.mxu0 %v14070_v9  ;;  %v15464_v27 = vsel %vm842_vm6, %v15435_v33, %v871_v26  ;;  %908 = vst [vmem:[#allocation2 + $0x88] sm:$0xf] %v871_v26  ;;  %v912_v24 = vld [vmem:[#allocation2 + $0x8] sm:$0xff]  ;;  %v911_v9 = vld [vmem:[#allocation2] sm:$0xff] }
 0x234   :  { %v1120_v45 = vrot.slane %v15464_v27, 4  ;;  %v14116_v30 = vld [vmem:[#allocation9 + $0x408] ss:$16 sps:$4 sm:$0xff]   ;;  %v14121_v25 = vld [vmem:[#allocation9 + $0x424] ss:$16 sps:$4 sm:$0xff]  }
 0x235   :  { %2025 = vmatpush1.bf16.msra.mxu1 %v14065_v36  ;;  %2138 = vmatpush1.bf16.msra.mxu0 %v14068_v47  ;;  %v1007_v23 = vld [vmem:[#allocation2 + $0x80] sm:$0xf]  ;;  %v914_v47 = vld [vmem:[#allocation2 + $0x18] sm:$0xff]  ;;  %v14119_v26 = vld [vmem:[#allocation9 + $0x420] ss:$16 sps:$4 sm:$0xff]  }
 0x236   :  { %2026 = vmatprep.subr.bf16.mxu1 %v14073_v16  ;;  %2139 = vmatprep.subr.bf16.mxu0 %v14076_v40  ;;  %v1121_v1 = vsel %vm842_vm6, %v1116_v35, %v1120_v45  ;;  %v1122_v29 = vrot.slane %v1007_v23, 4  ;;  %v14124_v36 = vld [vmem:[#allocation9 + $0x42c] ss:$16 sps:$4 sm:$0xff]   ;;  %v14122_v16 = vld [vmem:[#allocation9 + $0x428] ss:$16 sps:$4 sm:$0xff]  }
 0x237   :  { %v14127_v40 = vld [vmem:[#allocation9 + $0x444] ss:$16 sps:$4 sm:$0xff]   ;;  %v14130_v7 = vld [vmem:[#allocation9 + $0x44c] ss:$16 sps:$4 sm:$0xff]   ;;  %v14125_v35 = vld [vmem:[#allocation9 + $0x440] ss:$16 sps:$4 sm:$0xff]  }
 0x238   :  { %1535 = vmatmul.mubr.bf16.gmra.mrb[16].mxu1 %v1111_v32  ;;  %1648 = vmatmul.mubr.bf16.gmra.mrb[48].mxu0 %v1111_v32  ;;  %v1123_v48 = vsel %vm842_vm6, %v1118_v4, %v1122_v29  ;;  %v14133_v32 = vld [vmem:[#allocation9 + $0x464] ss:$16 sps:$4 sm:$0xff]   ;;  %v14140_v56 = vld [vmem:[#allocation9 + $0x488] ss:$16 sps:$4 sm:$0xff]   ;;  %v919_v23 = vld [vmem:[#allocation2 + $0x40] sm:$0xff] }
 0x239   :  { %2027 = vmatpush1.bf16.msra.mxu1 %v14071_v8  ;;  %2140 = vmatpush1.bf16.msra.mxu0 %v14074_v11  ;;  %v14128_v8 = vld [vmem:[#allocation9 + $0x448] ss:$16 sps:$4 sm:$0xff]   ;;  %v913_v11 = vld [vmem:[#allocation2 + $0x10] sm:$0xff] }
 0x23a   :  { %1544 = vmatprep.mubr.bf16.mxu1 %v1117_v14  ;;  %1657 = vmatprep.mubr.bf16.mxu0 %v1117_v14  ;;  %v1008_v33 = vld [vmem:[#allocation2 + $0x88] sm:$0xf]  ;;  %v14136_v14 = vld [vmem:[#allocation9 + $0x46c] ss:$16 sps:$4 sm:$0xff]   ;;  %v922_v29 = vld [vmem:[#allocation2 + $0x58] sm:$0xff] }
 0x23b   :  { %2028 = vmatprep.subr.bf16.mxu1 %v14079_v43  ;;  %2141 = vmatprep.subr.bf16.mxu0 %v14082_v50  ;;  %v1124_v5 = vrot.slane %v1008_v33, 4  ;;  %v916_v43 = vld [vmem:[#allocation2 + $0x28] sm:$0xff]  ;;  %v14131_v50 = vld [vmem:[#allocation9 + $0x460] ss:$16 sps:$4 sm:$0xff]   ;;  %v14154_v33 = vld [vmem:[#allocation9 + $0x4cc] ss:$16 sps:$4 sm:$0xff]  }
 0x23c   :  { %v920_v4 = vld [vmem:[#allocation2 + $0x48] sm:$0xff] }
 0x23d   :  { %2029 = vmatpush1.bf16.msra.mxu1 %v14077_v21  ;;  %2142 = vmatpush1.bf16.msra.mxu0 %v14080_v51  ;;  %v1125_v10 = vsel %vm842_vm6, %v1120_v45, %v1124_v5  ;;  %v14134_v21 = vld [vmem:[#allocation9 + $0x468] ss:$16 sps:$4 sm:$0xff]   ;;  %v14139_v51 = vld [vmem:[#allocation9 + $0x484] ss:$16 sps:$4 sm:$0xff]   ;;  %v915_v45 = vld [vmem:[#allocation2 + $0x20] sm:$0xff] }
 0x23e   :  { %2030 = vmatprep.subr.bf16.mxu1 %v14085_v6  ;;  %2143 = vmatprep.subr.bf16.mxu0 %v14088_v53  ;;  %v14142_v6 = vld [vmem:[#allocation9 + $0x48c] ss:$16 sps:$4 sm:$0xff]   ;;  %v14137_v53 = vld [vmem:[#allocation9 + $0x480] ss:$16 sps:$4 sm:$0xff]  }
 0x23f   :  { %v917_v5 = vld [vmem:[#allocation2 + $0x30] sm:$0xff] }
 0x240   :  { %1545 = vmatmul.mubr.bf16.gmra.mrb[20].mxu1 %v1115_v37  ;;  %1658 = vmatmul.mubr.bf16.gmra.mrb[52].mxu0 %v1115_v37  ;;  %v918_v37 = vld [vmem:[#allocation2 + $0x38] sm:$0xff] }
 0x241   :  { %2031 = vmatpush1.bf16.msra.mxu1 %v14083_v59  ;;  %2144 = vmatpush1.bf16.msra.mxu0 %v14086_v63  ;;  %v14145_v59 = vld [vmem:[#allocation9 + $0x4a4] ss:$16 sps:$4 sm:$0xff]   ;;  %v14148_v63 = vld [vmem:[#allocation9 + $0x4ac] ss:$16 sps:$4 sm:$0xff]  }
 0x242   :  { %1554 = vmatprep.mubr.bf16.mxu1 %v1121_v1  ;;  %1667 = vmatprep.mubr.bf16.mxu0 %v1121_v1  ;;  %v14143_v1 = vld [vmem:[#allocation9 + $0x4a0] ss:$16 sps:$4 sm:$0xff]  }
 0x243   :  { %2032 = vmatprep.subr.bf16.mxu1 %v14091_v2  ;;  %2145 = vmatprep.subr.bf16.mxu0 %v14094_v58  ;;  %v14146_v2 = vld [vmem:[#allocation9 + $0x4a8] ss:$16 sps:$4 sm:$0xff]   ;;  %v14151_v58 = vld [vmem:[#allocation9 + $0x4c4] ss:$16 sps:$4 sm:$0xff]  }
 0x245   :  { %2033 = vmatpush1.bf16.msra.mxu1 %v14089_v31  ;;  %2146 = vmatpush1.bf16.msra.mxu0 %v14092_v55  ;;  %v14149_v31 = vld [vmem:[#allocation9 + $0x4c0] ss:$16 sps:$4 sm:$0xff]   ;;  %v14152_v55 = vld [vmem:[#allocation9 + $0x4c8] ss:$16 sps:$4 sm:$0xff]  }
 0x246   :  { %2034 = vmatprep.subr.bf16.mxu1 %v14097_v52  ;;  %2147 = vmatprep.subr.bf16.mxu0 %v14100_v19  ;;  %v14157_v52 = vld [vmem:[#allocation9 + $0x4e4] ss:$16 sps:$4 sm:$0xff]   ;;  %v14160_v19 = vld [vmem:[#allocation9 + $0x4ec] ss:$16 sps:$4 sm:$0xff]  }
 0x248   :  { %1555 = vmatmul.mubr.bf16.gmra.mrb[24].mxu1 %v1119_v54  ;;  %1668 = vmatmul.mubr.bf16.gmra.mrb[56].mxu0 %v1119_v54  ;;  %v14166_v54 = vld [vmem:[#allocation9 + $0x50c] ss:$16 sps:$4 sm:$0xff]  }
 0x249   :  { %1564 = vmatprep.mubr.bf16.mxu1 %v1125_v10  ;;  %1677 = vmatprep.mubr.bf16.mxu0 %v1125_v10  ;;  %v14155_v10 = vld [vmem:[#allocation9 + $0x4e0] ss:$16 sps:$4 sm:$0xff]  }
 0x24a   :  { %2035 = vmatpush1.bf16.msra.mxu1 %v14095_v3  ;;  %2148 = vmatpush1.bf16.msra.mxu0 %v14098_v12  ;;  %v14158_v3 = vld [vmem:[#allocation9 + $0x4e8] ss:$16 sps:$4 sm:$0xff]   ;;  %v14163_v12 = vld [vmem:[#allocation9 + $0x504] ss:$16 sps:$4 sm:$0xff]  }
 0x24b   :  { %2036 = vmatprep.subr.bf16.mxu1 %v14103_v28  ;;  %2149 = vmatprep.subr.bf16.mxu0 %v14106_v17  ;;  %v14161_v28 = vld [vmem:[#allocation9 + $0x500] ss:$16 sps:$4 sm:$0xff]   ;;  %v14164_v17 = vld [vmem:[#allocation9 + $0x508] ss:$16 sps:$4 sm:$0xff]  }
 0x24e   :  { %2037 = vmatpush1.bf16.msra.mxu1 %v14101_v20  ;;  %2150 = vmatpush1.bf16.msra.mxu0 %v14104_v18  ;;  %v14169_v20 = vld [vmem:[#allocation9 + $0x524] ss:$16 sps:$4 sm:$0xff]   ;;  %v14172_v18 = vld [vmem:[#allocation9 + $0x52c] ss:$16 sps:$4 sm:$0xff]  }
 0x24f   :  { %2038 = vmatprep.subr.bf16.mxu1 %v14109_v22  ;;  %2151 = vmatprep.subr.bf16.mxu0 %v14112_v46  ;;  %v14167_v22 = vld [vmem:[#allocation9 + $0x520] ss:$16 sps:$4 sm:$0xff]   ;;  %v14170_v46 = vld [vmem:[#allocation9 + $0x528] ss:$16 sps:$4 sm:$0xff]  }
 0x250   :  { %1565 = vmatmul.mubr.bf16.gmra.mrb[28].mxu1 %v1123_v48  ;;  %1678 = vmatmul.mubr.bf16.gmra.mrb[60].mxu0 %v1123_v48  ;;  %v14173_v48 = vld [vmem:[#allocation9 + $0x540] ss:$16 sps:$4 sm:$0xff]  }
 0x251   :  { %2040 = vmatprep.mubr.bf16.mxu1 %v912_v24  ;;  %2153 = vmatprep.mubr.bf16.mxu0 %v912_v24  ;;  %v14181_v24 = vld [vmem:[#allocation9 + $0x564] ss:$16 sps:$4 sm:$0xff]  }
 0x252   :  { %2039 = vmatpush1.bf16.msra.mxu1 %v14107_v44  ;;  %2152 = vmatpush1.bf16.msra.mxu0 %v14110_v61  ;;  %v14175_v44 = vld [vmem:[#allocation9 + $0x544] ss:$16 sps:$4 sm:$0xff]   ;;  %v14178_v61 = vld [vmem:[#allocation9 + $0x54c] ss:$16 sps:$4 sm:$0xff]  }
 0x253   :  { %2621 = vmatprep.subr.bf16.mxu1 %v14115_v13  ;;  %2734 = vmatprep.subr.bf16.mxu0 %v14118_v62  ;;  %v14176_v13 = vld [vmem:[#allocation9 + $0x548] ss:$16 sps:$4 sm:$0xff]   ;;  %v921_v62 = vld [vmem:[#allocation2 + $0x50] sm:$0xff] }
 0x258   :  { %2041 = vmatmul.mubr.bf16.vlgmr.msra.gmra.mrb[0].mxu1 %v911_v9  ;;  %2154 = vmatmul.mubr.bf16.vlgmr.msra.gmra.mrb[32].mxu0 %v911_v9  ;;  %v14182_v9 = vld [vmem:[#allocation9 + $0x568] ss:$16 sps:$4 sm:$0xff]  }
 0x259   :  { %2622 = vmatpush1.bf16.msra.mxu1 %v14113_v15  ;;  %2735 = vmatpush1.bf16.msra.mxu0 %v14116_v30  ;;  %v14184_v15 = vld [vmem:[#allocation9 + $0x56c] ss:$16 sps:$4 sm:$0xff]   ;;  %v14179_v30 = vld [vmem:[#allocation9 + $0x560] ss:$16 sps:$4 sm:$0xff]  }
 0x25a   :  { %2050 = vmatprep.mubr.bf16.mxu1 %v914_v47  ;;  %2163 = vmatprep.mubr.bf16.mxu0 %v914_v47  ;;  %v14185_v47 = vld [vmem:[#allocation9 + $0x580] ss:$16 sps:$4 sm:$0xff]  }
 0x25b   :  { %2623 = vmatprep.subr.bf16.mxu1 %v14121_v25  ;;  %2736 = vmatprep.subr.bf16.mxu0 %v14124_v36  ;;  %v14187_v25 = vld [vmem:[#allocation9 + $0x584] ss:$16 sps:$4 sm:$0xff]   ;;  %v14190_v36 = vld [vmem:[#allocation9 + $0x58c] ss:$16 sps:$4 sm:$0xff]  }
 0x25d   :  { %2624 = vmatpush1.bf16.msra.mxu1 %v14119_v26  ;;  %2737 = vmatpush1.bf16.msra.mxu0 %v14122_v16  ;;  %v14188_v26 = vld [vmem:[#allocation9 + $0x588] ss:$16 sps:$4 sm:$0xff]   ;;  %v923_v16 = vld [vmem:[#allocation2 + $0x60] sm:$0xff] }
 0x25e   :  { %2625 = vmatprep.subr.bf16.mxu1 %v14127_v40  ;;  %2738 = vmatprep.subr.bf16.mxu0 %v14130_v7  ;;  %v14193_v40 = vld [vmem:[#allocation9 + $0x5a4] ss:$16 sps:$4 sm:$0xff]   ;;  %v14196_v7 = vld [vmem:[#allocation9 + $0x5ac] ss:$16 sps:$4 sm:$0xff]  }
 0x260   :  { %2051 = vmatmul.mubr.bf16.gmra.mrb[4].mxu1 %v913_v11  ;;  %2164 = vmatmul.mubr.bf16.gmra.mrb[36].mxu0 %v913_v11  ;;  %v14199_v11 = vld [vmem:[#allocation9 + $0x5c4] ss:$16 sps:$4 sm:$0xff]  }
 0x261   :  { %2626 = vmatpush1.bf16.msra.mxu1 %v14125_v35  ;;  %2739 = vmatpush1.bf16.msra.mxu0 %v14128_v8  ;;  %v14191_v35 = vld [vmem:[#allocation9 + $0x5a0] ss:$16 sps:$4 sm:$0xff]   ;;  %v14194_v8 = vld [vmem:[#allocation9 + $0x5a8] ss:$16 sps:$4 sm:$0xff]  }
 0x262   :  { %2060 = vmatprep.mubr.bf16.mxu1 %v916_v43  ;;  %2173 = vmatprep.mubr.bf16.mxu0 %v916_v43  ;;  %v14200_v43 = vld [vmem:[#allocation9 + $0x5c8] ss:$16 sps:$4 sm:$0xff]  }
 0x263   :  { %2627 = vmatprep.subr.bf16.mxu1 %v14133_v32  ;;  %2740 = vmatprep.subr.bf16.mxu0 %v14136_v14  ;;  %v14202_v32 = vld [vmem:[#allocation9 + $0x5cc] ss:$16 sps:$4 sm:$0xff]   ;;  %v14197_v14 = vld [vmem:[#allocation9 + $0x5c0] ss:$16 sps:$4 sm:$0xff]  }
 0x265   :  { %2628 = vmatpush1.bf16.msra.mxu1 %v14131_v50  ;;  %2741 = vmatpush1.bf16.msra.mxu0 %v14134_v21  ;;  %v14205_v50 = vld [vmem:[#allocation9 + $0x5e4] ss:$16 sps:$4 sm:$0xff]   ;;  %v14208_v21 = vld [vmem:[#allocation9 + $0x5ec] ss:$16 sps:$4 sm:$0xff]  }
 0x266   :  { %2629 = vmatprep.subr.bf16.mxu1 %v14139_v51  ;;  %2742 = vmatprep.subr.bf16.mxu0 %v14142_v6  ;;  %v3712_v51 = vld [vmem:[#allocation14 + $0x400] sm:$0xff] }
 0x267   :  { %v3716_v6 = vld [vmem:[#allocation14 + $0x420] sm:$0xff] }
 0x268   :  { %2061 = vmatmul.mubr.bf16.gmra.mrb[8].mxu1 %v915_v45  ;;  %2174 = vmatmul.mubr.bf16.gmra.mrb[40].mxu0 %v915_v45  ;;  %v14203_v45 = vld [vmem:[#allocation9 + $0x5e0] ss:$16 sps:$4 sm:$0xff]  }
 0x269   :  { %2630 = vmatpush1.bf16.msra.mxu1 %v14137_v53  ;;  %2743 = vmatpush1.bf16.msra.mxu0 %v14140_v56  ;;  %v3713_v53 = vld [vmem:[#allocation14 + $0x408] sm:$0xff] }
 0x26a   :  { %2070 = vmatprep.mubr.bf16.mxu1 %v918_v37  ;;  %2183 = vmatprep.mubr.bf16.mxu0 %v918_v37  ;;  %v3717_v56 = vld [vmem:[#allocation14 + $0x428] sm:$0xff]  ;;  %v12496_v37 = vcombine.high %v3712_v51, %v3716_v6 }
 0x26b   :  { %2631 = vmatprep.subr.bf16.mxu1 %v14145_v59  ;;  %2744 = vmatprep.subr.bf16.mxu0 %v14148_v63  ;;  %v14206_v59 = vld [vmem:[#allocation9 + $0x5e8] ss:$16 sps:$4 sm:$0xff]  }
 0x26c   :  { %v14491_v63 = vld [vmem:[#allocation2 + $0x18] sm:$0xff] }
 0x26d   :  { %2632 = vmatpush1.bf16.msra.mxu1 %v14143_v1  ;;  %2745 = vmatpush1.bf16.msra.mxu0 %v14146_v2  ;;  %v12498_v1 = vcombine.high %v3713_v53, %v3717_v56  ;;  %v3720_v2 = vld [vmem:[#allocation14 + $0x440] sm:$0xff] }
 0x26e   :  { %2633 = vmatprep.subr.bf16.mxu1 %v14151_v58  ;;  %2746 = vmatprep.subr.bf16.mxu0 %v14154_v33  ;;  %v3724_v58 = vld [vmem:[#allocation14 + $0x460] sm:$0xff]  ;;  %v3721_v33 = vld [vmem:[#allocation14 + $0x448] sm:$0xff] }
 0x270   :  { %2071 = vmatmul.mubr.bf16.gmra.mrb[12].mxu1 %v917_v5  ;;  %2184 = vmatmul.mubr.bf16.gmra.mrb[44].mxu0 %v917_v5  ;;  %v12497_v5 = vcombine.low %v3713_v53, %v3717_v56  ;;  %v3765_v53 = vld [vmem:[#allocation14 + $0x5a8] sm:$0xff] }
 0x271   :  { %2634 = vmatpush1.bf16.msra.mxu1 %v14149_v31  ;;  %2747 = vmatpush1.bf16.msra.mxu0 %v14152_v55  ;;  %v3725_v31 = vld [vmem:[#allocation14 + $0x468] sm:$0xff]  ;;  %v12495_v55 = vcombine.low %v3712_v51, %v3716_v6 }
 0x272   :  { %2080 = vmatprep.mubr.bf16.mxu1 %v920_v4  ;;  %2193 = vmatprep.mubr.bf16.mxu0 %v920_v4  ;;  %v3728_v4 = vld [vmem:[#allocation14 + $0x480] sm:$0xff]  ;;  %v3761_v51 = vld [vmem:[#allocation14 + $0x588] sm:$0xff] }
 0x273   :  { %2635 = vmatprep.subr.bf16.mxu1 %v14157_v52  ;;  %2748 = vmatprep.subr.bf16.mxu0 %v14160_v19  ;;  %v12504_v52 = vcombine.high %v3720_v2, %v3724_v58  ;;  %v12506_v19 = vcombine.high %v3721_v33, %v3725_v31 }
 0x275   :  { %2636 = vmatpush1.bf16.msra.mxu1 %v14155_v10  ;;  %2749 = vmatpush1.bf16.msra.mxu0 %v14158_v3  ;;  %v14492_v10 = vld [vmem:[#allocation2 + $0x10] sm:$0xff] }
 0x276   :  { %2637 = vmatprep.subr.bf16.mxu1 %v14163_v12  ;;  %2750 = vmatprep.subr.bf16.mxu0 %v14166_v54  ;;  %v3732_v3 = vld [vmem:[#allocation14 + $0x4a0] sm:$0xff]  ;;  %v3729_v12 = vld [vmem:[#allocation14 + $0x488] sm:$0xff] }
 0x277   :  { %v3733_v54 = vld [vmem:[#allocation14 + $0x4a8] sm:$0xff] }
 0x278   :  { %2081 = vmatmul.mubr.bf16.gmra.mrb[16].mxu1 %v919_v23  ;;  %2194 = vmatmul.mubr.bf16.gmra.mrb[48].mxu0 %v919_v23  ;;  %v12505_v23 = vcombine.low %v3721_v33, %v3725_v31 }
 0x279   :  { %2638 = vmatpush1.bf16.msra.mxu1 %v14161_v28  ;;  %2751 = vmatpush1.bf16.msra.mxu0 %v14164_v17  ;;  %v14493_v28 = vld [vmem:[#allocation2 + $0x28] sm:$0xff]  ;;  %v12503_v17 = vcombine.low %v3720_v2, %v3724_v58  ;;  %v3773_v58 = vld [vmem:[#allocation14 + $0x5e8] sm:$0xff] }
 0x27a   :  { %2090 = vmatprep.mubr.bf16.mxu1 %v922_v29  ;;  %2203 = vmatprep.mubr.bf16.mxu0 %v922_v29  ;;  %v3736_v29 = vld [vmem:[#allocation14 + $0x4c0] sm:$0xff] }
 0x27b   :  { %2639 = vmatprep.subr.bf16.mxu1 %v14169_v20  ;;  %2752 = vmatprep.subr.bf16.mxu0 %v14172_v18  ;;  %v12512_v20 = vcombine.high %v3728_v4, %v3732_v3  ;;  %v12514_v18 = vcombine.high %v3729_v12, %v3733_v54 }
 0x27d   :  { %2640 = vmatpush1.bf16.msra.mxu1 %v14167_v22  ;;  %2753 = vmatpush1.bf16.msra.mxu0 %v14170_v46  ;;  %v3740_v22 = vld [vmem:[#allocation14 + $0x4e0] sm:$0xff]  ;;  %v3737_v46 = vld [vmem:[#allocation14 + $0x4c8] sm:$0xff] }
 0x27e   :  { %2641 = vmatprep.subr.bf16.mxu1 %v14175_v44  ;;  %2754 = vmatprep.subr.bf16.mxu0 %v14178_v61  ;;  %v3741_v44 = vld [vmem:[#allocation14 + $0x4e8] sm:$0xff]  ;;  %v12511_v61 = vcombine.low %v3728_v4, %v3732_v3 }
 0x280   :  { %2091 = vmatmul.mubr.bf16.gmra.mrb[20].mxu1 %v921_v62  ;;  %2204 = vmatmul.mubr.bf16.gmra.mrb[52].mxu0 %v921_v62  ;;  %v12522_v62 = vcombine.high %v3737_v46, %v3741_v44 }
 0x281   :  { %2642 = vmatpush1.bf16.msra.mxu1 %v14173_v48  ;;  %2755 = vmatpush1.bf16.msra.mxu0 %v14176_v13  ;;  %v12513_v48 = vcombine.low %v3729_v12, %v3733_v54  ;;  %v12520_v13 = vcombine.high %v3736_v29, %v3740_v22 }
 0x282   :  { %2100 = vmatprep.mubr.bf16.mxu1 %v15442_v60  ;;  %2213 = vmatprep.mubr.bf16.mxu0 %v15442_v60 }
 0x283   :  { %2643 = vmatprep.subr.bf16.mxu1 %v14181_v24  ;;  %2756 = vmatprep.subr.bf16.mxu0 %v14184_v15  ;;  %v14494_v24 = vld [vmem:[#allocation2 + $0x20] sm:$0xff]  ;;  %v14495_v15 = vld [vmem:[#allocation2 + $0x38] sm:$0xff] }
 0x285   :  { %2644 = vmatpush1.bf16.msra.mxu1 %v14179_v30  ;;  %2757 = vmatpush1.bf16.msra.mxu0 %v14182_v9  ;;  %v12519_v30 = vcombine.low %v3736_v29, %v3740_v22  ;;  %v12521_v9 = vcombine.low %v3737_v46, %v3741_v44  ;;  %v3792_v44 = vld [vmem:[#allocation14 + $0x680] sm:$0xff] }
 0x286   :  { %2645 = vmatprep.subr.bf16.mxu1 %v14187_v25  ;;  %2758 = vmatprep.subr.bf16.mxu0 %v14190_v36  ;;  %v14496_v25 = vld [vmem:[#allocation2 + $0x30] sm:$0xff]  ;;  %v14497_v36 = vld [vmem:[#allocation2 + $0x40] sm:$0xff] }
 0x288   :  { %2101 = vmatmul.mubr.bf16.gmra.mrb[24].mxu1 %v923_v16  ;;  %2214 = vmatmul.mubr.bf16.gmra.mrb[56].mxu0 %v923_v16  ;;  %v3749_v16 = vld [vmem:[#allocation14 + $0x528] sm:$0xff] }
 0x289   :  { %2646 = vmatpush1.bf16.msra.mxu1 %v14185_v47  ;;  %2759 = vmatpush1.bf16.msra.mxu0 %v14188_v26  ;;  %v3745_v47 = vld [vmem:[#allocation14 + $0x508] sm:$0xff] }
 0x28a   :  { %2110 = vmatprep.mubr.bf16.mxu1 %v15464_v27  ;;  %2223 = vmatprep.mubr.bf16.mxu0 %v15464_v27 }
 0x28b   :  { %2647 = vmatprep.subr.bf16.mxu1 %v14193_v40  ;;  %2760 = vmatprep.subr.bf16.mxu0 %v14196_v7  ;;  %v12529_v40 = vcombine.low %v3745_v47, %v3749_v16  ;;  %v12530_v7 = vcombine.high %v3745_v47, %v3749_v16  ;;  %v3812_v16 = vld [vmem:[#allocation14 + $0x720] sm:$0xff] }
 0x28d   :  { %2648 = vmatpush1.bf16.msra.mxu1 %v14191_v35  ;;  %2761 = vmatpush1.bf16.msra.mxu0 %v14194_v8  ;;  %v3756_v35 = vld [vmem:[#allocation14 + $0x560] sm:$0xff] }
 0x28e   :  { %2649 = vmatprep.subr.bf16.mxu1 %v14199_v11  ;;  %2762 = vmatprep.subr.bf16.mxu0 %v14202_v32  ;;  %v3757_v11 = vld [vmem:[#allocation14 + $0x568] sm:$0xff] }
 0x290   :  { %2111 = vmatmul.mubr.bf16.gmra.mrb[28].mxu1 %v15453_v0  ;;  %2224 = vmatmul.mubr.bf16.gmra.mrb[60].mxu0 %v15453_v0 }
 0x291   :  { %2650 = vmatpush1.bf16.msra.mxu1 %v14197_v14  ;;  %2763 = vmatpush1.bf16.msra.mxu0 %v14200_v43 }
 0x292   :  { %2653 = vmatprep.mubr.bf16.mxu1 %v14491_v63  ;;  %2766 = vmatprep.mubr.bf16.mxu0 %v14491_v63  ;;  %v3768_v63 = vld [vmem:[#allocation14 + $0x5c0] sm:$0xff] }
 0x293   :  { %2651 = vmatprep.subr.bf16.mxu1 %v14205_v50  ;;  %2764 = vmatprep.subr.bf16.mxu0 %v14208_v21  ;;  %v3760_v50 = vld [vmem:[#allocation14 + $0x580] sm:$0xff] }
 0x294   :  { %v3764_v21 = vld [vmem:[#allocation14 + $0x5a0] sm:$0xff] }
 0x295   :  { %2652 = vmatpush1.bf16.msra.mxu1 %v14203_v45  ;;  %2765 = vmatpush1.bf16.msra.mxu0 %v14206_v59  ;;  %v12544_v6 = vcombine.high %v3760_v50, %v3764_v21  ;;  %v12543_v56 = vcombine.low %v3760_v50, %v3764_v21  ;;  %v12545_v45 = vcombine.low %v3761_v51, %v3765_v53 }
 0x296   :  { %4480 = vmatprep.subr.bf16.mxu1 %v12496_v37  ;;  %4521 = vmatprep.subr.bf16.mxu0 %v12498_v1  ;;  %v12546_v59 = vcombine.high %v3761_v51, %v3765_v53  ;;  %v3772_v37 = vld [vmem:[#allocation14 + $0x5e0] sm:$0xff]  ;;  %v3769_v1 = vld [vmem:[#allocation14 + $0x5c8] sm:$0xff] }
 0x297   :  { %v12552_v2 = vcombine.high %v3768_v63, %v3772_v37  ;;  %v12551_v33 = vcombine.low %v3768_v63, %v3772_v37  ;;  %v12553_v31 = vcombine.low %v3769_v1, %v3773_v58  ;;  %v3828_v53 = vld [vmem:[#allocation14 + $0x7a0] sm:$0xff] }
 0x298   :  { %2654 = vmatmul.mubr.bf16.vlgmr.msra.gmra.mrb[0].mxu1 %v14492_v10  ;;  %2767 = vmatmul.mubr.bf16.vlgmr.msra.gmra.mrb[32].mxu0 %v14492_v10  ;;  %v3781_v10 = vld [vmem:[#allocation14 + $0x628] sm:$0xff] }
 0x299   :  { %2663 = vmatprep.mubr.bf16.mxu1 %v14493_v28  ;;  %2776 = vmatprep.mubr.bf16.mxu0 %v14493_v28  ;;  %v3784_v28 = vld [vmem:[#allocation14 + $0x640] sm:$0xff] }
 0x29a   :  { %4481 = vmatpush1.bf16.msra.mxu1 %v12495_v55  ;;  %4522 = vmatpush1.bf16.msra.mxu0 %v12497_v5  ;;  %v12554_v55 = vcombine.high %v3769_v1, %v3773_v58  ;;  %v3776_v5 = vld [vmem:[#allocation14 + $0x600] sm:$0xff] }
 0x29b   :  { %4482 = vmatprep.subr.bf16.mxu1 %v12504_v52  ;;  %4523 = vmatprep.subr.bf16.mxu0 %v12506_v19  ;;  %v3780_v52 = vld [vmem:[#allocation14 + $0x620] sm:$0xff]  ;;  %v3777_v19 = vld [vmem:[#allocation14 + $0x608] sm:$0xff] }
 0x29c   :  { %v12560_v4 = vcombine.high %v3776_v5, %v3780_v52  ;;  %v12559_v3 = vcombine.low %v3776_v5, %v3780_v52  ;;  %v12561_v12 = vcombine.low %v3777_v19, %v3781_v10  ;;  %v12562_v54 = vcombine.high %v3777_v19, %v3781_v10  ;;  %v3836_v58 = vld [vmem:[#allocation14 + $0x7e0] sm:$0xff]  ;;  %v15498_v10 = vld [vmem:[#allocation14 + $0x430] sm:$0xff] }
 0x29d   :  { %16602 = vst [vmem:[#allocation34_spill] sm:$0xff] %v15498_v10 }
 0x29e   :  { %4483 = vmatpush1.bf16.msra.mxu1 %v12503_v17  ;;  %4524 = vmatpush1.bf16.msra.mxu0 %v12505_v23  ;;  %v3788_v17 = vld [vmem:[#allocation14 + $0x660] sm:$0xff]  ;;  %v3785_v23 = vld [vmem:[#allocation14 + $0x648] sm:$0xff] }
 0x29f   :  { %4484 = vmatprep.subr.bf16.mxu1 %v12512_v20  ;;  %4525 = vmatprep.subr.bf16.mxu0 %v12514_v18  ;;  %v12568_v20 = vcombine.high %v3784_v28, %v3788_v17  ;;  %v3789_v18 = vld [vmem:[#allocation14 + $0x668] sm:$0xff]  ;;  %v12567_v29 = vcombine.low %v3784_v28, %v3788_v17 }
 0x2a0   :  { %2664 = vmatmul.mubr.bf16.gmra.mrb[4].mxu1 %v14494_v24  ;;  %2777 = vmatmul.mubr.bf16.gmra.mrb[36].mxu0 %v14494_v24  ;;  %v12569_v22 = vcombine.low %v3785_v23, %v3789_v18  ;;  %v12570_v46 = vcombine.high %v3785_v23, %v3789_v18  ;;  %v2911_v18 = vld [vmem:[#allocation11] sm:$0xf] }
 0x2a1   :  { %2673 = vmatprep.mubr.bf16.mxu1 %v14495_v15  ;;  %2786 = vmatprep.mubr.bf16.mxu0 %v14495_v15 }
 0x2a2   :  { %4485 = vmatpush1.bf16.msra.mxu1 %v12511_v61  ;;  %4526 = vmatpush1.bf16.msra.mxu0 %v12513_v48  ;;  %v3796_v61 = vld [vmem:[#allocation14 + $0x6a0] sm:$0xff]  ;;  %v3793_v48 = vld [vmem:[#allocation14 + $0x688] sm:$0xff] }
 0x2a3   :  { %4486 = vmatprep.subr.bf16.mxu1 %v12520_v13  ;;  %4527 = vmatprep.subr.bf16.mxu0 %v12522_v62  ;;  %v12576_v13 = vcombine.high %v3792_v44, %v3796_v61  ;;  %v3797_v62 = vld [vmem:[#allocation14 + $0x6a8] sm:$0xff]  ;;  %v12575_v24 = vcombine.low %v3792_v44, %v3796_v61  ;;  %v15525_v61 = vrot.slane %v2911_v18, %v15089_v41 }
 0x2a4   :  { %v12577_v15 = vcombine.low %v3793_v48, %v3797_v62 }
 0x2a6   :  { %4487 = vmatpush1.bf16.msra.mxu1 %v12519_v30  ;;  %4528 = vmatpush1.bf16.msra.mxu0 %v12521_v9  ;;  %v12578_v30 = vcombine.high %v3793_v48, %v3797_v62  ;;  %v3800_v9 = vld [vmem:[#allocation14 + $0x6c0] sm:$0xff] }
 0x2a7   :  { %4529 = vmatprep.subr.bf16.mxu0 %v12530_v7  ;;  %v3813_v7 = vld [vmem:[#allocation14 + $0x728] sm:$0xff] }
 0x2a8   :  { %2674 = vmatmul.mubr.bf16.gmra.mrb[8].mxu1 %v14496_v25  ;;  %2787 = vmatmul.mubr.bf16.gmra.mrb[40].mxu0 %v14496_v25  ;;  %v3804_v25 = vld [vmem:[#allocation14 + $0x6e0] sm:$0xff] }
 0x2a9   :  { %2683 = vmatprep.mubr.bf16.mxu1 %v15359_v34  ;;  %2796 = vmatprep.mubr.bf16.mxu0 %v15359_v34  ;;  %v2235_v34 = vld [vmem:[#allocation2 + $0x88] sm:$0xff] }
 0x2aa   :  { %4530 = vmatpush1.bf16.msra.mxu0 %v12529_v40 }
 0x2b0   :  { %2684 = vmatmul.mubr.bf16.gmra.mrb[12].mxu1 %v14497_v36  ;;  %2797 = vmatmul.mubr.bf16.gmra.mrb[44].mxu0 %v14497_v36  ;;  %v3801_v36 = vld [vmem:[#allocation14 + $0x6c8] sm:$0xff] }
 0x2b1   :  { %2693 = vmatprep.mubr.bf16.mxu1 %v15406_v42  ;;  %2806 = vmatprep.mubr.bf16.mxu0 %v15406_v42  ;;  %v3744_v42 = vld [vmem:[#allocation14 + $0x500] sm:$0xff] }
 0x2b8   :  { %2694 = vmatmul.mubr.bf16.gmra.mrb[16].mxu1 %v15396_v49  ;;  %2807 = vmatmul.mubr.bf16.gmra.mrb[48].mxu0 %v15396_v49  ;;  %v2234_v49 = vld [vmem:[#allocation2 + $0x80] sm:$0xff] }
 0x2b9   :  { %2703 = vmatprep.mubr.bf16.mxu1 %v15442_v60  ;;  %2816 = vmatprep.mubr.bf16.mxu0 %v15442_v60  ;;  %v3748_v60 = vld [vmem:[#allocation14 + $0x520] sm:$0xff] }
 0x2ba   :  { %v12528_v26 = vcombine.high %v3744_v42, %v3748_v60 }
 0x2bc   :  { %4488 = vmatprep.subr.bf16.mxu1 %v12528_v26  ;;  %v3808_v26 = vld [vmem:[#allocation14 + $0x700] sm:$0xff] }
 0x2bd   :  { %v12592_v40 = vcombine.high %v3808_v26, %v3812_v16 }
 0x2c0   :  { %2704 = vmatmul.mubr.bf16.gmra.mrb[20].mxu1 %v15427_v57  ;;  %2817 = vmatmul.mubr.bf16.gmra.mrb[52].mxu0 %v15427_v57  ;;  %v12527_v57 = vcombine.low %v3744_v42, %v3748_v60  ;;  %v12583_v42 = vcombine.low %v3800_v9, %v3804_v25 }
 0x2c1   :  { %2713 = vmatprep.mubr.bf16.mxu1 %v15464_v27  ;;  %2826 = vmatprep.mubr.bf16.mxu0 %v15464_v27  ;;  %v3752_v27 = vld [vmem:[#allocation14 + $0x540] sm:$0xff] }
 0x2c2   :  { %4489 = vmatpush1.bf16.msra.mxu1 %v12527_v57  ;;  %v12536_v8 = vcombine.high %v3752_v27, %v3756_v35  ;;  %v12535_v32 = vcombine.low %v3752_v27, %v3756_v35  ;;  %v3809_v57 = vld [vmem:[#allocation14 + $0x708] sm:$0xff]  ;;  %v12591_v27 = vcombine.low %v3808_v26, %v3812_v16 }
 0x2c3   :  { %v12593_v35 = vcombine.low %v3809_v57, %v3813_v7 }
 0x2c4   :  { %4490 = vmatprep.subr.bf16.mxu1 %v12536_v8  ;;  %v3816_v8 = vld [vmem:[#allocation14 + $0x740] sm:$0xff] }
 0x2c6   :  { %4491 = vmatpush1.bf16.msra.mxu1 %v12535_v32  ;;  %v3817_v32 = vld [vmem:[#allocation14 + $0x748] sm:$0xff] }
 0x2c7   :  { %4492 = vmatprep.subr.bf16.mxu1 %v12544_v6  ;;  %v3824_v6 = vld [vmem:[#allocation14 + $0x780] sm:$0xff] }
 0x2c8   :  { %2714 = vmatmul.mubr.bf16.gmra.mrb[24].mxu1 %v15453_v0  ;;  %2827 = vmatmul.mubr.bf16.gmra.mrb[56].mxu0 %v15453_v0  ;;  %v3753_v0 = vld [vmem:[#allocation14 + $0x548] sm:$0xff]  ;;  %v12607_v63 = vcombine.low %v3824_v6, %v3828_v53 }
 0x2c9   :  { %2723 = vmatprep.mubr.bf16.mxu1 %v2235_v34  ;;  %2836 = vmatprep.mubr.bf16.mxu0 %v2235_v34  ;;  %v12537_v14 = vcombine.low %v3753_v0, %v3757_v11  ;;  %v12538_v43 = vcombine.high %v3753_v0, %v3757_v11  ;;  %v12584_v34 = vcombine.high %v3800_v9, %v3804_v25  ;;  %v3820_v11 = vld [vmem:[#allocation14 + $0x760] sm:$0xff] }
 0x2ca   :  { %4493 = vmatpush1.bf16.msra.mxu1 %v12543_v56  ;;  %v12594_v0 = vcombine.high %v3809_v57, %v3813_v7  ;;  %v12599_v50 = vcombine.low %v3816_v8, %v3820_v11  ;;  %v3825_v56 = vld [vmem:[#allocation14 + $0x788] sm:$0xff] }
 0x2cb   :  { %4531 = vmatprep.subr.bf16.mxu0 %v12538_v43  ;;  %4494 = vmatprep.subr.bf16.mxu1 %v12552_v2  ;;  %v3821_v43 = vld [vmem:[#allocation14 + $0x768] sm:$0xff]  ;;  %v3832_v2 = vld [vmem:[#allocation14 + $0x7c0] sm:$0xff] }
 0x2cc   :  { %4532 = vmatpush1.bf16.msra.mxu0 %v12537_v14  ;;  %v12600_v14 = vcombine.high %v3816_v8, %v3820_v11  ;;  %v12601_v21 = vcombine.low %v3817_v32, %v3821_v43  ;;  %v12602_v51 = vcombine.high %v3817_v32, %v3821_v43  ;;  %v12615_v5 = vcombine.low %v3832_v2, %v3836_v58 }
 0x2cd   :  { %4533 = vmatprep.subr.bf16.mxu0 %v12546_v59  ;;  %v3829_v59 = vld [vmem:[#allocation14 + $0x7a8] sm:$0xff] }
 0x2ce   :  { %4495 = vmatpush1.bf16.msra.mxu1 %v12551_v33  ;;  %v12609_v37 = vcombine.low %v3825_v56, %v3829_v59  ;;  %v12610_v1 = vcombine.high %v3825_v56, %v3829_v59  ;;  %v3833_v33 = vld [vmem:[#allocation14 + $0x7c8] sm:$0xff] }
 0x2cf   :  { %4496 = vmatprep.subr.bf16.mxu1 %v12560_v4  ;;  %v15496_v4 = vld [vmem:[#allocation14 + $0x410] sm:$0xff] }
 0x2d0   :  { %2724 = vmatmul.mubr.bf16.gmra.mrb[28].mxu1 %v2234_v49  ;;  %2837 = vmatmul.mubr.bf16.gmra.mrb[60].mxu0 %v2234_v49  ;;  %v3805_v49 = vld [vmem:[#allocation14 + $0x6e8] sm:$0xff]  ;;  %16601 = vst [vmem:[#allocation33_spill] sm:$0xff] %v15496_v4 }
 0x2d1   :  { %4534 = vmatpush1.bf16.msra.mxu0 %v12545_v45  ;;  %v12585_v60 = vcombine.low %v3801_v36, %v3805_v49  ;;  %v12586_v47 = vcombine.high %v3801_v36, %v3805_v49  ;;  %v12608_v45 = vcombine.high %v3824_v6, %v3828_v53 }
 0x2d2   :  { %4535 = vmatprep.subr.bf16.mxu0 %v12554_v55  ;;  %4497 = vmatpush1.bf16.msra.mxu1 %v12559_v3  ;;  %v3837_v55 = vld [vmem:[#allocation14 + $0x7e8] sm:$0xff]  ;;  %v15500_v3 = vld [vmem:[#allocation14 + $0x418] sm:$0xff] }
 0x2d3   :  { %4498 = vmatprep.subr.bf16.mxu1 %v12568_v20  ;;  %v12617_v52 = vcombine.low %v3833_v33, %v3837_v55  ;;  %v12618_v19 = vcombine.high %v3833_v33, %v3837_v55  ;;  %16603 = vst [vmem:[#allocation35_spill] sm:$0xff] %v15500_v3  ;;  %v15513_v20 = vsub.s32 2, %v15083_v38 }
 0x2d5   :  { %4536 = vmatpush1.bf16.msra.mxu0 %v12553_v31  ;;  %v12616_v31 = vcombine.high %v3832_v2, %v3836_v58  ;;  %16605 = vst [vmem:[#allocation37_spill] sm:$0xff] %v15513_v20  ;;  %v15522_v44 = vrot.slane %v2911_v18, %v15513_v20 }
 0x2d6   :  { %4537 = vmatprep.subr.bf16.mxu0 %v12562_v54  ;;  %4499 = vmatpush1.bf16.msra.mxu1 %v12567_v29  ;;  %v15504_v54 = vld [vmem:[#allocation14 + $0x438] sm:$0xff]  ;;  %v15516_v29 = vsub.s32 3, %v15083_v38 }
 0x2d7   :  { %4500 = vmatprep.subr.bf16.mxu1 %v12576_v13  ;;  %16604 = vst [vmem:[#allocation36_spill] sm:$0xff] %v15504_v54  ;;  %v12502_v23 = vcombine.high %v15500_v3, %v15504_v54 }
 0x2d8   :  { %16606 = vst [vmem:[#allocation38_spill] sm:$0xff] %v15516_v29  ;;  %v15528_v48 = vrot.slane %v2911_v18, %v15516_v29 }
 0x2d9   :  { %4538 = vmatpush1.bf16.msra.mxu0 %v12561_v12  ;;  %v12500_v12 = vcombine.high %v15496_v4, %v15498_v10 }
 0x2da   :  { %4539 = vmatprep.subr.bf16.mxu0 %v12570_v46  ;;  %4501 = vmatpush1.bf16.msra.mxu1 %v12575_v24  ;;  %v15519_v46 = vrot.slane %v2911_v18, %v15086_v39 }
 0x2db   :  { %4502 = vmatprep.subr.bf16.mxu1 %v12584_v34 }
 0x2dd   :  { %4540 = vmatpush1.bf16.msra.mxu0 %v12569_v22  ;;  %v2997_v22 = vld [vmem:[#allocation12] sm:$0xf] }
 0x2de   :  { %4541 = vmatprep.subr.bf16.mxu0 %v12578_v30  ;;  %4503 = vmatpush1.bf16.msra.mxu1 %v12583_v42  ;;  %v15531_v13 = vrot.slane %v2997_v22, %v15086_v39  ;;  %v15534_v62 = vrot.slane %v2997_v22, %v15513_v20  ;;  %v15537_v30 = vrot.slane %v2997_v22, %v15089_v41 }
 0x2df   :  { %4504 = vmatprep.subr.bf16.mxu1 %v12592_v40  ;;  %v15540_v9 = vrot.slane %v2997_v22, %v15516_v29 }
 0x2e1   :  { %4542 = vmatpush1.bf16.msra.mxu0 %v12577_v15 }
 0x2e2   :  { %4543 = vmatprep.subr.bf16.mxu0 %v12586_v47  ;;  %4505 = vmatpush1.bf16.msra.mxu1 %v12591_v27 }
 0x2e3   :  { %4506 = vmatprep.subr.bf16.mxu1 %v12600_v14 }
 0x2e5   :  { %4544 = vmatpush1.bf16.msra.mxu0 %v12585_v60 }
 0x2e6   :  { %4545 = vmatprep.subr.bf16.mxu0 %v12594_v0  ;;  %4507 = vmatpush1.bf16.msra.mxu1 %v12599_v50 }
 0x2e7   :  { %4508 = vmatprep.subr.bf16.mxu1 %v12608_v45 }
 0x2e9   :  { %4546 = vmatpush1.bf16.msra.mxu0 %v12593_v35 }
 0x2ea   :  { %4547 = vmatprep.subr.bf16.mxu0 %v12602_v51  ;;  %4509 = vmatpush1.bf16.msra.mxu1 %v12607_v63 }
 0x2eb   :  { %4510 = vmatprep.subr.bf16.mxu1 %v12616_v31 }
 0x2ed   :  { %4548 = vmatpush1.bf16.msra.mxu0 %v12601_v21 }
 0x2ee   :  { %4549 = vmatprep.subr.bf16.mxu0 %v12610_v1  ;;  %4511 = vmatpush1.bf16.msra.mxu1 %v12615_v5 }
 0x2ef   :  { %4562 = vmatprep.subr.bf16.mxu1 %v12500_v12 }
 0x2f1   :  { %4550 = vmatpush1.bf16.msra.mxu0 %v12609_v37 }
 0x2f2   :  { %4551 = vmatprep.subr.bf16.mxu0 %v12618_v19 }
 0x2f5   :  { %4552 = vmatpush1.bf16.msra.mxu0 %v12617_v52 }
 0x2f6   :  { %4603 = vmatprep.subr.bf16.mxu0 %v12502_v23 }
 0x36b   :  { %v2655_v24 = vpop.f32.mrb[0].mxu1  ;;  %v2768_v15 = vpop.f32.mrb[32].mxu0 }
 0x36c   :  { %v2933_v25 = vmul.f32 %v15519_v46, %v2655_v24  ;;  %v2935_v36 = vmul.f32 %v15522_v44, %v2768_v15  ;;  %v2657_v34 = vpop.f32.mrb[1].mxu1  ;;  %v2770_v49 = vpop.f32.mrb[33].mxu0 }
 0x36d   :  { %v2934_v42 = vmul.f32 %v15525_v61, %v2657_v34  ;;  %v2936_v60 = vmul.f32 %v15528_v48, %v2770_v49  ;;  %v2659_v47 = vpop.f32.mrb[2].mxu1  ;;  %v2772_v26 = vpop.f32.mrb[34].mxu0 }
 0x36e   :  { %v15547_v16 = vadd.f32 %v15531_v13, %v2933_v25  ;;  %v15550_v57 = vadd.f32 %v15534_v62, %v2935_v36  ;;  %v2937_v40 = vmul.f32 %v15519_v46, %v2659_v47  ;;  %v2939_v7 = vmul.f32 %v15522_v44, %v2772_v26  ;;  %v2661_v27 = vpop.f32.mrb[3].mxu1  ;;  %v2774_v35 = vpop.f32.mrb[35].mxu0 }
 0x36f   :  { %v15555_v0 = vadd.f32 %v15537_v30, %v2934_v42  ;;  %v15558_v8 = vadd.f32 %v15540_v9, %v2936_v60  ;;  %v2938_v11 = vmul.f32 %v15525_v61, %v2661_v27  ;;  %v2940_v32 = vmul.f32 %v15528_v48, %v2774_v35 }
 0x370   :  { %v3147_v14 = vmin.f32 %v15547_v16, 0.0  ;;  %v3149_v43 = vmin.f32 %v15550_v57, 0.0  ;;  %v15567_v53 = vadd.f32 %v15531_v13, %v2937_v40  ;;  %v15570_v56 = vadd.f32 %v15534_v62, %v2939_v7 }
 0x371   :  { %v3148_v50 = vmin.f32 %v15555_v0, 0.0  ;;  %v3150_v21 = vmin.f32 %v15558_v8, 0.0  ;;  %v15573_v63 = vadd.f32 %v15537_v30, %v2938_v11  ;;  %v15576_v37 = vadd.f32 %v15540_v9, %v2940_v32 }
 0x372   :  { %v3211_v51 = vmul.f32 1.442695, %v3147_v14  ;;  %v3215_v6 = vmul.f32 1.442695, %v3149_v43  ;;  %v3151_v58 = vmin.f32 %v15567_v53, 0.0  ;;  %v3153_v55 = vmin.f32 %v15570_v56, 0.0 }
 0x373   :  { %v3213_v45 = vmul.f32 1.442695, %v3148_v50  ;;  %v3217_v59 = vmul.f32 1.442695, %v3150_v21  ;;  %v2665_v1 = vpop.f32.mrb[4].mxu1  ;;  %v2778_v2 = vpop.f32.mrb[36].mxu0 }
 0x374   :  { %14345 = vpow2.f32 %v3211_v51  ;;  %v2667_v33 = vpop.f32.mrb[5].mxu1  ;;  %v2780_v31 = vpop.f32.mrb[37].mxu0  ;;  %v3152_v5 = vmin.f32 %v15573_v63, 0.0  ;;  %v3219_v12 = vmul.f32 1.442695, %v3151_v58  ;;  %v3154_v23 = vmin.f32 %v15576_v37, 0.0 }
 0x375   :  { %14347 = vpow2.f32 %v3215_v6  ;;  %v2669_v52 = vpop.f32.mrb[6].mxu1  ;;  %v2782_v19 = vpop.f32.mrb[38].mxu0  ;;  %v3223_v24 = vmul.f32 1.442695, %v3153_v55  ;;  %v2941_v25 = vmul.f32 %v15519_v46, %v2665_v1  ;;  %v2943_v34 = vmul.f32 %v15522_v44, %v2778_v2 }
 0x376   :  { %14349 = vpow2.f32 %v3213_v45  ;;  %v2671_v18 = vpop.f32.mrb[7].mxu1  ;;  %v15582_v22 = vpop.f32.mrb[39].mxu0  ;;  %v3221_v15 = vmul.f32 1.442695, %v3152_v5  ;;  %v3225_v36 = vmul.f32 1.442695, %v3154_v23  ;;  %v2942_v49 = vmul.f32 %v15525_v61, %v2667_v33 }
 0x377   :  { %14351 = vpow2.f32 %v3217_v59  ;;  %vm3083_vm6 = vcmp.gt.f32.partialorder %v15547_v16, 0.0  ;;  %v15589_v42 = vadd.f32 %v15531_v13, %v2941_v25  ;;  %v2944_v60 = vmul.f32 %v15528_v48, %v2780_v31 }
 0x378   :  { %14353 = vpow2.f32 %v3219_v12  ;;  %v2945_v47 = vmul.f32 %v15519_v46, %v2669_v52  ;;  %v15594_v26 = vadd.f32 %v15534_v62, %v2943_v34  ;;  %v15597_v40 = vadd.f32 %v15537_v30, %v2942_v49 }
 0x379   :  { %14355 = vpow2.f32 %v3223_v24  ;;  %v2947_v7 = vmul.f32 %v15522_v44, %v2782_v19  ;;  %vm3085_vm3 = vcmp.gt.f32.partialorder %v15550_v57, 0.0  ;;  %v3155_v27 = vmin.f32 %v15589_v42, 0.0 }
 0x37a   :  { %14357 = vpow2.f32 %v3221_v15  ;;  %v15603_v35 = vadd.f32 %v15540_v9, %v2944_v60  ;;  %vm3084_vm4 = vcmp.gt.f32.partialorder %v15555_v0, 0.0  ;;  %vm3086_vm5 = vcmp.gt.f32.partialorder %v15558_v8, 0.0 }
 0x37b   :  { %14359 = vpow2.f32 %v3225_v36  ;;  %v15605_v11 = vpop.f32.mrb[8].mxu1  ;;  %v15607_v32 = vpop.f32.mrb[40].mxu0  ;;  %v3157_v14 = vmin.f32 %v15594_v26, 0.0  ;;  %v3156_v43 = vmin.f32 %v15597_v40, 0.0  ;;  %vm3087_vm7 = vcmp.gt.f32.partialorder %v15567_v53, 0.0 }
 0x37c   :  { %v15613_v50 = vpop.f32.mrb[9].mxu1  ;;  %v15615_v21 = vpop.f32.mrb[41].mxu0  ;;  %v3227_v51 = vmul.f32 1.442695, %v3155_v27  ;;  %v3158_v6 = vmin.f32 %v15603_v35, 0.0  ;;  %v15620_v45 = vadd.f32 %v15531_v13, %v2945_v47  ;;  %v15627_v31 = vadd.f32 %v15534_v62, %v2947_v7 }
 0x37d   :  { %v15622_v59 = vpop.f32.mrb[10].mxu1  ;;  %v15624_v1 = vpop.f32.mrb[42].mxu0  ;;  %v3231_v58 = vmul.f32 1.442695, %v3157_v14  ;;  %v3229_v33 = vmul.f32 1.442695, %v3156_v43  ;;  %v2946_v12 = vmul.f32 %v15525_v61, %v2671_v18 }
 0x37e   :  { %v14346_v2 = vpop.eup %14345  ;;  %v15629_v55 = vpop.f32.mrb[11].mxu1  ;;  %vm3089_vm8 = vcmp.gt.f32.partialorder %v15570_v56, 0.0  ;;  %14361 = vpow2.f32 %v3227_v51  ;;  %vm3088_vm9 = vcmp.gt.f32.partialorder %v15573_v63, 0.0  ;;  %v3159_v15 = vmin.f32 %v15620_v45, 0.0 }
 0x37f   :  { %v15631_v5 = vpop.f32.mrb[43].mxu0  ;;  %v14348_v52 = vpop.eup %14347  ;;  %v12431_v19 = vadd.f32 -1.0, %v14346_v2  ;;  %14363 = vpow2.f32 %v3231_v58  ;;  %vm3090_vm10 = vcmp.gt.f32.partialorder %v15576_v37, 0.0  ;;  %v3233_v34 = vmul.f32 1.442695, %v3158_v6 }
 0x380   :  { %v14350_v23 = vpop.eup %14349  ;;  %v12433_v24 = vadd.f32 -1.0, %v14348_v52  ;;  %v3161_v49 = vmin.f32 %v15627_v31, 0.0  ;;  %14365 = vpow2.f32 %v3229_v33  ;;  %v3235_v7 = vmul.f32 1.442695, %v3159_v15 }
 0x381   :  { %v14352_v25 = vpop.eup %14351  ;;  %v12432_v36 = vadd.f32 -1.0, %v14350_v23  ;;  %v3403_v47 = vsel %vm3083_vm6, %v15547_v16, %v12431_v19  ;;  %v15646_v2 = vadd.f32 %v15537_v30, %v2946_v12  ;;  %v2948_v19 = vmul.f32 %v15528_v48, %v15582_v22 }
 0x382   :  { %v14354_v60 = vpop.eup %14353  ;;  %v12434_v18 = vadd.f32 -1.0, %v14352_v25  ;;  %v3405_v14 = vsel %vm3085_vm3, %v15550_v57, %v12433_v24  ;;  %v3239_v51 = vmul.f32 1.442695, %v3161_v49  ;;  %14367 = vpow2.f32 %v3235_v7 }
 0x383   :  { %v14356_v27 = vpop.eup %14355  ;;  %v12435_v43 = vadd.f32 -1.0, %v14354_v60  ;;  %v15648_v6 = vpop.f32.mrb[12].mxu1  ;;  %v3404_v16 = vsel %vm3084_vm4, %v15555_v0, %v12432_v36  ;;  %v3160_v7 = vmin.f32 %v15646_v2, 0.0  ;;  %vm3091_vm11 = vcmp.gt.f32.partialorder %v15589_v42, 0.0 }
 0x384   :  { %v15650_v58 = vpop.f32.mrb[44].mxu0  ;;  %v14358_v52 = vpop.eup %14357  ;;  %v12437_v33 = vadd.f32 -1.0, %v14356_v27  ;;  %v3406_v24 = vsel %vm3086_vm5, %v15558_v8, %v12434_v18  ;;  %14369 = vpow2.f32 %v3239_v51  ;;  %vm3093_vm12 = vcmp.gt.f32.partialorder %v15594_v26, 0.0 }
 0x385   :  { %v15657_v57 = vpop.f32.mrb[13].mxu1  ;;  %v15659_v23 = vpop.f32.mrb[45].mxu0  ;;  %v3407_v15 = vsel %vm3087_vm7, %v15567_v53, %v12435_v43  ;;  %v12436_v25 = vadd.f32 -1.0, %v14358_v52  ;;  %v15683_v43 = vadd.f32 %v15540_v9, %v2948_v19  ;;  %v3237_v52 = vmul.f32 1.442695, %v3160_v7 }
 0x386   :  { %v14360_v12 = vpop.eup %14359  ;;  %v15667_v0 = vpop.f32.mrb[14].mxu1  ;;  %v3467_v22 = vpack.c.bf16 %v3407_v15, %v3403_v47  ;;  %v3409_v49 = vsel %vm3089_vm8, %v15570_v56, %v12437_v33  ;;  %v2949_v47 = vmul.f32 %v15519_v46, %v15605_v11  ;;  %14371 = vpow2.f32 %v3233_v34 }
 0x387   :  { %v15669_v36 = vpop.f32.mrb[46].mxu0  ;;  %v12438_v60 = vadd.f32 -1.0, %v14360_v12  ;;  %v15675_v27 = vpop.f32.mrb[15].mxu1  ;;  %v3469_v18 = vpack.c.bf16 %v3409_v49, %v3405_v14  ;;  %v3408_v53 = vsel %vm3088_vm9, %v15573_v63, %v12436_v25  ;;  %v2951_v14 = vmul.f32 %v15522_v44, %v15607_v32 }
 0x388   :  { %v15677_v8 = vpop.f32.mrb[47].mxu0  ;;  %3499 = vst [vmem:[#allocation3] sm:$0xff] %v3467_v22  ;;  %v3468_v56 = vpack.c.bf16 %v3408_v53, %v3404_v16  ;;  %v14362_v33 = vpop.eup %14361  ;;  %v3162_v63 = vmin.f32 %v15683_v43, 0.0  ;;  %v15694_v19 = vadd.f32 %v15531_v13, %v2949_v47  ;;  %14373 = vpow2.f32 %v3237_v52 }
 0x389   :  { %v3410_v51 = vsel %vm3090_vm10, %v15576_v37, %v12438_v60  ;;  %3501 = vst [vmem:[#allocation3 + $0x10] sm:$0xff] %v3469_v18  ;;  %v14364_v11 = vpop.eup %14363  ;;  %v12439_v16 = vadd.f32 -1.0, %v14362_v33  ;;  %v15697_v15 = vadd.f32 %v15534_v62, %v2951_v14  ;;  %v2950_v37 = vmul.f32 %v15525_v61, %v15613_v50 }
 0x38a   :  { %v3470_v12 = vpack.c.bf16 %v3410_v51, %v3406_v24  ;;  %3500 = vst [vmem:[#allocation3 + $0x8] sm:$0xff] %v3468_v56  ;;  %v3241_v32 = vmul.f32 1.442695, %v3162_v63  ;;  %v3163_v24 = vmin.f32 %v15694_v19, 0.0  ;;  %v14366_v25 = vpop.eup %14365  ;;  %v12441_v22 = vadd.f32 -1.0, %v14364_v11 }
 0x38b   :  { %v15702_v34 = vpop.f32.mrb[16].mxu1  ;;  %v3165_v49 = vmin.f32 %v15697_v15, 0.0  ;;  %v15707_v60 = vpop.f32.mrb[48].mxu0  ;;  %vm3092_vm13 = vcmp.gt.f32.partialorder %v15597_v40, 0.0  ;;  %vm3095_vm14 = vcmp.gt.f32.partialorder %v15620_v45, 0.0  ;;  %v3411_v56 = vsel %vm3091_vm11, %v15589_v42, %v12439_v16 }
 0x38c   :  { %3502 = vst [vmem:[#allocation3 + $0x18] sm:$0xff] %v3470_v12  ;;  %v15709_v7 = vpop.f32.mrb[17].mxu1  ;;  %14375 = vpow2.f32 %v3241_v32  ;;  %v3243_v50 = vmul.f32 1.442695, %v3163_v24  ;;  %v15713_v18 = vpop.f32.mrb[49].mxu0  ;;  %vm3097_vm15 = vcmp.gt.f32.partialorder %v15627_v31, 0.0  ;;  %v15720_v51 = vadd.f32 %v15537_v30, %v2950_v37 }
 0x38d   :  { %v15715_v53 = vpop.f32.mrb[18].mxu1  ;;  %v14368_v47 = vpop.eup %14367  ;;  %v2952_v52 = vmul.f32 %v15528_v48, %v15615_v21  ;;  %v12440_v63 = vadd.f32 -1.0, %v14366_v25  ;;  %v3247_v32 = vmul.f32 1.442695, %v3165_v49  ;;  %v2953_v24 = vmul.f32 %v15519_v46, %v15622_v59 }
 0x38e   :  { %v15724_v14 = vpop.f32.mrb[50].mxu0  ;;  %v15726_v33 = vpop.f32.mrb[19].mxu1  ;;  %v12443_v11 = vadd.f32 -1.0, %v14368_v47  ;;  %v3413_v16 = vsel %vm3093_vm12, %v15594_v26, %v12441_v22  ;;  %14377 = vpow2.f32 %v3243_v50  ;;  %v3164_v21 = vmin.f32 %v15720_v51, 0.0 }
 0x38f   :  { %v14370_v12 = vpop.eup %14369  ;;  %v15730_v42 = vpop.f32.mrb[51].mxu0  ;;  %vm3094_vm0 = vcmp.gt.f32.partialorder %v15603_v35, 0.0  ;;  %v15741_v49 = vadd.f32 %v15540_v9, %v2952_v52  ;;  %v15744_v59 = vadd.f32 %v15531_v13, %v2953_v24  ;;  %v2955_v47 = vmul.f32 %v15522_v44, %v15624_v1 }
 0x390   :  { %v12445_v37 = vadd.f32 -1.0, %v14370_v12  ;;  %v3415_v25 = vsel %vm3095_vm14, %v15620_v45, %v12443_v11  ;;  %v3245_v50 = vmul.f32 1.442695, %v3164_v21  ;;  %v2954_v12 = vmul.f32 %v15525_v61, %v15629_v55  ;;  %v14372_v17 = vpop.eup %14371 }
 0x391   :  { %v3471_v26 = vpack.c.bf16 %v3415_v25, %v3411_v56  ;;  %vm3096_vm1 = vcmp.gt.f32.partialorder %v15646_v2, 0.0  ;;  %14379 = vpow2.f32 %v3247_v32  ;;  %v3166_v52 = vmin.f32 %v15741_v49, 0.0 }
 0x392   :  { %v3417_v22 = vsel %vm3097_vm15, %v15627_v31, %v12445_v37  ;;  %v14374_v1 = vpop.eup %14373  ;;  %14381 = vpow2.f32 %v3245_v50  ;;  %v3167_v31 = vmin.f32 %v15744_v59, 0.0  ;;  %v15761_v56 = vadd.f32 %v15534_v62, %v2955_v47 }
 0x393   :  { %v3473_v45 = vpack.c.bf16 %v3417_v22, %v3413_v16  ;;  %v15755_v11 = vpop.f32.mrb[20].mxu1  ;;  %v15757_v24 = vpop.f32.mrb[52].mxu0  ;;  %3503 = vst [vmem:[#allocation3 + $0x20] sm:$0xff] %v3471_v26  ;;  %v15764_v55 = vadd.f32 %v15537_v30, %v2954_v12  ;;  %v12444_v37 = vadd.f32 -1.0, %v14374_v1  ;;  %v3249_v21 = vmul.f32 1.442695, %v3166_v52 }
 0x394   :  { %v15766_v16 = vpop.f32.mrb[21].mxu1  ;;  %v15768_v32 = vpop.f32.mrb[53].mxu0  ;;  %v2956_v25 = vmul.f32 %v15528_v48, %v15631_v5  ;;  %v2957_v26 = vmul.f32 %v15519_v46, %v15648_v6  ;;  %v3412_v50 = vsel %vm3092_vm13, %v15597_v40, %v12440_v63  ;;  %v12442_v12 = vadd.f32 -1.0, %v14372_v17 }
 0x395   :  { %3505 = vst [vmem:[#allocation3 + $0x30] sm:$0xff] %v3473_v45  ;;  %v15774_v22 = vpop.f32.mrb[22].mxu1  ;;  %v15776_v47 = vpop.f32.mrb[54].mxu0  ;;  %v3251_v28 = vmul.f32 1.442695, %v3167_v31  ;;  %v3169_v45 = vmin.f32 %v15761_v56, 0.0  ;;  %v3416_v5 = vsel %vm3096_vm1, %v15646_v2, %v12444_v37  ;;  %14383 = vpow2.f32 %v3249_v21 }
 0x396   :  { %v15782_v1 = vpop.f32.mrb[23].mxu1  ;;  %v14376_v52 = vpop.eup %14375  ;;  %v3168_v6 = vmin.f32 %v15764_v55, 0.0  ;;  %v15789_v38 = vadd.f32 %v15540_v9, %v2956_v25  ;;  %v3472_v40 = vpack.c.bf16 %v3416_v5, %v3412_v50  ;;  %vm3098_vm2 = vcmp.gt.f32.partialorder %v15683_v43, 0.0 }
 0x397   :  { %v15791_v20 = vpop.f32.mrb[55].mxu0  ;;  %v12446_v17 = vadd.f32 -1.0, %v14376_v52  ;;  %14385 = vpow2.f32 %v3251_v28  ;;  %v3255_v63 = vmul.f32 1.442695, %v3169_v45  ;;  %v15796_v41 = vadd.f32 %v15531_v13, %v2957_v26 }
 0x398   :  { %v3253_v31 = vmul.f32 1.442695, %v3168_v6  ;;  %v3170_v29 = vmin.f32 %v15789_v38, 0.0  ;;  %v14378_v2 = vpop.eup %14377  ;;  %v3414_v37 = vsel %vm3094_vm0, %v15603_v35, %v12442_v12  ;;  %3504 = vst [vmem:[#allocation3 + $0x28] sm:$0xff] %v3472_v40  ;;  %v2959_v28 = vmul.f32 %v15522_v44, %v15650_v58 }
 0x399   :  { %v3418_v21 = vsel %vm3098_vm2, %v15683_v43, %v12446_v17  ;;  %14387 = vpow2.f32 %v3255_v63  ;;  %vm3099_vm6 = vcmp.gt.f32.partialorder %v15694_v19, 0.0  ;;  %vm3101_vm3 = vcmp.gt.f32.partialorder %v15697_v15, 0.0 }
 0x39a   :  { %v3474_v25 = vpack.c.bf16 %v3418_v21, %v3414_v37  ;;  %14389 = vpow2.f32 %v3253_v31  ;;  %v3257_v50 = vmul.f32 1.442695, %v3170_v29  ;;  %vm3103_vm4 = vcmp.gt.f32.partialorder %v15744_v59, 0.0 }
 0x39b   :  { %v15805_v45 = vpop.f32.mrb[24].mxu1  ;;  %v15807_v26 = vpop.f32.mrb[56].mxu0  ;;  %v3171_v35 = vmin.f32 %v15796_v41, 0.0  ;;  %v15813_v43 = vadd.f32 %v15534_v62, %v2959_v28  ;;  %v12447_v29 = vadd.f32 -1.0, %v14378_v2  ;;  %vm3100_vm5 = vcmp.gt.f32.partialorder %v15720_v51, 0.0 }
 0x39c   :  { %v15815_v12 = vpop.f32.mrb[25].mxu1  ;;  %v15817_v58 = vpop.f32.mrb[57].mxu0  ;;  %3506 = vst [vmem:[#allocation3 + $0x38] sm:$0xff] %v3474_v25  ;;  %14391 = vpow2.f32 %v3257_v50  ;;  %v2958_v5 = vmul.f32 %v15525_v61, %v15657_v57  ;;  %v2960_v6 = vmul.f32 %v15528_v48, %v15659_v23  ;;  %vm3102_vm7 = vcmp.gt.f32.partialorder %v15741_v49, 0.0 }
 0x39d   :  { %v14380_v52 = vpop.eup %14379  ;;  %v15824_v40 = vpop.f32.mrb[26].mxu1  ;;  %vm3105_vm8 = vcmp.gt.f32.partialorder %v15761_v56, 0.0  ;;  %v3259_v31 = vmul.f32 1.442695, %v3171_v35  ;;  %v3173_v2 = vmin.f32 %v15813_v43, 0.0  ;;  %v2961_v37 = vmul.f32 %v15519_v46, %v15667_v0 }
 0x39e   :  { %v15826_v17 = vpop.f32.mrb[58].mxu0  ;;  %v14382_v63 = vpop.eup %14381  ;;  %vm3104_vm9 = vcmp.gt.f32.partialorder %v15764_v55, 0.0  ;;  %v15839_v23 = vadd.f32 %v15537_v30, %v2958_v5  ;;  %v15842_v28 = vadd.f32 %v15540_v9, %v2960_v6  ;;  %v2963_v25 = vmul.f32 %v15522_v44, %v15669_v36 }
 0x39f   :  { %16607 = vst [vmem:[#allocation39_spill] sm:$0xff] %v15826_v17  ;;  %v15833_v21 = vpop.f32.mrb[27].mxu1  ;;  %v15835_v57 = vpop.f32.mrb[59].mxu0  ;;  %v12449_v50 = vadd.f32 -1.0, %v14380_v52  ;;  %v3263_v35 = vmul.f32 1.442695, %v3173_v2  ;;  %v15847_v39 = vadd.f32 %v15531_v13, %v2961_v37  ;;  %v2962_v0 = vmul.f32 %v15525_v61, %v15675_v27 }
 0x3a0   :  { %16608 = vst [vmem:[#allocation40_spill] sm:$0xff] %v15833_v21  ;;  %16609 = vst [vmem:[#allocation41_spill] sm:$0xff] %v15835_v57  ;;  %v14384_v54 = vpop.eup %14383  ;;  %v3419_v5 = vsel %vm3099_vm6, %v15694_v19, %v12447_v29  ;;  %vm3106_vm10 = vcmp.gt.f32.partialorder %v15789_v38, 0.0  ;;  %14393 = vpow2.f32 %v3259_v31  ;;  %v3172_v6 = vmin.f32 %v15839_v23, 0.0 }
 0x3a1   :  { %v14386_v3 = vpop.eup %14385  ;;  %v12448_v36 = vadd.f32 -1.0, %v14382_v63  ;;  %v12450_v52 = vadd.f32 -1.0, %v14384_v54  ;;  %14395 = vpow2.f32 %v3263_v35  ;;  %v3174_v2 = vmin.f32 %v15842_v28, 0.0 }
 0x3a2   :  { %v12451_v37 = vadd.f32 -1.0, %v14386_v3  ;;  %v3261_v10 = vmul.f32 1.442695, %v3172_v6  ;;  %v3175_v27 = vmin.f32 %v15847_v39, 0.0  ;;  %v15859_v4 = vadd.f32 %v15534_v62, %v2963_v25 }
 0x3a3   :  { %v15861_v57 = vpop.f32.mrb[28].mxu1  ;;  %v15863_v19 = vpop.f32.mrb[60].mxu0  ;;  %v3421_v63 = vsel %vm3101_vm3, %v15697_v15, %v12449_v50  ;;  %v3265_v54 = vmul.f32 1.442695, %v3174_v2  ;;  %v15869_v31 = vadd.f32 %v15537_v30, %v2962_v0  ;;  %v2964_v3 = vmul.f32 %v15528_v48, %v15677_v8 }
 0x3a4   :  { %16610 = vst [vmem:[#allocation42_spill] sm:$0xff] %v15861_v57  ;;  %16611 = vst [vmem:[#allocation43_spill] sm:$0xff] %v15863_v19  ;;  %v14388_v29 = vpop.eup %14387  ;;  %v3423_v25 = vsel %vm3103_vm4, %v15744_v59, %v12451_v37  ;;  %14397 = vpow2.f32 %v3261_v10  ;;  %v3267_v19 = vmul.f32 1.442695, %v3175_v27  ;;  %v15876_v57 = vpop.f32.mrb[29].mxu1  ;;  %v3420_v15 = vsel %vm3100_vm5, %v15720_v51, %v12448_v36 }
 0x3a5   :  { %v14390_v35 = vpop.eup %14389  ;;  %v12453_v6 = vadd.f32 -1.0, %v14388_v29  ;;  %v15878_v21 = vpop.f32.mrb[61].mxu0  ;;  %v3475_v50 = vpack.c.bf16 %v3423_v25, %v3419_v5  ;;  %14399 = vpow2.f32 %v3265_v54  ;;  %v3422_v10 = vsel %vm3102_vm7, %v15741_v49, %v12450_v52  ;;  %v15914_v25 = vld [vmem:[#allocation14 + $0x450] sm:$0xff] }
 0x3a6   :  { %v12452_v0 = vadd.f32 -1.0, %v14390_v35  ;;  %v15883_v8 = vpop.f32.mrb[30].mxu1  ;;  %v15885_v2 = vpop.f32.mrb[62].mxu0  ;;  %14401 = vpow2.f32 %v3267_v19  ;;  %v3177_v37 = vmin.f32 %v15859_v4, 0.0  ;;  %v3176_v49 = vmin.f32 %v15869_v31, 0.0 }
 0x3a7   :  { %v14392_v17 = vpop.eup %14391  ;;  %v3425_v59 = vsel %vm3105_vm8, %v15761_v56, %v12453_v6  ;;  %v15894_v51 = vpop.f32.mrb[31].mxu1  ;;  %3507 = vst [vmem:[#allocation3 + $0x40] sm:$0xff] %v3475_v50  ;;  %v15903_v56 = vadd.f32 %v15540_v9, %v2964_v3  ;;  %v2965_v19 = vmul.f32 %v15519_v46, %v15702_v34  ;;  %v15916_v6 = vld [vmem:[#allocation14 + $0x470] sm:$0xff]  ;;  %vm3107_vm11 = vcmp.gt.f32.partialorder %v15796_v41, 0.0 }
 0x3a8   :  { %v15896_v5 = vpop.f32.mrb[63].mxu0  ;;  %v3477_v36 = vpack.c.bf16 %v3425_v59, %v3421_v63  ;;  %v3424_v27 = vsel %vm3104_vm9, %v15764_v55, %v12452_v0  ;;  %v12454_v29 = vadd.f32 -1.0, %v14392_v17  ;;  %v3271_v54 = vmul.f32 1.442695, %v3177_v37 }
 0x3a9   :  { %v3476_v52 = vpack.c.bf16 %v3424_v27, %v3420_v15  ;;  %v3269_v35 = vmul.f32 1.442695, %v3176_v49  ;;  %v2967_v55 = vmul.f32 %v15522_v44, %v15707_v60  ;;  %v2966_v17 = vmul.f32 %v15525_v61, %v15709_v7 }
 0x3aa   :  { %3509 = vst [vmem:[#allocation3 + $0x50] sm:$0xff] %v3477_v36  ;;  %v3426_v63 = vsel %vm3106_vm10, %v15789_v38, %v12454_v29  ;;  %v14394_v3 = vpop.eup %14393  ;;  %14403 = vpow2.f32 %v3271_v54  ;;  %v3178_v50 = vmin.f32 %v15903_v56, 0.0  ;;  %v15920_v38 = vadd.f32 %v15531_v13, %v2965_v19 }
 0x3ab   :  { %3508 = vst [vmem:[#allocation3 + $0x48] sm:$0xff] %v3476_v52  ;;  %v3478_v15 = vpack.c.bf16 %v3426_v63, %v3422_v10  ;;  %v14396_v34 = vpop.eup %14395  ;;  %14405 = vpow2.f32 %v3269_v35  ;;  %v15923_v60 = vadd.f32 %v15534_v62, %v2967_v55  ;;  %v15927_v7 = vadd.f32 %v15537_v30, %v2966_v17 }
 0x3ac   :  { %v2968_v0 = vmul.f32 %v15528_v48, %v15713_v18  ;;  %v12508_v10 = vcombine.high %v15914_v25, %v15916_v6  ;;  %v12455_v59 = vadd.f32 -1.0, %v14394_v3  ;;  %v12457_v37 = vadd.f32 -1.0, %v14396_v34 }
 0x3ad   :  { %3510 = vst [vmem:[#allocation3 + $0x58] sm:$0xff] %v3478_v15  ;;  %v3273_v36 = vmul.f32 1.442695, %v3178_v50  ;;  %v3179_v27 = vmin.f32 %v15920_v38, 0.0  ;;  %vm3109_vm12 = vcmp.gt.f32.partialorder %v15813_v43, 0.0  ;;  %vm3108_vm13 = vcmp.gt.f32.partialorder %v15839_v23, 0.0 }
 0x3ae   :  { %v14398_v29 = vpop.eup %14397  ;;  %v3181_v49 = vmin.f32 %v15923_v60, 0.0  ;;  %v3180_v52 = vmin.f32 %v15927_v7, 0.0  ;;  %vm3111_vm14 = vcmp.gt.f32.partialorder %v15847_v39, 0.0  ;;  %v15940_v19 = vadd.f32 %v15540_v9, %v2968_v0 }
 0x3af   :  { %v14400_v54 = vpop.eup %14399  ;;  %14407 = vpow2.f32 %v3273_v36  ;;  %v3275_v18 = vmul.f32 1.442695, %v3179_v27  ;;  %vm3113_vm15 = vcmp.gt.f32.partialorder %v15859_v4, 0.0  ;;  %v2969_v17 = vmul.f32 %v15519_v46, %v15715_v53 }
 0x3b0   :  { %v14402_v63 = vpop.eup %14401  ;;  %v3279_v35 = vmul.f32 1.442695, %v3181_v49  ;;  %v3277_v55 = vmul.f32 1.442695, %v3180_v52  ;;  %v3427_v3 = vsel %vm3107_vm11, %v15796_v41, %v12455_v59  ;;  %v3429_v15 = vsel %vm3109_vm12, %v15813_v43, %v12457_v37 }
 0x3b1   :  { %v12459_v34 = vadd.f32 -1.0, %v14402_v63  ;;  %vm3112_vm0 = vcmp.gt.f32.partialorder %v15869_v31, 0.0  ;;  %v12456_v50 = vadd.f32 -1.0, %v14398_v29  ;;  %14409 = vpow2.f32 %v3275_v18 }
 0x3b2   :  { %v3182_v0 = vmin.f32 %v15940_v19, 0.0  ;;  %v15952_v36 = vadd.f32 %v15531_v13, %v2969_v17  ;;  %14411 = vpow2.f32 %v3279_v35  ;;  %v2971_v41 = vmul.f32 %v15522_v44, %v15724_v14 }
 0x3b3   :  { %v3431_v53 = vsel %vm3111_vm14, %v15847_v39, %v12459_v34  ;;  %v2970_v43 = vmul.f32 %v15525_v61, %v15726_v33  ;;  %14413 = vpow2.f32 %v3277_v55  ;;  %v2972_v14 = vmul.f32 %v15528_v48, %v15730_v42 }
 0x3b4   :  { %v14404_v59 = vpop.eup %14403  ;;  %v3479_v37 = vpack.c.bf16 %v3431_v53, %v3427_v3  ;;  %v3281_v27 = vmul.f32 1.442695, %v3182_v0  ;;  %v3183_v29 = vmin.f32 %v15952_v36, 0.0  ;;  %v15963_v18 = vadd.f32 %v15534_v62, %v2971_v41 }
 0x3b5   :  { %v14406_v49 = vpop.eup %14405  ;;  %v12461_v52 = vadd.f32 -1.0, %v14404_v59  ;;  %v15966_v39 = vadd.f32 %v15537_v30, %v2970_v43  ;;  %v12458_v63 = vadd.f32 -1.0, %v14400_v54  ;;  %v2973_v55 = vmul.f32 %v15519_v46, %v15755_v11 }
 0x3b6   :  { %3511 = vst [vmem:[#allocation3 + $0x60] sm:$0xff] %v3479_v37  ;;  %v12460_v33 = vadd.f32 -1.0, %v14406_v49  ;;  %v3283_v35 = vmul.f32 1.442695, %v3183_v29  ;;  %v3428_v17 = vsel %vm3108_vm13, %v15839_v23, %v12456_v50  ;;  %14415 = vpow2.f32 %v3281_v27 }
 0x3b7   :  { %v3433_v3 = vsel %vm3113_vm15, %v15859_v4, %v12461_v52  ;;  %v3185_v34 = vmin.f32 %v15963_v18, 0.0  ;;  %v3184_v54 = vmin.f32 %v15966_v39, 0.0  ;;  %v15984_v23 = vadd.f32 %v15540_v9, %v2972_v14 }
 0x3b8   :  { %v3481_v0 = vpack.c.bf16 %v3433_v3, %v3429_v15  ;;  %v3432_v42 = vsel %vm3112_vm0, %v15869_v31, %v12460_v33  ;;  %14417 = vpow2.f32 %v3283_v35  ;;  %v15987_v50 = vadd.f32 %v15531_v13, %v2973_v55 }
 0x3b9   :  { %v14408_v11 = vpop.eup %14407  ;;  %v3480_v53 = vpack.c.bf16 %v3432_v42, %v3428_v17  ;;  %v3287_v41 = vmul.f32 1.442695, %v3185_v34  ;;  %v3285_v43 = vmul.f32 1.442695, %v3184_v54  ;;  %v2975_v15 = vmul.f32 %v15522_v44, %v15757_v24 }
 0x3ba   :  { %3513 = vst [vmem:[#allocation3 + $0x70] sm:$0xff] %v3481_v0  ;;  %v12462_v4 = vadd.f32 -1.0, %v14408_v11  ;;  %v2974_v31 = vmul.f32 %v15525_v61, %v15766_v16  ;;  %vm3110_vm1 = vcmp.gt.f32.partialorder %v15842_v28, 0.0  ;;  %vm3114_vm2 = vcmp.gt.f32.partialorder %v15903_v56, 0.0 }
 0x3bb   :  { %3512 = vst [vmem:[#allocation3 + $0x68] sm:$0xff] %v3480_v53  ;;  %14419 = vpow2.f32 %v3287_v41  ;;  %v3186_v59 = vmin.f32 %v15984_v23, 0.0  ;;  %v14410_v37 = vpop.eup %14409  ;;  %v3430_v27 = vsel %vm3110_vm1, %v15842_v28, %v12458_v63  ;;  %v3187_v49 = vmin.f32 %v15987_v50, 0.0 }
 0x3bc   :  { %v3434_v29 = vsel %vm3114_vm2, %v15903_v56, %v12462_v4  ;;  %14421 = vpow2.f32 %v3285_v43  ;;  %v14412_v24 = vpop.eup %14411  ;;  %v16000_v16 = vadd.f32 %v15534_v62, %v2975_v15  ;;  %v12507_v33 = vcombine.low %v15914_v25, %v15916_v6 }
 0x3bd   :  { %v3482_v52 = vpack.c.bf16 %v3434_v29, %v3430_v27  ;;  %v3289_v14 = vmul.f32 1.442695, %v3186_v59  ;;  %v14414_v35 = vpop.eup %14413  ;;  %vm3115_vm6 = vcmp.gt.f32.partialorder %v15920_v38, 0.0  ;;  %vm3117_vm3 = vcmp.gt.f32.partialorder %v15923_v60, 0.0 }
 0x3be   :  { %v3291_v28 = vmul.f32 1.442695, %v3187_v49  ;;  %v16007_v56 = vadd.f32 %v15537_v30, %v2974_v31  ;;  %vm3116_vm4 = vcmp.gt.f32.partialorder %v15927_v7, 0.0  ;;  %vm3119_vm5 = vcmp.gt.f32.partialorder %v15952_v36, 0.0 }
 0x3bf   :  { %3514 = vst [vmem:[#allocation3 + $0x78] sm:$0xff] %v3482_v52  ;;  %vm3121_vm7 = vcmp.gt.f32.partialorder %v15963_v18, 0.0  ;;  %14423 = vpow2.f32 %v3289_v14  ;;  %v3189_v63 = vmin.f32 %v16000_v16, 0.0  ;;  %v12463_v55 = vadd.f32 -1.0, %v14410_v37 }
 0x3c0   :  { %v12465_v17 = vadd.f32 -1.0, %v14412_v24  ;;  %vm3120_vm8 = vcmp.gt.f32.partialorder %v15966_v39, 0.0  ;;  %v3188_v3 = vmin.f32 %v16007_v56, 0.0  ;;  %v14416_v34 = vpop.eup %14415  ;;  %14425 = vpow2.f32 %v3291_v28 }
 0x3c1   :  { %v3295_v0 = vmul.f32 1.442695, %v3189_v63  ;;  %v2976_v42 = vmul.f32 %v15528_v48, %v15768_v32  ;;  %v2977_v54 = vmul.f32 %v15519_v46, %v15774_v22  ;;  %v12464_v53 = vadd.f32 -1.0, %v14414_v35 }
 0x3c2   :  { %v14418_v11 = vpop.eup %14417  ;;  %vm3118_vm9 = vcmp.gt.f32.partialorder %v15940_v19, 0.0  ;;  %v3293_v41 = vmul.f32 1.442695, %v3188_v3  ;;  %v2979_v4 = vmul.f32 %v15522_v44, %v15776_v47  ;;  %v2978_v43 = vmul.f32 %v15525_v61, %v15782_v1 }
 0x3c3   :  { %v12467_v15 = vadd.f32 -1.0, %v14418_v11  ;;  %vm3122_vm10 = vcmp.gt.f32.partialorder %v15984_v23, 0.0  ;;  %14427 = vpow2.f32 %v3295_v0  ;;  %v16026_v32 = vadd.f32 %v15540_v9, %v2976_v42 }
 0x3c4   :  { %v2980_v22 = vmul.f32 %v15528_v48, %v15791_v20  ;;  %14429 = vpow2.f32 %v3293_v41  ;;  %v16031_v31 = vadd.f32 %v15531_v13, %v2977_v54  ;;  %v16034_v59 = vadd.f32 %v15534_v62, %v2979_v4 }
 0x3c5   :  { %v16037_v47 = vadd.f32 %v15537_v30, %v2978_v43  ;;  %v14420_v1 = vpop.eup %14419  ;;  %v3435_v37 = vsel %vm3115_vm6, %v15920_v38, %v12463_v55  ;;  %v3437_v27 = vsel %vm3117_vm3, %v15923_v60, %v12465_v17  ;;  %v3439_v20 = vsel %vm3119_vm5, %v15952_v36, %v12467_v15 }
 0x3c6   :  { %v3190_v29 = vmin.f32 %v16026_v32, 0.0  ;;  %v14422_v49 = vpop.eup %14421  ;;  %v12466_v24 = vadd.f32 -1.0, %v14416_v34  ;;  %v3483_v52 = vpack.c.bf16 %v3439_v20, %v3435_v37  ;;  %v12469_v14 = vadd.f32 -1.0, %v14420_v1 }
 0x3c7   :  { %v3191_v35 = vmin.f32 %v16031_v31, 0.0  ;;  %v12468_v28 = vadd.f32 -1.0, %v14422_v49  ;;  %v3193_v38 = vmin.f32 %v16034_v59, 0.0  ;;  %v16052_v55 = vadd.f32 %v15540_v9, %v2980_v22 }
 0x3c8   :  { %v3297_v63 = vmul.f32 1.442695, %v3190_v29  ;;  %v3436_v60 = vsel %vm3116_vm4, %v15927_v7, %v12464_v53  ;;  %3515 = vst [vmem:[#allocation3 + $0x80] sm:$0xff] %v3483_v52  ;;  %v3441_v36 = vsel %vm3121_vm7, %v15963_v18, %v12469_v14  ;;  %v3192_v3 = vmin.f32 %v16037_v47, 0.0 }
 0x3c9   :  { %v3299_v17 = vmul.f32 1.442695, %v3191_v35  ;;  %v14424_v34 = vpop.eup %14423  ;;  %v3485_v0 = vpack.c.bf16 %v3441_v36, %v3437_v27  ;;  %v3440_v42 = vsel %vm3120_vm8, %v15966_v39, %v12468_v28  ;;  %vm3123_vm11 = vcmp.gt.f32.partialorder %v15987_v50, 0.0  ;;  %v3690_v35 = vld [vmem:[#allocation3 + $0x28] sm:$0xf0] }
 0x3ca   :  { %14431 = vpow2.f32 %v3297_v63  ;;  %v3303_v54 = vmul.f32 1.442695, %v3193_v38  ;;  %v3484_v11 = vpack.c.bf16 %v3440_v42, %v3436_v60  ;;  %v12470_v7 = vadd.f32 -1.0, %v14424_v34  ;;  %v14426_v41 = vpop.eup %14425  ;;  %v16612_v34 = vld [vmem:[#allocation39_spill] sm:$0xff] }
 0x3cb   :  { %14433 = vpow2.f32 %v3299_v17  ;;  %v3301_v53 = vmul.f32 1.442695, %v3192_v3  ;;  %v3438_v18 = vsel %vm3118_vm9, %v15940_v19, %v12466_v24  ;;  %3517 = vst [vmem:[#allocation3 + $0x90] sm:$0xff] %v3485_v0  ;;  %vm3125_vm12 = vcmp.gt.f32.partialorder %v16000_v16, 0.0 }
 0x3cc   :  { %14435 = vpow2.f32 %v3303_v54  ;;  %v3194_v4 = vmin.f32 %v16052_v55, 0.0  ;;  %3516 = vst [vmem:[#allocation3 + $0x88] sm:$0xff] %v3484_v11  ;;  %v3442_v39 = vsel %vm3122_vm10, %v15984_v23, %v12470_v7  ;;  %v2981_v43 = vmul.f32 %v15519_v46, %v15805_v45 }
 0x3cd   :  { %14437 = vpow2.f32 %v3301_v53  ;;  %v2983_v15 = vmul.f32 %v15522_v44, %v15807_v26  ;;  %v14428_v22 = vpop.eup %14427  ;;  %v3486_v19 = vpack.c.bf16 %v3442_v39, %v3438_v18  ;;  %vm3124_vm13 = vcmp.gt.f32.partialorder %v16007_v56, 0.0 }
 0x3ce   :  { %v3305_v1 = vmul.f32 1.442695, %v3194_v4  ;;  %v2982_v37 = vmul.f32 %v15525_v61, %v15815_v12  ;;  %v14430_v27 = vpop.eup %14429  ;;  %v12471_v20 = vadd.f32 -1.0, %v14426_v41  ;;  %v16081_v29 = vadd.f32 %v15531_v13, %v2981_v43 }
 0x3cf   :  { %v16084_v23 = vadd.f32 %v15534_v62, %v2983_v15  ;;  %v2984_v45 = vmul.f32 %v15528_v48, %v15817_v58  ;;  %3518 = vst [vmem:[#allocation3 + $0x98] sm:$0xff] %v3486_v19  ;;  %v12473_v26 = vadd.f32 -1.0, %v14428_v22  ;;  %v2985_v12 = vmul.f32 %v15519_v46, %v15824_v40 }
 0x3d0   :  { %14439 = vpow2.f32 %v3305_v1  ;;  %v16089_v49 = vadd.f32 %v15537_v30, %v2982_v37  ;;  %v12472_v24 = vadd.f32 -1.0, %v14430_v27  ;;  %vm3126_vm14 = vcmp.gt.f32.partialorder %v16026_v32, 0.0  ;;  %v3686_v37 = vld [vmem:[#allocation3 + $0x28] sm:$0xf] }
 0x3d1   :  { %vm3127_vm15 = vcmp.gt.f32.partialorder %v16031_v31, 0.0  ;;  %v3195_v52 = vmin.f32 %v16081_v29, 0.0  ;;  %vm3129_vm0 = vcmp.gt.f32.partialorder %v16034_v59, 0.0  ;;  %vm3128_vm1 = vcmp.gt.f32.partialorder %v16037_v47, 0.0 }
 0x3d2   :  { %v3197_v58 = vmin.f32 %v16084_v23, 0.0  ;;  %v3196_v14 = vmin.f32 %v16089_v49, 0.0  ;;  %v3443_v40 = vsel %vm3123_vm11, %v15987_v50, %v12471_v20  ;;  %v16104_v63 = vadd.f32 %v15540_v9, %v2984_v45  ;;  %v3692_v50 = vld [vmem:[#allocation3 + $0x38] sm:$0xf0] }
 0x3d3   :  { %v3307_v28 = vmul.f32 1.442695, %v3195_v52  ;;  %v16107_v38 = vadd.f32 %v15531_v13, %v2985_v12  ;;  %v3445_v36 = vsel %vm3125_vm12, %v16000_v16, %v12473_v26  ;;  %vm3130_vm2 = vcmp.gt.f32.partialorder %v16052_v55, 0.0  ;;  %v3689_v26 = vld [vmem:[#allocation3 + $0x20] sm:$0xf0] }
 0x3d4   :  { %v14432_v60 = vpop.eup %14431  ;;  %v3311_v17 = vmul.f32 1.442695, %v3197_v58  ;;  %v3309_v3 = vmul.f32 1.442695, %v3196_v14  ;;  %v2987_v0 = vmul.f32 %v15522_v44, %v16612_v34  ;;  %v3444_v54 = vsel %vm3124_vm13, %v16007_v56, %v12472_v24  ;;  %v3691_v12 = vld [vmem:[#allocation3 + $0x30] sm:$0xf0] }
 0x3d5   :  { %v14434_v42 = vpop.eup %14433  ;;  %14441 = vpow2.f32 %v3307_v28  ;;  %v3198_v11 = vmin.f32 %v16104_v63, 0.0  ;;  %v3698_v7 = vrot.slane %v3690_v35, 4  ;;  %v12474_v41 = vadd.f32 -1.0, %v14432_v60  ;;  %v3688_v14 = vld [vmem:[#allocation3 + $0x38] sm:$0xf] }
 0x3d6   :  { %v14436_v53 = vpop.eup %14435  ;;  %v12475_v16 = vadd.f32 -1.0, %v14434_v42  ;;  %14443 = vpow2.f32 %v3311_v17  ;;  %v3199_v18 = vmin.f32 %v16107_v38, 0.0  ;;  %v3700_v15 = vrot.slane %v3692_v50, 4  ;;  %v16613_v60 = vld [vmem:[#allocation40_spill] sm:$0xff] }
 0x3d7   :  { %v14438_v4 = vpop.eup %14437  ;;  %v12477_v39 = vadd.f32 -1.0, %v14436_v53  ;;  %14445 = vpow2.f32 %v3309_v3  ;;  %v3313_v43 = vmul.f32 1.442695, %v3198_v11  ;;  %v16124_v1 = vadd.f32 %v15534_v62, %v2987_v0  ;;  %v16614_v3 = vld [vmem:[#allocation41_spill] sm:$0xff]  ;;  %v16140_v0 = vld [vmem:[#allocation14 + $0x458] sm:$0xff] }
 0x3d8   :  { %v3447_v22 = vsel %vm3127_vm15, %v16031_v31, %v12475_v16  ;;  %v12476_v56 = vadd.f32 -1.0, %v14438_v4  ;;  %v3315_v19 = vmul.f32 1.442695, %v3199_v18  ;;  %v3706_v45 = vmax.bf16 %v3698_v7, %v3686_v37  ;;  %v3685_v11 = vld [vmem:[#allocation3 + $0x20] sm:$0xf]  ;;  %v16615_v7 = vld [vmem:[#allocation42_spill] sm:$0xff] }
 0x3d9   :  { %v3487_v27 = vpack.c.bf16 %v3447_v22, %v3443_v40  ;;  %v3449_v20 = vsel %vm3129_vm0, %v16034_v59, %v12477_v39  ;;  %14447 = vpow2.f32 %v3313_v43  ;;  %v3446_v31 = vsel %vm3126_vm14, %v16026_v32, %v12474_v41  ;;  %v16149_v41 = vld [vmem:[#allocation14 + $0x490] sm:$0xff]  ;;  %v16161_v22 = vld [vmem:[#allocation14 + $0x4b8] sm:$0xff] }
 0x3da   :  { %v14440_v24 = vpop.eup %14439  ;;  %v3489_v52 = vpack.c.bf16 %v3449_v20, %v3445_v36  ;;  %v3448_v58 = vsel %vm3128_vm1, %v16037_v47, %v12476_v56  ;;  %14449 = vpow2.f32 %v3315_v19  ;;  %v3201_v59 = vmin.f32 %v16124_v1, 0.0  ;;  %v16142_v47 = vld [vmem:[#allocation14 + $0x478] sm:$0xff]  ;;  %v16151_v16 = vld [vmem:[#allocation14 + $0x4b0] sm:$0xff] }
 0x3db   :  { %3519 = vst [vmem:[#allocation3 + $0xa0] sm:$0xff] %v3487_v27  ;;  %v3488_v35 = vpack.c.bf16 %v3448_v58, %v3444_v54  ;;  %v12478_v40 = vadd.f32 -1.0, %v14440_v24  ;;  %v3708_v28 = vmax.bf16 %v3700_v15, %v3688_v14  ;;  %v2986_v17 = vmul.f32 %v15525_v61, %v16613_v60  ;;  %v3687_v43 = vld [vmem:[#allocation3 + $0x30] sm:$0xf] }
 0x3dc   :  { %3521 = vst [vmem:[#allocation3 + $0xb0] sm:$0xff] %v3489_v52  ;;  %v2988_v32 = vmul.f32 %v15528_v48, %v16614_v3  ;;  %v3697_v36 = vrot.slane %v3689_v26, 4  ;;  %v3699_v34 = vrot.slane %v3691_v12, 4  ;;  %v3319_v42 = vmul.f32 1.442695, %v3201_v59  ;;  %v16616_v27 = vld [vmem:[#allocation43_spill] sm:$0xff] }
 0x3dd   :  { %3520 = vst [vmem:[#allocation3 + $0xa8] sm:$0xff] %v3488_v35  ;;  %v3450_v50 = vsel %vm3130_vm2, %v16052_v55, %v12478_v40  ;;  %v3710_v54 = vmax.bf16 %v3708_v28, %v3706_v45  ;;  %v2989_v53 = vmul.f32 %v15519_v46, %v16615_v7  ;;  %v16154_v4 = vadd.f32 %v15537_v30, %v2986_v17  ;;  %v16159_v55 = vld [vmem:[#allocation14 + $0x498] sm:$0xff] }
 0x3de   :  { %v3490_v18 = vpack.c.bf16 %v3450_v50, %v3446_v31  ;;  %v16157_v39 = vadd.f32 %v15540_v9, %v2988_v32  ;;  %v3705_v15 = vmax.bf16 %v3697_v36, %v3685_v11  ;;  %14451 = vpow2.f32 %v3319_v42  ;;  %v16618_v50 = vld [vmem:[#allocation34_spill] sm:$0xff]  ;;  %v16620_v11 = vld [vmem:[#allocation35_spill] sm:$0xff]  ;;  %v16621_v7 = vld [vmem:[#allocation36_spill] sm:$0xff] }
 0x3df   :  { %v14442_v56 = vpop.eup %14441  ;;  %4512 = vmatprep.mubr.bf16.mxu1 %v3710_v54  ;;  %4553 = vmatprep.mubr.bf16.mxu0 %v3710_v54  ;;  %v3707_v19 = vmax.bf16 %v3699_v34, %v3687_v43  ;;  %v16164_v37 = vadd.f32 %v15531_v13, %v2989_v53  ;;  %v2991_v20 = vmul.f32 %v15522_v44, %v16616_v27  ;;  %v3200_v26 = vmin.f32 %v16154_v4, 0.0 }
 0x3e0   :  { %v14444_v45 = vpop.eup %14443  ;;  %3522 = vst [vmem:[#allocation3 + $0xb8] sm:$0xff] %v3490_v18  ;;  %v12509_v12 = vcombine.low %v16140_v0, %v16142_v47  ;;  %v12510_v24 = vcombine.high %v16140_v0, %v16142_v47  ;;  %v12516_v31 = vcombine.high %v16149_v41, %v16151_v16  ;;  %v3202_v58 = vmin.f32 %v16157_v39, 0.0  ;;  %v16617_v47 = vld [vmem:[#allocation33_spill] sm:$0xff] }
 0x3e1   :  { %v14446_v52 = vpop.eup %14445  ;;  %v16176_v14 = vmax.bf16 %v3707_v19, %v3705_v15  ;;  %v12515_v35 = vcombine.low %v16149_v41, %v16151_v16  ;;  %v12517_v40 = vcombine.low %v16159_v55, %v16161_v22  ;;  %v12479_v59 = vadd.f32 -1.0, %v14442_v56  ;;  %v3739_v16 = vld [vmem:[#allocation14 + $0x4d8] sm:$0xff] }
 0x3e2   :  { %v3317_v28 = vmul.f32 1.442695, %v3200_v26  ;;  %v3203_v60 = vmin.f32 %v16164_v37, 0.0  ;;  %v12518_v17 = vcombine.high %v16159_v55, %v16161_v22  ;;  %vm3131_vm6 = vcmp.gt.f32.partialorder %v16081_v29, 0.0 }
 0x3e3   :  { %v14448_v3 = vpop.eup %14447  ;;  %v3321_v32 = vmul.f32 1.442695, %v3202_v58  ;;  %4513 = vmatmul.mubr.bf16.vlgmr.msra.gmra.mrb[32].mxu1 %v16176_v14  ;;  %4554 = vmatmul.mubr.bf16.vlgmr.msra.gmra.mrb[64].mxu0 %v16176_v14  ;;  %v16189_v36 = vadd.f32 %v15534_v62, %v2991_v20  ;;  %v2990_v34 = vmul.f32 %v15525_v61, %v15876_v57  ;;  %vm3133_vm3 = vcmp.gt.f32.partialorder %v16084_v23, 0.0 }
 0x3e4   :  { %v14450_v0 = vpop.eup %14449  ;;  %vm3135_vm4 = vcmp.gt.f32.partialorder %v16107_v38, 0.0  ;;  %vm3137_vm5 = vcmp.gt.f32.partialorder %v16124_v1, 0.0  ;;  %14453 = vpow2.f32 %v3317_v28  ;;  %v16619_v42 = vcombine.low %v16617_v47, %v16618_v50  ;;  %4594 = vmatprep.mubr.bf16.mxu1 %v3710_v54  ;;  %4635 = vmatprep.mubr.bf16.mxu0 %v3710_v54  ;;  %v3747_v50 = vld [vmem:[#allocation14 + $0x518] sm:$0xff] }
 0x3e5   :  { %v16622_v53 = vcombine.low %v16620_v11, %v16621_v7  ;;  %v12481_v18 = vadd.f32 -1.0, %v14444_v45  ;;  %vm3132_vm7 = vcmp.gt.f32.partialorder %v16089_v49, 0.0  ;;  %v12483_v57 = vadd.f32 -1.0, %v14450_v0 }
 0x3e6   :  { %4563 = vmatpush1.bf16.msra.mxu1 %v16619_v42  ;;  %14455 = vpow2.f32 %v3321_v32  ;;  %v3205_v43 = vmin.f32 %v16189_v36, 0.0  ;;  %v3451_v15 = vsel %vm3131_vm6, %v16081_v29, %v12479_v59  ;;  %v3323_v56 = vmul.f32 1.442695, %v3203_v60  ;;  %v3746_v32 = vld [vmem:[#allocation14 + $0x510] sm:$0xff]  ;;  %v3751_v42 = vld [vmem:[#allocation14 + $0x538] sm:$0xff] }
 0x3e7   :  { %4604 = vmatpush1.bf16.msra.mxu0 %v16622_v53  ;;  %4564 = vmatprep.subr.bf16.mxu1 %v12508_v10  ;;  %v16211_v19 = vadd.f32 %v15537_v30, %v2990_v34  ;;  %v2992_v27 = vmul.f32 %v15528_v48, %v15878_v21  ;;  %vm3134_vm8 = vcmp.gt.f32.partialorder %v16104_v63, 0.0  ;;  %v3455_v54 = vsel %vm3135_vm4, %v16107_v38, %v12483_v57  ;;  %v3750_v34 = vld [vmem:[#allocation14 + $0x530] sm:$0xff] }
 0x3e8   :  { %4605 = vmatprep.subr.bf16.mxu0 %v12510_v24  ;;  %v3327_v20 = vmul.f32 1.442695, %v3205_v43  ;;  %v2993_v29 = vmul.f32 %v15519_v46, %v15883_v8  ;;  %v2995_v10 = vmul.f32 %v15522_v44, %v15885_v2  ;;  %v3491_v45 = vpack.c.bf16 %v3455_v54, %v3451_v15  ;;  %v14452_v38 = vpop.eup %14451  ;;  %v3754_v53 = vld [vmem:[#allocation14 + $0x550] sm:$0xff]  ;;  %v3755_v15 = vld [vmem:[#allocation14 + $0x558] sm:$0xff] }
 0x3e9   :  { %vm3136_vm9 = vcmp.gt.f32.partialorder %v16154_v4, 0.0  ;;  %v3204_v21 = vmin.f32 %v16211_v19, 0.0  ;;  %v16229_v26 = vadd.f32 %v15540_v9, %v2992_v27  ;;  %v12480_v24 = vadd.f32 -1.0, %v14446_v52 }
 0x3ea   :  { %4565 = vmatpush1.bf16.msra.mxu1 %v12507_v33  ;;  %vm3138_vm10 = vcmp.gt.f32.partialorder %v16157_v39, 0.0  ;;  %v16233_v46 = vadd.f32 %v15531_v13, %v2993_v29  ;;  %v16236_v44 = vadd.f32 %v15534_v62, %v2995_v10  ;;  %v2994_v8 = vmul.f32 %v15525_v61, %v15894_v51  ;;  %3523 = vst [vmem:[#allocation3 + $0xc0] sm:$0xff] %v3491_v45  ;;  %v3762_v45 = vld [vmem:[#allocation14 + $0x590] sm:$0xff] }
 0x3eb   :  { %4606 = vmatpush1.bf16.msra.mxu0 %v12509_v12  ;;  %4566 = vmatprep.subr.bf16.mxu1 %v12516_v31  ;;  %v12485_v2 = vadd.f32 -1.0, %v14452_v38  ;;  %14457 = vpow2.f32 %v3323_v56  ;;  %v3325_v25 = vmul.f32 1.442695, %v3204_v21  ;;  %v3206_v6 = vmin.f32 %v16229_v26, 0.0  ;;  %v3738_v12 = vld [vmem:[#allocation14 + $0x4d0] sm:$0xff]  ;;  %v3759_v56 = vld [vmem:[#allocation14 + $0x578] sm:$0xff] }
 0x3ec   :  { %4607 = vmatprep.subr.bf16.mxu0 %v12518_v17  ;;  %v3453_v33 = vsel %vm3133_vm3, %v16084_v23, %v12481_v18  ;;  %14459 = vpow2.f32 %v3327_v20  ;;  %v3207_v13 = vmin.f32 %v16233_v46, 0.0  ;;  %v3209_v62 = vmin.f32 %v16236_v44, 0.0  ;;  %v3742_v31 = vld [vmem:[#allocation14 + $0x4f0] sm:$0xff] }
 0x3ed   :  { %v12482_v52 = vadd.f32 -1.0, %v14448_v3  ;;  %v3457_v61 = vsel %vm3137_vm5, %v16124_v1, %v12485_v2  ;;  %v3329_v51 = vmul.f32 1.442695, %v3206_v6  ;;  %v16250_v58 = vadd.f32 %v15537_v30, %v2994_v8  ;;  %v3758_v18 = vld [vmem:[#allocation14 + $0x570] sm:$0xff]  ;;  %v3763_v8 = vld [vmem:[#allocation14 + $0x598] sm:$0xff] }
 0x3ee   :  { %4567 = vmatpush1.bf16.msra.mxu1 %v12515_v35  ;;  %v3493_v23 = vpack.c.bf16 %v3457_v61, %v3453_v33  ;;  %v3331_v59 = vmul.f32 1.442695, %v3207_v13  ;;  %v3335_v28 = vmul.f32 1.442695, %v3209_v62  ;;  %v2996_v60 = vmul.f32 %v15528_v48, %v15896_v5  ;;  %v14454_v17 = vpop.eup %14453  ;;  %v3743_v35 = vld [vmem:[#allocation14 + $0x4f8] sm:$0xff]  ;;  %v3766_v21 = vld [vmem:[#allocation14 + $0x5b0] sm:$0xff] }
 0x3ef   :  { %4608 = vmatpush1.bf16.msra.mxu0 %v12517_v40  ;;  %v3452_v30 = vsel %vm3132_vm7, %v16089_v49, %v12480_v24  ;;  %14461 = vpow2.f32 %v3325_v25  ;;  %v3208_v1 = vmin.f32 %v16250_v58, 0.0  ;;  %v12523_v41 = vcombine.low %v3738_v12, %v3742_v31  ;;  %v3767_v2 = vld [vmem:[#allocation14 + $0x5b8] sm:$0xff] }
 0x3f0   :  { %v14456_v3 = vpop.eup %14455  ;;  %3525 = vst [vmem:[#allocation3 + $0xd0] sm:$0xff] %v3493_v23  ;;  %v12484_v55 = vadd.f32 -1.0, %v14454_v17  ;;  %14463 = vpow2.f32 %v3331_v59  ;;  %v16265_v22 = vadd.f32 %v15540_v9, %v2996_v60  ;;  %v12524_v40 = vcombine.high %v3738_v12, %v3742_v31  ;;  %v3770_v31 = vld [vmem:[#allocation14 + $0x5d0] sm:$0xff] }
 0x3f1   :  { %v3454_v48 = vsel %vm3134_vm8, %v16104_v63, %v12482_v52  ;;  %v12486_v5 = vadd.f32 -1.0, %v14456_v3  ;;  %14465 = vpow2.f32 %v3335_v28  ;;  %v3333_v49 = vmul.f32 1.442695, %v3208_v1  ;;  %v3774_v52 = vld [vmem:[#allocation14 + $0x5f0] sm:$0xff]  ;;  %v3775_v1 = vld [vmem:[#allocation14 + $0x5f8] sm:$0xff] }
 0x3f2   :  { %v3456_v0 = vsel %vm3136_vm9, %v16154_v4, %v12484_v55  ;;  %14467 = vpow2.f32 %v3329_v51  ;;  %v3210_v47 = vmin.f32 %v16265_v22, 0.0  ;;  %4568 = vmatprep.subr.bf16.mxu1 %v12524_v40  ;;  %v12525_v9 = vcombine.low %v3739_v16, %v3743_v35 }
 0x3f3   :  { %v3492_v11 = vpack.c.bf16 %v3456_v0, %v3452_v30  ;;  %v3458_v63 = vsel %vm3138_vm10, %v16157_v39, %v12486_v5  ;;  %14469 = vpow2.f32 %v3333_v49  ;;  %v12526_v7 = vcombine.high %v3739_v16, %v3743_v35  ;;  %4569 = vmatpush1.bf16.msra.mxu1 %v12523_v41  ;;  %v3771_v30 = vld [vmem:[#allocation14 + $0x5d8] sm:$0xff] }
 0x3f4   :  { %v3494_v57 = vpack.c.bf16 %v3458_v63, %v3454_v48  ;;  %v3337_v43 = vmul.f32 1.442695, %v3210_v47  ;;  %v12531_v4 = vcombine.low %v3746_v32, %v3750_v34  ;;  %v12532_v54 = vcombine.high %v3746_v32, %v3750_v34  ;;  %v3778_v32 = vld [vmem:[#allocation14 + $0x610] sm:$0xff] }
 0x3f5   :  { %v14458_v27 = vpop.eup %14457  ;;  %3524 = vst [vmem:[#allocation3 + $0xc8] sm:$0xff] %v3492_v11  ;;  %4609 = vmatprep.subr.bf16.mxu0 %v12526_v7  ;;  %v12534_v20 = vcombine.high %v3747_v50, %v3751_v42  ;;  %v12533_v39 = vcombine.low %v3747_v50, %v3751_v42  ;;  %v12540_v10 = vcombine.high %v3754_v53, %v3758_v18  ;;  %vm3139_vm11 = vcmp.gt.f32.partialorder %v16164_v37, 0.0  ;;  %v3782_v34 = vld [vmem:[#allocation14 + $0x630] sm:$0xff]  ;;  %v3779_v50 = vld [vmem:[#allocation14 + $0x618] sm:$0xff] }
 0x3f6   :  { %v14460_v29 = vpop.eup %14459  ;;  %3526 = vst [vmem:[#allocation3 + $0xd8] sm:$0xff] %v3494_v57  ;;  %14471 = vpow2.f32 %v3337_v43  ;;  %4610 = vmatpush1.bf16.msra.mxu0 %v12525_v9  ;;  %4570 = vmatprep.subr.bf16.mxu1 %v12532_v54  ;;  %v12542_v38 = vcombine.high %v3755_v15, %v3759_v56  ;;  %v12539_v24 = vcombine.low %v3754_v53, %v3758_v18  ;;  %v12487_v6 = vadd.f32 -1.0, %v14458_v27  ;;  %v3783_v42 = vld [vmem:[#allocation14 + $0x638] sm:$0xff]  ;;  %v3786_v18 = vld [vmem:[#allocation14 + $0x650] sm:$0xff] }
 0x3f7   :  { %4611 = vmatprep.subr.bf16.mxu0 %v12534_v20  ;;  %4571 = vmatpush1.bf16.msra.mxu1 %v12531_v4  ;;  %v12489_v33 = vadd.f32 -1.0, %v14460_v29  ;;  %v12548_v13 = vcombine.high %v3762_v45, %v3766_v21  ;;  %vm3141_vm12 = vcmp.gt.f32.partialorder %v16189_v36, 0.0  ;;  %v12541_v12 = vcombine.low %v3755_v15, %v3759_v56  ;;  %v3787_v56 = vld [vmem:[#allocation14 + $0x658] sm:$0xff]  ;;  %v3794_v29 = vld [vmem:[#allocation14 + $0x690] sm:$0xff] }
 0x3f8   :  { %4572 = vmatprep.subr.bf16.mxu1 %v12540_v10  ;;  %vm3140_vm13 = vcmp.gt.f32.partialorder %v16211_v19, 0.0  ;;  %vm3143_vm14 = vcmp.gt.f32.partialorder %v16233_v46, 0.0  ;;  %v12550_v23 = vcombine.high %v3763_v8, %v3767_v2  ;;  %vm3145_vm15 = vcmp.gt.f32.partialorder %v16236_v44, 0.0  ;;  %v3791_v27 = vld [vmem:[#allocation14 + $0x678] sm:$0xff] }
 0x3f9   :  { %v14462_v25 = vpop.eup %14461  ;;  %v12547_v17 = vcombine.low %v3762_v45, %v3766_v21  ;;  %v3459_v16 = vsel %vm3139_vm11, %v16164_v37, %v12487_v6  ;;  %v3461_v35 = vsel %vm3141_vm12, %v16189_v36, %v12489_v33  ;;  %v12556_v55 = vcombine.high %v3770_v31, %v3774_v52  ;;  %v3795_v45 = vld [vmem:[#allocation14 + $0x698] sm:$0xff] }
 0x3fa   :  { %v14464_v62 = vpop.eup %14463  ;;  %4612 = vmatpush1.bf16.msra.mxu0 %v12533_v39  ;;  %v12488_v28 = vadd.f32 -1.0, %v14462_v25  ;;  %v12549_v49 = vcombine.low %v3763_v8, %v3767_v2  ;;  %vm3144_vm0 = vcmp.gt.f32.partialorder %v16250_v58, 0.0  ;;  %v12558_v37 = vcombine.high %v3771_v30, %v3775_v1  ;;  %v3798_v39 = vld [vmem:[#allocation14 + $0x6b0] sm:$0xff]  ;;  %v3803_v6 = vld [vmem:[#allocation14 + $0x6d8] sm:$0xff] }
 0x3fb   :  { %v14466_v61 = vpop.eup %14465  ;;  %v12491_v51 = vadd.f32 -1.0, %v14464_v62  ;;  %4613 = vmatprep.subr.bf16.mxu0 %v12542_v38  ;;  %4573 = vmatpush1.bf16.msra.mxu1 %v12539_v24  ;;  %v12564_v7 = vcombine.high %v3778_v32, %v3782_v34  ;;  %vm3142_vm1 = vcmp.gt.f32.partialorder %v16229_v26, 0.0  ;;  %vm3146_vm2 = vcmp.gt.f32.partialorder %v16265_v22, 0.0  ;;  %v3802_v24 = vld [vmem:[#allocation14 + $0x6d0] sm:$0xff]  ;;  %v3807_v33 = vld [vmem:[#allocation14 + $0x6f8] sm:$0xff] }
 0x3fc   :  { %v14468_v59 = vpop.eup %14467  ;;  %v12493_v60 = vadd.f32 -1.0, %v14466_v61  ;;  %4574 = vmatprep.subr.bf16.mxu1 %v12548_v13  ;;  %v3460_v36 = vsel %vm3140_vm13, %v16211_v19, %v12488_v28  ;;  %v12557_v53 = vcombine.low %v3771_v30, %v3775_v1  ;;  %v3790_v19 = vld [vmem:[#allocation14 + $0x670] sm:$0xff]  ;;  %v12566_v43 = vcombine.high %v3779_v50, %v3783_v42 }
 0x3fd   :  { %v14470_v41 = vpop.eup %14469  ;;  %v3463_v3 = vsel %vm3143_vm14, %v16233_v46, %v12491_v51  ;;  %v12490_v0 = vadd.f32 -1.0, %v14468_v59  ;;  %v12563_v15 = vcombine.low %v3778_v32, %v3782_v34  ;;  %v12572_v54 = vcombine.high %v3786_v18, %v3790_v19  ;;  %v3806_v8 = vld [vmem:[#allocation14 + $0x6f0] sm:$0xff]  ;;  %v3811_v51 = vld [vmem:[#allocation14 + $0x718] sm:$0xff] }
 0x3fe   :  { %v3495_v40 = vpack.c.bf16 %v3463_v3, %v3459_v16  ;;  %v3465_v48 = vsel %vm3145_vm15, %v16236_v44, %v12493_v60  ;;  %v12492_v5 = vadd.f32 -1.0, %v14470_v41  ;;  %4614 = vmatpush1.bf16.msra.mxu0 %v12541_v12  ;;  %v12555_v44 = vcombine.low %v3770_v31, %v3774_v52  ;;  %v3810_v12 = vld [vmem:[#allocation14 + $0x710] sm:$0xff]  ;;  %v3819_v41 = vld [vmem:[#allocation14 + $0x758] sm:$0xff] }
 0x3ff   :  { %v3497_v47 = vpack.c.bf16 %v3465_v48, %v3461_v35  ;;  %4615 = vmatprep.subr.bf16.mxu0 %v12550_v23  ;;  %4575 = vmatpush1.bf16.msra.mxu1 %v12547_v17  ;;  %v3462_v57 = vsel %vm3142_vm1, %v16229_v26, %v12490_v0  ;;  %v12565_v20 = vcombine.low %v3779_v50, %v3783_v42  ;;  %v3814_v31 = vld [vmem:[#allocation14 + $0x730] sm:$0xff]  ;;  %v3815_v23 = vld [vmem:[#allocation14 + $0x738] sm:$0xff]  ;;  %vm14798_vm11 = vmmov 0  }
 0x400   :  { %v14472_v9 = vpop.eup %14471  ;;  %3527 = vst [vmem:[#allocation3 + $0xe0] sm:$0xff] %v3495_v40  ;;  %v3464_v46 = vsel %vm3144_vm0, %v16250_v58, %v12492_v5  ;;  %4576 = vmatprep.subr.bf16.mxu1 %v12556_v55  ;;  %v12574_v10 = vcombine.high %v3787_v56, %v3791_v27  ;;  %v12571_v26 = vcombine.low %v3786_v18, %v3790_v19  ;;  %v3818_v60 = vld [vmem:[#allocation14 + $0x750] sm:$0xff]  ;;  %v3823_v16 = vld [vmem:[#allocation14 + $0x778] sm:$0xff] }
 0x401   :  { %3529 = vst [vmem:[#allocation3 + $0xf0] sm:$0xff] %v3497_v47  ;;  %v3496_v11 = vpack.c.bf16 %v3464_v46, %v3460_v36  ;;  %v12494_v63 = vadd.f32 -1.0, %v14472_v9  ;;  %v12580_v21 = vcombine.high %v3794_v29, %v3798_v39  ;;  %v12573_v38 = vcombine.low %v3787_v56, %v3791_v27  ;;  %v3822_v17 = vld [vmem:[#allocation14 + $0x770] sm:$0xff]  ;;  %v3831_v32 = vld [vmem:[#allocation14 + $0x7b8] sm:$0xff]  ;;  %v3538_v46 = vld [vmem:[#allocation3 + $0x18] sm:$0xf0] }
 0x402   :  { %4616 = vmatpush1.bf16.msra.mxu0 %v12549_v49  ;;  %v12579_v25 = vcombine.low %v3794_v29, %v3798_v39  ;;  %v12588_v13 = vcombine.high %v3802_v24, %v3806_v8  ;;  %v12590_v52 = vcombine.high %v3803_v6, %v3807_v33  ;;  %v12587_v61 = vcombine.low %v3802_v24, %v3806_v8  ;;  %v3826_v55 = vld [vmem:[#allocation14 + $0x790] sm:$0xff]  ;;  %v3827_v49 = vld [vmem:[#allocation14 + $0x798] sm:$0xff]  ;;  %v3532_v56 = vld [vmem:[#allocation3 + $0x8] sm:$0xf] }
 0x403   :  { %3528 = vst [vmem:[#allocation3 + $0xe8] sm:$0xff] %v3496_v11  ;;  %v3466_v58 = vsel %vm3146_vm2, %v16265_v22, %v12494_v63  ;;  %4617 = vmatprep.subr.bf16.mxu0 %v12558_v37  ;;  %4577 = vmatpush1.bf16.msra.mxu1 %v12555_v44  ;;  %v3799_v22 = vld [vmem:[#allocation14 + $0x6b8] sm:$0xff]  ;;  %v12596_v59 = vcombine.high %v3810_v12, %v3814_v31  ;;  %v3830_v40 = vld [vmem:[#allocation14 + $0x7b0] sm:$0xff]  ;;  %v3546_v19 = vrot.slane %v3538_v46, 4  ;;  %v3565_v39 = vld [vmem:[#allocation14 + $0x40] sm:$0xff] }
 0x404   :  { %v3498_v4 = vpack.c.bf16 %v3466_v58, %v3462_v57  ;;  %4578 = vmatprep.subr.bf16.mxu1 %v12564_v7  ;;  %v12582_v2 = vcombine.high %v3795_v45, %v3799_v22  ;;  %v12581_v62 = vcombine.low %v3795_v45, %v3799_v22  ;;  %v12589_v28 = vcombine.low %v3803_v6, %v3807_v33  ;;  %v3834_v47 = vld [vmem:[#allocation14 + $0x7d0] sm:$0xff]  ;;  %v3835_v50 = vld [vmem:[#allocation14 + $0x7d8] sm:$0xff]  ;;  %v3557_v7 = vld [vmem:[#allocation14] sm:$0xff] }
 0x405   :  { %v12598_v30 = vcombine.high %v3811_v51, %v3815_v23  ;;  %v12595_v1 = vcombine.low %v3810_v12, %v3814_v31  ;;  %v12604_v35 = vcombine.high %v3818_v60, %v3822_v17  ;;  %v12597_v3 = vcombine.low %v3811_v51, %v3815_v23  ;;  %v3838_v37 = vld [vmem:[#allocation14 + $0x7f0] sm:$0xff]  ;;  %v3839_v42 = vld [vmem:[#allocation14 + $0x7f8] sm:$0xff]  ;;  %v3566_v22 = vld [vmem:[#allocation14 + $0x48] sm:$0xff] }
 0x406   :  { %3530 = vst [vmem:[#allocation3 + $0xf8] sm:$0xff] %v3498_v4  ;;  %4618 = vmatpush1.bf16.msra.mxu0 %v12557_v53  ;;  %v12606_v48 = vcombine.high %v3819_v41, %v3823_v16  ;;  %v12603_v5 = vcombine.low %v3818_v60, %v3822_v17  ;;  %v12612_v34 = vcombine.high %v3826_v55, %v3830_v40  ;;  %v3536_v36 = vld [vmem:[#allocation3 + $0x8] sm:$0xf0]  ;;  %v3561_v53 = vld [vmem:[#allocation14 + $0x20] sm:$0xff]  ;;  %v3562_v4 = vld [vmem:[#allocation14 + $0x28] sm:$0xff] }
 0x407   :  { %4619 = vmatprep.subr.bf16.mxu0 %v12566_v43  ;;  %4579 = vmatpush1.bf16.msra.mxu1 %v12563_v15  ;;  %v12605_v0 = vcombine.low %v3819_v41, %v3823_v16  ;;  %v12614_v9 = vcombine.high %v3827_v49, %v3831_v32  ;;  %v12611_v44 = vcombine.low %v3826_v55, %v3830_v40  ;;  %v3544_v18 = vrot.slane %v3536_v36, 4  ;;  %v3558_v43 = vld [vmem:[#allocation14 + $0x8] sm:$0xff]  ;;  %v3534_v27 = vld [vmem:[#allocation3 + $0x18] sm:$0xf]  ;;  %v3597_v40 = vld [vmem:[#allocation14 + $0x140] sm:$0xff] }
 0x408   :  { %4580 = vmatprep.subr.bf16.mxu1 %v12572_v54  ;;  %v12620_v11 = vcombine.high %v3834_v47, %v3838_v37  ;;  %v12613_v63 = vcombine.low %v3827_v49, %v3831_v32  ;;  %v12622_v57 = vcombine.high %v3835_v50, %v3839_v42  ;;  %v12619_v58 = vcombine.low %v3834_v47, %v3838_v37  ;;  %v3590_v16 = vld [vmem:[#allocation14 + $0x108] sm:$0xff]  ;;  %v3605_v37 = vld [vmem:[#allocation14 + $0x180] sm:$0xff] }
 0x409   :  { %v12624_v15 = vcombine.high %v3557_v7, %v3561_v53  ;;  %v12621_v54 = vcombine.low %v3835_v50, %v3839_v42  ;;  %v3554_v29 = vmax.bf16 %v3546_v19, %v3534_v27  ;;  %v12623_v45 = vcombine.low %v3557_v7, %v3561_v53  ;;  %v3598_v32 = vld [vmem:[#allocation14 + $0x148] sm:$0xff]  ;;  %v3617_v7 = vld [vmem:[#allocation14 + $0x1e0] sm:$0xff] }
 0x40a   :  { %4620 = vmatpush1.bf16.msra.mxu0 %v12565_v20  ;;  %v3552_v20 = vmax.bf16 %v3544_v18, %v3532_v56  ;;  %v12625_v24 = vcombine.low %v3558_v43, %v3562_v4  ;;  %v3610_v50 = vld [vmem:[#allocation14 + $0x1a8] sm:$0xff] }
 0x40b   :  { %4621 = vmatprep.subr.bf16.mxu0 %v12574_v10  ;;  %4581 = vmatpush1.bf16.msra.mxu1 %v12571_v26  ;;  %v3569_v10 = vld [vmem:[#allocation14 + $0x60] sm:$0xff]  ;;  %v12626_v26 = vcombine.high %v3558_v43, %v3562_v4  ;;  %v3614_v19 = vld [vmem:[#allocation14 + $0x1c8] sm:$0xff] }
 0x40c   :  { %4582 = vmatprep.subr.bf16.mxu1 %v12580_v21  ;;  %v3570_v21 = vld [vmem:[#allocation14 + $0x68] sm:$0xff]  ;;  %v16299_v8 = vmax.bf16 %v3554_v29, %v3552_v20  ;;  %v12631_v33 = vcombine.low %v3565_v39, %v3569_v10  ;;  %v3621_v4 = vld [vmem:[#allocation14 + $0x200] sm:$0xff] }
 0x40d   :  { %v12634_v6 = vcombine.high %v3566_v22, %v3570_v21  ;;  %v12633_v31 = vcombine.low %v3566_v22, %v3570_v21  ;;  %v3626_v20 = vld [vmem:[#allocation14 + $0x228] sm:$0xff] }
 0x40e   :  { %4622 = vmatpush1.bf16.msra.mxu0 %v12573_v38  ;;  %v12632_v38 = vcombine.high %v3565_v39, %v3569_v10  ;;  %v3629_v10 = vld [vmem:[#allocation14 + $0x240] sm:$0xff]  ;;  %v3630_v21 = vld [vmem:[#allocation14 + $0x248] sm:$0xff] }
 0x40f   :  { %4623 = vmatprep.subr.bf16.mxu0 %v12582_v2  ;;  %4583 = vmatpush1.bf16.msra.mxu1 %v12579_v25  ;;  %v3573_v2 = vld [vmem:[#allocation14 + $0x80] sm:$0xff] }
 0x410   :  { %4584 = vmatprep.subr.bf16.mxu1 %v12588_v13  ;;  %v3577_v25 = vld [vmem:[#allocation14 + $0xa0] sm:$0xff]  ;;  %v3574_v13 = vld [vmem:[#allocation14 + $0x88] sm:$0xff] }
 0x411   :  { %v12640_v12 = vcombine.high %v3573_v2, %v3577_v25  ;;  %v12639_v23 = vcombine.low %v3573_v2, %v3577_v25  ;;  %v3637_v25 = vld [vmem:[#allocation14 + $0x280] sm:$0xff] }
 0x412   :  { %4624 = vmatpush1.bf16.msra.mxu0 %v12581_v62  ;;  %v3578_v62 = vld [vmem:[#allocation14 + $0xa8] sm:$0xff] }
 0x413   :  { %4625 = vmatprep.subr.bf16.mxu0 %v12590_v52  ;;  %4585 = vmatpush1.bf16.msra.mxu1 %v12587_v61  ;;  %v3581_v52 = vld [vmem:[#allocation14 + $0xc0] sm:$0xff]  ;;  %v12642_v51 = vcombine.high %v3574_v13, %v3578_v62  ;;  %v12641_v17 = vcombine.low %v3574_v13, %v3578_v62  ;;  %v3638_v62 = vld [vmem:[#allocation14 + $0x288] sm:$0xff] }
 0x414   :  { %4586 = vmatprep.subr.bf16.mxu1 %v12596_v59  ;;  %v3585_v61 = vld [vmem:[#allocation14 + $0xe0] sm:$0xff]  ;;  %v3582_v59 = vld [vmem:[#allocation14 + $0xc8] sm:$0xff] }
 0x415   :  { %v12648_v60 = vcombine.high %v3581_v52, %v3585_v61  ;;  %v12647_v41 = vcombine.low %v3581_v52, %v3585_v61  ;;  %v3645_v61 = vld [vmem:[#allocation14 + $0x2c0] sm:$0xff] }
 0x416   :  { %4626 = vmatpush1.bf16.msra.mxu0 %v12589_v28  ;;  %v3586_v28 = vld [vmem:[#allocation14 + $0xe8] sm:$0xff] }
 0x417   :  { %4627 = vmatprep.subr.bf16.mxu0 %v12598_v30  ;;  %4587 = vmatpush1.bf16.msra.mxu1 %v12595_v1  ;;  %v3589_v30 = vld [vmem:[#allocation14 + $0x100] sm:$0xff]  ;;  %v12650_v1 = vcombine.high %v3582_v59, %v3586_v28  ;;  %v12649_v55 = vcombine.low %v3582_v59, %v3586_v28  ;;  %v3646_v28 = vld [vmem:[#allocation14 + $0x2c8] sm:$0xff] }
 0x418   :  { %4588 = vmatprep.subr.bf16.mxu1 %v12604_v35  ;;  %v3594_v35 = vld [vmem:[#allocation14 + $0x128] sm:$0xff] }
 0x419   :  { %v12657_v47 = vcombine.low %v3590_v16, %v3594_v35 }
 0x41a   :  { %4628 = vmatpush1.bf16.msra.mxu0 %v12597_v3 }
 0x41b   :  { %4629 = vmatprep.subr.bf16.mxu0 %v12606_v48  ;;  %4589 = vmatpush1.bf16.msra.mxu1 %v12603_v5  ;;  %v3601_v48 = vld [vmem:[#allocation14 + $0x160] sm:$0xff]  ;;  %v12658_v5 = vcombine.high %v3590_v16, %v3594_v35  ;;  %v3654_v35 = vld [vmem:[#allocation14 + $0x308] sm:$0xff] }
 0x41c   :  { %4590 = vmatprep.subr.bf16.mxu1 %v12612_v34  ;;  %v3602_v34 = vld [vmem:[#allocation14 + $0x168] sm:$0xff]  ;;  %v12663_v46 = vcombine.low %v3597_v40, %v3601_v48 }
 0x41d   :  { %v12666_v36 = vcombine.high %v3598_v32, %v3602_v34 }
 0x41e   :  { %4630 = vmatpush1.bf16.msra.mxu0 %v12605_v0  ;;  %v12664_v0 = vcombine.high %v3597_v40, %v3601_v48  ;;  %v3661_v48 = vld [vmem:[#allocation14 + $0x340] sm:$0xff] }
 0x41f   :  { %4631 = vmatprep.subr.bf16.mxu0 %v12614_v9  ;;  %4591 = vmatpush1.bf16.msra.mxu1 %v12611_v44  ;;  %v3609_v9 = vld [vmem:[#allocation14 + $0x1a0] sm:$0xff]  ;;  %v3606_v44 = vld [vmem:[#allocation14 + $0x188] sm:$0xff] }
 0x420   :  { %4592 = vmatprep.subr.bf16.mxu1 %v12620_v11  ;;  %v12672_v42 = vcombine.high %v3605_v37, %v3609_v9  ;;  %v12665_v11 = vcombine.low %v3598_v32, %v3602_v34  ;;  %v12674_v53 = vcombine.high %v3606_v44, %v3610_v50  ;;  %v12671_v18 = vcombine.low %v3605_v37, %v3609_v9  ;;  %v3662_v34 = vld [vmem:[#allocation14 + $0x348] sm:$0xff]  ;;  %v3669_v9 = vld [vmem:[#allocation14 + $0x380] sm:$0xff] }
 0x421   :  { %v12673_v43 = vcombine.low %v3606_v44, %v3610_v50  ;;  %v3670_v50 = vld [vmem:[#allocation14 + $0x388] sm:$0xff] }
 0x422   :  { %4632 = vmatpush1.bf16.msra.mxu0 %v12613_v63  ;;  %v3613_v63 = vld [vmem:[#allocation14 + $0x1c0] sm:$0xff] }
 0x423   :  { %4633 = vmatprep.subr.bf16.mxu0 %v12622_v57  ;;  %4593 = vmatpush1.bf16.msra.mxu1 %v12619_v58  ;;  %v3618_v57 = vld [vmem:[#allocation14 + $0x1e8] sm:$0xff]  ;;  %v12680_v58 = vcombine.high %v3613_v63, %v3617_v7  ;;  %v12679_v27 = vcombine.low %v3613_v63, %v3617_v7 }
 0x424   :  { %5284 = vmatprep.subr.bf16.mxu1 %v12624_v15  ;;  %v3625_v15 = vld [vmem:[#allocation14 + $0x220] sm:$0xff]  ;;  %v12682_v56 = vcombine.high %v3614_v19, %v3618_v57  ;;  %v12681_v39 = vcombine.low %v3614_v19, %v3618_v57  ;;  %v3535_v63 = vld [vmem:[#allocation3] sm:$0xf0]  ;;  %v3537_v19 = vld [vmem:[#allocation3 + $0x10] sm:$0xf0] }
 0x425   :  { %v12688_v29 = vcombine.high %v3621_v4, %v3625_v15  ;;  %v12687_v22 = vcombine.low %v3621_v4, %v3625_v15  ;;  %v3682_v4 = vld [vmem:[#allocation14 + $0x3e8] sm:$0xff] }
 0x426   :  { %4634 = vmatpush1.bf16.msra.mxu0 %v12621_v54  ;;  %4595 = vmatmul.mubr.bf16.vlgmr.msra.gmra.mrb[36].mxu1 %v16176_v14  ;;  %v3622_v54 = vld [vmem:[#allocation14 + $0x208] sm:$0xff] }
 0x427   :  { %5325 = vmatprep.subr.bf16.mxu0 %v12626_v26  ;;  %5285 = vmatpush1.bf16.msra.mxu1 %v12623_v45  ;;  %v3633_v26 = vld [vmem:[#allocation14 + $0x260] sm:$0xff]  ;;  %v12690_v45 = vcombine.high %v3622_v54, %v3626_v20  ;;  %v12689_v2 = vcombine.low %v3622_v54, %v3626_v20  ;;  %v3559_v20 = vld [vmem:[#allocation14 + $0x10] sm:$0xff] }
 0x428   :  { %5316 = vmatprep.mubr.bf16.mxu1 %v16299_v8  ;;  %5286 = vmatprep.subr.bf16.mxu1 %v12632_v38  ;;  %v3634_v38 = vld [vmem:[#allocation14 + $0x268] sm:$0xff]  ;;  %v12695_v13 = vcombine.low %v3629_v10, %v3633_v26 }
 0x429   :  { %4636 = vmatmul.mubr.bf16.vlgmr.msra.gmra.mrb[68].mxu0 %v16176_v14  ;;  %v3593_v14 = vld [vmem:[#allocation14 + $0x120] sm:$0xff]  ;;  %v12697_v52 = vcombine.low %v3630_v21, %v3634_v38 }
 0x42a   :  { %5326 = vmatpush1.bf16.msra.mxu0 %v12625_v24  ;;  %5357 = vmatprep.mubr.bf16.mxu0 %v16299_v8  ;;  %v12656_v3 = vcombine.high %v3589_v30, %v3593_v14  ;;  %v12655_v49 = vcombine.low %v3589_v30, %v3593_v14  ;;  %v12696_v24 = vcombine.high %v3629_v10, %v3633_v26  ;;  %v3653_v14 = vld [vmem:[#allocation14 + $0x300] sm:$0xff] }
 0x42b   :  { %5327 = vmatprep.subr.bf16.mxu0 %v12634_v6  ;;  %5287 = vmatpush1.bf16.msra.mxu1 %v12631_v33  ;;  %v3641_v6 = vld [vmem:[#allocation14 + $0x2a0] sm:$0xff]  ;;  %v12698_v33 = vcombine.high %v3630_v21, %v3634_v38  ;;  %v3564_v21 = vld [vmem:[#allocation14 + $0x38] sm:$0xff] }
 0x42c   :  { %5288 = vmatprep.subr.bf16.mxu1 %v12640_v12  ;;  %v3642_v12 = vld [vmem:[#allocation14 + $0x2a8] sm:$0xff]  ;;  %v12703_v59 = vcombine.low %v3637_v25, %v3641_v6  ;;  %v3531_v10 = vld [vmem:[#allocation3] sm:$0xf] }
 0x42d   :  { %v12705_v30 = vcombine.low %v3638_v62, %v3642_v12 }
 0x42e   :  { %5328 = vmatpush1.bf16.msra.mxu0 %v12633_v31  ;;  %v12704_v31 = vcombine.high %v3637_v25, %v3641_v6  ;;  %v3567_v6 = vld [vmem:[#allocation14 + $0x50] sm:$0xff] }
 0x42f   :  { %5329 = vmatprep.subr.bf16.mxu0 %v12642_v51  ;;  %5289 = vmatpush1.bf16.msra.mxu1 %v12639_v23  ;;  %v3649_v51 = vld [vmem:[#allocation14 + $0x2e0] sm:$0xff]  ;;  %v12706_v23 = vcombine.high %v3638_v62, %v3642_v12  ;;  %v3568_v12 = vld [vmem:[#allocation14 + $0x58] sm:$0xff] }
 0x430   :  { %5290 = vmatprep.subr.bf16.mxu1 %v12648_v60  ;;  %v3650_v60 = vld [vmem:[#allocation14 + $0x2e8] sm:$0xff]  ;;  %v12711_v16 = vcombine.low %v3645_v61, %v3649_v51 }
 0x431   :  { %v12713_v40 = vcombine.low %v3646_v28, %v3650_v60 }
 0x432   :  { %5330 = vmatpush1.bf16.msra.mxu0 %v12641_v17  ;;  %v12712_v17 = vcombine.high %v3645_v61, %v3649_v51 }
 0x433   :  { %5331 = vmatprep.subr.bf16.mxu0 %v12650_v1  ;;  %5291 = vmatpush1.bf16.msra.mxu1 %v12647_v41  ;;  %v3657_v1 = vld [vmem:[#allocation14 + $0x320] sm:$0xff]  ;;  %v12714_v41 = vcombine.high %v3646_v28, %v3650_v60 }
 0x434   :  { %5292 = vmatprep.subr.bf16.mxu1 %v12656_v3  ;;  %v3658_v3 = vld [vmem:[#allocation14 + $0x328] sm:$0xff]  ;;  %v12719_v32 = vcombine.low %v3653_v14, %v3657_v1 }
 0x435   :  { %v12721_v37 = vcombine.low %v3654_v35, %v3658_v3 }
 0x436   :  { %5332 = vmatpush1.bf16.msra.mxu0 %v12649_v55  ;;  %v12720_v55 = vcombine.high %v3653_v14, %v3657_v1 }
 0x437   :  { %5333 = vmatprep.subr.bf16.mxu0 %v12658_v5  ;;  %5293 = vmatpush1.bf16.msra.mxu1 %v12655_v49  ;;  %v3665_v5 = vld [vmem:[#allocation14 + $0x360] sm:$0xff]  ;;  %v12722_v49 = vcombine.high %v3654_v35, %v3658_v3 }
 0x438   :  { %5294 = vmatprep.subr.bf16.mxu1 %v12664_v0  ;;  %v3666_v0 = vld [vmem:[#allocation14 + $0x368] sm:$0xff]  ;;  %v12727_v44 = vcombine.low %v3661_v48, %v3665_v5 }
 0x439   :  { %v12729_v7 = vcombine.low %v3662_v34, %v3666_v0 }
 0x43a   :  { %5334 = vmatpush1.bf16.msra.mxu0 %v12657_v47  ;;  %v12728_v47 = vcombine.high %v3661_v48, %v3665_v5 }
 0x43b   :  { %5335 = vmatprep.subr.bf16.mxu0 %v12666_v36  ;;  %5295 = vmatpush1.bf16.msra.mxu1 %v12663_v46  ;;  %v3673_v36 = vld [vmem:[#allocation14 + $0x3a0] sm:$0xff]  ;;  %v12730_v46 = vcombine.high %v3662_v34, %v3666_v0 }
 0x43c   :  { %5296 = vmatprep.subr.bf16.mxu1 %v12672_v42  ;;  %v3674_v42 = vld [vmem:[#allocation14 + $0x3a8] sm:$0xff] }
 0x43d   :  { %v12738_v57 = vcombine.high %v3670_v50, %v3674_v42  ;;  %v12737_v54 = vcombine.low %v3670_v50, %v3674_v42  ;;  %v3600_v42 = vld [vmem:[#allocation14 + $0x158] sm:$0xff] }
 0x43e   :  { %5336 = vmatpush1.bf16.msra.mxu0 %v12665_v11  ;;  %v12736_v11 = vcombine.high %v3669_v9, %v3673_v36 }
 0x43f   :  { %5337 = vmatprep.subr.bf16.mxu0 %v12674_v53  ;;  %5297 = vmatpush1.bf16.msra.mxu1 %v12671_v18  ;;  %v3677_v53 = vld [vmem:[#allocation14 + $0x3c0] sm:$0xff] }
 0x440   :  { %5298 = vmatprep.subr.bf16.mxu1 %v12680_v58  ;;  %v3681_v18 = vld [vmem:[#allocation14 + $0x3e0] sm:$0xff]  ;;  %v12735_v58 = vcombine.low %v3669_v9, %v3673_v36  ;;  %v3599_v36 = vld [vmem:[#allocation14 + $0x150] sm:$0xff] }
 0x441   :  { %v12744_v15 = vcombine.high %v3677_v53, %v3681_v18  ;;  %v12743_v26 = vcombine.low %v3677_v53, %v3681_v18  ;;  %v3607_v53 = vld [vmem:[#allocation14 + $0x190] sm:$0xff] }
 0x442   :  { %5338 = vmatpush1.bf16.msra.mxu0 %v12673_v43  ;;  %v3678_v43 = vld [vmem:[#allocation14 + $0x3c8] sm:$0xff]  ;;  %v3611_v18 = vld [vmem:[#allocation14 + $0x1b0] sm:$0xff] }
 0x443   :  { %5339 = vmatprep.subr.bf16.mxu0 %v12682_v56  ;;  %5299 = vmatpush1.bf16.msra.mxu1 %v12679_v27  ;;  %v3543_v56 = vrot.slane %v3535_v63, 4  ;;  %v3545_v27 = vrot.slane %v3537_v19, 4  ;;  %v12745_v25 = vcombine.low %v3678_v43, %v3682_v4 }
 0x444   :  { %5300 = vmatprep.subr.bf16.mxu1 %v12688_v29  ;;  %v3563_v29 = vld [vmem:[#allocation14 + $0x30] sm:$0xff] }
 0x445   :  { %v3551_v38 = vmax.bf16 %v3543_v56, %v3531_v10  ;;  %v12627_v62 = vcombine.low %v3559_v20, %v3563_v29  ;;  %v3615_v56 = vld [vmem:[#allocation14 + $0x1d0] sm:$0xff] }
 0x446   :  { %5340 = vmatpush1.bf16.msra.mxu0 %v12681_v39  ;;  %v12746_v39 = vcombine.high %v3678_v43, %v3682_v4  ;;  %v3612_v43 = vld [vmem:[#allocation14 + $0x1b8] sm:$0xff]  ;;  %v12676_v4 = vcombine.high %v3607_v53, %v3611_v18 }
 0x447   :  { %5341 = vmatprep.subr.bf16.mxu0 %v12690_v45  ;;  %5301 = vmatpush1.bf16.msra.mxu1 %v12687_v22  ;;  %v3533_v45 = vld [vmem:[#allocation3 + $0x10] sm:$0xf]  ;;  %v3560_v22 = vld [vmem:[#allocation14 + $0x18] sm:$0xff] }
 0x448   :  { %5302 = vmatprep.subr.bf16.mxu1 %v12696_v24  ;;  %v3553_v24 = vmax.bf16 %v3545_v27, %v3533_v45  ;;  %v12629_v51 = vcombine.low %v3560_v22, %v3564_v21  ;;  %v3619_v27 = vld [vmem:[#allocation14 + $0x1f0] sm:$0xff] }
 0x449   :  { %v12684_v10 = vcombine.high %v3615_v56, %v3619_v27  ;;  %v3623_v45 = vld [vmem:[#allocation14 + $0x210] sm:$0xff] }
 0x44a   :  { %5342 = vmatpush1.bf16.msra.mxu0 %v12689_v2  ;;  %v12628_v2 = vcombine.high %v3559_v20, %v3563_v29  ;;  %v12675_v20 = vcombine.low %v3607_v53, %v3611_v18  ;;  %v3616_v29 = vld [vmem:[#allocation14 + $0x1d8] sm:$0xff]  ;;  %v3671_v18 = vld [vmem:[#allocation14 + $0x390] sm:$0xff] }
 0x44b   :  { %5343 = vmatprep.subr.bf16.mxu0 %v12698_v33  ;;  %5303 = vmatpush1.bf16.msra.mxu1 %v12695_v13  ;;  %v3571_v33 = vld [vmem:[#allocation14 + $0x70] sm:$0xff]  ;;  %v12630_v13 = vcombine.high %v3560_v22, %v3564_v21 }
 0x44c   :  { %5304 = vmatprep.subr.bf16.mxu1 %v12704_v31  ;;  %v3572_v31 = vld [vmem:[#allocation14 + $0x78] sm:$0xff]  ;;  %v12636_v61 = vcombine.high %v3567_v6, %v3571_v33  ;;  %v12635_v60 = vcombine.low %v3567_v6, %v3571_v33  ;;  %v3627_v22 = vld [vmem:[#allocation14 + $0x230] sm:$0xff] }
 0x44d   :  { %v12638_v28 = vcombine.high %v3568_v12, %v3572_v31  ;;  %v12637_v1 = vcombine.low %v3568_v12, %v3572_v31  ;;  %v3631_v33 = vld [vmem:[#allocation14 + $0x250] sm:$0xff]  ;;  %v12691_v12 = vcombine.low %v3623_v45, %v3627_v22  ;;  %v3632_v31 = vld [vmem:[#allocation14 + $0x258] sm:$0xff] }
 0x44e   :  { %5344 = vmatpush1.bf16.msra.mxu0 %v12697_v52  ;;  %v16305_v52 = vmax.bf16 %v3553_v24, %v3551_v38  ;;  %v12683_v38 = vcombine.low %v3615_v56, %v3619_v27  ;;  %v3624_v24 = vld [vmem:[#allocation14 + $0x218] sm:$0xff]  ;;  %v3679_v27 = vld [vmem:[#allocation14 + $0x3d0] sm:$0xff] }
 0x44f   :  { %5345 = vmatprep.subr.bf16.mxu0 %v12706_v23  ;;  %5305 = vmatpush1.bf16.msra.mxu1 %v12703_v59  ;;  %v3575_v23 = vld [vmem:[#allocation14 + $0x90] sm:$0xff] }
 0x450   :  { %5306 = vmatprep.subr.bf16.mxu1 %v12712_v17  ;;  %v3579_v59 = vld [vmem:[#allocation14 + $0xb0] sm:$0xff]  ;;  %v3576_v17 = vld [vmem:[#allocation14 + $0x98] sm:$0xff] }
 0x451   :  { %v12644_v14 = vcombine.high %v3575_v23, %v3579_v59  ;;  %v12643_v3 = vcombine.low %v3575_v23, %v3579_v59  ;;  %v3639_v59 = vld [vmem:[#allocation14 + $0x290] sm:$0xff] }
 0x452   :  { %5346 = vmatpush1.bf16.msra.mxu0 %v12705_v30  ;;  %v3580_v30 = vld [vmem:[#allocation14 + $0xb8] sm:$0xff] }
 0x453   :  { %5347 = vmatprep.subr.bf16.mxu0 %v12714_v41  ;;  %5307 = vmatpush1.bf16.msra.mxu1 %v12711_v16  ;;  %v3583_v41 = vld [vmem:[#allocation14 + $0xd0] sm:$0xff]  ;;  %v12646_v35 = vcombine.high %v3576_v17, %v3580_v30  ;;  %v12645_v5 = vcombine.low %v3576_v17, %v3580_v30  ;;  %v3640_v30 = vld [vmem:[#allocation14 + $0x298] sm:$0xff] }
 0x454   :  { %5308 = vmatprep.subr.bf16.mxu1 %v12720_v55  ;;  %v3587_v16 = vld [vmem:[#allocation14 + $0xf0] sm:$0xff]  ;;  %v3584_v55 = vld [vmem:[#allocation14 + $0xd8] sm:$0xff] }
 0x455   :  { %v12652_v48 = vcombine.high %v3583_v41, %v3587_v16  ;;  %v12651_v0 = vcombine.low %v3583_v41, %v3587_v16  ;;  %v3647_v16 = vld [vmem:[#allocation14 + $0x2d0] sm:$0xff] }
 0x456   :  { %5348 = vmatpush1.bf16.msra.mxu0 %v12713_v40  ;;  %v3588_v40 = vld [vmem:[#allocation14 + $0xf8] sm:$0xff] }
 0x457   :  { %5349 = vmatprep.subr.bf16.mxu0 %v12722_v49  ;;  %5309 = vmatpush1.bf16.msra.mxu1 %v12719_v32  ;;  %v3591_v49 = vld [vmem:[#allocation14 + $0x110] sm:$0xff]  ;;  %v12654_v34 = vcombine.high %v3584_v55, %v3588_v40  ;;  %v12653_v9 = vcombine.low %v3584_v55, %v3588_v40  ;;  %v3648_v40 = vld [vmem:[#allocation14 + $0x2d8] sm:$0xff] }
 0x458   :  { %5310 = vmatprep.subr.bf16.mxu1 %v12728_v47  ;;  %v3595_v32 = vld [vmem:[#allocation14 + $0x130] sm:$0xff]  ;;  %v3596_v47 = vld [vmem:[#allocation14 + $0x138] sm:$0xff] }
 0x459   :  { %v12659_v50 = vcombine.low %v3591_v49, %v3595_v32 }
 0x45a   :  { %5350 = vmatpush1.bf16.msra.mxu0 %v12721_v37  ;;  %v12660_v37 = vcombine.high %v3591_v49, %v3595_v32  ;;  %v3655_v32 = vld [vmem:[#allocation14 + $0x310] sm:$0xff] }
 0x45b   :  { %5351 = vmatprep.subr.bf16.mxu0 %v12730_v46  ;;  %5311 = vmatpush1.bf16.msra.mxu1 %v12727_v44  ;;  %v3603_v46 = vld [vmem:[#allocation14 + $0x170] sm:$0xff] }
 0x45c   :  { %5312 = vmatprep.subr.bf16.mxu1 %v12736_v11  ;;  %v3604_v11 = vld [vmem:[#allocation14 + $0x178] sm:$0xff]  ;;  %v12668_v63 = vcombine.high %v3599_v36, %v3603_v46 }
 0x45d   :  { %v12670_v19 = vcombine.high %v3600_v42, %v3604_v11 }
 0x45e   :  { %5352 = vmatpush1.bf16.msra.mxu0 %v12729_v7 }
 0x45f   :  { %5353 = vmatprep.subr.bf16.mxu0 %v12738_v57  ;;  %5313 = vmatpush1.bf16.msra.mxu1 %v12735_v58  ;;  %v12667_v57 = vcombine.low %v3599_v36, %v3603_v46  ;;  %v3608_v58 = vld [vmem:[#allocation14 + $0x198] sm:$0xff]  ;;  %v3663_v46 = vld [vmem:[#allocation14 + $0x350] sm:$0xff] }
 0x460   :  { %5314 = vmatprep.subr.bf16.mxu1 %v12744_v15  ;;  %v12669_v15 = vcombine.low %v3600_v42, %v3604_v11  ;;  %v3664_v11 = vld [vmem:[#allocation14 + $0x358] sm:$0xff] }
 0x462   :  { %5354 = vmatpush1.bf16.msra.mxu0 %v12737_v54  ;;  %v12678_v54 = vcombine.high %v3608_v58, %v3612_v43 }
 0x463   :  { %5355 = vmatprep.subr.bf16.mxu0 %v12746_v39  ;;  %5315 = vmatpush1.bf16.msra.mxu1 %v12743_v26  ;;  %v3620_v39 = vld [vmem:[#allocation14 + $0x1f8] sm:$0xff]  ;;  %v12677_v26 = vcombine.low %v3608_v58, %v3612_v43 }
 0x464   :  { %5366 = vmatprep.subr.bf16.mxu1 %v12628_v2  ;;  %v12686_v21 = vcombine.high %v3616_v29, %v3620_v39  ;;  %v3628_v2 = vld [vmem:[#allocation14 + $0x238] sm:$0xff]  ;;  %v12685_v6 = vcombine.low %v3616_v29, %v3620_v39  ;;  %v5453_v29 = vld [vmem:[#allocation3 + $0x48] sm:$0xf0]  ;;  %v5455_v39 = vld [vmem:[#allocation3 + $0x58] sm:$0xf0] }
 0x465   :  { %v12693_v23 = vcombine.low %v3624_v24, %v3628_v2  ;;  %v3672_v43 = vld [vmem:[#allocation14 + $0x398] sm:$0xff] }
 0x466   :  { %5356 = vmatpush1.bf16.msra.mxu0 %v12745_v25  ;;  %5317 = vmatmul.mubr.bf16.vlgmr.msra.gmra.mrb[40].mxu1 %v16305_v52  ;;  %v12692_v25 = vcombine.high %v3623_v45, %v3627_v22  ;;  %v3684_v45 = vld [vmem:[#allocation14 + $0x3f8] sm:$0xff] }
 0x467   :  { %5407 = vmatprep.subr.bf16.mxu0 %v12630_v13  ;;  %5367 = vmatpush1.bf16.msra.mxu1 %v12627_v62  ;;  %v3635_v13 = vld [vmem:[#allocation14 + $0x270] sm:$0xff]  ;;  %v12694_v62 = vcombine.high %v3624_v24, %v3628_v2  ;;  %v5479_v24 = vld [vmem:[#allocation14 + $0x820] sm:$0xff]  ;;  %v5461_v2 = vrot.slane %v5453_v29, 4 }
 0x468   :  { %5398 = vmatprep.mubr.bf16.mxu1 %v16299_v8  ;;  %5368 = vmatprep.subr.bf16.mxu1 %v12636_v61  ;;  %v3636_v61 = vld [vmem:[#allocation14 + $0x278] sm:$0xff]  ;;  %v12699_v17 = vcombine.low %v3631_v33, %v3635_v13 }
 0x469   :  { %5358 = vmatmul.mubr.bf16.vlgmr.msra.gmra.mrb[72].mxu0 %v16305_v52  ;;  %v12701_v41 = vcombine.low %v3632_v31, %v3636_v61 }
 0x46a   :  { %5408 = vmatpush1.bf16.msra.mxu0 %v12629_v51  ;;  %5439 = vmatprep.mubr.bf16.mxu0 %v16299_v8  ;;  %v3592_v8 = vld [vmem:[#allocation14 + $0x118] sm:$0xff]  ;;  %v12700_v51 = vcombine.high %v3631_v33, %v3635_v13  ;;  %v5476_v13 = vld [vmem:[#allocation14 + $0x808] sm:$0xff] }
 0x46b   :  { %5409 = vmatprep.subr.bf16.mxu0 %v12638_v28  ;;  %5369 = vmatpush1.bf16.msra.mxu1 %v12635_v60  ;;  %v12662_v44 = vcombine.high %v3592_v8, %v3596_v47  ;;  %v12661_v7 = vcombine.low %v3592_v8, %v3596_v47  ;;  %v3643_v28 = vld [vmem:[#allocation14 + $0x2b0] sm:$0xff]  ;;  %v12702_v60 = vcombine.high %v3632_v31, %v3636_v61  ;;  %v3656_v47 = vld [vmem:[#allocation14 + $0x318] sm:$0xff]  ;;  %v5449_v31 = vld [vmem:[#allocation3 + $0x48] sm:$0xf] }
 0x46c   :  { %5370 = vmatprep.subr.bf16.mxu1 %v12644_v14  ;;  %v3644_v14 = vld [vmem:[#allocation14 + $0x2b8] sm:$0xff]  ;;  %v12707_v55 = vcombine.low %v3639_v59, %v3643_v28 }
 0x46d   :  { %v12709_v49 = vcombine.low %v3640_v30, %v3644_v14  ;;  %v5451_v61 = vld [vmem:[#allocation3 + $0x58] sm:$0xf] }
 0x46e   :  { %5410 = vmatpush1.bf16.msra.mxu0 %v12637_v1  ;;  %v12708_v1 = vcombine.high %v3639_v59, %v3643_v28  ;;  %v5483_v28 = vld [vmem:[#allocation14 + $0x840] sm:$0xff] }
 0x46f   :  { %5411 = vmatprep.subr.bf16.mxu0 %v12646_v35  ;;  %5371 = vmatpush1.bf16.msra.mxu1 %v12643_v3  ;;  %v3651_v35 = vld [vmem:[#allocation14 + $0x2f0] sm:$0xff]  ;;  %v12710_v3 = vcombine.high %v3640_v30, %v3644_v14  ;;  %v5484_v14 = vld [vmem:[#allocation14 + $0x848] sm:$0xff] }
 0x470   :  { %5372 = vmatprep.subr.bf16.mxu1 %v12652_v48  ;;  %v3652_v48 = vld [vmem:[#allocation14 + $0x2f8] sm:$0xff]  ;;  %v12715_v8 = vcombine.low %v3647_v16, %v3651_v35 }
 0x471   :  { %v12717_v36 = vcombine.low %v3648_v40, %v3652_v48 }
 0x472   :  { %5412 = vmatpush1.bf16.msra.mxu0 %v12645_v5  ;;  %v12716_v5 = vcombine.high %v3647_v16, %v3651_v35 }
 0x473   :  { %5413 = vmatprep.subr.bf16.mxu0 %v12654_v34  ;;  %5373 = vmatpush1.bf16.msra.mxu1 %v12651_v0  ;;  %v3659_v34 = vld [vmem:[#allocation14 + $0x330] sm:$0xff]  ;;  %v12718_v0 = vcombine.high %v3648_v40, %v3652_v48 }
 0x474   :  { %5374 = vmatprep.subr.bf16.mxu1 %v12660_v37  ;;  %v3660_v37 = vld [vmem:[#allocation14 + $0x338] sm:$0xff]  ;;  %v12723_v42 = vcombine.low %v3655_v32, %v3659_v34 }
 0x475   :  { %v12725_v53 = vcombine.low %v3656_v47, %v3660_v37 }
 0x476   :  { %5414 = vmatpush1.bf16.msra.mxu0 %v12653_v9  ;;  %v12724_v9 = vcombine.high %v3655_v32, %v3659_v34 }
 0x477   :  { %5415 = vmatprep.subr.bf16.mxu0 %v12662_v44  ;;  %5375 = vmatpush1.bf16.msra.mxu1 %v12659_v50  ;;  %v3667_v44 = vld [vmem:[#allocation14 + $0x370] sm:$0xff]  ;;  %v12726_v50 = vcombine.high %v3656_v47, %v3660_v37 }
 0x478   :  { %5376 = vmatprep.subr.bf16.mxu1 %v12668_v63  ;;  %v3668_v63 = vld [vmem:[#allocation14 + $0x378] sm:$0xff]  ;;  %v12731_v58 = vcombine.low %v3663_v46, %v3667_v44 }
 0x479   :  { %v12733_v56 = vcombine.low %v3664_v11, %v3668_v63 }
 0x47a   :  { %5416 = vmatpush1.bf16.msra.mxu0 %v12661_v7  ;;  %v12732_v7 = vcombine.high %v3663_v46, %v3667_v44 }
 0x47b   :  { %5417 = vmatprep.subr.bf16.mxu0 %v12670_v19  ;;  %5377 = vmatpush1.bf16.msra.mxu1 %v12667_v57  ;;  %v3675_v19 = vld [vmem:[#allocation14 + $0x3b0] sm:$0xff]  ;;  %v12734_v57 = vcombine.high %v3664_v11, %v3668_v63  ;;  %v5508_v63 = vld [vmem:[#allocation14 + $0x908] sm:$0xff] }
 0x47c   :  { %5378 = vmatprep.subr.bf16.mxu1 %v12676_v4  ;;  %v3676_v4 = vld [vmem:[#allocation14 + $0x3b8] sm:$0xff] }
 0x47e   :  { %5418 = vmatpush1.bf16.msra.mxu0 %v12669_v15  ;;  %v12740_v15 = vcombine.high %v3671_v18, %v3675_v19 }
 0x47f   :  { %5419 = vmatprep.subr.bf16.mxu0 %v12678_v54  ;;  %5379 = vmatpush1.bf16.msra.mxu1 %v12675_v20  ;;  %v3683_v54 = vld [vmem:[#allocation14 + $0x3f0] sm:$0xff]  ;;  %v12742_v20 = vcombine.high %v3672_v43, %v3676_v4 }
 0x480   :  { %5380 = vmatprep.subr.bf16.mxu1 %v12684_v10  ;;  %v12739_v10 = vcombine.low %v3671_v18, %v3675_v19  ;;  %v12748_v22 = vcombine.high %v3679_v27, %v3683_v54  ;;  %v12747_v33 = vcombine.low %v3679_v27, %v3683_v54  ;;  %v5515_v19 = vld [vmem:[#allocation14 + $0x940] sm:$0xff] }
 0x481   :  { %v5523_v54 = vld [vmem:[#allocation14 + $0x980] sm:$0xff] }
 0x482   :  { %5420 = vmatpush1.bf16.msra.mxu0 %v12677_v26  ;;  %v3680_v26 = vld [vmem:[#allocation14 + $0x3d8] sm:$0xff] }
 0x483   :  { %5421 = vmatprep.subr.bf16.mxu0 %v12686_v21  ;;  %5381 = vmatpush1.bf16.msra.mxu1 %v12683_v38  ;;  %v12741_v21 = vcombine.low %v3672_v43, %v3676_v4  ;;  %v5475_v38 = vld [vmem:[#allocation14 + $0x800] sm:$0xff]  ;;  %v5516_v4 = vld [vmem:[#allocation14 + $0x948] sm:$0xff] }
 0x484   :  { %5382 = vmatprep.subr.bf16.mxu1 %v12692_v25  ;;  %v5463_v25 = vrot.slane %v5455_v39, 4  ;;  %v12751_v30 = vcombine.low %v5475_v38, %v5479_v24 }
 0x486   :  { %5422 = vmatpush1.bf16.msra.mxu0 %v12685_v6  ;;  %v12750_v6 = vcombine.high %v3680_v26, %v3684_v45  ;;  %v5471_v59 = vmax.bf16 %v5463_v25, %v5451_v61 }
 0x487   :  { %5423 = vmatprep.subr.bf16.mxu0 %v12694_v62  ;;  %5383 = vmatpush1.bf16.msra.mxu1 %v12691_v12  ;;  %v5480_v62 = vld [vmem:[#allocation14 + $0x828] sm:$0xff]  ;;  %v12752_v12 = vcombine.high %v5475_v38, %v5479_v24 }
 0x488   :  { %5384 = vmatprep.subr.bf16.mxu1 %v12700_v51  ;;  %v12749_v51 = vcombine.low %v3680_v26, %v3684_v45  ;;  %v12753_v16 = vcombine.low %v5476_v13, %v5480_v62  ;;  %v5528_v38 = vld [vmem:[#allocation14 + $0x9a8] sm:$0xff] }
 0x48a   :  { %5424 = vmatpush1.bf16.msra.mxu0 %v12693_v23  ;;  %v5469_v23 = vmax.bf16 %v5461_v2, %v5449_v31 }
 0x48b   :  { %5425 = vmatprep.subr.bf16.mxu0 %v12702_v60  ;;  %5385 = vmatpush1.bf16.msra.mxu1 %v12699_v17  ;;  %v5487_v60 = vld [vmem:[#allocation14 + $0x860] sm:$0xff]  ;;  %v12754_v17 = vcombine.high %v5476_v13, %v5480_v62 }
 0x48c   :  { %5386 = vmatprep.subr.bf16.mxu1 %v12708_v1  ;;  %v5488_v1 = vld [vmem:[#allocation14 + $0x868] sm:$0xff]  ;;  %v16311_v35 = vmax.bf16 %v5471_v59, %v5469_v23  ;;  %v12759_v48 = vcombine.low %v5483_v28, %v5487_v60  ;;  %v5531_v62 = vld [vmem:[#allocation14 + $0x9c0] sm:$0xff] }
 0x48d   :  { %v12762_v40 = vcombine.high %v5484_v14, %v5488_v1  ;;  %v12761_v34 = vcombine.low %v5484_v14, %v5488_v1  ;;  %v5536_v23 = vld [vmem:[#allocation14 + $0x9e8] sm:$0xff] }
 0x48e   :  { %5426 = vmatpush1.bf16.msra.mxu0 %v12701_v41  ;;  %v12760_v41 = vcombine.high %v5483_v28, %v5487_v60  ;;  %v5539_v60 = vld [vmem:[#allocation14 + $0xa00] sm:$0xff]  ;;  %v5540_v1 = vld [vmem:[#allocation14 + $0xa08] sm:$0xff] }
 0x48f   :  { %5427 = vmatprep.subr.bf16.mxu0 %v12710_v3  ;;  %5387 = vmatpush1.bf16.msra.mxu1 %v12707_v55  ;;  %v5491_v3 = vld [vmem:[#allocation14 + $0x880] sm:$0xff] }
 0x490   :  { %5388 = vmatprep.subr.bf16.mxu1 %v12716_v5  ;;  %v5495_v55 = vld [vmem:[#allocation14 + $0x8a0] sm:$0xff]  ;;  %v5492_v5 = vld [vmem:[#allocation14 + $0x888] sm:$0xff] }
 0x491   :  { %v12768_v32 = vcombine.high %v5491_v3, %v5495_v55  ;;  %v12767_v37 = vcombine.low %v5491_v3, %v5495_v55  ;;  %v5547_v55 = vld [vmem:[#allocation14 + $0xa40] sm:$0xff] }
 0x492   :  { %5428 = vmatpush1.bf16.msra.mxu0 %v12709_v49  ;;  %v5496_v49 = vld [vmem:[#allocation14 + $0x8a8] sm:$0xff] }
 0x493   :  { %5429 = vmatprep.subr.bf16.mxu0 %v12718_v0  ;;  %5389 = vmatpush1.bf16.msra.mxu1 %v12715_v8  ;;  %v5499_v0 = vld [vmem:[#allocation14 + $0x8c0] sm:$0xff]  ;;  %v12770_v47 = vcombine.high %v5492_v5, %v5496_v49  ;;  %v12769_v44 = vcombine.low %v5492_v5, %v5496_v49  ;;  %v5548_v49 = vld [vmem:[#allocation14 + $0xa48] sm:$0xff] }
 0x494   :  { %5390 = vmatprep.subr.bf16.mxu1 %v12724_v9  ;;  %v5503_v8 = vld [vmem:[#allocation14 + $0x8e0] sm:$0xff]  ;;  %v5500_v9 = vld [vmem:[#allocation14 + $0x8c8] sm:$0xff] }
 0x495   :  { %v12776_v46 = vcombine.high %v5499_v0, %v5503_v8  ;;  %v12775_v11 = vcombine.low %v5499_v0, %v5503_v8  ;;  %v5555_v8 = vld [vmem:[#allocation14 + $0xa80] sm:$0xff] }
 0x496   :  { %5430 = vmatpush1.bf16.msra.mxu0 %v12717_v36  ;;  %v5504_v36 = vld [vmem:[#allocation14 + $0x8e8] sm:$0xff] }
 0x497   :  { %5431 = vmatprep.subr.bf16.mxu0 %v12726_v50  ;;  %5391 = vmatpush1.bf16.msra.mxu1 %v12723_v42  ;;  %v5507_v50 = vld [vmem:[#allocation14 + $0x900] sm:$0xff]  ;;  %v12778_v42 = vcombine.high %v5500_v9, %v5504_v36  ;;  %v12777_v18 = vcombine.low %v5500_v9, %v5504_v36  ;;  %v5556_v36 = vld [vmem:[#allocation14 + $0xa88] sm:$0xff] }
 0x498   :  { %5392 = vmatprep.subr.bf16.mxu1 %v12732_v7  ;;  %v5512_v7 = vld [vmem:[#allocation14 + $0x928] sm:$0xff] }
 0x499   :  { %v12785_v27 = vcombine.low %v5508_v63, %v5512_v7 }
 0x49a   :  { %5432 = vmatpush1.bf16.msra.mxu0 %v12725_v53 }
 0x49b   :  { %5433 = vmatprep.subr.bf16.mxu0 %v12734_v57  ;;  %5393 = vmatpush1.bf16.msra.mxu1 %v12731_v58  ;;  %v5519_v57 = vld [vmem:[#allocation14 + $0x960] sm:$0xff]  ;;  %v12786_v58 = vcombine.high %v5508_v63, %v5512_v7  ;;  %v5564_v7 = vld [vmem:[#allocation14 + $0xac8] sm:$0xff] }
 0x49c   :  { %5394 = vmatprep.subr.bf16.mxu1 %v12740_v15  ;;  %v5520_v15 = vld [vmem:[#allocation14 + $0x968] sm:$0xff]  ;;  %v12791_v26 = vcombine.low %v5515_v19, %v5519_v57 }
 0x49e   :  { %5434 = vmatpush1.bf16.msra.mxu0 %v12733_v56  ;;  %v12792_v56 = vcombine.high %v5515_v19, %v5519_v57  ;;  %v5571_v57 = vld [vmem:[#allocation14 + $0xb00] sm:$0xff] }
 0x49f   :  { %5435 = vmatprep.subr.bf16.mxu0 %v12742_v20  ;;  %5395 = vmatpush1.bf16.msra.mxu1 %v12739_v10  ;;  %v5527_v20 = vld [vmem:[#allocation14 + $0x9a0] sm:$0xff]  ;;  %v12794_v10 = vcombine.high %v5516_v4, %v5520_v15 }
 0x4a0   :  { %5396 = vmatprep.subr.bf16.mxu1 %v12748_v22  ;;  %v12800_v25 = vcombine.high %v5523_v54, %v5527_v20  ;;  %v12799_v61 = vcombine.low %v5523_v54, %v5527_v20  ;;  %v5579_v20 = vld [vmem:[#allocation14 + $0xb40] sm:$0xff] }
 0x4a2   :  { %5436 = vmatpush1.bf16.msra.mxu0 %v12741_v21  ;;  %v5524_v21 = vld [vmem:[#allocation14 + $0x988] sm:$0xff] }
 0x4a3   :  { %5437 = vmatprep.subr.bf16.mxu0 %v12750_v6  ;;  %5397 = vmatpush1.bf16.msra.mxu1 %v12747_v33  ;;  %v12793_v6 = vcombine.low %v5516_v4, %v5520_v15  ;;  %v12802_v31 = vcombine.high %v5524_v21, %v5528_v38  ;;  %v12801_v28 = vcombine.low %v5524_v21, %v5528_v38  ;;  %v5572_v15 = vld [vmem:[#allocation14 + $0xb08] sm:$0xff] }
 0x4a4   :  { %6243 = vmatprep.subr.bf16.mxu1 %v12752_v12  ;;  %v5535_v12 = vld [vmem:[#allocation14 + $0x9e0] sm:$0xff]  ;;  %v5580_v38 = vld [vmem:[#allocation14 + $0xb48] sm:$0xff] }
 0x4a5   :  { %v12808_v59 = vcombine.high %v5531_v62, %v5535_v12  ;;  %v12807_v14 = vcombine.low %v5531_v62, %v5535_v12  ;;  %v5588_v12 = vld [vmem:[#allocation14 + $0xb88] sm:$0xff] }
 0x4a6   :  { %5438 = vmatpush1.bf16.msra.mxu0 %v12749_v51  ;;  %5399 = vmatmul.mubr.bf16.vlgmr.msra.gmra.mrb[44].mxu1 %v16305_v52  ;;  %v5532_v51 = vld [vmem:[#allocation14 + $0x9c8] sm:$0xff] }
 0x4a7   :  { %6284 = vmatprep.subr.bf16.mxu0 %v12754_v17  ;;  %6244 = vmatpush1.bf16.msra.mxu1 %v12751_v30  ;;  %v5543_v17 = vld [vmem:[#allocation14 + $0xa20] sm:$0xff]  ;;  %v12810_v30 = vcombine.high %v5532_v51, %v5536_v23  ;;  %v12809_v3 = vcombine.low %v5532_v51, %v5536_v23  ;;  %v5452_v51 = vld [vmem:[#allocation3 + $0x40] sm:$0xf0] }
 0x4a8   :  { %6275 = vmatprep.mubr.bf16.mxu1 %v16311_v35  ;;  %6245 = vmatprep.subr.bf16.mxu1 %v12760_v41  ;;  %v5544_v41 = vld [vmem:[#allocation14 + $0xa28] sm:$0xff]  ;;  %v12815_v5 = vcombine.low %v5539_v60, %v5543_v17 }
 0x4a9   :  { %5440 = vmatmul.mubr.bf16.vlgmr.msra.gmra.mrb[76].mxu0 %v16305_v52  ;;  %v5511_v52 = vld [vmem:[#allocation14 + $0x920] sm:$0xff]  ;;  %v12817_v0 = vcombine.low %v5540_v1, %v5544_v41 }
 0x4aa   :  { %6285 = vmatpush1.bf16.msra.mxu0 %v12753_v16  ;;  %6316 = vmatprep.mubr.bf16.mxu0 %v16311_v35  ;;  %v12784_v53 = vcombine.high %v5507_v50, %v5511_v52  ;;  %v12783_v43 = vcombine.low %v5507_v50, %v5511_v52  ;;  %v12816_v16 = vcombine.high %v5539_v60, %v5543_v17  ;;  %v5563_v52 = vld [vmem:[#allocation14 + $0xac0] sm:$0xff]  ;;  %v5454_v60 = vld [vmem:[#allocation3 + $0x50] sm:$0xf0] }
 0x4ab   :  { %6286 = vmatprep.subr.bf16.mxu0 %v12762_v40  ;;  %6246 = vmatpush1.bf16.msra.mxu1 %v12759_v48  ;;  %v5551_v40 = vld [vmem:[#allocation14 + $0xa60] sm:$0xff]  ;;  %v12818_v48 = vcombine.high %v5540_v1, %v5544_v41  ;;  %v5600_v1 = vld [vmem:[#allocation14 + $0xbe8] sm:$0xff] }
 0x4ac   :  { %6247 = vmatprep.subr.bf16.mxu1 %v12768_v32  ;;  %v5552_v32 = vld [vmem:[#allocation14 + $0xa68] sm:$0xff]  ;;  %v12823_v9 = vcombine.low %v5547_v55, %v5551_v40 }
 0x4ad   :  { %v12825_v50 = vcombine.low %v5548_v49, %v5552_v32 }
 0x4ae   :  { %6287 = vmatpush1.bf16.msra.mxu0 %v12761_v34  ;;  %v12824_v34 = vcombine.high %v5547_v55, %v5551_v40  ;;  %v5477_v40 = vld [vmem:[#allocation14 + $0x810] sm:$0xff] }
 0x4af   :  { %6288 = vmatprep.subr.bf16.mxu0 %v12770_v47  ;;  %6248 = vmatpush1.bf16.msra.mxu1 %v12767_v37  ;;  %v5559_v47 = vld [vmem:[#allocation14 + $0xaa0] sm:$0xff]  ;;  %v12826_v37 = vcombine.high %v5548_v49, %v5552_v32 }
 0x4b0   :  { %6249 = vmatprep.subr.bf16.mxu1 %v12776_v46  ;;  %v5560_v46 = vld [vmem:[#allocation14 + $0xaa8] sm:$0xff]  ;;  %v12831_v63 = vcombine.low %v5555_v8, %v5559_v47  ;;  %v5448_v49 = vld [vmem:[#allocation3 + $0x40] sm:$0xf] }
 0x4b1   :  { %v12833_v19 = vcombine.low %v5556_v36, %v5560_v46 }
 0x4b2   :  { %6289 = vmatpush1.bf16.msra.mxu0 %v12769_v44  ;;  %v12832_v44 = vcombine.high %v5555_v8, %v5559_v47  ;;  %v5482_v8 = vld [vmem:[#allocation14 + $0x838] sm:$0xff] }
 0x4b3   :  { %6290 = vmatprep.subr.bf16.mxu0 %v12778_v42  ;;  %6250 = vmatpush1.bf16.msra.mxu1 %v12775_v11  ;;  %v5567_v42 = vld [vmem:[#allocation14 + $0xae0] sm:$0xff]  ;;  %v12834_v11 = vcombine.high %v5556_v36, %v5560_v46  ;;  %v5485_v46 = vld [vmem:[#allocation14 + $0x850] sm:$0xff] }
 0x4b4   :  { %6251 = vmatprep.subr.bf16.mxu1 %v12784_v53  ;;  %v5568_v53 = vld [vmem:[#allocation14 + $0xae8] sm:$0xff]  ;;  %v12839_v4 = vcombine.low %v5563_v52, %v5567_v42 }
 0x4b5   :  { %v12841_v54 = vcombine.low %v5564_v7, %v5568_v53 }
 0x4b6   :  { %6291 = vmatpush1.bf16.msra.mxu0 %v12777_v18  ;;  %v16317_v29 = vpop.f32.mrb[32].mxu1  ;;  %v16319_v39 = vpop.f32.mrb[64].mxu0  ;;  %v12840_v18 = vcombine.high %v5563_v52, %v5567_v42  ;;  %v5486_v42 = vld [vmem:[#allocation14 + $0x858] sm:$0xff] }
 0x4b7   :  { %6292 = vmatprep.subr.bf16.mxu0 %v12786_v58  ;;  %6252 = vmatpush1.bf16.msra.mxu1 %v12783_v43  ;;  %v16321_v45 = vpop.f32.mrb[33].mxu1  ;;  %v16323_v22 = vpop.f32.mrb[65].mxu0  ;;  %v5575_v58 = vld [vmem:[#allocation14 + $0xb20] sm:$0xff]  ;;  %v12842_v43 = vcombine.high %v5564_v7, %v5568_v53 }
 0x4b8   :  { %6253 = vmatprep.subr.bf16.mxu1 %v12792_v56  ;;  %v4518_v24 = vpop.f32.mrb[34].mxu1  ;;  %v4559_v2 = vpop.f32.mrb[66].mxu0  ;;  %v5576_v56 = vld [vmem:[#allocation14 + $0xb28] sm:$0xff]  ;;  %v12847_v21 = vcombine.low %v5571_v57, %v5575_v58 }
 0x4b9   :  { %v4519_v33 = vpop.f32.mrb[35].mxu1  ;;  %v4560_v13 = vpop.f32.mrb[67].mxu0  ;;  %v5584_v24 = vld [vmem:[#allocation14 + $0xb68] sm:$0xff] }
 0x4ba   :  { %6293 = vmatpush1.bf16.msra.mxu0 %v12785_v27  ;;  %v12848_v27 = vcombine.high %v5571_v57, %v5575_v58  ;;  %v5591_v33 = vld [vmem:[#allocation14 + $0xba0] sm:$0xff]  ;;  %v12858_v13 = vcombine.high %v5580_v38, %v5584_v24  ;;  %v12857_v23 = vcombine.low %v5580_v38, %v5584_v24 }
 0x4bb   :  { %6294 = vmatprep.subr.bf16.mxu0 %v12794_v10  ;;  %6254 = vmatpush1.bf16.msra.mxu1 %v12791_v26  ;;  %v5583_v10 = vld [vmem:[#allocation14 + $0xb60] sm:$0xff]  ;;  %v12850_v26 = vcombine.high %v5572_v15, %v5576_v56 }
 0x4bc   :  { %6255 = vmatprep.subr.bf16.mxu1 %v12800_v25  ;;  %v12856_v2 = vcombine.high %v5579_v20, %v5583_v10  ;;  %v12849_v25 = vcombine.low %v5572_v15, %v5576_v56  ;;  %v12855_v62 = vcombine.low %v5579_v20, %v5583_v10 }
 0x4be   :  { %6295 = vmatpush1.bf16.msra.mxu0 %v12793_v6  ;;  %v5587_v6 = vld [vmem:[#allocation14 + $0xb80] sm:$0xff] }
 0x4bf   :  { %6296 = vmatprep.subr.bf16.mxu0 %v12802_v31  ;;  %6256 = vmatpush1.bf16.msra.mxu1 %v12799_v61  ;;  %v5592_v31 = vld [vmem:[#allocation14 + $0xba8] sm:$0xff]  ;;  %v12864_v61 = vcombine.high %v5587_v6, %v5591_v33 }
 0x4c0   :  { %6257 = vmatprep.subr.bf16.mxu1 %v12808_v59  ;;  %v5595_v59 = vld [vmem:[#allocation14 + $0xbc0] sm:$0xff]  ;;  %v12866_v17 = vcombine.high %v5588_v12, %v5592_v31  ;;  %v12865_v55 = vcombine.low %v5588_v12, %v5592_v31  ;;  %v5517_v31 = vld [vmem:[#allocation14 + $0x950] sm:$0xff] }
 0x4c2   :  { %6297 = vmatpush1.bf16.msra.mxu0 %v12801_v28  ;;  %v5599_v28 = vld [vmem:[#allocation14 + $0xbe0] sm:$0xff] }
 0x4c3   :  { %6298 = vmatprep.subr.bf16.mxu0 %v12810_v30  ;;  %6258 = vmatpush1.bf16.msra.mxu1 %v12807_v14  ;;  %v12863_v30 = vcombine.low %v5587_v6, %v5591_v33  ;;  %v5596_v14 = vld [vmem:[#allocation14 + $0xbc8] sm:$0xff]  ;;  %v12872_v41 = vcombine.high %v5595_v59, %v5599_v28  ;;  %v12871_v32 = vcombine.low %v5595_v59, %v5599_v28  ;;  %v5518_v59 = vld [vmem:[#allocation14 + $0x958] sm:$0xff] }
 0x4c4   :  { %6259 = vmatprep.subr.bf16.mxu1 %v12816_v16  ;;  %v5460_v16 = vrot.slane %v5452_v51, 4  ;;  %v12873_v36 = vcombine.low %v5596_v14, %v5600_v1  ;;  %v5522_v28 = vld [vmem:[#allocation14 + $0x978] sm:$0xff] }
 0x4c6   :  { %6299 = vmatpush1.bf16.msra.mxu0 %v12809_v3  ;;  %v5462_v3 = vrot.slane %v5454_v60, 4  ;;  %v5468_v47 = vmax.bf16 %v5460_v16, %v5448_v49  ;;  %v5526_v16 = vld [vmem:[#allocation14 + $0x998] sm:$0xff]  ;;  %v5537_v49 = vld [vmem:[#allocation14 + $0x9f0] sm:$0xff] }
 0x4c7   :  { %6300 = vmatprep.subr.bf16.mxu0 %v12818_v48  ;;  %6260 = vmatpush1.bf16.msra.mxu1 %v12815_v5  ;;  %v5481_v48 = vld [vmem:[#allocation14 + $0x830] sm:$0xff]  ;;  %v12874_v5 = vcombine.high %v5596_v14, %v5600_v1  ;;  %v12798_v1 = vcombine.high %v5518_v59, %v5522_v28 }
 0x4c8   :  { %6261 = vmatprep.subr.bf16.mxu1 %v12824_v34  ;;  %v5450_v34 = vld [vmem:[#allocation3 + $0x50] sm:$0xf]  ;;  %v12755_v52 = vcombine.low %v5477_v40, %v5481_v48 }
 0x4c9   :  { %v5529_v14 = vld [vmem:[#allocation14 + $0x9b0] sm:$0xff] }
 0x4ca   :  { %6301 = vmatpush1.bf16.msra.mxu0 %v12817_v0  ;;  %v5478_v0 = vld [vmem:[#allocation14 + $0x818] sm:$0xff] }
 0x4cb   :  { %6302 = vmatprep.subr.bf16.mxu0 %v12826_v37  ;;  %6262 = vmatpush1.bf16.msra.mxu1 %v12823_v9  ;;  %v5470_v37 = vmax.bf16 %v5462_v3, %v5450_v34  ;;  %v12756_v9 = vcombine.high %v5477_v40, %v5481_v48  ;;  %v12757_v53 = vcombine.low %v5478_v0, %v5482_v8  ;;  %v5530_v3 = vld [vmem:[#allocation14 + $0x9b8] sm:$0xff] }
 0x4cc   :  { %6263 = vmatprep.subr.bf16.mxu1 %v12832_v44  ;;  %v5489_v44 = vld [vmem:[#allocation14 + $0x870] sm:$0xff]  ;;  %v12797_v48 = vcombine.low %v5518_v59, %v5522_v28  ;;  %v12806_v34 = vcombine.high %v5526_v16, %v5530_v3 }
 0x4cd   :  { %v12764_v7 = vcombine.high %v5485_v46, %v5489_v44  ;;  %v12763_v58 = vcombine.low %v5485_v46, %v5489_v44  ;;  %v5573_v28 = vld [vmem:[#allocation14 + $0xb10] sm:$0xff] }
 0x4ce   :  { %6303 = vmatpush1.bf16.msra.mxu0 %v12825_v50  ;;  %v12758_v50 = vcombine.high %v5478_v0, %v5482_v8 }
 0x4cf   :  { %6304 = vmatprep.subr.bf16.mxu0 %v12834_v11  ;;  %6264 = vmatpush1.bf16.msra.mxu1 %v12831_v63  ;;  %v5490_v11 = vld [vmem:[#allocation14 + $0x878] sm:$0xff]  ;;  %v16325_v63 = vmax.bf16 %v5470_v37, %v5468_v47 }
 0x4d0   :  { %6265 = vmatprep.subr.bf16.mxu1 %v12840_v18  ;;  %v5493_v18 = vld [vmem:[#allocation14 + $0x890] sm:$0xff]  ;;  %v12766_v57 = vcombine.high %v5486_v42, %v5490_v11  ;;  %v12765_v56 = vcombine.low %v5486_v42, %v5490_v11  ;;  %v5534_v37 = vld [vmem:[#allocation14 + $0x9d8] sm:$0xff] }
 0x4d1   :  { %v5541_v42 = vld [vmem:[#allocation14 + $0xa10] sm:$0xff] }
 0x4d2   :  { %6305 = vmatpush1.bf16.msra.mxu0 %v12833_v19  ;;  %v5497_v19 = vld [vmem:[#allocation14 + $0x8b0] sm:$0xff] }
 0x4d3   :  { %6306 = vmatprep.subr.bf16.mxu0 %v12842_v43  ;;  %6266 = vmatpush1.bf16.msra.mxu1 %v12839_v4  ;;  %v5494_v43 = vld [vmem:[#allocation14 + $0x898] sm:$0xff]  ;;  %v12772_v15 = vcombine.high %v5493_v18, %v5497_v19  ;;  %v12771_v10 = vcombine.low %v5493_v18, %v5497_v19  ;;  %v5545_v11 = vld [vmem:[#allocation14 + $0xa30] sm:$0xff] }
 0x4d4   :  { %6267 = vmatprep.subr.bf16.mxu1 %v12848_v27  ;;  %v5498_v4 = vld [vmem:[#allocation14 + $0x8b8] sm:$0xff]  ;;  %v5501_v27 = vld [vmem:[#allocation14 + $0x8d0] sm:$0xff] }
 0x4d5   :  { %v12774_v20 = vcombine.high %v5494_v43, %v5498_v4  ;;  %v12773_v24 = vcombine.low %v5494_v43, %v5498_v4  ;;  %v5542_v19 = vld [vmem:[#allocation14 + $0xa18] sm:$0xff]  ;;  %v5549_v4 = vld [vmem:[#allocation14 + $0xa50] sm:$0xff] }
 0x4d6   :  { %6307 = vmatpush1.bf16.msra.mxu0 %v12841_v54  ;;  %v5505_v54 = vld [vmem:[#allocation14 + $0x8f0] sm:$0xff] }
 0x4d7   :  { %6308 = vmatprep.subr.bf16.mxu0 %v12850_v26  ;;  %6268 = vmatpush1.bf16.msra.mxu1 %v12847_v21  ;;  %v5502_v26 = vld [vmem:[#allocation14 + $0x8d8] sm:$0xff]  ;;  %v12780_v38 = vcombine.high %v5501_v27, %v5505_v54  ;;  %v12779_v33 = vcombine.low %v5501_v27, %v5505_v54  ;;  %v12819_v27 = vcombine.low %v5541_v42, %v5545_v11 }
 0x4d8   :  { %6269 = vmatprep.subr.bf16.mxu1 %v12856_v2  ;;  %v5506_v21 = vld [vmem:[#allocation14 + $0x8f8] sm:$0xff]  ;;  %v5509_v2 = vld [vmem:[#allocation14 + $0x910] sm:$0xff] }
 0x4d9   :  { %v12782_v6 = vcombine.high %v5502_v26, %v5506_v21  ;;  %v12781_v12 = vcombine.low %v5502_v26, %v5506_v21  ;;  %v5550_v54 = vld [vmem:[#allocation14 + $0xa58] sm:$0xff]  ;;  %v5557_v21 = vld [vmem:[#allocation14 + $0xa90] sm:$0xff] }
 0x4da   :  { %6309 = vmatpush1.bf16.msra.mxu0 %v12849_v25  ;;  %v5513_v25 = vld [vmem:[#allocation14 + $0x930] sm:$0xff] }
 0x4db   :  { %6310 = vmatprep.subr.bf16.mxu0 %v12858_v13  ;;  %6270 = vmatpush1.bf16.msra.mxu1 %v12855_v62  ;;  %v5514_v13 = vld [vmem:[#allocation14 + $0x938] sm:$0xff]  ;;  %v12788_v62 = vcombine.high %v5509_v2, %v5513_v25 }
 0x4dc   :  { %6271 = vmatprep.subr.bf16.mxu1 %v12864_v61  ;;  %v5521_v61 = vld [vmem:[#allocation14 + $0x970] sm:$0xff] }
 0x4dd   :  { %v12796_v60 = vcombine.high %v5517_v31, %v5521_v61 }
 0x4de   :  { %6311 = vmatpush1.bf16.msra.mxu0 %v12857_v23  ;;  %v12787_v23 = vcombine.low %v5509_v2, %v5513_v25  ;;  %v5558_v25 = vld [vmem:[#allocation14 + $0xa98] sm:$0xff] }
 0x4df   :  { %6312 = vmatprep.subr.bf16.mxu0 %v12866_v17  ;;  %6272 = vmatpush1.bf16.msra.mxu1 %v12863_v30  ;;  %v5525_v30 = vld [vmem:[#allocation14 + $0x990] sm:$0xff] }
 0x4e0   :  { %6273 = vmatprep.subr.bf16.mxu1 %v12872_v41  ;;  %v12795_v41 = vcombine.low %v5517_v31, %v5521_v61  ;;  %v12803_v47 = vcombine.low %v5525_v30, %v5529_v14  ;;  %v5566_v61 = vld [vmem:[#allocation14 + $0xad8] sm:$0xff] }
 0x4e2   :  { %6313 = vmatpush1.bf16.msra.mxu0 %v12865_v55  ;;  %v12804_v55 = vcombine.high %v5525_v30, %v5529_v14  ;;  %v5574_v14 = vld [vmem:[#allocation14 + $0xb18] sm:$0xff] }
 0x4e3   :  { %6314 = vmatprep.subr.bf16.mxu0 %v12874_v5  ;;  %6274 = vmatpush1.bf16.msra.mxu1 %v12871_v32  ;;  %v5533_v5 = vld [vmem:[#allocation14 + $0x9d0] sm:$0xff] }
 0x4e4   :  { %6325 = vmatprep.subr.bf16.mxu1 %v12756_v9  ;;  %v5538_v9 = vld [vmem:[#allocation14 + $0x9f8] sm:$0xff]  ;;  %v12812_v44 = vcombine.high %v5533_v5, %v5537_v49  ;;  %v12811_v18 = vcombine.low %v5533_v5, %v5537_v49 }
 0x4e5   :  { %v12813_v43 = vcombine.low %v5534_v37, %v5538_v9  ;;  %v5582_v49 = vld [vmem:[#allocation14 + $0xb58] sm:$0xff] }
 0x4e6   :  { %6315 = vmatpush1.bf16.msra.mxu0 %v12873_v36  ;;  %6276 = vmatmul.mubr.bf16.vlgmr.msra.gmra.mrb[48].mxu1 %v16325_v63 }
 0x4e7   :  { %6366 = vmatprep.subr.bf16.mxu0 %v12758_v50  ;;  %6326 = vmatpush1.bf16.msra.mxu1 %v12755_v52  ;;  %v12805_v52 = vcombine.low %v5526_v16, %v5530_v3  ;;  %v5581_v3 = vld [vmem:[#allocation14 + $0xb50] sm:$0xff] }
 0x4e8   :  { %6357 = vmatprep.mubr.bf16.mxu1 %v16311_v35  ;;  %6327 = vmatprep.subr.bf16.mxu1 %v12764_v7 }
 0x4e9   :  { %6317 = vmatmul.mubr.bf16.vlgmr.msra.gmra.mrb[80].mxu0 %v16325_v63 }
 0x4ea   :  { %6367 = vmatpush1.bf16.msra.mxu0 %v12757_v53  ;;  %6398 = vmatprep.mubr.bf16.mxu0 %v16311_v35  ;;  %v5510_v35 = vld [vmem:[#allocation14 + $0x918] sm:$0xff]  ;;  %v12814_v53 = vcombine.high %v5534_v37, %v5538_v9  ;;  %v5589_v37 = vld [vmem:[#allocation14 + $0xb90] sm:$0xff] }
 0x4eb   :  { %6368 = vmatprep.subr.bf16.mxu0 %v12766_v57  ;;  %6328 = vmatpush1.bf16.msra.mxu1 %v12763_v58  ;;  %v12790_v51 = vcombine.high %v5510_v35, %v5514_v13  ;;  %v12789_v17 = vcombine.low %v5510_v35, %v5514_v13  ;;  %v5546_v57 = vld [vmem:[#allocation14 + $0xa38] sm:$0xff]  ;;  %v12820_v58 = vcombine.high %v5541_v42, %v5545_v11  ;;  %v5565_v13 = vld [vmem:[#allocation14 + $0xad0] sm:$0xff] }
 0x4ec   :  { %6329 = vmatprep.subr.bf16.mxu1 %v12772_v15  ;;  %v5553_v15 = vld [vmem:[#allocation14 + $0xa70] sm:$0xff]  ;;  %v12821_v26 = vcombine.low %v5542_v19, %v5546_v57 }
 0x4ed   :  { %v12827_v2 = vcombine.low %v5549_v4, %v5553_v15  ;;  %v5593_v9 = vld [vmem:[#allocation14 + $0xbb0] sm:$0xff] }
 0x4ee   :  { %6369 = vmatpush1.bf16.msra.mxu0 %v12765_v56  ;;  %v12822_v56 = vcombine.high %v5542_v19, %v5546_v57  ;;  %v12868_v42 = vcombine.high %v5589_v37, %v5593_v9  ;;  %v6420_v19 = vld [vmem:[#allocation3 + $0x68] sm:$0xf0]  ;;  %v6422_v57 = vld [vmem:[#allocation3 + $0x78] sm:$0xf0] }
 0x4ef   :  { %6370 = vmatprep.subr.bf16.mxu0 %v12774_v20  ;;  %6330 = vmatpush1.bf16.msra.mxu1 %v12771_v10  ;;  %v5554_v20 = vld [vmem:[#allocation14 + $0xa78] sm:$0xff]  ;;  %v12828_v10 = vcombine.high %v5549_v4, %v5553_v15 }
 0x4f0   :  { %6331 = vmatprep.subr.bf16.mxu1 %v12780_v38  ;;  %v5561_v38 = vld [vmem:[#allocation14 + $0xab0] sm:$0xff]  ;;  %v12829_v35 = vcombine.low %v5550_v54, %v5554_v20  ;;  %v5602_v4 = vld [vmem:[#allocation14 + $0xbf8] sm:$0xff] }
 0x4f1   :  { %v12835_v31 = vcombine.low %v5557_v21, %v5561_v38 }
 0x4f2   :  { %6371 = vmatpush1.bf16.msra.mxu0 %v12773_v24  ;;  %v12830_v24 = vcombine.high %v5550_v54, %v5554_v20  ;;  %v6446_v54 = vld [vmem:[#allocation14 + $0xc20] sm:$0xff]  ;;  %v6428_v20 = vrot.slane %v6420_v19, 4 }
 0x4f3   :  { %6372 = vmatprep.subr.bf16.mxu0 %v12782_v6  ;;  %6332 = vmatpush1.bf16.msra.mxu1 %v12779_v33  ;;  %v5562_v6 = vld [vmem:[#allocation14 + $0xab8] sm:$0xff]  ;;  %v12836_v33 = vcombine.high %v5557_v21, %v5561_v38  ;;  %v6443_v38 = vld [vmem:[#allocation14 + $0xc08] sm:$0xff] }
 0x4f4   :  { %6333 = vmatprep.subr.bf16.mxu1 %v12788_v62  ;;  %v5569_v62 = vld [vmem:[#allocation14 + $0xaf0] sm:$0xff]  ;;  %v12837_v59 = vcombine.low %v5558_v25, %v5562_v6 }
 0x4f5   :  { %v12843_v30 = vcombine.low %v5565_v13, %v5569_v62 }
 0x4f6   :  { %6373 = vmatpush1.bf16.msra.mxu0 %v12781_v12  ;;  %v12838_v12 = vcombine.high %v5558_v25, %v5562_v6  ;;  %v6416_v25 = vld [vmem:[#allocation3 + $0x68] sm:$0xf]  ;;  %v6418_v6 = vld [vmem:[#allocation3 + $0x78] sm:$0xf] }
 0x4f7   :  { %6374 = vmatprep.subr.bf16.mxu0 %v12790_v51  ;;  %6334 = vmatpush1.bf16.msra.mxu1 %v12787_v23  ;;  %v5570_v51 = vld [vmem:[#allocation14 + $0xaf8] sm:$0xff]  ;;  %v12844_v23 = vcombine.high %v5565_v13, %v5569_v62  ;;  %v6450_v62 = vld [vmem:[#allocation14 + $0xc40] sm:$0xff] }
 0x4f8   :  { %6335 = vmatprep.subr.bf16.mxu1 %v12796_v60  ;;  %v5577_v60 = vld [vmem:[#allocation14 + $0xb30] sm:$0xff]  ;;  %v12845_v16 = vcombine.low %v5566_v61, %v5570_v51 }
 0x4f9   :  { %v16331_v40 = vpop.f32.mrb[36].mxu1  ;;  %v12851_v5 = vcombine.low %v5573_v28, %v5577_v60 }
 0x4fa   :  { %6375 = vmatpush1.bf16.msra.mxu0 %v12789_v17  ;;  %v16333_v32 = vpop.f32.mrb[37].mxu1  ;;  %v12846_v17 = vcombine.high %v5566_v61, %v5570_v51  ;;  %v6451_v51 = vld [vmem:[#allocation14 + $0xc48] sm:$0xff] }
 0x4fb   :  { %6376 = vmatprep.subr.bf16.mxu0 %v12798_v1  ;;  %v4600_v8 = vpop.f32.mrb[38].mxu1  ;;  %6336 = vmatpush1.bf16.msra.mxu1 %v12795_v41  ;;  %v5578_v1 = vld [vmem:[#allocation14 + $0xb38] sm:$0xff]  ;;  %v12852_v41 = vcombine.high %v5573_v28, %v5577_v60 }
 0x4fc   :  { %v16335_v0 = vpop.f32.mrb[68].mxu0  ;;  %v4601_v46 = vpop.f32.mrb[39].mxu1  ;;  %6337 = vmatprep.subr.bf16.mxu1 %v12804_v55  ;;  %v5585_v55 = vld [vmem:[#allocation14 + $0xb70] sm:$0xff] }
 0x4fd   :  { %v16337_v36 = vpop.f32.mrb[69].mxu0  ;;  %v12860_v8 = vcombine.high %v5581_v3, %v5585_v55 }
 0x4fe   :  { %v4641_v50 = vpop.f32.mrb[70].mxu0  ;;  %6377 = vmatpush1.bf16.msra.mxu0 %v12797_v48  ;;  %v12854_v48 = vcombine.high %v5574_v14, %v5578_v1 }
 0x4ff   :  { %v4642_v7 = vpop.f32.mrb[71].mxu0  ;;  %6378 = vmatprep.subr.bf16.mxu0 %v12806_v34  ;;  %6338 = vmatpush1.bf16.msra.mxu1 %v12803_v47  ;;  %v5586_v34 = vld [vmem:[#allocation14 + $0xb78] sm:$0xff]  ;;  %v12853_v47 = vcombine.low %v5574_v14, %v5578_v1 }
 0x500   :  { %6339 = vmatprep.subr.bf16.mxu1 %v12812_v44  ;;  %v12862_v46 = vcombine.high %v5582_v49, %v5586_v34  ;;  %v12859_v44 = vcombine.low %v5581_v3, %v5585_v55  ;;  %v5590_v50 = vld [vmem:[#allocation14 + $0xb98] sm:$0xff]  ;;  %v12861_v11 = vcombine.low %v5582_v49, %v5586_v34  ;;  %v5597_v7 = vld [vmem:[#allocation14 + $0xbd0] sm:$0xff] }
 0x502   :  { %6379 = vmatpush1.bf16.msra.mxu0 %v12805_v52  ;;  %v5594_v52 = vld [vmem:[#allocation14 + $0xbb8] sm:$0xff] }
 0x503   :  { %6380 = vmatprep.subr.bf16.mxu0 %v12814_v53  ;;  %6340 = vmatpush1.bf16.msra.mxu1 %v12811_v18  ;;  %v5601_v53 = vld [vmem:[#allocation14 + $0xbf0] sm:$0xff]  ;;  %v12870_v18 = vcombine.high %v5590_v50, %v5594_v52 }
 0x504   :  { %6341 = vmatprep.subr.bf16.mxu1 %v12820_v58  ;;  %v12867_v58 = vcombine.low %v5589_v37, %v5593_v9  ;;  %v12876_v15 = vcombine.high %v5597_v7, %v5601_v53  ;;  %v12875_v21 = vcombine.low %v5597_v7, %v5601_v53  ;;  %v6482_v53 = vld [vmem:[#allocation14 + $0xd40] sm:$0xff] }
 0x506   :  { %6381 = vmatpush1.bf16.msra.mxu0 %v12813_v43  ;;  %v5598_v43 = vld [vmem:[#allocation14 + $0xbd8] sm:$0xff] }
 0x507   :  { %6382 = vmatprep.subr.bf16.mxu0 %v12822_v56  ;;  %6342 = vmatpush1.bf16.msra.mxu1 %v12819_v27  ;;  %v12869_v56 = vcombine.low %v5590_v50, %v5594_v52  ;;  %v6442_v27 = vld [vmem:[#allocation14 + $0xc00] sm:$0xff]  ;;  %v6475_v52 = vld [vmem:[#allocation14 + $0xd08] sm:$0xff] }
 0x508   :  { %6343 = vmatprep.subr.bf16.mxu1 %v12828_v10  ;;  %v6430_v10 = vrot.slane %v6422_v57, 4  ;;  %v12879_v61 = vcombine.low %v6442_v27, %v6446_v54 }
 0x50a   :  { %6383 = vmatpush1.bf16.msra.mxu0 %v12821_v26  ;;  %v12878_v26 = vcombine.high %v5598_v43, %v5602_v4  ;;  %v6438_v13 = vmax.bf16 %v6430_v10, %v6418_v6  ;;  %v6491_v10 = vld [vmem:[#allocation14 + $0xd88] sm:$0xff] }
 0x50b   :  { %6384 = vmatprep.subr.bf16.mxu0 %v12830_v24  ;;  %6344 = vmatpush1.bf16.msra.mxu1 %v12827_v2  ;;  %v6447_v24 = vld [vmem:[#allocation14 + $0xc28] sm:$0xff]  ;;  %v12880_v2 = vcombine.high %v6442_v27, %v6446_v54  ;;  %v6494_v27 = vld [vmem:[#allocation14 + $0xda0] sm:$0xff] }
 0x50c   :  { %6345 = vmatprep.subr.bf16.mxu1 %v12836_v33  ;;  %v12877_v33 = vcombine.low %v5598_v43, %v5602_v4  ;;  %v12881_v28 = vcombine.low %v6443_v38, %v6447_v24  ;;  %v6487_v43 = vld [vmem:[#allocation14 + $0xd68] sm:$0xff] }
 0x50e   :  { %6385 = vmatpush1.bf16.msra.mxu0 %v12829_v35  ;;  %v6436_v35 = vmax.bf16 %v6428_v20, %v6416_v25  ;;  %v6502_v25 = vld [vmem:[#allocation14 + $0xde0] sm:$0xff] }
 0x50f   :  { %6386 = vmatprep.subr.bf16.mxu0 %v12838_v12  ;;  %6346 = vmatpush1.bf16.msra.mxu1 %v12835_v31  ;;  %v6454_v12 = vld [vmem:[#allocation14 + $0xc60] sm:$0xff]  ;;  %v12882_v31 = vcombine.high %v6443_v38, %v6447_v24 }
 0x510   :  { %6347 = vmatprep.subr.bf16.mxu1 %v12844_v23  ;;  %v6455_v23 = vld [vmem:[#allocation14 + $0xc68] sm:$0xff]  ;;  %v16339_v60 = vmax.bf16 %v6438_v13, %v6436_v35  ;;  %v12887_v1 = vcombine.low %v6450_v62, %v6454_v12 }
 0x511   :  { %v12890_v14 = vcombine.high %v6451_v51, %v6455_v23  ;;  %v12889_v55 = vcombine.low %v6451_v51, %v6455_v23  ;;  %v6503_v51 = vld [vmem:[#allocation14 + $0xde8] sm:$0xff] }
 0x512   :  { %6387 = vmatpush1.bf16.msra.mxu0 %v12837_v59  ;;  %v12888_v59 = vcombine.high %v6450_v62, %v6454_v12 }
 0x513   :  { %6388 = vmatprep.subr.bf16.mxu0 %v12846_v17  ;;  %6348 = vmatpush1.bf16.msra.mxu1 %v12843_v30  ;;  %v6458_v17 = vld [vmem:[#allocation14 + $0xc80] sm:$0xff] }
 0x514   :  { %6349 = vmatprep.subr.bf16.mxu1 %v12852_v41  ;;  %v6462_v30 = vld [vmem:[#allocation14 + $0xca0] sm:$0xff]  ;;  %v6459_v41 = vld [vmem:[#allocation14 + $0xc88] sm:$0xff] }
 0x515   :  { %v12896_v3 = vcombine.high %v6458_v17, %v6462_v30  ;;  %v12895_v34 = vcombine.low %v6458_v17, %v6462_v30 }
 0x516   :  { %6389 = vmatpush1.bf16.msra.mxu0 %v12845_v16  ;;  %v6463_v16 = vld [vmem:[#allocation14 + $0xca8] sm:$0xff] }
 0x517   :  { %6390 = vmatprep.subr.bf16.mxu0 %v12854_v48  ;;  %6350 = vmatpush1.bf16.msra.mxu1 %v12851_v5  ;;  %v6466_v48 = vld [vmem:[#allocation14 + $0xcc0] sm:$0xff]  ;;  %v12898_v49 = vcombine.high %v6459_v41, %v6463_v16  ;;  %v12897_v9 = vcombine.low %v6459_v41, %v6463_v16 }
 0x518   :  { %6351 = vmatprep.subr.bf16.mxu1 %v12860_v8  ;;  %v6470_v5 = vld [vmem:[#allocation14 + $0xce0] sm:$0xff]  ;;  %v6467_v8 = vld [vmem:[#allocation14 + $0xcc8] sm:$0xff] }
 0x519   :  { %v12904_v37 = vcombine.high %v6466_v48, %v6470_v5  ;;  %v12903_v50 = vcombine.low %v6466_v48, %v6470_v5 }
 0x51a   :  { %6391 = vmatpush1.bf16.msra.mxu0 %v12853_v47  ;;  %v6471_v47 = vld [vmem:[#allocation14 + $0xce8] sm:$0xff] }
 0x51b   :  { %6392 = vmatprep.subr.bf16.mxu0 %v12862_v46  ;;  %6352 = vmatpush1.bf16.msra.mxu1 %v12859_v44  ;;  %v6474_v46 = vld [vmem:[#allocation14 + $0xd00] sm:$0xff]  ;;  %v12906_v44 = vcombine.high %v6467_v8, %v6471_v47  ;;  %v12905_v7 = vcombine.low %v6467_v8, %v6471_v47  ;;  %v6515_v47 = vld [vmem:[#allocation14 + $0xe48] sm:$0xff] }
 0x51c   :  { %6353 = vmatprep.subr.bf16.mxu1 %v12868_v42  ;;  %v6479_v42 = vld [vmem:[#allocation14 + $0xd28] sm:$0xff] }
 0x51d   :  { %v12914_v19 = vcombine.high %v6475_v52, %v6479_v42 }
 0x51e   :  { %6393 = vmatpush1.bf16.msra.mxu0 %v12861_v11 }
 0x51f   :  { %6394 = vmatprep.subr.bf16.mxu0 %v12870_v18  ;;  %6354 = vmatpush1.bf16.msra.mxu1 %v12867_v58  ;;  %v6486_v18 = vld [vmem:[#allocation14 + $0xd60] sm:$0xff]  ;;  %v6483_v58 = vld [vmem:[#allocation14 + $0xd48] sm:$0xff] }
 0x520   :  { %6355 = vmatprep.subr.bf16.mxu1 %v12876_v15  ;;  %v12920_v4 = vcombine.high %v6482_v53, %v6486_v18  ;;  %v12913_v15 = vcombine.low %v6475_v52, %v6479_v42  ;;  %v12922_v54 = vcombine.high %v6483_v58, %v6487_v43  ;;  %v12919_v20 = vcombine.low %v6482_v53, %v6486_v18  ;;  %v6523_v42 = vld [vmem:[#allocation14 + $0xe88] sm:$0xff]  ;;  %v6530_v18 = vld [vmem:[#allocation14 + $0xec0] sm:$0xff] }
 0x521   :  { %v12921_v24 = vcombine.low %v6483_v58, %v6487_v43  ;;  %v6531_v43 = vld [vmem:[#allocation14 + $0xec8] sm:$0xff] }
 0x522   :  { %6395 = vmatpush1.bf16.msra.mxu0 %v12869_v56  ;;  %v6490_v56 = vld [vmem:[#allocation14 + $0xd80] sm:$0xff] }
 0x523   :  { %6396 = vmatprep.subr.bf16.mxu0 %v12878_v26  ;;  %6356 = vmatpush1.bf16.msra.mxu1 %v12875_v21  ;;  %v6495_v26 = vld [vmem:[#allocation14 + $0xda8] sm:$0xff]  ;;  %v12928_v21 = vcombine.high %v6490_v56, %v6494_v27 }
 0x524   :  { %7210 = vmatprep.subr.bf16.mxu1 %v12880_v2  ;;  %v6498_v2 = vld [vmem:[#allocation14 + $0xdc0] sm:$0xff]  ;;  %v12930_v35 = vcombine.high %v6491_v10, %v6495_v26 }
 0x526   :  { %6397 = vmatpush1.bf16.msra.mxu0 %v12877_v33  ;;  %6358 = vmatmul.mubr.bf16.vlgmr.msra.gmra.mrb[52].mxu1 %v16325_v63 }
 0x527   :  { %7251 = vmatprep.subr.bf16.mxu0 %v12882_v31  ;;  %7211 = vmatpush1.bf16.msra.mxu1 %v12879_v61  ;;  %v12927_v31 = vcombine.low %v6490_v56, %v6494_v27  ;;  %v6499_v61 = vld [vmem:[#allocation14 + $0xdc8] sm:$0xff]  ;;  %v6538_v27 = vld [vmem:[#allocation14 + $0xf00] sm:$0xff] }
 0x528   :  { %7242 = vmatprep.mubr.bf16.mxu1 %v16339_v60  ;;  %7212 = vmatprep.subr.bf16.mxu1 %v12888_v59  ;;  %v12938_v16 = vcombine.high %v6499_v61, %v6503_v51  ;;  %v12937_v5 = vcombine.low %v6499_v61, %v6503_v51  ;;  %v6554_v51 = vld [vmem:[#allocation14 + $0xf80] sm:$0xff] }
 0x529   :  { %6399 = vmatmul.mubr.bf16.vlgmr.msra.gmra.mrb[84].mxu0 %v16325_v63  ;;  %v6478_v63 = vld [vmem:[#allocation14 + $0xd20] sm:$0xff] }
 0x52a   :  { %7252 = vmatpush1.bf16.msra.mxu0 %v12881_v28  ;;  %7283 = vmatprep.mubr.bf16.mxu0 %v16339_v60  ;;  %v12912_v11 = vcombine.high %v6474_v46, %v6478_v63  ;;  %v12911_v57 = vcombine.low %v6474_v46, %v6478_v63  ;;  %v6522_v63 = vld [vmem:[#allocation14 + $0xe80] sm:$0xff] }
 0x52b   :  { %7253 = vmatprep.subr.bf16.mxu0 %v12890_v14  ;;  %7213 = vmatpush1.bf16.msra.mxu1 %v12887_v1  ;;  %v12929_v14 = vcombine.low %v6491_v10, %v6495_v26  ;;  %v6510_v1 = vld [vmem:[#allocation14 + $0xe20] sm:$0xff]  ;;  %v6539_v26 = vld [vmem:[#allocation14 + $0xf08] sm:$0xff] }
 0x52c   :  { %7214 = vmatprep.subr.bf16.mxu1 %v12896_v3  ;;  %v12935_v3 = vcombine.low %v6498_v2, %v6502_v25 }
 0x52e   :  { %7254 = vmatpush1.bf16.msra.mxu0 %v12889_v55  ;;  %v6507_v55 = vld [vmem:[#allocation14 + $0xe08] sm:$0xff] }
 0x52f   :  { %7255 = vmatprep.subr.bf16.mxu0 %v12898_v49  ;;  %7215 = vmatpush1.bf16.msra.mxu1 %v12895_v34  ;;  %v6514_v49 = vld [vmem:[#allocation14 + $0xe40] sm:$0xff] }
 0x530   :  { %7216 = vmatprep.subr.bf16.mxu1 %v12904_v37  ;;  %v6518_v34 = vld [vmem:[#allocation14 + $0xe60] sm:$0xff]  ;;  %v6519_v37 = vld [vmem:[#allocation14 + $0xe68] sm:$0xff] }
 0x531   :  { %v12951_v52 = vcombine.low %v6514_v49, %v6518_v34  ;;  %v12953_v53 = vcombine.low %v6515_v47, %v6519_v37 }
 0x532   :  { %7256 = vmatpush1.bf16.msra.mxu0 %v12897_v9  ;;  %v12952_v9 = vcombine.high %v6514_v49, %v6518_v34  ;;  %v6567_v49 = vld [vmem:[#allocation14 + $0xfe8] sm:$0xff] }
 0x533   :  { %7257 = vmatprep.subr.bf16.mxu0 %v12906_v44  ;;  %7217 = vmatpush1.bf16.msra.mxu1 %v12903_v50  ;;  %v6526_v44 = vld [vmem:[#allocation14 + $0xea0] sm:$0xff]  ;;  %v12954_v50 = vcombine.high %v6515_v47, %v6519_v37  ;;  %v6444_v37 = vld [vmem:[#allocation14 + $0xc10] sm:$0xff] }
 0x534   :  { %7218 = vmatprep.subr.bf16.mxu1 %v12912_v11  ;;  %v6527_v11 = vld [vmem:[#allocation14 + $0xea8] sm:$0xff]  ;;  %v12959_v58 = vcombine.low %v6522_v63, %v6526_v44 }
 0x535   :  { %v12961_v56 = vcombine.low %v6523_v42, %v6527_v11 }
 0x536   :  { %7258 = vmatpush1.bf16.msra.mxu0 %v12905_v7  ;;  %v12960_v7 = vcombine.high %v6522_v63, %v6526_v44  ;;  %v6415_v63 = vld [vmem:[#allocation3 + $0x60] sm:$0xf] }
 0x537   :  { %7259 = vmatprep.subr.bf16.mxu0 %v12914_v19  ;;  %7219 = vmatpush1.bf16.msra.mxu1 %v12911_v57  ;;  %v6534_v19 = vld [vmem:[#allocation14 + $0xee0] sm:$0xff]  ;;  %v12962_v57 = vcombine.high %v6523_v42, %v6527_v11  ;;  %v6449_v42 = vld [vmem:[#allocation14 + $0xc38] sm:$0xff] }
 0x538   :  { %7220 = vmatprep.subr.bf16.mxu1 %v12920_v4  ;;  %v6535_v4 = vld [vmem:[#allocation14 + $0xee8] sm:$0xff]  ;;  %v12967_v10 = vcombine.low %v6530_v18, %v6534_v19 }
 0x539   :  { %v5318_v38 = vpop.f32.mrb[40].mxu1 }
 0x53a   :  { %7260 = vmatpush1.bf16.msra.mxu0 %v12913_v15  ;;  %v16346_v6 = vadd.f32 %v5318_v38, %v16317_v29  ;;  %v5320_v33 = vpop.f32.mrb[41].mxu1  ;;  %v12936_v29 = vcombine.high %v6498_v2, %v6502_v25  ;;  %v12968_v15 = vcombine.high %v6530_v18, %v6534_v19  ;;  %v6546_v2 = vld [vmem:[#allocation14 + $0xf40] sm:$0xff]  ;;  %v6452_v19 = vld [vmem:[#allocation14 + $0xc50] sm:$0xff] }
 0x53b   :  { %7261 = vmatprep.subr.bf16.mxu0 %v12922_v54  ;;  %v16349_v62 = vadd.f32 %v5320_v33, %v16321_v45  ;;  %v5322_v12 = vpop.f32.mrb[42].mxu1  ;;  %7221 = vmatpush1.bf16.msra.mxu1 %v12919_v20  ;;  %v6506_v45 = vld [vmem:[#allocation14 + $0xe00] sm:$0xff]  ;;  %v12970_v20 = vcombine.high %v6531_v43, %v6535_v4 }
 0x53c   :  { %v5359_v13 = vpop.f32.mrb[72].mxu0  ;;  %v5323_v28 = vpop.f32.mrb[43].mxu1  ;;  %7222 = vmatprep.subr.bf16.mxu1 %v12928_v21  ;;  %v12944_v48 = vcombine.high %v6506_v45, %v6510_v1  ;;  %v12943_v8 = vcombine.low %v6506_v45, %v6510_v1  ;;  %v6542_v54 = vld [vmem:[#allocation14 + $0xf20] sm:$0xff]  ;;  %v6543_v21 = vld [vmem:[#allocation14 + $0xf28] sm:$0xff] }
 0x53d   :  { %v16352_v23 = vadd.f32 %v5359_v13, %v16319_v39  ;;  %v5361_v59 = vpop.f32.mrb[73].mxu0  ;;  %v6511_v39 = vld [vmem:[#allocation14 + $0xe28] sm:$0xff]  ;;  %v12976_v38 = vcombine.high %v6538_v27, %v6542_v54  ;;  %v6550_v25 = vld [vmem:[#allocation14 + $0xf60] sm:$0xff]  ;;  %v12978_v33 = vcombine.high %v6539_v26, %v6543_v21  ;;  %v12977_v61 = vcombine.low %v6539_v26, %v6543_v21 }
 0x53e   :  { %v16355_v17 = vadd.f32 %v5361_v59, %v16323_v22  ;;  %v5363_v30 = vpop.f32.mrb[74].mxu0  ;;  %7262 = vmatpush1.bf16.msra.mxu0 %v12921_v24  ;;  %v12946_v22 = vcombine.high %v6507_v55, %v6511_v39  ;;  %v12945_v46 = vcombine.low %v6507_v55, %v6511_v39  ;;  %v12969_v24 = vcombine.low %v6531_v43, %v6535_v4  ;;  %v6547_v13 = vld [vmem:[#allocation14 + $0xf48] sm:$0xff]  ;;  %v6558_v59 = vld [vmem:[#allocation14 + $0xfa0] sm:$0xff]  ;;  %v6421_v55 = vld [vmem:[#allocation3 + $0x70] sm:$0xf0] }
 0x53f   :  { %v5364_v41 = vpop.f32.mrb[75].mxu0  ;;  %7263 = vmatprep.subr.bf16.mxu0 %v12930_v35  ;;  %7223 = vmatpush1.bf16.msra.mxu1 %v12927_v31  ;;  %v12975_v35 = vcombine.low %v6538_v27, %v6542_v54  ;;  %v6551_v12 = vld [vmem:[#allocation14 + $0xf68] sm:$0xff]  ;;  %v12984_v31 = vcombine.high %v6546_v2, %v6550_v25  ;;  %v12992_v45 = vcombine.high %v6554_v51, %v6558_v59  ;;  %v6453_v4 = vld [vmem:[#allocation14 + $0xc58] sm:$0xff] }
 0x540   :  { %7224 = vmatprep.subr.bf16.mxu1 %v12936_v29  ;;  %v12986_v28 = vcombine.high %v6547_v13, %v6551_v12  ;;  %v12983_v29 = vcombine.low %v6546_v2, %v6550_v25  ;;  %v6555_v30 = vld [vmem:[#allocation14 + $0xf88] sm:$0xff]  ;;  %v12985_v41 = vcombine.low %v6547_v13, %v6551_v12 }
 0x541   :  { %v6419_v1 = vld [vmem:[#allocation3 + $0x60] sm:$0xf0] }
 0x542   :  { %7264 = vmatpush1.bf16.msra.mxu0 %v12929_v14  ;;  %v6559_v14 = vld [vmem:[#allocation14 + $0xfa8] sm:$0xff] }
 0x543   :  { %7265 = vmatprep.subr.bf16.mxu0 %v12938_v16  ;;  %7225 = vmatpush1.bf16.msra.mxu1 %v12935_v3  ;;  %v6562_v16 = vld [vmem:[#allocation14 + $0xfc0] sm:$0xff]  ;;  %v12994_v39 = vcombine.high %v6555_v30, %v6559_v14  ;;  %v12993_v47 = vcombine.low %v6555_v30, %v6559_v14 }
 0x544   :  { %7226 = vmatprep.subr.bf16.mxu1 %v12944_v48  ;;  %v6566_v3 = vld [vmem:[#allocation14 + $0xfe0] sm:$0xff]  ;;  %v12991_v48 = vcombine.low %v6554_v51, %v6558_v59 }
 0x545   :  { %v13000_v34 = vcombine.high %v6562_v16, %v6566_v3  ;;  %v12999_v44 = vcombine.low %v6562_v16, %v6566_v3  ;;  %v6484_v16 = vld [vmem:[#allocation14 + $0xd50] sm:$0xff] }
 0x546   :  { %7266 = vmatpush1.bf16.msra.mxu0 %v12937_v5  ;;  %v6563_v5 = vld [vmem:[#allocation14 + $0xfc8] sm:$0xff]  ;;  %v6488_v3 = vld [vmem:[#allocation14 + $0xd70] sm:$0xff] }
 0x547   :  { %7267 = vmatprep.subr.bf16.mxu0 %v12946_v22  ;;  %7227 = vmatpush1.bf16.msra.mxu1 %v12943_v8  ;;  %v6427_v22 = vrot.slane %v6419_v1, 4  ;;  %v6429_v8 = vrot.slane %v6421_v55, 4  ;;  %v13001_v18 = vcombine.low %v6563_v5, %v6567_v49 }
 0x548   :  { %7228 = vmatprep.subr.bf16.mxu1 %v12952_v9  ;;  %v6448_v9 = vld [vmem:[#allocation14 + $0xc30] sm:$0xff] }
 0x549   :  { %v6435_v11 = vmax.bf16 %v6427_v22, %v6415_v63  ;;  %v12883_v43 = vcombine.low %v6444_v37, %v6448_v9  ;;  %v6492_v22 = vld [vmem:[#allocation14 + $0xd90] sm:$0xff] }
 0x54a   :  { %7268 = vmatpush1.bf16.msra.mxu0 %v12945_v46  ;;  %v13002_v46 = vcombine.high %v6563_v5, %v6567_v49  ;;  %v6489_v5 = vld [vmem:[#allocation14 + $0xd78] sm:$0xff]  ;;  %v12924_v49 = vcombine.high %v6484_v16, %v6488_v3 }
 0x54b   :  { %7269 = vmatprep.subr.bf16.mxu0 %v12954_v50  ;;  %7229 = vmatpush1.bf16.msra.mxu1 %v12951_v52  ;;  %v6417_v50 = vld [vmem:[#allocation3 + $0x70] sm:$0xf]  ;;  %v6445_v52 = vld [vmem:[#allocation14 + $0xc18] sm:$0xff] }
 0x54c   :  { %7230 = vmatprep.subr.bf16.mxu1 %v12960_v7  ;;  %v6437_v7 = vmax.bf16 %v6429_v8, %v6417_v50  ;;  %v12885_v54 = vcombine.low %v6445_v52, %v6449_v42  ;;  %v6496_v8 = vld [vmem:[#allocation14 + $0xdb0] sm:$0xff] }
 0x54d   :  { %v12932_v63 = vcombine.high %v6492_v22, %v6496_v8 }
 0x54e   :  { %7270 = vmatpush1.bf16.msra.mxu0 %v12953_v53  ;;  %v12884_v53 = vcombine.high %v6444_v37, %v6448_v9  ;;  %v12923_v37 = vcombine.low %v6484_v16, %v6488_v3  ;;  %v6493_v9 = vld [vmem:[#allocation14 + $0xd98] sm:$0xff]  ;;  %v6532_v3 = vld [vmem:[#allocation14 + $0xed0] sm:$0xff] }
 0x54f   :  { %7271 = vmatprep.subr.bf16.mxu0 %v12962_v57  ;;  %7231 = vmatpush1.bf16.msra.mxu1 %v12959_v58  ;;  %v6456_v57 = vld [vmem:[#allocation14 + $0xc70] sm:$0xff]  ;;  %v12886_v58 = vcombine.high %v6445_v52, %v6449_v42 }
 0x550   :  { %7232 = vmatprep.subr.bf16.mxu1 %v12968_v15  ;;  %v6457_v15 = vld [vmem:[#allocation14 + $0xc78] sm:$0xff]  ;;  %v12892_v27 = vcombine.high %v6452_v19, %v6456_v57  ;;  %v12891_v21 = vcombine.low %v6452_v19, %v6456_v57  ;;  %v6500_v52 = vld [vmem:[#allocation14 + $0xdd0] sm:$0xff] }
 0x551   :  { %v12894_v26 = vcombine.high %v6453_v4, %v6457_v15  ;;  %v12893_v25 = vcombine.low %v6453_v4, %v6457_v15  ;;  %v6504_v42 = vld [vmem:[#allocation14 + $0xdf0] sm:$0xff]  ;;  %v6505_v4 = vld [vmem:[#allocation14 + $0xdf8] sm:$0xff] }
 0x552   :  { %7272 = vmatpush1.bf16.msra.mxu0 %v12961_v56  ;;  %v16357_v56 = vmax.bf16 %v6437_v7, %v6435_v11 }
 0x553   :  { %7273 = vmatprep.subr.bf16.mxu0 %v12970_v20  ;;  %7233 = vmatpush1.bf16.msra.mxu1 %v12967_v10  ;;  %v6460_v20 = vld [vmem:[#allocation14 + $0xc90] sm:$0xff] }
 0x554   :  { %7234 = vmatprep.subr.bf16.mxu1 %v12976_v38  ;;  %v6464_v10 = vld [vmem:[#allocation14 + $0xcb0] sm:$0xff]  ;;  %v6461_v38 = vld [vmem:[#allocation14 + $0xc98] sm:$0xff] }
 0x555   :  { %v12900_v2 = vcombine.high %v6460_v20, %v6464_v10  ;;  %v12899_v12 = vcombine.low %v6460_v20, %v6464_v10 }
 0x556   :  { %7274 = vmatpush1.bf16.msra.mxu0 %v12969_v24  ;;  %v6465_v24 = vld [vmem:[#allocation14 + $0xcb8] sm:$0xff] }
 0x557   :  { %7275 = vmatprep.subr.bf16.mxu0 %v12978_v33  ;;  %7235 = vmatpush1.bf16.msra.mxu1 %v12975_v35  ;;  %v6468_v33 = vld [vmem:[#allocation14 + $0xcd0] sm:$0xff]  ;;  %v12902_v13 = vcombine.high %v6461_v38, %v6465_v24  ;;  %v12901_v59 = vcombine.low %v6461_v38, %v6465_v24 }
 0x558   :  { %7236 = vmatprep.subr.bf16.mxu1 %v12984_v31  ;;  %v6472_v35 = vld [vmem:[#allocation14 + $0xcf0] sm:$0xff]  ;;  %v6469_v31 = vld [vmem:[#allocation14 + $0xcd8] sm:$0xff] }
 0x559   :  { %v12908_v51 = vcombine.high %v6468_v33, %v6472_v35  ;;  %v12907_v14 = vcombine.low %v6468_v33, %v6472_v35 }
 0x55a   :  { %7276 = vmatpush1.bf16.msra.mxu0 %v12977_v61  ;;  %v6473_v61 = vld [vmem:[#allocation14 + $0xcf8] sm:$0xff] }
 0x55b   :  { %7277 = vmatprep.subr.bf16.mxu0 %v12986_v28  ;;  %7237 = vmatpush1.bf16.msra.mxu1 %v12983_v29  ;;  %v6476_v28 = vld [vmem:[#allocation14 + $0xd10] sm:$0xff]  ;;  %v12910_v30 = vcombine.high %v6469_v31, %v6473_v61 }
 0x55c   :  { %7238 = vmatprep.subr.bf16.mxu1 %v12992_v45  ;;  %v6480_v29 = vld [vmem:[#allocation14 + $0xd30] sm:$0xff]  ;;  %v6481_v45 = vld [vmem:[#allocation14 + $0xd38] sm:$0xff] }
 0x55d   :  { %v12916_v1 = vcombine.high %v6476_v28, %v6480_v29 }
 0x55e   :  { %7278 = vmatpush1.bf16.msra.mxu0 %v12985_v41  ;;  %v12909_v41 = vcombine.low %v6469_v31, %v6473_v61  ;;  %v6517_v61 = vld [vmem:[#allocation14 + $0xe58] sm:$0xff] }
 0x55f   :  { %7279 = vmatprep.subr.bf16.mxu0 %v12994_v39  ;;  %7239 = vmatpush1.bf16.msra.mxu1 %v12991_v48  ;;  %v12915_v39 = vcombine.low %v6476_v28, %v6480_v29  ;;  %v6485_v48 = vld [vmem:[#allocation14 + $0xd58] sm:$0xff]  ;;  %v6524_v29 = vld [vmem:[#allocation14 + $0xe90] sm:$0xff] }
 0x560   :  { %7240 = vmatprep.subr.bf16.mxu1 %v13000_v34  ;;  %v12925_v50 = vcombine.low %v6485_v48, %v6489_v5 }
 0x562   :  { %7280 = vmatpush1.bf16.msra.mxu0 %v12993_v47  ;;  %v12926_v47 = vcombine.high %v6485_v48, %v6489_v5  ;;  %v6533_v5 = vld [vmem:[#allocation14 + $0xed8] sm:$0xff] }
 0x563   :  { %7281 = vmatprep.subr.bf16.mxu0 %v13002_v46  ;;  %7241 = vmatpush1.bf16.msra.mxu1 %v12999_v44  ;;  %v6497_v46 = vld [vmem:[#allocation14 + $0xdb8] sm:$0xff] }
 0x564   :  { %7292 = vmatprep.subr.bf16.mxu1 %v12884_v53  ;;  %v12934_v53 = vcombine.high %v6493_v9, %v6497_v46 }
 0x566   :  { %7282 = vmatpush1.bf16.msra.mxu0 %v13001_v18  ;;  %7243 = vmatmul.mubr.bf16.vlgmr.msra.gmra.mrb[56].mxu1 %v16357_v56 }
 0x567   :  { %7333 = vmatprep.subr.bf16.mxu0 %v12886_v58  ;;  %7293 = vmatpush1.bf16.msra.mxu1 %v12883_v43  ;;  %v12931_v58 = vcombine.low %v6492_v22, %v6496_v8  ;;  %v6501_v43 = vld [vmem:[#allocation14 + $0xdd8] sm:$0xff]  ;;  %v6540_v8 = vld [vmem:[#allocation14 + $0xf10] sm:$0xff] }
 0x568   :  { %7324 = vmatprep.mubr.bf16.mxu1 %v16339_v60  ;;  %7294 = vmatprep.subr.bf16.mxu1 %v12892_v27  ;;  %v12942_v24 = vcombine.high %v6501_v43, %v6505_v4  ;;  %v12941_v35 = vcombine.low %v6501_v43, %v6505_v4  ;;  %v6556_v4 = vld [vmem:[#allocation14 + $0xf90] sm:$0xff] }
 0x569   :  { %7284 = vmatmul.mubr.bf16.vlgmr.msra.gmra.mrb[88].mxu0 %v16357_v56 }
 0x56a   :  { %7334 = vmatpush1.bf16.msra.mxu0 %v12885_v54  ;;  %7365 = vmatprep.mubr.bf16.mxu0 %v16339_v60  ;;  %v6477_v60 = vld [vmem:[#allocation14 + $0xd18] sm:$0xff] }
 0x56b   :  { %7335 = vmatprep.subr.bf16.mxu0 %v12894_v26  ;;  %7295 = vmatpush1.bf16.msra.mxu1 %v12891_v21  ;;  %v12918_v55 = vcombine.high %v6477_v60, %v6481_v45  ;;  %v12917_v34 = vcombine.low %v6477_v60, %v6481_v45  ;;  %v12933_v26 = vcombine.low %v6493_v9, %v6497_v46  ;;  %v6512_v21 = vld [vmem:[#allocation14 + $0xe30] sm:$0xff]  ;;  %v6525_v45 = vld [vmem:[#allocation14 + $0xe98] sm:$0xff] }
 0x56c   :  { %7296 = vmatprep.subr.bf16.mxu1 %v12900_v2  ;;  %v12939_v2 = vcombine.low %v6500_v52, %v6504_v42  ;;  %v6541_v46 = vld [vmem:[#allocation14 + $0xf18] sm:$0xff] }
 0x56e   :  { %7336 = vmatpush1.bf16.msra.mxu0 %v12893_v25  ;;  %v6509_v25 = vld [vmem:[#allocation14 + $0xe18] sm:$0xff] }
 0x56f   :  { %7337 = vmatprep.subr.bf16.mxu0 %v12902_v13  ;;  %7297 = vmatpush1.bf16.msra.mxu1 %v12899_v12  ;;  %v6516_v13 = vld [vmem:[#allocation14 + $0xe50] sm:$0xff] }
 0x570   :  { %7298 = vmatprep.subr.bf16.mxu1 %v12908_v51  ;;  %v6520_v12 = vld [vmem:[#allocation14 + $0xe70] sm:$0xff]  ;;  %v6521_v51 = vld [vmem:[#allocation14 + $0xe78] sm:$0xff] }
 0x571   :  { %v12955_v60 = vcombine.low %v6516_v13, %v6520_v12  ;;  %v12957_v16 = vcombine.low %v6517_v61, %v6521_v51 }
 0x572   :  { %7338 = vmatpush1.bf16.msra.mxu0 %v12901_v59  ;;  %v12956_v59 = vcombine.high %v6516_v13, %v6520_v12  ;;  %v6569_v13 = vld [vmem:[#allocation14 + $0xff8] sm:$0xff] }
 0x573   :  { %7339 = vmatprep.subr.bf16.mxu0 %v12910_v30  ;;  %7299 = vmatpush1.bf16.msra.mxu1 %v12907_v14  ;;  %v6528_v30 = vld [vmem:[#allocation14 + $0xeb0] sm:$0xff]  ;;  %v12958_v14 = vcombine.high %v6517_v61, %v6521_v51  ;;  %v7413_v61 = vld [vmem:[#allocation14 + $0x1020] sm:$0xff] }
 0x574   :  { %7300 = vmatprep.subr.bf16.mxu1 %v12916_v1  ;;  %v6529_v1 = vld [vmem:[#allocation14 + $0xeb8] sm:$0xff]  ;;  %v12963_v48 = vcombine.low %v6524_v29, %v6528_v30 }
 0x575   :  { %v12965_v22 = vcombine.low %v6525_v45, %v6529_v1 }
 0x576   :  { %7340 = vmatpush1.bf16.msra.mxu0 %v12909_v41  ;;  %v12964_v41 = vcombine.high %v6524_v29, %v6528_v30  ;;  %v7410_v30 = vld [vmem:[#allocation14 + $0x1008] sm:$0xff] }
 0x577   :  { %7341 = vmatprep.subr.bf16.mxu0 %v12918_v55  ;;  %7301 = vmatpush1.bf16.msra.mxu1 %v12915_v39  ;;  %v6536_v55 = vld [vmem:[#allocation14 + $0xef0] sm:$0xff]  ;;  %v12966_v39 = vcombine.high %v6525_v45, %v6529_v1  ;;  %v7383_v45 = vld [vmem:[#allocation3 + $0x88] sm:$0xf]  ;;  %v7385_v1 = vld [vmem:[#allocation3 + $0x98] sm:$0xf] }
 0x578   :  { %7302 = vmatprep.subr.bf16.mxu1 %v12924_v49  ;;  %v6537_v49 = vld [vmem:[#allocation14 + $0xef8] sm:$0xff]  ;;  %v12971_v9 = vcombine.low %v6532_v3, %v6536_v55 }
 0x579   :  { %v5400_v44 = vpop.f32.mrb[44].mxu1 }
 0x57a   :  { %7342 = vmatpush1.bf16.msra.mxu0 %v12917_v34  ;;  %v16364_v11 = vadd.f32 %v5400_v44, %v16331_v40  ;;  %v5402_v7 = vpop.f32.mrb[45].mxu1  ;;  %v12940_v40 = vcombine.high %v6500_v52, %v6504_v42  ;;  %v12972_v34 = vcombine.high %v6532_v3, %v6536_v55  ;;  %v6548_v52 = vld [vmem:[#allocation14 + $0xf50] sm:$0xff]  ;;  %v7417_v55 = vld [vmem:[#allocation14 + $0x1040] sm:$0xff] }
 0x57b   :  { %7343 = vmatprep.subr.bf16.mxu0 %v12926_v47  ;;  %v16367_v19 = vadd.f32 %v5402_v7, %v16333_v32  ;;  %v5404_v57 = vpop.f32.mrb[46].mxu1  ;;  %7303 = vmatpush1.bf16.msra.mxu1 %v12923_v37  ;;  %v6508_v32 = vld [vmem:[#allocation14 + $0xe10] sm:$0xff]  ;;  %v12974_v37 = vcombine.high %v6533_v5, %v6537_v49 }
 0x57c   :  { %v5441_v18 = vpop.f32.mrb[76].mxu0  ;;  %v5405_v54 = vpop.f32.mrb[47].mxu1  ;;  %7304 = vmatprep.subr.bf16.mxu1 %v12932_v63  ;;  %v12948_v33 = vcombine.high %v6508_v32, %v6512_v21  ;;  %v12947_v31 = vcombine.low %v6508_v32, %v6512_v21  ;;  %v6544_v47 = vld [vmem:[#allocation14 + $0xf30] sm:$0xff]  ;;  %v6545_v63 = vld [vmem:[#allocation14 + $0xf38] sm:$0xff] }
 0x57d   :  { %v16370_v15 = vadd.f32 %v5441_v18, %v16335_v0  ;;  %v5443_v27 = vpop.f32.mrb[77].mxu0  ;;  %v6513_v0 = vld [vmem:[#allocation14 + $0xe38] sm:$0xff]  ;;  %v12980_v44 = vcombine.high %v6540_v8, %v6544_v47  ;;  %v6552_v42 = vld [vmem:[#allocation14 + $0xf70] sm:$0xff]  ;;  %v12982_v7 = vcombine.high %v6541_v46, %v6545_v63  ;;  %v12981_v43 = vcombine.low %v6541_v46, %v6545_v63 }
 0x57e   :  { %v16373_v20 = vadd.f32 %v5443_v27, %v16337_v36  ;;  %v5445_v10 = vpop.f32.mrb[78].mxu0  ;;  %7344 = vmatpush1.bf16.msra.mxu0 %v12925_v50  ;;  %v12950_v36 = vcombine.high %v6509_v25, %v6513_v0  ;;  %v12949_v28 = vcombine.low %v6509_v25, %v6513_v0  ;;  %v12973_v50 = vcombine.low %v6533_v5, %v6537_v49  ;;  %v6549_v18 = vld [vmem:[#allocation14 + $0xf58] sm:$0xff]  ;;  %v6560_v27 = vld [vmem:[#allocation14 + $0xfb0] sm:$0xff]  ;;  %v7389_v0 = vld [vmem:[#allocation3 + $0x98] sm:$0xf0] }
 0x57f   :  { %v5446_v38 = vpop.f32.mrb[79].mxu0  ;;  %7345 = vmatprep.subr.bf16.mxu0 %v12934_v53  ;;  %7305 = vmatpush1.bf16.msra.mxu1 %v12931_v58  ;;  %v12979_v53 = vcombine.low %v6540_v8, %v6544_v47  ;;  %v6553_v57 = vld [vmem:[#allocation14 + $0xf78] sm:$0xff]  ;;  %v12988_v58 = vcombine.high %v6548_v52, %v6552_v42  ;;  %v12996_v32 = vcombine.high %v6556_v4, %v6560_v27  ;;  %v7387_v25 = vld [vmem:[#allocation3 + $0x88] sm:$0xf0]  ;;  %v7418_v49 = vld [vmem:[#allocation14 + $0x1048] sm:$0xff] }
 0x580   :  { %7306 = vmatprep.subr.bf16.mxu1 %v12940_v40  ;;  %v12990_v54 = vcombine.high %v6549_v18, %v6553_v57  ;;  %v12987_v40 = vcombine.low %v6548_v52, %v6552_v42  ;;  %v6557_v10 = vld [vmem:[#allocation14 + $0xf98] sm:$0xff]  ;;  %v12989_v21 = vcombine.low %v6549_v18, %v6553_v57  ;;  %v6564_v38 = vld [vmem:[#allocation14 + $0xfd0] sm:$0xff]  ;;  %v7395_v51 = vrot.slane %v7387_v25, 4 }
 0x582   :  { %7346 = vmatpush1.bf16.msra.mxu0 %v12933_v26  ;;  %v6561_v26 = vld [vmem:[#allocation14 + $0xfb8] sm:$0xff] }
 0x583   :  { %7347 = vmatprep.subr.bf16.mxu0 %v12942_v24  ;;  %7307 = vmatpush1.bf16.msra.mxu1 %v12939_v2  ;;  %v6568_v24 = vld [vmem:[#allocation14 + $0xff0] sm:$0xff]  ;;  %v12998_v2 = vcombine.high %v6557_v10, %v6561_v26 }
 0x584   :  { %7308 = vmatprep.subr.bf16.mxu1 %v12948_v33  ;;  %v12995_v33 = vcombine.low %v6556_v4, %v6560_v27  ;;  %v13004_v12 = vcombine.high %v6564_v38, %v6568_v24  ;;  %v13003_v29 = vcombine.low %v6564_v38, %v6568_v24  ;;  %v7449_v24 = vld [vmem:[#allocation14 + $0x1140] sm:$0xff] }
 0x586   :  { %7348 = vmatpush1.bf16.msra.mxu0 %v12941_v35  ;;  %v6565_v35 = vld [vmem:[#allocation14 + $0xfd8] sm:$0xff] }
 0x587   :  { %7349 = vmatprep.subr.bf16.mxu0 %v12950_v36  ;;  %7309 = vmatpush1.bf16.msra.mxu1 %v12947_v31  ;;  %v12997_v36 = vcombine.low %v6557_v10, %v6561_v26  ;;  %v7409_v31 = vld [vmem:[#allocation14 + $0x1000] sm:$0xff]  ;;  %v7442_v26 = vld [vmem:[#allocation14 + $0x1108] sm:$0xff] }
 0x588   :  { %7310 = vmatprep.subr.bf16.mxu1 %v12956_v59  ;;  %v7397_v59 = vrot.slane %v7389_v0, 4  ;;  %v13007_v5 = vcombine.low %v7409_v31, %v7413_v61 }
 0x58a   :  { %7350 = vmatpush1.bf16.msra.mxu0 %v12949_v28  ;;  %v13006_v28 = vcombine.high %v6565_v35, %v6569_v13  ;;  %v7405_v3 = vmax.bf16 %v7397_v59, %v7385_v1  ;;  %v7458_v59 = vld [vmem:[#allocation14 + $0x1188] sm:$0xff] }
 0x58b   :  { %7351 = vmatprep.subr.bf16.mxu0 %v12958_v14  ;;  %7311 = vmatpush1.bf16.msra.mxu1 %v12955_v60  ;;  %v7414_v14 = vld [vmem:[#allocation14 + $0x1028] sm:$0xff]  ;;  %v13008_v60 = vcombine.high %v7409_v31, %v7413_v61  ;;  %v7461_v31 = vld [vmem:[#allocation14 + $0x11a0] sm:$0xff] }
 0x58c   :  { %7312 = vmatprep.subr.bf16.mxu1 %v12964_v41  ;;  %v13005_v41 = vcombine.low %v6565_v35, %v6569_v13  ;;  %v13009_v8 = vcombine.low %v7410_v30, %v7414_v14  ;;  %v7454_v35 = vld [vmem:[#allocation14 + $0x1168] sm:$0xff] }
 0x58e   :  { %7352 = vmatpush1.bf16.msra.mxu0 %v12957_v16  ;;  %v7403_v16 = vmax.bf16 %v7395_v51, %v7383_v45  ;;  %v7469_v45 = vld [vmem:[#allocation14 + $0x11e0] sm:$0xff] }
 0x58f   :  { %7353 = vmatprep.subr.bf16.mxu0 %v12966_v39  ;;  %7313 = vmatpush1.bf16.msra.mxu1 %v12963_v48  ;;  %v7421_v39 = vld [vmem:[#allocation14 + $0x1060] sm:$0xff]  ;;  %v13010_v48 = vcombine.high %v7410_v30, %v7414_v14 }
 0x590   :  { %7314 = vmatprep.subr.bf16.mxu1 %v12972_v34  ;;  %v7422_v34 = vld [vmem:[#allocation14 + $0x1068] sm:$0xff]  ;;  %v16375_v47 = vmax.bf16 %v7405_v3, %v7403_v16  ;;  %v13015_v63 = vcombine.low %v7417_v55, %v7421_v39 }
 0x591   :  { %v13018_v46 = vcombine.high %v7418_v49, %v7422_v34  ;;  %v13017_v42 = vcombine.low %v7418_v49, %v7422_v34  ;;  %v7470_v49 = vld [vmem:[#allocation14 + $0x11e8] sm:$0xff] }
 0x592   :  { %7354 = vmatpush1.bf16.msra.mxu0 %v12965_v22  ;;  %v13016_v22 = vcombine.high %v7417_v55, %v7421_v39 }
 0x593   :  { %7355 = vmatprep.subr.bf16.mxu0 %v12974_v37  ;;  %7315 = vmatpush1.bf16.msra.mxu1 %v12971_v9  ;;  %v7425_v37 = vld [vmem:[#allocation14 + $0x1080] sm:$0xff] }
 0x594   :  { %7316 = vmatprep.subr.bf16.mxu1 %v12980_v44  ;;  %v7429_v9 = vld [vmem:[#allocation14 + $0x10a0] sm:$0xff]  ;;  %v7426_v44 = vld [vmem:[#allocation14 + $0x1088] sm:$0xff] }
 0x595   :  { %v13024_v52 = vcombine.high %v7425_v37, %v7429_v9  ;;  %v13023_v57 = vcombine.low %v7425_v37, %v7429_v9 }
 0x596   :  { %7356 = vmatpush1.bf16.msra.mxu0 %v12973_v50  ;;  %v7430_v50 = vld [vmem:[#allocation14 + $0x10a8] sm:$0xff] }
 0x597   :  { %7357 = vmatprep.subr.bf16.mxu0 %v12982_v7  ;;  %7317 = vmatpush1.bf16.msra.mxu1 %v12979_v53  ;;  %v7433_v7 = vld [vmem:[#allocation14 + $0x10c0] sm:$0xff]  ;;  %v13026_v18 = vcombine.high %v7426_v44, %v7430_v50  ;;  %v13025_v27 = vcombine.low %v7426_v44, %v7430_v50 }
 0x598   :  { %7318 = vmatprep.subr.bf16.mxu1 %v12988_v58  ;;  %v7437_v53 = vld [vmem:[#allocation14 + $0x10e0] sm:$0xff]  ;;  %v7434_v58 = vld [vmem:[#allocation14 + $0x10c8] sm:$0xff] }
 0x599   :  { %v13032_v4 = vcombine.high %v7433_v7, %v7437_v53  ;;  %v13031_v10 = vcombine.low %v7433_v7, %v7437_v53 }
 0x59a   :  { %7358 = vmatpush1.bf16.msra.mxu0 %v12981_v43  ;;  %v7438_v43 = vld [vmem:[#allocation14 + $0x10e8] sm:$0xff] }
 0x59b   :  { %7359 = vmatprep.subr.bf16.mxu0 %v12990_v54  ;;  %7319 = vmatpush1.bf16.msra.mxu1 %v12987_v40  ;;  %v7441_v54 = vld [vmem:[#allocation14 + $0x1100] sm:$0xff]  ;;  %v13034_v40 = vcombine.high %v7434_v58, %v7438_v43  ;;  %v13033_v38 = vcombine.low %v7434_v58, %v7438_v43  ;;  %v7482_v43 = vld [vmem:[#allocation14 + $0x1248] sm:$0xff] }
 0x59c   :  { %7320 = vmatprep.subr.bf16.mxu1 %v12996_v32  ;;  %v7446_v32 = vld [vmem:[#allocation14 + $0x1128] sm:$0xff] }
 0x59d   :  { %v13042_v25 = vcombine.high %v7442_v26, %v7446_v32 }
 0x59e   :  { %7360 = vmatpush1.bf16.msra.mxu0 %v12989_v21 }
 0x59f   :  { %7361 = vmatprep.subr.bf16.mxu0 %v12998_v2  ;;  %7321 = vmatpush1.bf16.msra.mxu1 %v12995_v33  ;;  %v7453_v2 = vld [vmem:[#allocation14 + $0x1160] sm:$0xff]  ;;  %v7450_v33 = vld [vmem:[#allocation14 + $0x1148] sm:$0xff] }
 0x5a0   :  { %7322 = vmatprep.subr.bf16.mxu1 %v13004_v12  ;;  %v13048_v13 = vcombine.high %v7449_v24, %v7453_v2  ;;  %v13041_v12 = vcombine.low %v7442_v26, %v7446_v32  ;;  %v13050_v61 = vcombine.high %v7450_v33, %v7454_v35  ;;  %v13047_v51 = vcombine.low %v7449_v24, %v7453_v2  ;;  %v7490_v32 = vld [vmem:[#allocation14 + $0x1288] sm:$0xff]  ;;  %v7497_v2 = vld [vmem:[#allocation14 + $0x12c0] sm:$0xff] }
 0x5a1   :  { %v13049_v14 = vcombine.low %v7450_v33, %v7454_v35  ;;  %v7498_v35 = vld [vmem:[#allocation14 + $0x12c8] sm:$0xff] }
 0x5a2   :  { %7362 = vmatpush1.bf16.msra.mxu0 %v12997_v36  ;;  %v7457_v36 = vld [vmem:[#allocation14 + $0x1180] sm:$0xff] }
 0x5a3   :  { %7363 = vmatprep.subr.bf16.mxu0 %v13006_v28  ;;  %7323 = vmatpush1.bf16.msra.mxu1 %v13003_v29  ;;  %v7462_v28 = vld [vmem:[#allocation14 + $0x11a8] sm:$0xff]  ;;  %v13056_v29 = vcombine.high %v7457_v36, %v7461_v31 }
 0x5a4   :  { %8177 = vmatprep.subr.bf16.mxu1 %v13008_v60  ;;  %v7465_v60 = vld [vmem:[#allocation14 + $0x11c0] sm:$0xff]  ;;  %v13058_v16 = vcombine.high %v7458_v59, %v7462_v28 }
 0x5a6   :  { %7364 = vmatpush1.bf16.msra.mxu0 %v13005_v41  ;;  %7325 = vmatmul.mubr.bf16.vlgmr.msra.gmra.mrb[60].mxu1 %v16357_v56 }
 0x5a7   :  { %8218 = vmatprep.subr.bf16.mxu0 %v13010_v48  ;;  %8178 = vmatpush1.bf16.msra.mxu1 %v13007_v5  ;;  %v13055_v48 = vcombine.low %v7457_v36, %v7461_v31  ;;  %v7466_v5 = vld [vmem:[#allocation14 + $0x11c8] sm:$0xff]  ;;  %v7505_v31 = vld [vmem:[#allocation14 + $0x1300] sm:$0xff] }
 0x5a8   :  { %8209 = vmatprep.mubr.bf16.mxu1 %v16375_v47  ;;  %8179 = vmatprep.subr.bf16.mxu1 %v13016_v22  ;;  %v13066_v50 = vcombine.high %v7466_v5, %v7470_v49  ;;  %v13065_v53 = vcombine.low %v7466_v5, %v7470_v49  ;;  %v7521_v49 = vld [vmem:[#allocation14 + $0x1380] sm:$0xff] }
 0x5a9   :  { %7366 = vmatmul.mubr.bf16.vlgmr.msra.gmra.mrb[92].mxu0 %v16357_v56  ;;  %v7445_v56 = vld [vmem:[#allocation14 + $0x1120] sm:$0xff] }
 0x5aa   :  { %8219 = vmatpush1.bf16.msra.mxu0 %v13009_v8  ;;  %8250 = vmatprep.mubr.bf16.mxu0 %v16375_v47  ;;  %v13040_v21 = vcombine.high %v7441_v54, %v7445_v56  ;;  %v13039_v0 = vcombine.low %v7441_v54, %v7445_v56  ;;  %v7489_v56 = vld [vmem:[#allocation14 + $0x1280] sm:$0xff] }
 0x5ab   :  { %8220 = vmatprep.subr.bf16.mxu0 %v13018_v46  ;;  %8180 = vmatpush1.bf16.msra.mxu1 %v13015_v63  ;;  %v13057_v46 = vcombine.low %v7458_v59, %v7462_v28  ;;  %v7477_v63 = vld [vmem:[#allocation14 + $0x1220] sm:$0xff]  ;;  %v7506_v28 = vld [vmem:[#allocation14 + $0x1308] sm:$0xff] }
 0x5ac   :  { %8181 = vmatprep.subr.bf16.mxu1 %v13024_v52  ;;  %v13063_v52 = vcombine.low %v7465_v60, %v7469_v45 }
 0x5ae   :  { %8221 = vmatpush1.bf16.msra.mxu0 %v13017_v42  ;;  %v7474_v42 = vld [vmem:[#allocation14 + $0x1208] sm:$0xff] }
 0x5af   :  { %8222 = vmatprep.subr.bf16.mxu0 %v13026_v18  ;;  %8182 = vmatpush1.bf16.msra.mxu1 %v13023_v57  ;;  %v7481_v18 = vld [vmem:[#allocation14 + $0x1240] sm:$0xff] }
 0x5b0   :  { %8183 = vmatprep.subr.bf16.mxu1 %v13032_v4  ;;  %v7485_v57 = vld [vmem:[#allocation14 + $0x1260] sm:$0xff]  ;;  %v7486_v4 = vld [vmem:[#allocation14 + $0x1268] sm:$0xff] }
 0x5b1   :  { %v13079_v26 = vcombine.low %v7481_v18, %v7485_v57  ;;  %v13081_v24 = vcombine.low %v7482_v43, %v7486_v4 }
 0x5b2   :  { %8223 = vmatpush1.bf16.msra.mxu0 %v13025_v27  ;;  %v13080_v27 = vcombine.high %v7481_v18, %v7485_v57  ;;  %v7534_v18 = vld [vmem:[#allocation14 + $0x13e8] sm:$0xff] }
 0x5b3   :  { %8224 = vmatprep.subr.bf16.mxu0 %v13034_v40  ;;  %8184 = vmatpush1.bf16.msra.mxu1 %v13031_v10  ;;  %v7493_v40 = vld [vmem:[#allocation14 + $0x12a0] sm:$0xff]  ;;  %v13082_v10 = vcombine.high %v7482_v43, %v7486_v4  ;;  %v7411_v4 = vld [vmem:[#allocation14 + $0x1010] sm:$0xff] }
 0x5b4   :  { %8185 = vmatprep.subr.bf16.mxu1 %v13040_v21  ;;  %v7494_v21 = vld [vmem:[#allocation14 + $0x12a8] sm:$0xff]  ;;  %v13087_v33 = vcombine.low %v7489_v56, %v7493_v40 }
 0x5b5   :  { %v13089_v36 = vcombine.low %v7490_v32, %v7494_v21 }
 0x5b6   :  { %8225 = vmatpush1.bf16.msra.mxu0 %v13033_v38  ;;  %v13088_v38 = vcombine.high %v7489_v56, %v7493_v40  ;;  %v7382_v56 = vld [vmem:[#allocation3 + $0x80] sm:$0xf] }
 0x5b7   :  { %8226 = vmatprep.subr.bf16.mxu0 %v13042_v25  ;;  %8186 = vmatpush1.bf16.msra.mxu1 %v13039_v0  ;;  %v7501_v25 = vld [vmem:[#allocation14 + $0x12e0] sm:$0xff]  ;;  %v13090_v0 = vcombine.high %v7490_v32, %v7494_v21  ;;  %v7416_v32 = vld [vmem:[#allocation14 + $0x1038] sm:$0xff] }
 0x5b8   :  { %8187 = vmatprep.subr.bf16.mxu1 %v13048_v13  ;;  %v7502_v13 = vld [vmem:[#allocation14 + $0x12e8] sm:$0xff]  ;;  %v13095_v59 = vcombine.low %v7497_v2, %v7501_v25 }
 0x5b9   :  { %v6277_v30 = vpop.f32.mrb[48].mxu1 }
 0x5ba   :  { %8227 = vmatpush1.bf16.msra.mxu0 %v13041_v12  ;;  %v16382_v1 = vadd.f32 %v6277_v30, %v16346_v6  ;;  %v6279_v41 = vpop.f32.mrb[49].mxu1  ;;  %v13064_v6 = vcombine.high %v7465_v60, %v7469_v45  ;;  %v13096_v12 = vcombine.high %v7497_v2, %v7501_v25  ;;  %v7513_v60 = vld [vmem:[#allocation14 + $0x1340] sm:$0xff]  ;;  %v7419_v25 = vld [vmem:[#allocation14 + $0x1050] sm:$0xff] }
 0x5bb   :  { %8228 = vmatprep.subr.bf16.mxu0 %v13050_v61  ;;  %v16385_v55 = vadd.f32 %v6279_v41, %v16349_v62  ;;  %v6281_v39 = vpop.f32.mrb[50].mxu1  ;;  %8188 = vmatpush1.bf16.msra.mxu1 %v13047_v51  ;;  %v7473_v62 = vld [vmem:[#allocation14 + $0x1200] sm:$0xff]  ;;  %v13098_v51 = vcombine.high %v7498_v35, %v7502_v13 }
 0x5bc   :  { %v6318_v3 = vpop.f32.mrb[80].mxu0  ;;  %v6282_v8 = vpop.f32.mrb[51].mxu1  ;;  %8189 = vmatprep.subr.bf16.mxu1 %v13056_v29  ;;  %v13072_v7 = vcombine.high %v7473_v62, %v7477_v63  ;;  %v13071_v58 = vcombine.low %v7473_v62, %v7477_v63  ;;  %v7509_v61 = vld [vmem:[#allocation14 + $0x1320] sm:$0xff]  ;;  %v7510_v29 = vld [vmem:[#allocation14 + $0x1328] sm:$0xff] }
 0x5bd   :  { %v16388_v34 = vadd.f32 %v6318_v3, %v16352_v23  ;;  %v6320_v22 = vpop.f32.mrb[81].mxu0  ;;  %v7478_v23 = vld [vmem:[#allocation14 + $0x1228] sm:$0xff]  ;;  %v13104_v30 = vcombine.high %v7505_v31, %v7509_v61  ;;  %v7517_v45 = vld [vmem:[#allocation14 + $0x1360] sm:$0xff]  ;;  %v13106_v41 = vcombine.high %v7506_v28, %v7510_v29  ;;  %v13105_v5 = vcombine.low %v7506_v28, %v7510_v29 }
 0x5be   :  { %v16391_v37 = vadd.f32 %v6320_v22, %v16355_v17  ;;  %v6322_v9 = vpop.f32.mrb[82].mxu0  ;;  %8229 = vmatpush1.bf16.msra.mxu0 %v13049_v14  ;;  %v13074_v17 = vcombine.high %v7474_v42, %v7478_v23  ;;  %v13073_v54 = vcombine.low %v7474_v42, %v7478_v23  ;;  %v13097_v14 = vcombine.low %v7498_v35, %v7502_v13  ;;  %v7514_v3 = vld [vmem:[#allocation14 + $0x1348] sm:$0xff]  ;;  %v7525_v22 = vld [vmem:[#allocation14 + $0x13a0] sm:$0xff]  ;;  %v7388_v42 = vld [vmem:[#allocation3 + $0x90] sm:$0xf0] }
 0x5bf   :  { %v6323_v44 = vpop.f32.mrb[83].mxu0  ;;  %8230 = vmatprep.subr.bf16.mxu0 %v13058_v16  ;;  %8190 = vmatpush1.bf16.msra.mxu1 %v13055_v48  ;;  %v13103_v16 = vcombine.low %v7505_v31, %v7509_v61  ;;  %v7518_v39 = vld [vmem:[#allocation14 + $0x1368] sm:$0xff]  ;;  %v13112_v48 = vcombine.high %v7513_v60, %v7517_v45  ;;  %v13120_v62 = vcombine.high %v7521_v49, %v7525_v22  ;;  %v7420_v13 = vld [vmem:[#allocation14 + $0x1058] sm:$0xff] }
 0x5c0   :  { %8191 = vmatprep.subr.bf16.mxu1 %v13064_v6  ;;  %v13114_v8 = vcombine.high %v7514_v3, %v7518_v39  ;;  %v13111_v6 = vcombine.low %v7513_v60, %v7517_v45  ;;  %v7522_v9 = vld [vmem:[#allocation14 + $0x1388] sm:$0xff]  ;;  %v13113_v44 = vcombine.low %v7514_v3, %v7518_v39 }
 0x5c1   :  { %v7386_v63 = vld [vmem:[#allocation3 + $0x80] sm:$0xf0] }
 0x5c2   :  { %8231 = vmatpush1.bf16.msra.mxu0 %v13057_v46  ;;  %v7526_v46 = vld [vmem:[#allocation14 + $0x13a8] sm:$0xff] }
 0x5c3   :  { %8232 = vmatprep.subr.bf16.mxu0 %v13066_v50  ;;  %8192 = vmatpush1.bf16.msra.mxu1 %v13063_v52  ;;  %v7529_v50 = vld [vmem:[#allocation14 + $0x13c0] sm:$0xff]  ;;  %v13122_v23 = vcombine.high %v7522_v9, %v7526_v46  ;;  %v13121_v43 = vcombine.low %v7522_v9, %v7526_v46 }
 0x5c4   :  { %8193 = vmatprep.subr.bf16.mxu1 %v13072_v7  ;;  %v7533_v52 = vld [vmem:[#allocation14 + $0x13e0] sm:$0xff]  ;;  %v13119_v7 = vcombine.low %v7521_v49, %v7525_v22 }
 0x5c5   :  { %v13128_v57 = vcombine.high %v7529_v50, %v7533_v52  ;;  %v13127_v40 = vcombine.low %v7529_v50, %v7533_v52  ;;  %v7451_v50 = vld [vmem:[#allocation14 + $0x1150] sm:$0xff] }
 0x5c6   :  { %8233 = vmatpush1.bf16.msra.mxu0 %v13065_v53  ;;  %v7530_v53 = vld [vmem:[#allocation14 + $0x13c8] sm:$0xff]  ;;  %v7455_v52 = vld [vmem:[#allocation14 + $0x1170] sm:$0xff] }
 0x5c7   :  { %8234 = vmatprep.subr.bf16.mxu0 %v13074_v17  ;;  %8194 = vmatpush1.bf16.msra.mxu1 %v13071_v58  ;;  %v7394_v17 = vrot.slane %v7386_v63, 4  ;;  %v7396_v58 = vrot.slane %v7388_v42, 4  ;;  %v13129_v2 = vcombine.low %v7530_v53, %v7534_v18 }
 0x5c8   :  { %8195 = vmatprep.subr.bf16.mxu1 %v13080_v27  ;;  %v7415_v27 = vld [vmem:[#allocation14 + $0x1030] sm:$0xff] }
 0x5c9   :  { %v7402_v21 = vmax.bf16 %v7394_v17, %v7382_v56  ;;  %v13011_v35 = vcombine.low %v7411_v4, %v7415_v27  ;;  %v7459_v17 = vld [vmem:[#allocation14 + $0x1190] sm:$0xff] }
 0x5ca   :  { %8235 = vmatpush1.bf16.msra.mxu0 %v13073_v54  ;;  %v13130_v54 = vcombine.high %v7530_v53, %v7534_v18  ;;  %v7456_v53 = vld [vmem:[#allocation14 + $0x1178] sm:$0xff]  ;;  %v13052_v18 = vcombine.high %v7451_v50, %v7455_v52 }
 0x5cb   :  { %8236 = vmatprep.subr.bf16.mxu0 %v13082_v10  ;;  %8196 = vmatpush1.bf16.msra.mxu1 %v13079_v26  ;;  %v7384_v10 = vld [vmem:[#allocation3 + $0x90] sm:$0xf]  ;;  %v7412_v26 = vld [vmem:[#allocation14 + $0x1018] sm:$0xff] }
 0x5cc   :  { %8197 = vmatprep.subr.bf16.mxu1 %v13088_v38  ;;  %v7404_v38 = vmax.bf16 %v7396_v58, %v7384_v10  ;;  %v13013_v61 = vcombine.low %v7412_v26, %v7416_v32  ;;  %v7463_v58 = vld [vmem:[#allocation14 + $0x11b0] sm:$0xff] }
 0x5cd   :  { %v13060_v56 = vcombine.high %v7459_v17, %v7463_v58 }
 0x5ce   :  { %8237 = vmatpush1.bf16.msra.mxu0 %v13081_v24  ;;  %v13012_v24 = vcombine.high %v7411_v4, %v7415_v27  ;;  %v13051_v4 = vcombine.low %v7451_v50, %v7455_v52  ;;  %v7460_v27 = vld [vmem:[#allocation14 + $0x1198] sm:$0xff]  ;;  %v7499_v52 = vld [vmem:[#allocation14 + $0x12d0] sm:$0xff] }
 0x5cf   :  { %8238 = vmatprep.subr.bf16.mxu0 %v13090_v0  ;;  %8198 = vmatpush1.bf16.msra.mxu1 %v13087_v33  ;;  %v7423_v0 = vld [vmem:[#allocation14 + $0x1070] sm:$0xff]  ;;  %v13014_v33 = vcombine.high %v7412_v26, %v7416_v32 }
 0x5d0   :  { %8199 = vmatprep.subr.bf16.mxu1 %v13096_v12  ;;  %v7424_v12 = vld [vmem:[#allocation14 + $0x1078] sm:$0xff]  ;;  %v13020_v31 = vcombine.high %v7419_v25, %v7423_v0  ;;  %v13019_v29 = vcombine.low %v7419_v25, %v7423_v0  ;;  %v7467_v26 = vld [vmem:[#allocation14 + $0x11d0] sm:$0xff] }
 0x5d1   :  { %v13022_v28 = vcombine.high %v7420_v13, %v7424_v12  ;;  %v13021_v45 = vcombine.low %v7420_v13, %v7424_v12  ;;  %v7471_v32 = vld [vmem:[#allocation14 + $0x11f0] sm:$0xff]  ;;  %v7472_v13 = vld [vmem:[#allocation14 + $0x11f8] sm:$0xff] }
 0x5d2   :  { %8239 = vmatpush1.bf16.msra.mxu0 %v13089_v36  ;;  %v16393_v36 = vmax.bf16 %v7404_v38, %v7402_v21 }
 0x5d3   :  { %8240 = vmatprep.subr.bf16.mxu0 %v13098_v51  ;;  %8200 = vmatpush1.bf16.msra.mxu1 %v13095_v59  ;;  %v7427_v51 = vld [vmem:[#allocation14 + $0x1090] sm:$0xff] }
 0x5d4   :  { %8201 = vmatprep.subr.bf16.mxu1 %v13104_v30  ;;  %v7431_v59 = vld [vmem:[#allocation14 + $0x10b0] sm:$0xff]  ;;  %v7428_v30 = vld [vmem:[#allocation14 + $0x1098] sm:$0xff] }
 0x5d5   :  { %v13028_v60 = vcombine.high %v7427_v51, %v7431_v59  ;;  %v13027_v39 = vcombine.low %v7427_v51, %v7431_v59 }
 0x5d6   :  { %8241 = vmatpush1.bf16.msra.mxu0 %v13097_v14  ;;  %v7432_v14 = vld [vmem:[#allocation14 + $0x10b8] sm:$0xff] }
 0x5d7   :  { %8242 = vmatprep.subr.bf16.mxu0 %v13106_v41  ;;  %8202 = vmatpush1.bf16.msra.mxu1 %v13103_v16  ;;  %v7435_v41 = vld [vmem:[#allocation14 + $0x10d0] sm:$0xff]  ;;  %v13030_v3 = vcombine.high %v7428_v30, %v7432_v14  ;;  %v13029_v22 = vcombine.low %v7428_v30, %v7432_v14 }
 0x5d8   :  { %8203 = vmatprep.subr.bf16.mxu1 %v13112_v48  ;;  %v7439_v16 = vld [vmem:[#allocation14 + $0x10f0] sm:$0xff]  ;;  %v7436_v48 = vld [vmem:[#allocation14 + $0x10d8] sm:$0xff] }
 0x5d9   :  { %v13036_v49 = vcombine.high %v7435_v41, %v7439_v16  ;;  %v13035_v46 = vcombine.low %v7435_v41, %v7439_v16 }
 0x5da   :  { %8243 = vmatpush1.bf16.msra.mxu0 %v13105_v5  ;;  %v7440_v5 = vld [vmem:[#allocation14 + $0x10f8] sm:$0xff] }
 0x5db   :  { %8244 = vmatprep.subr.bf16.mxu0 %v13114_v8  ;;  %8204 = vmatpush1.bf16.msra.mxu1 %v13111_v6  ;;  %v7443_v8 = vld [vmem:[#allocation14 + $0x1110] sm:$0xff]  ;;  %v13038_v9 = vcombine.high %v7436_v48, %v7440_v5 }
 0x5dc   :  { %8205 = vmatprep.subr.bf16.mxu1 %v13120_v62  ;;  %v7447_v6 = vld [vmem:[#allocation14 + $0x1130] sm:$0xff]  ;;  %v7448_v62 = vld [vmem:[#allocation14 + $0x1138] sm:$0xff] }
 0x5dd   :  { %v13044_v63 = vcombine.high %v7443_v8, %v7447_v6 }
 0x5de   :  { %8245 = vmatpush1.bf16.msra.mxu0 %v13113_v44  ;;  %v13037_v44 = vcombine.low %v7436_v48, %v7440_v5  ;;  %v7484_v5 = vld [vmem:[#allocation14 + $0x1258] sm:$0xff] }
 0x5df   :  { %8246 = vmatprep.subr.bf16.mxu0 %v13122_v23  ;;  %8206 = vmatpush1.bf16.msra.mxu1 %v13119_v7  ;;  %v13043_v23 = vcombine.low %v7443_v8, %v7447_v6  ;;  %v7452_v7 = vld [vmem:[#allocation14 + $0x1158] sm:$0xff]  ;;  %v7491_v6 = vld [vmem:[#allocation14 + $0x1290] sm:$0xff] }
 0x5e0   :  { %8207 = vmatprep.subr.bf16.mxu1 %v13128_v57  ;;  %v13053_v10 = vcombine.low %v7452_v7, %v7456_v53 }
 0x5e2   :  { %8247 = vmatpush1.bf16.msra.mxu0 %v13121_v43  ;;  %v13054_v43 = vcombine.high %v7452_v7, %v7456_v53  ;;  %v7500_v53 = vld [vmem:[#allocation14 + $0x12d8] sm:$0xff] }
 0x5e3   :  { %8248 = vmatprep.subr.bf16.mxu0 %v13130_v54  ;;  %8208 = vmatpush1.bf16.msra.mxu1 %v13127_v40  ;;  %v7464_v54 = vld [vmem:[#allocation14 + $0x11b8] sm:$0xff] }
 0x5e4   :  { %8259 = vmatprep.subr.bf16.mxu1 %v13012_v24  ;;  %v13062_v24 = vcombine.high %v7460_v27, %v7464_v54 }
 0x5e6   :  { %8249 = vmatpush1.bf16.msra.mxu0 %v13129_v2  ;;  %8210 = vmatmul.mubr.bf16.vlgmr.msra.gmra.mrb[64].mxu1 %v16393_v36 }
 0x5e7   :  { %8300 = vmatprep.subr.bf16.mxu0 %v13014_v33  ;;  %8260 = vmatpush1.bf16.msra.mxu1 %v13011_v35  ;;  %v13059_v33 = vcombine.low %v7459_v17, %v7463_v58  ;;  %v7468_v35 = vld [vmem:[#allocation14 + $0x11d8] sm:$0xff]  ;;  %v7507_v58 = vld [vmem:[#allocation14 + $0x1310] sm:$0xff] }
 0x5e8   :  { %8291 = vmatprep.mubr.bf16.mxu1 %v16375_v47  ;;  %8261 = vmatprep.subr.bf16.mxu1 %v13020_v31  ;;  %v13070_v14 = vcombine.high %v7468_v35, %v7472_v13  ;;  %v13069_v16 = vcombine.low %v7468_v35, %v7472_v13  ;;  %v7523_v13 = vld [vmem:[#allocation14 + $0x1390] sm:$0xff] }
 0x5e9   :  { %8251 = vmatmul.mubr.bf16.vlgmr.msra.gmra.mrb[96].mxu0 %v16393_v36 }
 0x5ea   :  { %8301 = vmatpush1.bf16.msra.mxu0 %v13013_v61  ;;  %8332 = vmatprep.mubr.bf16.mxu0 %v16375_v47  ;;  %v7444_v47 = vld [vmem:[#allocation14 + $0x1118] sm:$0xff] }
 0x5eb   :  { %8302 = vmatprep.subr.bf16.mxu0 %v13022_v28  ;;  %8262 = vmatpush1.bf16.msra.mxu1 %v13019_v29  ;;  %v13046_v42 = vcombine.high %v7444_v47, %v7448_v62  ;;  %v13045_v57 = vcombine.low %v7444_v47, %v7448_v62  ;;  %v13061_v28 = vcombine.low %v7460_v27, %v7464_v54  ;;  %v7479_v29 = vld [vmem:[#allocation14 + $0x1230] sm:$0xff]  ;;  %v7492_v62 = vld [vmem:[#allocation14 + $0x1298] sm:$0xff] }
 0x5ec   :  { %8263 = vmatprep.subr.bf16.mxu1 %v13028_v60  ;;  %v13067_v60 = vcombine.low %v7467_v26, %v7471_v32  ;;  %v7508_v54 = vld [vmem:[#allocation14 + $0x1318] sm:$0xff] }
 0x5ee   :  { %8303 = vmatpush1.bf16.msra.mxu0 %v13021_v45  ;;  %v7476_v45 = vld [vmem:[#allocation14 + $0x1218] sm:$0xff] }
 0x5ef   :  { %8304 = vmatprep.subr.bf16.mxu0 %v13030_v3  ;;  %8264 = vmatpush1.bf16.msra.mxu1 %v13027_v39  ;;  %v7483_v3 = vld [vmem:[#allocation14 + $0x1250] sm:$0xff] }
 0x5f0   :  { %8265 = vmatprep.subr.bf16.mxu1 %v13036_v49  ;;  %v7487_v39 = vld [vmem:[#allocation14 + $0x1270] sm:$0xff]  ;;  %v7488_v49 = vld [vmem:[#allocation14 + $0x1278] sm:$0xff] }
 0x5f1   :  { %v13083_v47 = vcombine.low %v7483_v3, %v7487_v39  ;;  %v13085_v50 = vcombine.low %v7484_v5, %v7488_v49 }
 0x5f2   :  { %8305 = vmatpush1.bf16.msra.mxu0 %v13029_v22  ;;  %v13084_v22 = vcombine.high %v7483_v3, %v7487_v39  ;;  %v7536_v3 = vld [vmem:[#allocation14 + $0x13f8] sm:$0xff] }
 0x5f3   :  { %8306 = vmatprep.subr.bf16.mxu0 %v13038_v9  ;;  %8266 = vmatpush1.bf16.msra.mxu1 %v13035_v46  ;;  %v7495_v9 = vld [vmem:[#allocation14 + $0x12b0] sm:$0xff]  ;;  %v13086_v46 = vcombine.high %v7484_v5, %v7488_v49  ;;  %v8380_v5 = vld [vmem:[#allocation14 + $0x1420] sm:$0xff] }
 0x5f4   :  { %8267 = vmatprep.subr.bf16.mxu1 %v13044_v63  ;;  %v7496_v63 = vld [vmem:[#allocation14 + $0x12b8] sm:$0xff]  ;;  %v13091_v7 = vcombine.low %v7491_v6, %v7495_v9 }
 0x5f5   :  { %v13093_v17 = vcombine.low %v7492_v62, %v7496_v63 }
 0x5f6   :  { %8307 = vmatpush1.bf16.msra.mxu0 %v13037_v44  ;;  %v13092_v44 = vcombine.high %v7491_v6, %v7495_v9  ;;  %v8377_v9 = vld [vmem:[#allocation14 + $0x1408] sm:$0xff] }
 0x5f7   :  { %8308 = vmatprep.subr.bf16.mxu0 %v13046_v42  ;;  %8268 = vmatpush1.bf16.msra.mxu1 %v13043_v23  ;;  %v7503_v42 = vld [vmem:[#allocation14 + $0x12f0] sm:$0xff]  ;;  %v13094_v23 = vcombine.high %v7492_v62, %v7496_v63  ;;  %v8350_v62 = vld [vmem:[#allocation3 + $0xa8] sm:$0xf]  ;;  %v8352_v63 = vld [vmem:[#allocation3 + $0xb8] sm:$0xf] }
 0x5f8   :  { %8269 = vmatprep.subr.bf16.mxu1 %v13052_v18  ;;  %v7504_v18 = vld [vmem:[#allocation14 + $0x12f8] sm:$0xff]  ;;  %v13099_v27 = vcombine.low %v7499_v52, %v7503_v42 }
 0x5f9   :  { %v6359_v40 = vpop.f32.mrb[52].mxu1 }
 0x5fa   :  { %8309 = vmatpush1.bf16.msra.mxu0 %v13045_v57  ;;  %v16400_v21 = vadd.f32 %v6359_v40, %v16364_v11  ;;  %v6361_v38 = vpop.f32.mrb[53].mxu1  ;;  %v13068_v11 = vcombine.high %v7467_v26, %v7471_v32  ;;  %v13100_v57 = vcombine.high %v7499_v52, %v7503_v42  ;;  %v7515_v26 = vld [vmem:[#allocation14 + $0x1350] sm:$0xff]  ;;  %v8384_v42 = vld [vmem:[#allocation14 + $0x1440] sm:$0xff] }
 0x5fb   :  { %8310 = vmatprep.subr.bf16.mxu0 %v13054_v43  ;;  %v16403_v25 = vadd.f32 %v6361_v38, %v16367_v19  ;;  %v6363_v0 = vpop.f32.mrb[54].mxu1  ;;  %8270 = vmatpush1.bf16.msra.mxu1 %v13051_v4  ;;  %v7475_v19 = vld [vmem:[#allocation14 + $0x1210] sm:$0xff]  ;;  %v13102_v4 = vcombine.high %v7500_v53, %v7504_v18 }
 0x5fc   :  { %v6400_v2 = vpop.f32.mrb[84].mxu0  ;;  %v6364_v61 = vpop.f32.mrb[55].mxu1  ;;  %8271 = vmatprep.subr.bf16.mxu1 %v13060_v56  ;;  %v13076_v41 = vcombine.high %v7475_v19, %v7479_v29  ;;  %v13075_v48 = vcombine.low %v7475_v19, %v7479_v29  ;;  %v7511_v43 = vld [vmem:[#allocation14 + $0x1330] sm:$0xff]  ;;  %v7512_v56 = vld [vmem:[#allocation14 + $0x1338] sm:$0xff] }
 0x5fd   :  { %v16406_v12 = vadd.f32 %v6400_v2, %v16370_v15  ;;  %v6402_v31 = vpop.f32.mrb[85].mxu0  ;;  %v7480_v15 = vld [vmem:[#allocation14 + $0x1238] sm:$0xff]  ;;  %v13108_v40 = vcombine.high %v7507_v58, %v7511_v43  ;;  %v7519_v32 = vld [vmem:[#allocation14 + $0x1370] sm:$0xff]  ;;  %v13110_v38 = vcombine.high %v7508_v54, %v7512_v56  ;;  %v13109_v35 = vcombine.low %v7508_v54, %v7512_v56 }
 0x5fe   :  { %v16409_v51 = vadd.f32 %v6402_v31, %v16373_v20  ;;  %v6404_v59 = vpop.f32.mrb[86].mxu0  ;;  %8311 = vmatpush1.bf16.msra.mxu0 %v13053_v10  ;;  %v13078_v20 = vcombine.high %v7476_v45, %v7480_v15  ;;  %v13077_v8 = vcombine.low %v7476_v45, %v7480_v15  ;;  %v13101_v10 = vcombine.low %v7500_v53, %v7504_v18  ;;  %v7516_v2 = vld [vmem:[#allocation14 + $0x1358] sm:$0xff]  ;;  %v7527_v31 = vld [vmem:[#allocation14 + $0x13b0] sm:$0xff]  ;;  %v8356_v15 = vld [vmem:[#allocation3 + $0xb8] sm:$0xf0] }
 0x5ff   :  { %v6405_v30 = vpop.f32.mrb[87].mxu0  ;;  %8312 = vmatprep.subr.bf16.mxu0 %v13062_v24  ;;  %8272 = vmatpush1.bf16.msra.mxu1 %v13059_v33  ;;  %v13107_v24 = vcombine.low %v7507_v58, %v7511_v43  ;;  %v7520_v0 = vld [vmem:[#allocation14 + $0x1378] sm:$0xff]  ;;  %v13116_v33 = vcombine.high %v7515_v26, %v7519_v32  ;;  %v13124_v19 = vcombine.high %v7523_v13, %v7527_v31  ;;  %v8354_v45 = vld [vmem:[#allocation3 + $0xa8] sm:$0xf0]  ;;  %v8385_v18 = vld [vmem:[#allocation14 + $0x1448] sm:$0xff] }
 0x600   :  { %8273 = vmatprep.subr.bf16.mxu1 %v13068_v11  ;;  %v13118_v61 = vcombine.high %v7516_v2, %v7520_v0  ;;  %v13115_v11 = vcombine.low %v7515_v26, %v7519_v32  ;;  %v7524_v59 = vld [vmem:[#allocation14 + $0x1398] sm:$0xff]  ;;  %v13117_v29 = vcombine.low %v7516_v2, %v7520_v0  ;;  %v7531_v30 = vld [vmem:[#allocation14 + $0x13d0] sm:$0xff]  ;;  %v8362_v49 = vrot.slane %v8354_v45, 4 }
 0x602   :  { %8313 = vmatpush1.bf16.msra.mxu0 %v13061_v28  ;;  %v7528_v28 = vld [vmem:[#allocation14 + $0x13b8] sm:$0xff] }
 0x603   :  { %8314 = vmatprep.subr.bf16.mxu0 %v13070_v14  ;;  %8274 = vmatpush1.bf16.msra.mxu1 %v13067_v60  ;;  %v7535_v14 = vld [vmem:[#allocation14 + $0x13f0] sm:$0xff]  ;;  %v13126_v60 = vcombine.high %v7524_v59, %v7528_v28 }
 0x604   :  { %8275 = vmatprep.subr.bf16.mxu1 %v13076_v41  ;;  %v13123_v41 = vcombine.low %v7523_v13, %v7527_v31  ;;  %v13132_v39 = vcombine.high %v7531_v30, %v7535_v14  ;;  %v13131_v6 = vcombine.low %v7531_v30, %v7535_v14  ;;  %v8416_v14 = vld [vmem:[#allocation14 + $0x1540] sm:$0xff] }
 0x606   :  { %8315 = vmatpush1.bf16.msra.mxu0 %v13069_v16  ;;  %v7532_v16 = vld [vmem:[#allocation14 + $0x13d8] sm:$0xff] }
 0x607   :  { %8316 = vmatprep.subr.bf16.mxu0 %v13078_v20  ;;  %8276 = vmatpush1.bf16.msra.mxu1 %v13075_v48  ;;  %v13125_v20 = vcombine.low %v7524_v59, %v7528_v28  ;;  %v8376_v48 = vld [vmem:[#allocation14 + $0x1400] sm:$0xff]  ;;  %v8409_v28 = vld [vmem:[#allocation14 + $0x1508] sm:$0xff] }
 0x608   :  { %8277 = vmatprep.subr.bf16.mxu1 %v13084_v22  ;;  %v8364_v22 = vrot.slane %v8356_v15, 4  ;;  %v13135_v53 = vcombine.low %v8376_v48, %v8380_v5 }
 0x60a   :  { %8317 = vmatpush1.bf16.msra.mxu0 %v13077_v8  ;;  %v13134_v8 = vcombine.high %v7532_v16, %v7536_v3  ;;  %v8372_v52 = vmax.bf16 %v8364_v22, %v8352_v63  ;;  %v8425_v22 = vld [vmem:[#allocation14 + $0x1588] sm:$0xff] }
 0x60b   :  { %8318 = vmatprep.subr.bf16.mxu0 %v13086_v46  ;;  %8278 = vmatpush1.bf16.msra.mxu1 %v13083_v47  ;;  %v8381_v46 = vld [vmem:[#allocation14 + $0x1428] sm:$0xff]  ;;  %v13136_v47 = vcombine.high %v8376_v48, %v8380_v5  ;;  %v8428_v48 = vld [vmem:[#allocation14 + $0x15a0] sm:$0xff] }
 0x60c   :  { %8279 = vmatprep.subr.bf16.mxu1 %v13092_v44  ;;  %v13133_v44 = vcombine.low %v7532_v16, %v7536_v3  ;;  %v13137_v58 = vcombine.low %v8377_v9, %v8381_v46  ;;  %v8421_v16 = vld [vmem:[#allocation14 + $0x1568] sm:$0xff] }
 0x60e   :  { %8319 = vmatpush1.bf16.msra.mxu0 %v13085_v50  ;;  %v8370_v50 = vmax.bf16 %v8362_v49, %v8350_v62  ;;  %v8436_v62 = vld [vmem:[#allocation14 + $0x15e0] sm:$0xff] }
 0x60f   :  { %8320 = vmatprep.subr.bf16.mxu0 %v13094_v23  ;;  %8280 = vmatpush1.bf16.msra.mxu1 %v13091_v7  ;;  %v8388_v23 = vld [vmem:[#allocation14 + $0x1460] sm:$0xff]  ;;  %v13138_v7 = vcombine.high %v8377_v9, %v8381_v46 }
 0x610   :  { %8281 = vmatprep.subr.bf16.mxu1 %v13100_v57  ;;  %v8389_v57 = vld [vmem:[#allocation14 + $0x1468] sm:$0xff]  ;;  %v16411_v43 = vmax.bf16 %v8372_v52, %v8370_v50  ;;  %v13143_v56 = vcombine.low %v8384_v42, %v8388_v23 }
 0x611   :  { %v13146_v54 = vcombine.high %v8385_v18, %v8389_v57  ;;  %v13145_v32 = vcombine.low %v8385_v18, %v8389_v57  ;;  %v8437_v18 = vld [vmem:[#allocation14 + $0x15e8] sm:$0xff] }
 0x612   :  { %8321 = vmatpush1.bf16.msra.mxu0 %v13093_v17  ;;  %v13144_v17 = vcombine.high %v8384_v42, %v8388_v23 }
 0x613   :  { %8322 = vmatprep.subr.bf16.mxu0 %v13102_v4  ;;  %8282 = vmatpush1.bf16.msra.mxu1 %v13099_v27  ;;  %v8392_v4 = vld [vmem:[#allocation14 + $0x1480] sm:$0xff] }
 0x614   :  { %8283 = vmatprep.subr.bf16.mxu1 %v13108_v40  ;;  %v8396_v27 = vld [vmem:[#allocation14 + $0x14a0] sm:$0xff]  ;;  %v8393_v40 = vld [vmem:[#allocation14 + $0x1488] sm:$0xff] }
 0x615   :  { %v13152_v26 = vcombine.high %v8392_v4, %v8396_v27  ;;  %v13151_v0 = vcombine.low %v8392_v4, %v8396_v27 }
 0x616   :  { %8323 = vmatpush1.bf16.msra.mxu0 %v13101_v10  ;;  %v8397_v10 = vld [vmem:[#allocation14 + $0x14a8] sm:$0xff] }
 0x617   :  { %8324 = vmatprep.subr.bf16.mxu0 %v13110_v38  ;;  %8284 = vmatpush1.bf16.msra.mxu1 %v13107_v24  ;;  %v8400_v38 = vld [vmem:[#allocation14 + $0x14c0] sm:$0xff]  ;;  %v13154_v2 = vcombine.high %v8393_v40, %v8397_v10  ;;  %v13153_v31 = vcombine.low %v8393_v40, %v8397_v10 }
 0x618   :  { %8285 = vmatprep.subr.bf16.mxu1 %v13116_v33  ;;  %v8404_v24 = vld [vmem:[#allocation14 + $0x14e0] sm:$0xff]  ;;  %v8401_v33 = vld [vmem:[#allocation14 + $0x14c8] sm:$0xff] }
 0x619   :  { %v13160_v13 = vcombine.high %v8400_v38, %v8404_v24  ;;  %v13159_v59 = vcombine.low %v8400_v38, %v8404_v24 }
 0x61a   :  { %8325 = vmatpush1.bf16.msra.mxu0 %v13109_v35  ;;  %v8405_v35 = vld [vmem:[#allocation14 + $0x14e8] sm:$0xff] }
 0x61b   :  { %8326 = vmatprep.subr.bf16.mxu0 %v13118_v61  ;;  %8286 = vmatpush1.bf16.msra.mxu1 %v13115_v11  ;;  %v8408_v61 = vld [vmem:[#allocation14 + $0x1500] sm:$0xff]  ;;  %v13162_v11 = vcombine.high %v8401_v33, %v8405_v35  ;;  %v13161_v30 = vcombine.low %v8401_v33, %v8405_v35  ;;  %v8449_v35 = vld [vmem:[#allocation14 + $0x1648] sm:$0xff] }
 0x61c   :  { %8287 = vmatprep.subr.bf16.mxu1 %v13124_v19  ;;  %v8413_v19 = vld [vmem:[#allocation14 + $0x1528] sm:$0xff] }
 0x61d   :  { %v13170_v45 = vcombine.high %v8409_v28, %v8413_v19 }
 0x61e   :  { %8327 = vmatpush1.bf16.msra.mxu0 %v13117_v29 }
 0x61f   :  { %8328 = vmatprep.subr.bf16.mxu0 %v13126_v60  ;;  %8288 = vmatpush1.bf16.msra.mxu1 %v13123_v41  ;;  %v8420_v60 = vld [vmem:[#allocation14 + $0x1560] sm:$0xff]  ;;  %v8417_v41 = vld [vmem:[#allocation14 + $0x1548] sm:$0xff] }
 0x620   :  { %8289 = vmatprep.subr.bf16.mxu1 %v13132_v39  ;;  %v13176_v3 = vcombine.high %v8416_v14, %v8420_v60  ;;  %v13169_v39 = vcombine.low %v8409_v28, %v8413_v19  ;;  %v13178_v5 = vcombine.high %v8417_v41, %v8421_v16  ;;  %v13175_v49 = vcombine.low %v8416_v14, %v8420_v60  ;;  %v8457_v19 = vld [vmem:[#allocation14 + $0x1688] sm:$0xff]  ;;  %v8464_v60 = vld [vmem:[#allocation14 + $0x16c0] sm:$0xff] }
 0x621   :  { %v13177_v46 = vcombine.low %v8417_v41, %v8421_v16  ;;  %v8465_v16 = vld [vmem:[#allocation14 + $0x16c8] sm:$0xff] }
 0x622   :  { %8329 = vmatpush1.bf16.msra.mxu0 %v13125_v20  ;;  %v8424_v20 = vld [vmem:[#allocation14 + $0x1580] sm:$0xff] }
 0x623   :  { %8330 = vmatprep.subr.bf16.mxu0 %v13134_v8  ;;  %8290 = vmatpush1.bf16.msra.mxu1 %v13131_v6  ;;  %v8429_v8 = vld [vmem:[#allocation14 + $0x15a8] sm:$0xff]  ;;  %v13184_v6 = vcombine.high %v8424_v20, %v8428_v48 }
 0x624   :  { %9144 = vmatprep.subr.bf16.mxu1 %v13136_v47  ;;  %v8432_v47 = vld [vmem:[#allocation14 + $0x15c0] sm:$0xff]  ;;  %v13186_v50 = vcombine.high %v8425_v22, %v8429_v8 }
 0x626   :  { %8331 = vmatpush1.bf16.msra.mxu0 %v13133_v44  ;;  %8292 = vmatmul.mubr.bf16.vlgmr.msra.gmra.mrb[68].mxu1 %v16393_v36 }
 0x627   :  { %9185 = vmatprep.subr.bf16.mxu0 %v13138_v7  ;;  %9145 = vmatpush1.bf16.msra.mxu1 %v13135_v53  ;;  %v13183_v7 = vcombine.low %v8424_v20, %v8428_v48  ;;  %v8433_v53 = vld [vmem:[#allocation14 + $0x15c8] sm:$0xff]  ;;  %v8472_v48 = vld [vmem:[#allocation14 + $0x1700] sm:$0xff] }
 0x628   :  { %9176 = vmatprep.mubr.bf16.mxu1 %v16411_v43  ;;  %9146 = vmatprep.subr.bf16.mxu1 %v13144_v17  ;;  %v13194_v10 = vcombine.high %v8433_v53, %v8437_v18  ;;  %v13193_v24 = vcombine.low %v8433_v53, %v8437_v18  ;;  %v8488_v18 = vld [vmem:[#allocation14 + $0x1780] sm:$0xff] }
 0x629   :  { %8333 = vmatmul.mubr.bf16.vlgmr.msra.gmra.mrb[100].mxu0 %v16393_v36  ;;  %v8412_v36 = vld [vmem:[#allocation14 + $0x1520] sm:$0xff] }
 0x62a   :  { %9186 = vmatpush1.bf16.msra.mxu0 %v13137_v58  ;;  %9217 = vmatprep.mubr.bf16.mxu0 %v16411_v43  ;;  %v13168_v29 = vcombine.high %v8408_v61, %v8412_v36  ;;  %v13167_v15 = vcombine.low %v8408_v61, %v8412_v36  ;;  %v8456_v36 = vld [vmem:[#allocation14 + $0x1680] sm:$0xff] }
 0x62b   :  { %9187 = vmatprep.subr.bf16.mxu0 %v13146_v54  ;;  %9147 = vmatpush1.bf16.msra.mxu1 %v13143_v56  ;;  %v13185_v54 = vcombine.low %v8425_v22, %v8429_v8  ;;  %v8444_v56 = vld [vmem:[#allocation14 + $0x1620] sm:$0xff]  ;;  %v8473_v8 = vld [vmem:[#allocation14 + $0x1708] sm:$0xff] }
 0x62c   :  { %9148 = vmatprep.subr.bf16.mxu1 %v13152_v26  ;;  %v13191_v26 = vcombine.low %v8432_v47, %v8436_v62 }
 0x62e   :  { %9188 = vmatpush1.bf16.msra.mxu0 %v13145_v32  ;;  %v8441_v32 = vld [vmem:[#allocation14 + $0x1608] sm:$0xff] }
 0x62f   :  { %9189 = vmatprep.subr.bf16.mxu0 %v13154_v2  ;;  %9149 = vmatpush1.bf16.msra.mxu1 %v13151_v0  ;;  %v8448_v2 = vld [vmem:[#allocation14 + $0x1640] sm:$0xff] }
 0x630   :  { %9150 = vmatprep.subr.bf16.mxu1 %v13160_v13  ;;  %v8452_v0 = vld [vmem:[#allocation14 + $0x1660] sm:$0xff]  ;;  %v8453_v13 = vld [vmem:[#allocation14 + $0x1668] sm:$0xff] }
 0x631   :  { %v13207_v28 = vcombine.low %v8448_v2, %v8452_v0  ;;  %v13209_v14 = vcombine.low %v8449_v35, %v8453_v13 }
 0x632   :  { %9190 = vmatpush1.bf16.msra.mxu0 %v13153_v31  ;;  %v13208_v31 = vcombine.high %v8448_v2, %v8452_v0  ;;  %v8501_v2 = vld [vmem:[#allocation14 + $0x17e8] sm:$0xff] }
 0x633   :  { %9191 = vmatprep.subr.bf16.mxu0 %v13162_v11  ;;  %9151 = vmatpush1.bf16.msra.mxu1 %v13159_v59  ;;  %v8460_v11 = vld [vmem:[#allocation14 + $0x16a0] sm:$0xff]  ;;  %v13210_v59 = vcombine.high %v8449_v35, %v8453_v13  ;;  %v8378_v13 = vld [vmem:[#allocation14 + $0x1410] sm:$0xff] }
 0x634   :  { %9152 = vmatprep.subr.bf16.mxu1 %v13168_v29  ;;  %v8461_v29 = vld [vmem:[#allocation14 + $0x16a8] sm:$0xff]  ;;  %v13215_v41 = vcombine.low %v8456_v36, %v8460_v11 }
 0x635   :  { %v13217_v20 = vcombine.low %v8457_v19, %v8461_v29 }
 0x636   :  { %9192 = vmatpush1.bf16.msra.mxu0 %v13161_v30  ;;  %v13216_v30 = vcombine.high %v8456_v36, %v8460_v11  ;;  %v8349_v36 = vld [vmem:[#allocation3 + $0xa0] sm:$0xf] }
 0x637   :  { %9193 = vmatprep.subr.bf16.mxu0 %v13170_v45  ;;  %9153 = vmatpush1.bf16.msra.mxu1 %v13167_v15  ;;  %v8468_v45 = vld [vmem:[#allocation14 + $0x16e0] sm:$0xff]  ;;  %v13218_v15 = vcombine.high %v8457_v19, %v8461_v29  ;;  %v8383_v19 = vld [vmem:[#allocation14 + $0x1438] sm:$0xff] }
 0x638   :  { %9154 = vmatprep.subr.bf16.mxu1 %v13176_v3  ;;  %v8469_v3 = vld [vmem:[#allocation14 + $0x16e8] sm:$0xff]  ;;  %v13223_v22 = vcombine.low %v8464_v60, %v8468_v45 }
 0x639   :  { %v7244_v9 = vpop.f32.mrb[56].mxu1 }
 0x63a   :  { %9194 = vmatpush1.bf16.msra.mxu0 %v13169_v39  ;;  %v16418_v63 = vadd.f32 %v7244_v9, %v16382_v1  ;;  %v7246_v44 = vpop.f32.mrb[57].mxu1  ;;  %v13192_v1 = vcombine.high %v8432_v47, %v8436_v62  ;;  %v13224_v39 = vcombine.high %v8464_v60, %v8468_v45  ;;  %v8480_v47 = vld [vmem:[#allocation14 + $0x1740] sm:$0xff]  ;;  %v8386_v45 = vld [vmem:[#allocation14 + $0x1450] sm:$0xff] }
 0x63b   :  { %9195 = vmatprep.subr.bf16.mxu0 %v13178_v5  ;;  %v16421_v42 = vadd.f32 %v7246_v44, %v16385_v55  ;;  %v7248_v23 = vpop.f32.mrb[58].mxu1  ;;  %9155 = vmatpush1.bf16.msra.mxu1 %v13175_v49  ;;  %v8440_v55 = vld [vmem:[#allocation14 + $0x1600] sm:$0xff]  ;;  %v13226_v49 = vcombine.high %v8465_v16, %v8469_v3 }
 0x63c   :  { %v7285_v52 = vpop.f32.mrb[88].mxu0  ;;  %v7249_v58 = vpop.f32.mrb[59].mxu1  ;;  %9156 = vmatprep.subr.bf16.mxu1 %v13184_v6  ;;  %v13200_v38 = vcombine.high %v8440_v55, %v8444_v56  ;;  %v13199_v33 = vcombine.low %v8440_v55, %v8444_v56  ;;  %v8476_v5 = vld [vmem:[#allocation14 + $0x1720] sm:$0xff]  ;;  %v8477_v6 = vld [vmem:[#allocation14 + $0x1728] sm:$0xff] }
 0x63d   :  { %v16424_v57 = vadd.f32 %v7285_v52, %v16388_v34  ;;  %v7287_v17 = vpop.f32.mrb[89].mxu0  ;;  %v8445_v34 = vld [vmem:[#allocation14 + $0x1628] sm:$0xff]  ;;  %v13232_v9 = vcombine.high %v8472_v48, %v8476_v5  ;;  %v8484_v62 = vld [vmem:[#allocation14 + $0x1760] sm:$0xff]  ;;  %v13234_v44 = vcombine.high %v8473_v8, %v8477_v6  ;;  %v13233_v53 = vcombine.low %v8473_v8, %v8477_v6 }
 0x63e   :  { %v16427_v4 = vadd.f32 %v7287_v17, %v16391_v37  ;;  %v7289_v27 = vpop.f32.mrb[90].mxu0  ;;  %9196 = vmatpush1.bf16.msra.mxu0 %v13177_v46  ;;  %v13202_v37 = vcombine.high %v8441_v32, %v8445_v34  ;;  %v13201_v61 = vcombine.low %v8441_v32, %v8445_v34  ;;  %v13225_v46 = vcombine.low %v8465_v16, %v8469_v3  ;;  %v8481_v52 = vld [vmem:[#allocation14 + $0x1748] sm:$0xff]  ;;  %v8492_v17 = vld [vmem:[#allocation14 + $0x17a0] sm:$0xff]  ;;  %v8355_v32 = vld [vmem:[#allocation3 + $0xb0] sm:$0xf0] }
 0x63f   :  { %v7290_v40 = vpop.f32.mrb[91].mxu0  ;;  %9197 = vmatprep.subr.bf16.mxu0 %v13186_v50  ;;  %9157 = vmatpush1.bf16.msra.mxu1 %v13183_v7  ;;  %v13231_v50 = vcombine.low %v8472_v48, %v8476_v5  ;;  %v8485_v23 = vld [vmem:[#allocation14 + $0x1768] sm:$0xff]  ;;  %v13240_v7 = vcombine.high %v8480_v47, %v8484_v62  ;;  %v13248_v55 = vcombine.high %v8488_v18, %v8492_v17  ;;  %v8387_v3 = vld [vmem:[#allocation14 + $0x1458] sm:$0xff] }
 0x640   :  { %9158 = vmatprep.subr.bf16.mxu1 %v13192_v1  ;;  %v13242_v58 = vcombine.high %v8481_v52, %v8485_v23  ;;  %v13239_v1 = vcombine.low %v8480_v47, %v8484_v62  ;;  %v8489_v27 = vld [vmem:[#allocation14 + $0x1788] sm:$0xff]  ;;  %v13241_v40 = vcombine.low %v8481_v52, %v8485_v23 }
 0x641   :  { %v8353_v56 = vld [vmem:[#allocation3 + $0xa0] sm:$0xf0] }
 0x642   :  { %9198 = vmatpush1.bf16.msra.mxu0 %v13185_v54  ;;  %v8493_v54 = vld [vmem:[#allocation14 + $0x17a8] sm:$0xff] }
 0x643   :  { %9199 = vmatprep.subr.bf16.mxu0 %v13194_v10  ;;  %9159 = vmatpush1.bf16.msra.mxu1 %v13191_v26  ;;  %v8496_v10 = vld [vmem:[#allocation14 + $0x17c0] sm:$0xff]  ;;  %v13250_v34 = vcombine.high %v8489_v27, %v8493_v54  ;;  %v13249_v35 = vcombine.low %v8489_v27, %v8493_v54 }
 0x644   :  { %9160 = vmatprep.subr.bf16.mxu1 %v13200_v38  ;;  %v8500_v26 = vld [vmem:[#allocation14 + $0x17e0] sm:$0xff]  ;;  %v13247_v38 = vcombine.low %v8488_v18, %v8492_v17 }
 0x645   :  { %v13256_v0 = vcombine.high %v8496_v10, %v8500_v26  ;;  %v13255_v11 = vcombine.low %v8496_v10, %v8500_v26  ;;  %v8418_v10 = vld [vmem:[#allocation14 + $0x1550] sm:$0xff] }
 0x646   :  { %9200 = vmatpush1.bf16.msra.mxu0 %v13193_v24  ;;  %v8497_v24 = vld [vmem:[#allocation14 + $0x17c8] sm:$0xff]  ;;  %v8422_v26 = vld [vmem:[#allocation14 + $0x1570] sm:$0xff] }
 0x647   :  { %9201 = vmatprep.subr.bf16.mxu0 %v13202_v37  ;;  %9161 = vmatpush1.bf16.msra.mxu1 %v13199_v33  ;;  %v8361_v37 = vrot.slane %v8353_v56, 4  ;;  %v8363_v33 = vrot.slane %v8355_v32, 4  ;;  %v13257_v60 = vcombine.low %v8497_v24, %v8501_v2 }
 0x648   :  { %9162 = vmatprep.subr.bf16.mxu1 %v13208_v31  ;;  %v8382_v31 = vld [vmem:[#allocation14 + $0x1430] sm:$0xff] }
 0x649   :  { %v8369_v29 = vmax.bf16 %v8361_v37, %v8349_v36  ;;  %v13139_v16 = vcombine.low %v8378_v13, %v8382_v31  ;;  %v8426_v37 = vld [vmem:[#allocation14 + $0x1590] sm:$0xff] }
 0x64a   :  { %9202 = vmatpush1.bf16.msra.mxu0 %v13201_v61  ;;  %v13258_v61 = vcombine.high %v8497_v24, %v8501_v2  ;;  %v8423_v24 = vld [vmem:[#allocation14 + $0x1578] sm:$0xff]  ;;  %v13180_v2 = vcombine.high %v8418_v10, %v8422_v26 }
 0x64b   :  { %9203 = vmatprep.subr.bf16.mxu0 %v13210_v59  ;;  %9163 = vmatpush1.bf16.msra.mxu1 %v13207_v28  ;;  %v8351_v59 = vld [vmem:[#allocation3 + $0xb0] sm:$0xf]  ;;  %v8379_v28 = vld [vmem:[#allocation14 + $0x1418] sm:$0xff] }
 0x64c   :  { %9164 = vmatprep.subr.bf16.mxu1 %v13216_v30  ;;  %v8371_v30 = vmax.bf16 %v8363_v33, %v8351_v59  ;;  %v13141_v5 = vcombine.low %v8379_v28, %v8383_v19  ;;  %v8430_v33 = vld [vmem:[#allocation14 + $0x15b0] sm:$0xff] }
 0x64d   :  { %v13188_v36 = vcombine.high %v8426_v37, %v8430_v33 }
 0x64e   :  { %9204 = vmatpush1.bf16.msra.mxu0 %v13209_v14  ;;  %v13140_v14 = vcombine.high %v8378_v13, %v8382_v31  ;;  %v13179_v13 = vcombine.low %v8418_v10, %v8422_v26  ;;  %v8427_v31 = vld [vmem:[#allocation14 + $0x1598] sm:$0xff]  ;;  %v8466_v26 = vld [vmem:[#allocation14 + $0x16d0] sm:$0xff] }
 0x64f   :  { %9205 = vmatprep.subr.bf16.mxu0 %v13218_v15  ;;  %9165 = vmatpush1.bf16.msra.mxu1 %v13215_v41  ;;  %v8390_v15 = vld [vmem:[#allocation14 + $0x1470] sm:$0xff]  ;;  %v13142_v41 = vcombine.high %v8379_v28, %v8383_v19 }
 0x650   :  { %9166 = vmatprep.subr.bf16.mxu1 %v13224_v39  ;;  %v8391_v39 = vld [vmem:[#allocation14 + $0x1478] sm:$0xff]  ;;  %v13148_v48 = vcombine.high %v8386_v45, %v8390_v15  ;;  %v13147_v6 = vcombine.low %v8386_v45, %v8390_v15  ;;  %v8434_v28 = vld [vmem:[#allocation14 + $0x15d0] sm:$0xff] }
 0x651   :  { %v13150_v8 = vcombine.high %v8387_v3, %v8391_v39  ;;  %v13149_v62 = vcombine.low %v8387_v3, %v8391_v39  ;;  %v8438_v19 = vld [vmem:[#allocation14 + $0x15f0] sm:$0xff]  ;;  %v8439_v3 = vld [vmem:[#allocation14 + $0x15f8] sm:$0xff] }
 0x652   :  { %9206 = vmatpush1.bf16.msra.mxu0 %v13217_v20  ;;  %v16429_v20 = vmax.bf16 %v8371_v30, %v8369_v29 }
 0x653   :  { %9207 = vmatprep.subr.bf16.mxu0 %v13226_v49  ;;  %9167 = vmatpush1.bf16.msra.mxu1 %v13223_v22  ;;  %v8394_v49 = vld [vmem:[#allocation14 + $0x1490] sm:$0xff] }
 0x654   :  { %9168 = vmatprep.subr.bf16.mxu1 %v13232_v9  ;;  %v8398_v22 = vld [vmem:[#allocation14 + $0x14b0] sm:$0xff]  ;;  %v8395_v9 = vld [vmem:[#allocation14 + $0x1498] sm:$0xff] }
 0x655   :  { %v13156_v47 = vcombine.high %v8394_v49, %v8398_v22  ;;  %v13155_v23 = vcombine.low %v8394_v49, %v8398_v22 }
 0x656   :  { %9208 = vmatpush1.bf16.msra.mxu0 %v13225_v46  ;;  %v8399_v46 = vld [vmem:[#allocation14 + $0x14b8] sm:$0xff] }
 0x657   :  { %9209 = vmatprep.subr.bf16.mxu0 %v13234_v44  ;;  %9169 = vmatpush1.bf16.msra.mxu1 %v13231_v50  ;;  %v8402_v44 = vld [vmem:[#allocation14 + $0x14d0] sm:$0xff]  ;;  %v13158_v52 = vcombine.high %v8395_v9, %v8399_v46  ;;  %v13157_v17 = vcombine.low %v8395_v9, %v8399_v46 }
 0x658   :  { %9170 = vmatprep.subr.bf16.mxu1 %v13240_v7  ;;  %v8406_v50 = vld [vmem:[#allocation14 + $0x14f0] sm:$0xff]  ;;  %v8403_v7 = vld [vmem:[#allocation14 + $0x14d8] sm:$0xff] }
 0x659   :  { %v13164_v18 = vcombine.high %v8402_v44, %v8406_v50  ;;  %v13163_v54 = vcombine.low %v8402_v44, %v8406_v50 }
 0x65a   :  { %9210 = vmatpush1.bf16.msra.mxu0 %v13233_v53  ;;  %v8407_v53 = vld [vmem:[#allocation14 + $0x14f8] sm:$0xff] }
 0x65b   :  { %9211 = vmatprep.subr.bf16.mxu0 %v13242_v58  ;;  %9171 = vmatpush1.bf16.msra.mxu1 %v13239_v1  ;;  %v8410_v58 = vld [vmem:[#allocation14 + $0x1510] sm:$0xff]  ;;  %v13166_v27 = vcombine.high %v8403_v7, %v8407_v53 }
 0x65c   :  { %9172 = vmatprep.subr.bf16.mxu1 %v13248_v55  ;;  %v8414_v1 = vld [vmem:[#allocation14 + $0x1530] sm:$0xff]  ;;  %v8415_v55 = vld [vmem:[#allocation14 + $0x1538] sm:$0xff] }
 0x65d   :  { %v13172_v56 = vcombine.high %v8410_v58, %v8414_v1 }
 0x65e   :  { %9212 = vmatpush1.bf16.msra.mxu0 %v13241_v40  ;;  %v13165_v40 = vcombine.low %v8403_v7, %v8407_v53  ;;  %v8451_v53 = vld [vmem:[#allocation14 + $0x1658] sm:$0xff] }
 0x65f   :  { %9213 = vmatprep.subr.bf16.mxu0 %v13250_v34  ;;  %9173 = vmatpush1.bf16.msra.mxu1 %v13247_v38  ;;  %v13171_v34 = vcombine.low %v8410_v58, %v8414_v1  ;;  %v8419_v38 = vld [vmem:[#allocation14 + $0x1558] sm:$0xff]  ;;  %v8458_v1 = vld [vmem:[#allocation14 + $0x1690] sm:$0xff] }
 0x660   :  { %9174 = vmatprep.subr.bf16.mxu1 %v13256_v0  ;;  %v13181_v59 = vcombine.low %v8419_v38, %v8423_v24 }
 0x662   :  { %9214 = vmatpush1.bf16.msra.mxu0 %v13249_v35  ;;  %v13182_v35 = vcombine.high %v8419_v38, %v8423_v24  ;;  %v8467_v24 = vld [vmem:[#allocation14 + $0x16d8] sm:$0xff] }
 0x663   :  { %9215 = vmatprep.subr.bf16.mxu0 %v13258_v61  ;;  %9175 = vmatpush1.bf16.msra.mxu1 %v13255_v11  ;;  %v8431_v61 = vld [vmem:[#allocation14 + $0x15b8] sm:$0xff] }
 0x664   :  { %9226 = vmatprep.subr.bf16.mxu1 %v13140_v14  ;;  %v13190_v14 = vcombine.high %v8427_v31, %v8431_v61 }
 0x666   :  { %9216 = vmatpush1.bf16.msra.mxu0 %v13257_v60  ;;  %9177 = vmatmul.mubr.bf16.vlgmr.msra.gmra.mrb[72].mxu1 %v16429_v20 }
 0x667   :  { %9267 = vmatprep.subr.bf16.mxu0 %v13142_v41  ;;  %9227 = vmatpush1.bf16.msra.mxu1 %v13139_v16  ;;  %v13187_v41 = vcombine.low %v8426_v37, %v8430_v33  ;;  %v8435_v16 = vld [vmem:[#allocation14 + $0x15d8] sm:$0xff]  ;;  %v8474_v33 = vld [vmem:[#allocation14 + $0x1710] sm:$0xff] }
 0x668   :  { %9258 = vmatprep.mubr.bf16.mxu1 %v16411_v43  ;;  %9228 = vmatprep.subr.bf16.mxu1 %v13148_v48  ;;  %v13198_v46 = vcombine.high %v8435_v16, %v8439_v3  ;;  %v13197_v50 = vcombine.low %v8435_v16, %v8439_v3  ;;  %v8490_v3 = vld [vmem:[#allocation14 + $0x1790] sm:$0xff] }
 0x669   :  { %9218 = vmatmul.mubr.bf16.vlgmr.msra.gmra.mrb[104].mxu0 %v16429_v20 }
 0x66a   :  { %9268 = vmatpush1.bf16.msra.mxu0 %v13141_v5  ;;  %9299 = vmatprep.mubr.bf16.mxu0 %v16411_v43  ;;  %v8411_v43 = vld [vmem:[#allocation14 + $0x1518] sm:$0xff] }
 0x66b   :  { %9269 = vmatprep.subr.bf16.mxu0 %v13150_v8  ;;  %9229 = vmatpush1.bf16.msra.mxu1 %v13147_v6  ;;  %v13174_v32 = vcombine.high %v8411_v43, %v8415_v55  ;;  %v13173_v0 = vcombine.low %v8411_v43, %v8415_v55  ;;  %v13189_v8 = vcombine.low %v8427_v31, %v8431_v61  ;;  %v8446_v6 = vld [vmem:[#allocation14 + $0x1630] sm:$0xff]  ;;  %v8459_v55 = vld [vmem:[#allocation14 + $0x1698] sm:$0xff] }
 0x66c   :  { %9230 = vmatprep.subr.bf16.mxu1 %v13156_v47  ;;  %v13195_v47 = vcombine.low %v8434_v28, %v8438_v19  ;;  %v8475_v61 = vld [vmem:[#allocation14 + $0x1718] sm:$0xff] }
 0x66e   :  { %9270 = vmatpush1.bf16.msra.mxu0 %v13149_v62  ;;  %v8443_v62 = vld [vmem:[#allocation14 + $0x1618] sm:$0xff] }
 0x66f   :  { %9271 = vmatprep.subr.bf16.mxu0 %v13158_v52  ;;  %9231 = vmatpush1.bf16.msra.mxu1 %v13155_v23  ;;  %v8450_v52 = vld [vmem:[#allocation14 + $0x1650] sm:$0xff] }
 0x670   :  { %9232 = vmatprep.subr.bf16.mxu1 %v13164_v18  ;;  %v8454_v23 = vld [vmem:[#allocation14 + $0x1670] sm:$0xff]  ;;  %v8455_v18 = vld [vmem:[#allocation14 + $0x1678] sm:$0xff] }
 0x671   :  { %v13211_v43 = vcombine.low %v8450_v52, %v8454_v23  ;;  %v13213_v10 = vcombine.low %v8451_v53, %v8455_v18 }
 0x672   :  { %9272 = vmatpush1.bf16.msra.mxu0 %v13157_v17  ;;  %v13212_v17 = vcombine.high %v8450_v52, %v8454_v23  ;;  %v8503_v52 = vld [vmem:[#allocation14 + $0x17f8] sm:$0xff] }
 0x673   :  { %9273 = vmatprep.subr.bf16.mxu0 %v13166_v27  ;;  %9233 = vmatpush1.bf16.msra.mxu1 %v13163_v54  ;;  %v8462_v27 = vld [vmem:[#allocation14 + $0x16b0] sm:$0xff]  ;;  %v13214_v54 = vcombine.high %v8451_v53, %v8455_v18  ;;  %v9347_v53 = vld [vmem:[#allocation14 + $0x1820] sm:$0xff] }
 0x674   :  { %9234 = vmatprep.subr.bf16.mxu1 %v13172_v56  ;;  %v8463_v56 = vld [vmem:[#allocation14 + $0x16b8] sm:$0xff]  ;;  %v13219_v38 = vcombine.low %v8458_v1, %v8462_v27 }
 0x675   :  { %v13221_v37 = vcombine.low %v8459_v55, %v8463_v56 }
 0x676   :  { %9274 = vmatpush1.bf16.msra.mxu0 %v13165_v40  ;;  %v13220_v40 = vcombine.high %v8458_v1, %v8462_v27  ;;  %v9344_v27 = vld [vmem:[#allocation14 + $0x1808] sm:$0xff] }
 0x677   :  { %9275 = vmatprep.subr.bf16.mxu0 %v13174_v32  ;;  %9235 = vmatpush1.bf16.msra.mxu1 %v13171_v34  ;;  %v8470_v32 = vld [vmem:[#allocation14 + $0x16f0] sm:$0xff]  ;;  %v13222_v34 = vcombine.high %v8459_v55, %v8463_v56  ;;  %v9317_v55 = vld [vmem:[#allocation3 + $0xc8] sm:$0xf]  ;;  %v9319_v56 = vld [vmem:[#allocation3 + $0xd8] sm:$0xf] }
 0x678   :  { %9236 = vmatprep.subr.bf16.mxu1 %v13180_v2  ;;  %v8471_v2 = vld [vmem:[#allocation14 + $0x16f8] sm:$0xff]  ;;  %v13227_v31 = vcombine.low %v8466_v26, %v8470_v32 }
 0x679   :  { %v7326_v11 = vpop.f32.mrb[60].mxu1 }
 0x67a   :  { %9276 = vmatpush1.bf16.msra.mxu0 %v13173_v0  ;;  %v16436_v29 = vadd.f32 %v7326_v11, %v16400_v21  ;;  %v7328_v30 = vpop.f32.mrb[61].mxu1  ;;  %v13196_v21 = vcombine.high %v8434_v28, %v8438_v19  ;;  %v13228_v0 = vcombine.high %v8466_v26, %v8470_v32  ;;  %v8482_v28 = vld [vmem:[#allocation14 + $0x1750] sm:$0xff]  ;;  %v9351_v32 = vld [vmem:[#allocation14 + $0x1840] sm:$0xff] }
 0x67b   :  { %9277 = vmatprep.subr.bf16.mxu0 %v13182_v35  ;;  %v16439_v45 = vadd.f32 %v7328_v30, %v16403_v25  ;;  %v7330_v15 = vpop.f32.mrb[62].mxu1  ;;  %9237 = vmatpush1.bf16.msra.mxu1 %v13179_v13  ;;  %v8442_v25 = vld [vmem:[#allocation14 + $0x1610] sm:$0xff]  ;;  %v13230_v13 = vcombine.high %v8467_v24, %v8471_v2 }
 0x67c   :  { %v7367_v60 = vpop.f32.mrb[92].mxu0  ;;  %v7331_v5 = vpop.f32.mrb[63].mxu1  ;;  %9238 = vmatprep.subr.bf16.mxu1 %v13188_v36  ;;  %v13204_v44 = vcombine.high %v8442_v25, %v8446_v6  ;;  %v13203_v7 = vcombine.low %v8442_v25, %v8446_v6  ;;  %v8478_v35 = vld [vmem:[#allocation14 + $0x1730] sm:$0xff]  ;;  %v8479_v36 = vld [vmem:[#allocation14 + $0x1738] sm:$0xff] }
 0x67d   :  { %v16442_v39 = vadd.f32 %v7367_v60, %v16406_v12  ;;  %v7369_v48 = vpop.f32.mrb[93].mxu0  ;;  %v8447_v12 = vld [vmem:[#allocation14 + $0x1638] sm:$0xff]  ;;  %v13236_v11 = vcombine.high %v8474_v33, %v8478_v35  ;;  %v8486_v19 = vld [vmem:[#allocation14 + $0x1770] sm:$0xff]  ;;  %v13238_v30 = vcombine.high %v8475_v61, %v8479_v36  ;;  %v13237_v16 = vcombine.low %v8475_v61, %v8479_v36 }
 0x67e   :  { %v16445_v49 = vadd.f32 %v7369_v48, %v16409_v51  ;;  %v7371_v22 = vpop.f32.mrb[94].mxu0  ;;  %9278 = vmatpush1.bf16.msra.mxu0 %v13181_v59  ;;  %v13206_v51 = vcombine.high %v8443_v62, %v8447_v12  ;;  %v13205_v58 = vcombine.low %v8443_v62, %v8447_v12  ;;  %v13229_v59 = vcombine.low %v8467_v24, %v8471_v2  ;;  %v8483_v60 = vld [vmem:[#allocation14 + $0x1758] sm:$0xff]  ;;  %v8494_v48 = vld [vmem:[#allocation14 + $0x17b0] sm:$0xff]  ;;  %v9323_v12 = vld [vmem:[#allocation3 + $0xd8] sm:$0xf0] }
 0x67f   :  { %v7372_v9 = vpop.f32.mrb[95].mxu0  ;;  %9279 = vmatprep.subr.bf16.mxu0 %v13190_v14  ;;  %9239 = vmatpush1.bf16.msra.mxu1 %v13187_v41  ;;  %v13235_v14 = vcombine.low %v8474_v33, %v8478_v35  ;;  %v8487_v15 = vld [vmem:[#allocation14 + $0x1778] sm:$0xff]  ;;  %v13244_v41 = vcombine.high %v8482_v28, %v8486_v19  ;;  %v13252_v25 = vcombine.high %v8490_v3, %v8494_v48  ;;  %v9321_v62 = vld [vmem:[#allocation3 + $0xc8] sm:$0xf0]  ;;  %v9352_v2 = vld [vmem:[#allocation14 + $0x1848] sm:$0xff] }
 0x680   :  { %9240 = vmatprep.subr.bf16.mxu1 %v13196_v21  ;;  %v13246_v5 = vcombine.high %v8483_v60, %v8487_v15  ;;  %v13243_v21 = vcombine.low %v8482_v28, %v8486_v19  ;;  %v8491_v22 = vld [vmem:[#allocation14 + $0x1798] sm:$0xff]  ;;  %v13245_v6 = vcombine.low %v8483_v60, %v8487_v15  ;;  %v8498_v9 = vld [vmem:[#allocation14 + $0x17d0] sm:$0xff]  ;;  %v9329_v18 = vrot.slane %v9321_v62, 4 }
 0x682   :  { %9280 = vmatpush1.bf16.msra.mxu0 %v13189_v8  ;;  %v8495_v8 = vld [vmem:[#allocation14 + $0x17b8] sm:$0xff] }
 0x683   :  { %9281 = vmatprep.subr.bf16.mxu0 %v13198_v46  ;;  %9241 = vmatpush1.bf16.msra.mxu1 %v13195_v47  ;;  %v8502_v46 = vld [vmem:[#allocation14 + $0x17f0] sm:$0xff]  ;;  %v13254_v47 = vcombine.high %v8491_v22, %v8495_v8 }
 0x684   :  { %9242 = vmatprep.subr.bf16.mxu1 %v13204_v44  ;;  %v13251_v44 = vcombine.low %v8490_v3, %v8494_v48  ;;  %v13260_v23 = vcombine.high %v8498_v9, %v8502_v46  ;;  %v13259_v1 = vcombine.low %v8498_v9, %v8502_v46  ;;  %v9383_v46 = vld [vmem:[#allocation14 + $0x1940] sm:$0xff] }
 0x686   :  { %9282 = vmatpush1.bf16.msra.mxu0 %v13197_v50  ;;  %v8499_v50 = vld [vmem:[#allocation14 + $0x17d8] sm:$0xff] }
 0x687   :  { %9283 = vmatprep.subr.bf16.mxu0 %v13206_v51  ;;  %9243 = vmatpush1.bf16.msra.mxu1 %v13203_v7  ;;  %v13253_v51 = vcombine.low %v8491_v22, %v8495_v8  ;;  %v9343_v7 = vld [vmem:[#allocation14 + $0x1800] sm:$0xff]  ;;  %v9376_v8 = vld [vmem:[#allocation14 + $0x1908] sm:$0xff] }
 0x688   :  { %9244 = vmatprep.subr.bf16.mxu1 %v13212_v17  ;;  %v9331_v17 = vrot.slane %v9323_v12, 4  ;;  %v13263_v24 = vcombine.low %v9343_v7, %v9347_v53 }
 0x68a   :  { %9284 = vmatpush1.bf16.msra.mxu0 %v13205_v58  ;;  %v13262_v58 = vcombine.high %v8499_v50, %v8503_v52  ;;  %v9339_v26 = vmax.bf16 %v9331_v17, %v9319_v56  ;;  %v9392_v17 = vld [vmem:[#allocation14 + $0x1988] sm:$0xff] }
 0x68b   :  { %9285 = vmatprep.subr.bf16.mxu0 %v13214_v54  ;;  %9245 = vmatpush1.bf16.msra.mxu1 %v13211_v43  ;;  %v9348_v54 = vld [vmem:[#allocation14 + $0x1828] sm:$0xff]  ;;  %v13264_v43 = vcombine.high %v9343_v7, %v9347_v53  ;;  %v9395_v7 = vld [vmem:[#allocation14 + $0x19a0] sm:$0xff] }
 0x68c   :  { %9246 = vmatprep.subr.bf16.mxu1 %v13220_v40  ;;  %v13261_v40 = vcombine.low %v8499_v50, %v8503_v52  ;;  %v13265_v33 = vcombine.low %v9344_v27, %v9348_v54  ;;  %v9388_v50 = vld [vmem:[#allocation14 + $0x1968] sm:$0xff] }
 0x68e   :  { %9286 = vmatpush1.bf16.msra.mxu0 %v13213_v10  ;;  %v9337_v10 = vmax.bf16 %v9329_v18, %v9317_v55  ;;  %v9403_v55 = vld [vmem:[#allocation14 + $0x19e0] sm:$0xff] }
 0x68f   :  { %9287 = vmatprep.subr.bf16.mxu0 %v13222_v34  ;;  %9247 = vmatpush1.bf16.msra.mxu1 %v13219_v38  ;;  %v9355_v34 = vld [vmem:[#allocation14 + $0x1860] sm:$0xff]  ;;  %v13266_v38 = vcombine.high %v9344_v27, %v9348_v54 }
 0x690   :  { %9248 = vmatprep.subr.bf16.mxu1 %v13228_v0  ;;  %v9356_v0 = vld [vmem:[#allocation14 + $0x1868] sm:$0xff]  ;;  %v16447_v35 = vmax.bf16 %v9339_v26, %v9337_v10  ;;  %v13271_v36 = vcombine.low %v9351_v32, %v9355_v34 }
 0x691   :  { %v13274_v61 = vcombine.high %v9352_v2, %v9356_v0  ;;  %v13273_v19 = vcombine.low %v9352_v2, %v9356_v0  ;;  %v9404_v2 = vld [vmem:[#allocation14 + $0x19e8] sm:$0xff] }
 0x692   :  { %9288 = vmatpush1.bf16.msra.mxu0 %v13221_v37  ;;  %v13272_v37 = vcombine.high %v9351_v32, %v9355_v34 }
 0x693   :  { %9289 = vmatprep.subr.bf16.mxu0 %v13230_v13  ;;  %9249 = vmatpush1.bf16.msra.mxu1 %v13227_v31  ;;  %v9359_v13 = vld [vmem:[#allocation14 + $0x1880] sm:$0xff] }
 0x694   :  { %9250 = vmatprep.subr.bf16.mxu1 %v13236_v11  ;;  %v9363_v31 = vld [vmem:[#allocation14 + $0x18a0] sm:$0xff]  ;;  %v9360_v11 = vld [vmem:[#allocation14 + $0x1888] sm:$0xff] }
 0x695   :  { %v13280_v28 = vcombine.high %v9359_v13, %v9363_v31  ;;  %v13279_v15 = vcombine.low %v9359_v13, %v9363_v31 }
 0x696   :  { %9290 = vmatpush1.bf16.msra.mxu0 %v13229_v59  ;;  %v9364_v59 = vld [vmem:[#allocation14 + $0x18a8] sm:$0xff] }
 0x697   :  { %9291 = vmatprep.subr.bf16.mxu0 %v13238_v30  ;;  %9251 = vmatpush1.bf16.msra.mxu1 %v13235_v14  ;;  %v9367_v30 = vld [vmem:[#allocation14 + $0x18c0] sm:$0xff]  ;;  %v13282_v60 = vcombine.high %v9360_v11, %v9364_v59  ;;  %v13281_v48 = vcombine.low %v9360_v11, %v9364_v59 }
 0x698   :  { %9252 = vmatprep.subr.bf16.mxu1 %v13244_v41  ;;  %v9371_v14 = vld [vmem:[#allocation14 + $0x18e0] sm:$0xff]  ;;  %v9368_v41 = vld [vmem:[#allocation14 + $0x18c8] sm:$0xff] }
 0x699   :  { %v13288_v3 = vcombine.high %v9367_v30, %v9371_v14  ;;  %v13287_v22 = vcombine.low %v9367_v30, %v9371_v14 }
 0x69a   :  { %9292 = vmatpush1.bf16.msra.mxu0 %v13237_v16  ;;  %v9372_v16 = vld [vmem:[#allocation14 + $0x18e8] sm:$0xff] }
 0x69b   :  { %9293 = vmatprep.subr.bf16.mxu0 %v13246_v5  ;;  %9253 = vmatpush1.bf16.msra.mxu1 %v13243_v21  ;;  %v9375_v5 = vld [vmem:[#allocation14 + $0x1900] sm:$0xff]  ;;  %v13290_v21 = vcombine.high %v9368_v41, %v9372_v16  ;;  %v13289_v9 = vcombine.low %v9368_v41, %v9372_v16  ;;  %v9416_v16 = vld [vmem:[#allocation14 + $0x1a48] sm:$0xff] }
 0x69c   :  { %9254 = vmatprep.subr.bf16.mxu1 %v13252_v25  ;;  %v9380_v25 = vld [vmem:[#allocation14 + $0x1928] sm:$0xff] }
 0x69d   :  { %v13298_v62 = vcombine.high %v9376_v8, %v9380_v25 }
 0x69e   :  { %9294 = vmatpush1.bf16.msra.mxu0 %v13245_v6 }
 0x69f   :  { %9295 = vmatprep.subr.bf16.mxu0 %v13254_v47  ;;  %9255 = vmatpush1.bf16.msra.mxu1 %v13251_v44  ;;  %v9387_v47 = vld [vmem:[#allocation14 + $0x1960] sm:$0xff]  ;;  %v9384_v44 = vld [vmem:[#allocation14 + $0x1948] sm:$0xff] }
 0x6a0   :  { %9256 = vmatprep.subr.bf16.mxu1 %v13260_v23  ;;  %v13304_v52 = vcombine.high %v9383_v46, %v9387_v47  ;;  %v13297_v23 = vcombine.low %v9376_v8, %v9380_v25  ;;  %v13306_v53 = vcombine.high %v9384_v44, %v9388_v50  ;;  %v13303_v18 = vcombine.low %v9383_v46, %v9387_v47  ;;  %v9424_v25 = vld [vmem:[#allocation14 + $0x1a88] sm:$0xff]  ;;  %v9431_v47 = vld [vmem:[#allocation14 + $0x1ac0] sm:$0xff] }
 0x6a1   :  { %v13305_v54 = vcombine.low %v9384_v44, %v9388_v50  ;;  %v9432_v50 = vld [vmem:[#allocation14 + $0x1ac8] sm:$0xff] }
 0x6a2   :  { %9296 = vmatpush1.bf16.msra.mxu0 %v13253_v51  ;;  %v9391_v51 = vld [vmem:[#allocation14 + $0x1980] sm:$0xff] }
 0x6a3   :  { %9297 = vmatprep.subr.bf16.mxu0 %v13262_v58  ;;  %9257 = vmatpush1.bf16.msra.mxu1 %v13259_v1  ;;  %v9396_v58 = vld [vmem:[#allocation14 + $0x19a8] sm:$0xff]  ;;  %v13312_v1 = vcombine.high %v9391_v51, %v9395_v7 }
 0x6a4   :  { %10111 = vmatprep.subr.bf16.mxu1 %v13264_v43  ;;  %v9399_v43 = vld [vmem:[#allocation14 + $0x19c0] sm:$0xff]  ;;  %v13314_v10 = vcombine.high %v9392_v17, %v9396_v58 }
 0x6a6   :  { %9298 = vmatpush1.bf16.msra.mxu0 %v13261_v40  ;;  %9259 = vmatmul.mubr.bf16.vlgmr.msra.gmra.mrb[76].mxu1 %v16429_v20 }
 0x6a7   :  { %10152 = vmatprep.subr.bf16.mxu0 %v13266_v38  ;;  %10112 = vmatpush1.bf16.msra.mxu1 %v13263_v24  ;;  %v13311_v38 = vcombine.low %v9391_v51, %v9395_v7  ;;  %v9400_v24 = vld [vmem:[#allocation14 + $0x19c8] sm:$0xff]  ;;  %v9439_v7 = vld [vmem:[#allocation14 + $0x1b00] sm:$0xff] }
 0x6a8   :  { %10143 = vmatprep.mubr.bf16.mxu1 %v16447_v35  ;;  %10113 = vmatprep.subr.bf16.mxu1 %v13272_v37  ;;  %v13322_v59 = vcombine.high %v9400_v24, %v9404_v2  ;;  %v13321_v14 = vcombine.low %v9400_v24, %v9404_v2  ;;  %v9455_v2 = vld [vmem:[#allocation14 + $0x1b80] sm:$0xff] }
 0x6a9   :  { %9300 = vmatmul.mubr.bf16.vlgmr.msra.gmra.mrb[108].mxu0 %v16429_v20  ;;  %v9379_v20 = vld [vmem:[#allocation14 + $0x1920] sm:$0xff] }
 0x6aa   :  { %10153 = vmatpush1.bf16.msra.mxu0 %v13265_v33  ;;  %10184 = vmatprep.mubr.bf16.mxu0 %v16447_v35  ;;  %v13296_v6 = vcombine.high %v9375_v5, %v9379_v20  ;;  %v13295_v12 = vcombine.low %v9375_v5, %v9379_v20  ;;  %v9423_v20 = vld [vmem:[#allocation14 + $0x1a80] sm:$0xff] }
 0x6ab   :  { %10154 = vmatprep.subr.bf16.mxu0 %v13274_v61  ;;  %10114 = vmatpush1.bf16.msra.mxu1 %v13271_v36  ;;  %v13313_v61 = vcombine.low %v9392_v17, %v9396_v58  ;;  %v9411_v36 = vld [vmem:[#allocation14 + $0x1a20] sm:$0xff]  ;;  %v9440_v58 = vld [vmem:[#allocation14 + $0x1b08] sm:$0xff] }
 0x6ac   :  { %10115 = vmatprep.subr.bf16.mxu1 %v13280_v28  ;;  %v13319_v28 = vcombine.low %v9399_v43, %v9403_v55 }
 0x6ae   :  { %10155 = vmatpush1.bf16.msra.mxu0 %v13273_v19  ;;  %v9408_v19 = vld [vmem:[#allocation14 + $0x1a08] sm:$0xff] }
 0x6af   :  { %10156 = vmatprep.subr.bf16.mxu0 %v13282_v60  ;;  %10116 = vmatpush1.bf16.msra.mxu1 %v13279_v15  ;;  %v9415_v60 = vld [vmem:[#allocation14 + $0x1a40] sm:$0xff] }
 0x6b0   :  { %10117 = vmatprep.subr.bf16.mxu1 %v13288_v3  ;;  %v9419_v15 = vld [vmem:[#allocation14 + $0x1a60] sm:$0xff]  ;;  %v9420_v3 = vld [vmem:[#allocation14 + $0x1a68] sm:$0xff] }
 0x6b1   :  { %v13335_v8 = vcombine.low %v9415_v60, %v9419_v15  ;;  %v13337_v46 = vcombine.low %v9416_v16, %v9420_v3 }
 0x6b2   :  { %10157 = vmatpush1.bf16.msra.mxu0 %v13281_v48  ;;  %v13336_v48 = vcombine.high %v9415_v60, %v9419_v15  ;;  %v9468_v60 = vld [vmem:[#allocation14 + $0x1be8] sm:$0xff] }
 0x6b3   :  { %10158 = vmatprep.subr.bf16.mxu0 %v13290_v21  ;;  %10118 = vmatpush1.bf16.msra.mxu1 %v13287_v22  ;;  %v9427_v21 = vld [vmem:[#allocation14 + $0x1aa0] sm:$0xff]  ;;  %v13338_v22 = vcombine.high %v9416_v16, %v9420_v3  ;;  %v9345_v3 = vld [vmem:[#allocation14 + $0x1810] sm:$0xff] }
 0x6b4   :  { %10119 = vmatprep.subr.bf16.mxu1 %v13296_v6  ;;  %v9428_v6 = vld [vmem:[#allocation14 + $0x1aa8] sm:$0xff]  ;;  %v13343_v44 = vcombine.low %v9423_v20, %v9427_v21 }
 0x6b5   :  { %v13345_v51 = vcombine.low %v9424_v25, %v9428_v6 }
 0x6b6   :  { %10159 = vmatpush1.bf16.msra.mxu0 %v13289_v9  ;;  %v13344_v9 = vcombine.high %v9423_v20, %v9427_v21  ;;  %v9316_v20 = vld [vmem:[#allocation3 + $0xc0] sm:$0xf] }
 0x6b7   :  { %10160 = vmatprep.subr.bf16.mxu0 %v13298_v62  ;;  %10120 = vmatpush1.bf16.msra.mxu1 %v13295_v12  ;;  %v9435_v62 = vld [vmem:[#allocation14 + $0x1ae0] sm:$0xff]  ;;  %v13346_v12 = vcombine.high %v9424_v25, %v9428_v6  ;;  %v9350_v25 = vld [vmem:[#allocation14 + $0x1838] sm:$0xff] }
 0x6b8   :  { %10121 = vmatprep.subr.bf16.mxu1 %v13304_v52  ;;  %v9436_v52 = vld [vmem:[#allocation14 + $0x1ae8] sm:$0xff]  ;;  %v13351_v17 = vcombine.low %v9431_v47, %v9435_v62 }
 0x6b9   :  { %v8211_v27 = vpop.f32.mrb[64].mxu1 }
 0x6ba   :  { %10161 = vmatpush1.bf16.msra.mxu0 %v13297_v23  ;;  %v16454_v56 = vadd.f32 %v8211_v27, %v16418_v63  ;;  %v8213_v40 = vpop.f32.mrb[65].mxu1  ;;  %v13320_v63 = vcombine.high %v9399_v43, %v9403_v55  ;;  %v13352_v23 = vcombine.high %v9431_v47, %v9435_v62  ;;  %v9447_v43 = vld [vmem:[#allocation14 + $0x1b40] sm:$0xff]  ;;  %v9353_v62 = vld [vmem:[#allocation14 + $0x1850] sm:$0xff] }
 0x6bb   :  { %10162 = vmatprep.subr.bf16.mxu0 %v13306_v53  ;;  %v16457_v32 = vadd.f32 %v8213_v40, %v16421_v42  ;;  %v8215_v34 = vpop.f32.mrb[66].mxu1  ;;  %10122 = vmatpush1.bf16.msra.mxu1 %v13303_v18  ;;  %v9407_v42 = vld [vmem:[#allocation14 + $0x1a00] sm:$0xff]  ;;  %v13354_v18 = vcombine.high %v9432_v50, %v9436_v52 }
 0x6bc   :  { %v8252_v26 = vpop.f32.mrb[96].mxu0  ;;  %v8216_v33 = vpop.f32.mrb[67].mxu1  ;;  %10123 = vmatprep.subr.bf16.mxu1 %v13312_v1  ;;  %v13328_v30 = vcombine.high %v9407_v42, %v9411_v36  ;;  %v13327_v41 = vcombine.low %v9407_v42, %v9411_v36  ;;  %v9443_v53 = vld [vmem:[#allocation14 + $0x1b20] sm:$0xff]  ;;  %v9444_v1 = vld [vmem:[#allocation14 + $0x1b28] sm:$0xff] }
 0x6bd   :  { %v16460_v0 = vadd.f32 %v8252_v26, %v16424_v57  ;;  %v8254_v37 = vpop.f32.mrb[97].mxu0  ;;  %v9412_v57 = vld [vmem:[#allocation14 + $0x1a28] sm:$0xff]  ;;  %v13360_v27 = vcombine.high %v9439_v7, %v9443_v53  ;;  %v9451_v55 = vld [vmem:[#allocation14 + $0x1b60] sm:$0xff]  ;;  %v13362_v40 = vcombine.high %v9440_v58, %v9444_v1  ;;  %v13361_v24 = vcombine.low %v9440_v58, %v9444_v1 }
 0x6be   :  { %v16463_v13 = vadd.f32 %v8254_v37, %v16427_v4  ;;  %v8256_v31 = vpop.f32.mrb[98].mxu0  ;;  %10163 = vmatpush1.bf16.msra.mxu0 %v13305_v54  ;;  %v13330_v4 = vcombine.high %v9408_v19, %v9412_v57  ;;  %v13329_v5 = vcombine.low %v9408_v19, %v9412_v57  ;;  %v13353_v54 = vcombine.low %v9432_v50, %v9436_v52  ;;  %v9448_v26 = vld [vmem:[#allocation14 + $0x1b48] sm:$0xff]  ;;  %v9459_v37 = vld [vmem:[#allocation14 + $0x1ba0] sm:$0xff]  ;;  %v9322_v19 = vld [vmem:[#allocation3 + $0xd0] sm:$0xf0] }
 0x6bf   :  { %v8257_v11 = vpop.f32.mrb[99].mxu0  ;;  %10164 = vmatprep.subr.bf16.mxu0 %v13314_v10  ;;  %10124 = vmatpush1.bf16.msra.mxu1 %v13311_v38  ;;  %v13359_v10 = vcombine.low %v9439_v7, %v9443_v53  ;;  %v9452_v34 = vld [vmem:[#allocation14 + $0x1b68] sm:$0xff]  ;;  %v13368_v38 = vcombine.high %v9447_v43, %v9451_v55  ;;  %v13376_v42 = vcombine.high %v9455_v2, %v9459_v37  ;;  %v9354_v52 = vld [vmem:[#allocation14 + $0x1858] sm:$0xff] }
 0x6c0   :  { %10125 = vmatprep.subr.bf16.mxu1 %v13320_v63  ;;  %v13370_v33 = vcombine.high %v9448_v26, %v9452_v34  ;;  %v13367_v63 = vcombine.low %v9447_v43, %v9451_v55  ;;  %v9456_v31 = vld [vmem:[#allocation14 + $0x1b88] sm:$0xff]  ;;  %v13369_v11 = vcombine.low %v9448_v26, %v9452_v34 }
 0x6c1   :  { %v9320_v36 = vld [vmem:[#allocation3 + $0xc0] sm:$0xf0] }
 0x6c2   :  { %10165 = vmatpush1.bf16.msra.mxu0 %v13313_v61  ;;  %v9460_v61 = vld [vmem:[#allocation14 + $0x1ba8] sm:$0xff] }
 0x6c3   :  { %10166 = vmatprep.subr.bf16.mxu0 %v13322_v59  ;;  %10126 = vmatpush1.bf16.msra.mxu1 %v13319_v28  ;;  %v9463_v59 = vld [vmem:[#allocation14 + $0x1bc0] sm:$0xff]  ;;  %v13378_v57 = vcombine.high %v9456_v31, %v9460_v61  ;;  %v13377_v16 = vcombine.low %v9456_v31, %v9460_v61 }
 0x6c4   :  { %10127 = vmatprep.subr.bf16.mxu1 %v13328_v30  ;;  %v9467_v28 = vld [vmem:[#allocation14 + $0x1be0] sm:$0xff]  ;;  %v13375_v30 = vcombine.low %v9455_v2, %v9459_v37 }
 0x6c5   :  { %v13384_v15 = vcombine.high %v9463_v59, %v9467_v28  ;;  %v13383_v21 = vcombine.low %v9463_v59, %v9467_v28  ;;  %v9385_v59 = vld [vmem:[#allocation14 + $0x1950] sm:$0xff] }
 0x6c6   :  { %10167 = vmatpush1.bf16.msra.mxu0 %v13321_v14  ;;  %v9464_v14 = vld [vmem:[#allocation14 + $0x1bc8] sm:$0xff]  ;;  %v9389_v28 = vld [vmem:[#allocation14 + $0x1970] sm:$0xff] }
 0x6c7   :  { %10168 = vmatprep.subr.bf16.mxu0 %v13330_v4  ;;  %10128 = vmatpush1.bf16.msra.mxu1 %v13327_v41  ;;  %v9328_v4 = vrot.slane %v9320_v36, 4  ;;  %v9330_v41 = vrot.slane %v9322_v19, 4  ;;  %v13385_v47 = vcombine.low %v9464_v14, %v9468_v60 }
 0x6c8   :  { %10129 = vmatprep.subr.bf16.mxu1 %v13336_v48  ;;  %v9349_v48 = vld [vmem:[#allocation14 + $0x1830] sm:$0xff] }
 0x6c9   :  { %v9336_v6 = vmax.bf16 %v9328_v4, %v9316_v20  ;;  %v13267_v50 = vcombine.low %v9345_v3, %v9349_v48  ;;  %v9393_v4 = vld [vmem:[#allocation14 + $0x1990] sm:$0xff] }
 0x6ca   :  { %10169 = vmatpush1.bf16.msra.mxu0 %v13329_v5  ;;  %v13386_v5 = vcombine.high %v9464_v14, %v9468_v60  ;;  %v9390_v14 = vld [vmem:[#allocation14 + $0x1978] sm:$0xff]  ;;  %v13308_v60 = vcombine.high %v9385_v59, %v9389_v28 }
 0x6cb   :  { %10170 = vmatprep.subr.bf16.mxu0 %v13338_v22  ;;  %10130 = vmatpush1.bf16.msra.mxu1 %v13335_v8  ;;  %v9318_v22 = vld [vmem:[#allocation3 + $0xd0] sm:$0xf]  ;;  %v9346_v8 = vld [vmem:[#allocation14 + $0x1818] sm:$0xff] }
 0x6cc   :  { %10131 = vmatprep.subr.bf16.mxu1 %v13344_v9  ;;  %v9338_v9 = vmax.bf16 %v9330_v41, %v9318_v22  ;;  %v13269_v53 = vcombine.low %v9346_v8, %v9350_v25  ;;  %v9397_v41 = vld [vmem:[#allocation14 + $0x19b0] sm:$0xff] }
 0x6cd   :  { %v13316_v20 = vcombine.high %v9393_v4, %v9397_v41 }
 0x6ce   :  { %10171 = vmatpush1.bf16.msra.mxu0 %v13337_v46  ;;  %v13268_v46 = vcombine.high %v9345_v3, %v9349_v48  ;;  %v13307_v3 = vcombine.low %v9385_v59, %v9389_v28  ;;  %v9394_v48 = vld [vmem:[#allocation14 + $0x1998] sm:$0xff]  ;;  %v9433_v28 = vld [vmem:[#allocation14 + $0x1ad0] sm:$0xff] }
 0x6cf   :  { %10172 = vmatprep.subr.bf16.mxu0 %v13346_v12  ;;  %10132 = vmatpush1.bf16.msra.mxu1 %v13343_v44  ;;  %v9357_v12 = vld [vmem:[#allocation14 + $0x1870] sm:$0xff]  ;;  %v13270_v44 = vcombine.high %v9346_v8, %v9350_v25 }
 0x6d0   :  { %10133 = vmatprep.subr.bf16.mxu1 %v13352_v23  ;;  %v9358_v23 = vld [vmem:[#allocation14 + $0x1878] sm:$0xff]  ;;  %v13276_v7 = vcombine.high %v9353_v62, %v9357_v12  ;;  %v13275_v1 = vcombine.low %v9353_v62, %v9357_v12  ;;  %v9401_v8 = vld [vmem:[#allocation14 + $0x19d0] sm:$0xff] }
 0x6d1   :  { %v13278_v58 = vcombine.high %v9354_v52, %v9358_v23  ;;  %v13277_v55 = vcombine.low %v9354_v52, %v9358_v23  ;;  %v9405_v25 = vld [vmem:[#allocation14 + $0x19f0] sm:$0xff]  ;;  %v9406_v52 = vld [vmem:[#allocation14 + $0x19f8] sm:$0xff] }
 0x6d2   :  { %10173 = vmatpush1.bf16.msra.mxu0 %v13345_v51  ;;  %v16465_v51 = vmax.bf16 %v9338_v9, %v9336_v6 }
 0x6d3   :  { %10174 = vmatprep.subr.bf16.mxu0 %v13354_v18  ;;  %10134 = vmatpush1.bf16.msra.mxu1 %v13351_v17  ;;  %v9361_v18 = vld [vmem:[#allocation14 + $0x1890] sm:$0xff] }
 0x6d4   :  { %10135 = vmatprep.subr.bf16.mxu1 %v13360_v27  ;;  %v9365_v17 = vld [vmem:[#allocation14 + $0x18b0] sm:$0xff]  ;;  %v9362_v27 = vld [vmem:[#allocation14 + $0x1898] sm:$0xff] }
 0x6d5   :  { %v13284_v43 = vcombine.high %v9361_v18, %v9365_v17  ;;  %v13283_v34 = vcombine.low %v9361_v18, %v9365_v17 }
 0x6d6   :  { %10175 = vmatpush1.bf16.msra.mxu0 %v13353_v54  ;;  %v9366_v54 = vld [vmem:[#allocation14 + $0x18b8] sm:$0xff] }
 0x6d7   :  { %10176 = vmatprep.subr.bf16.mxu0 %v13362_v40  ;;  %10136 = vmatpush1.bf16.msra.mxu1 %v13359_v10  ;;  %v9369_v40 = vld [vmem:[#allocation14 + $0x18d0] sm:$0xff]  ;;  %v13286_v26 = vcombine.high %v9362_v27, %v9366_v54  ;;  %v13285_v37 = vcombine.low %v9362_v27, %v9366_v54 }
 0x6d8   :  { %10137 = vmatprep.subr.bf16.mxu1 %v13368_v38  ;;  %v9373_v10 = vld [vmem:[#allocation14 + $0x18f0] sm:$0xff]  ;;  %v9370_v38 = vld [vmem:[#allocation14 + $0x18d8] sm:$0xff] }
 0x6d9   :  { %v13292_v2 = vcombine.high %v9369_v40, %v9373_v10  ;;  %v13291_v61 = vcombine.low %v9369_v40, %v9373_v10 }
 0x6da   :  { %10177 = vmatpush1.bf16.msra.mxu0 %v13361_v24  ;;  %v9374_v24 = vld [vmem:[#allocation14 + $0x18f8] sm:$0xff] }
 0x6db   :  { %10178 = vmatprep.subr.bf16.mxu0 %v13370_v33  ;;  %10138 = vmatpush1.bf16.msra.mxu1 %v13367_v63  ;;  %v9377_v33 = vld [vmem:[#allocation14 + $0x1910] sm:$0xff]  ;;  %v13294_v31 = vcombine.high %v9370_v38, %v9374_v24 }
 0x6dc   :  { %10139 = vmatprep.subr.bf16.mxu1 %v13376_v42  ;;  %v9381_v63 = vld [vmem:[#allocation14 + $0x1930] sm:$0xff]  ;;  %v9382_v42 = vld [vmem:[#allocation14 + $0x1938] sm:$0xff] }
 0x6dd   :  { %v13300_v36 = vcombine.high %v9377_v33, %v9381_v63 }
 0x6de   :  { %10179 = vmatpush1.bf16.msra.mxu0 %v13369_v11  ;;  %v13293_v11 = vcombine.low %v9370_v38, %v9374_v24  ;;  %v9418_v24 = vld [vmem:[#allocation14 + $0x1a58] sm:$0xff] }
 0x6df   :  { %10180 = vmatprep.subr.bf16.mxu0 %v13378_v57  ;;  %10140 = vmatpush1.bf16.msra.mxu1 %v13375_v30  ;;  %v13299_v57 = vcombine.low %v9377_v33, %v9381_v63  ;;  %v9386_v30 = vld [vmem:[#allocation14 + $0x1958] sm:$0xff]  ;;  %v9425_v63 = vld [vmem:[#allocation14 + $0x1a90] sm:$0xff] }
 0x6e0   :  { %10141 = vmatprep.subr.bf16.mxu1 %v13384_v15  ;;  %v13309_v22 = vcombine.low %v9386_v30, %v9390_v14 }
 0x6e2   :  { %10181 = vmatpush1.bf16.msra.mxu0 %v13377_v16  ;;  %v13310_v16 = vcombine.high %v9386_v30, %v9390_v14  ;;  %v9434_v14 = vld [vmem:[#allocation14 + $0x1ad8] sm:$0xff] }
 0x6e3   :  { %10182 = vmatprep.subr.bf16.mxu0 %v13386_v5  ;;  %10142 = vmatpush1.bf16.msra.mxu1 %v13383_v21  ;;  %v9398_v5 = vld [vmem:[#allocation14 + $0x19b8] sm:$0xff] }
 0x6e4   :  { %10193 = vmatprep.subr.bf16.mxu1 %v13268_v46  ;;  %v13318_v46 = vcombine.high %v9394_v48, %v9398_v5 }
 0x6e6   :  { %10183 = vmatpush1.bf16.msra.mxu0 %v13385_v47  ;;  %10144 = vmatmul.mubr.bf16.vlgmr.msra.gmra.mrb[80].mxu1 %v16465_v51 }
 0x6e7   :  { %10234 = vmatprep.subr.bf16.mxu0 %v13270_v44  ;;  %10194 = vmatpush1.bf16.msra.mxu1 %v13267_v50  ;;  %v13315_v44 = vcombine.low %v9393_v4, %v9397_v41  ;;  %v9402_v50 = vld [vmem:[#allocation14 + $0x19d8] sm:$0xff]  ;;  %v9441_v41 = vld [vmem:[#allocation14 + $0x1b10] sm:$0xff] }
 0x6e8   :  { %10225 = vmatprep.mubr.bf16.mxu1 %v16447_v35  ;;  %10195 = vmatprep.subr.bf16.mxu1 %v13276_v7  ;;  %v13326_v54 = vcombine.high %v9402_v50, %v9406_v52  ;;  %v13325_v10 = vcombine.low %v9402_v50, %v9406_v52  ;;  %v9457_v52 = vld [vmem:[#allocation14 + $0x1b90] sm:$0xff] }
 0x6e9   :  { %10185 = vmatmul.mubr.bf16.vlgmr.msra.gmra.mrb[112].mxu0 %v16465_v51 }
 0x6ea   :  { %10235 = vmatpush1.bf16.msra.mxu0 %v13269_v53  ;;  %10266 = vmatprep.mubr.bf16.mxu0 %v16447_v35  ;;  %v9378_v35 = vld [vmem:[#allocation14 + $0x1918] sm:$0xff] }
 0x6eb   :  { %10236 = vmatprep.subr.bf16.mxu0 %v13278_v58  ;;  %10196 = vmatpush1.bf16.msra.mxu1 %v13275_v1  ;;  %v13302_v19 = vcombine.high %v9378_v35, %v9382_v42  ;;  %v13301_v15 = vcombine.low %v9378_v35, %v9382_v42  ;;  %v13317_v58 = vcombine.low %v9394_v48, %v9398_v5  ;;  %v9413_v1 = vld [vmem:[#allocation14 + $0x1a30] sm:$0xff]  ;;  %v9426_v42 = vld [vmem:[#allocation14 + $0x1a98] sm:$0xff] }
 0x6ec   :  { %10197 = vmatprep.subr.bf16.mxu1 %v13284_v43  ;;  %v13323_v43 = vcombine.low %v9401_v8, %v9405_v25  ;;  %v9442_v5 = vld [vmem:[#allocation14 + $0x1b18] sm:$0xff] }
 0x6ee   :  { %10237 = vmatpush1.bf16.msra.mxu0 %v13277_v55  ;;  %v9410_v55 = vld [vmem:[#allocation14 + $0x1a18] sm:$0xff] }
 0x6ef   :  { %10238 = vmatprep.subr.bf16.mxu0 %v13286_v26  ;;  %10198 = vmatpush1.bf16.msra.mxu1 %v13283_v34  ;;  %v9417_v26 = vld [vmem:[#allocation14 + $0x1a50] sm:$0xff] }
 0x6f0   :  { %10199 = vmatprep.subr.bf16.mxu1 %v13292_v2  ;;  %v9421_v34 = vld [vmem:[#allocation14 + $0x1a70] sm:$0xff]  ;;  %v9422_v2 = vld [vmem:[#allocation14 + $0x1a78] sm:$0xff] }
 0x6f1   :  { %v13339_v35 = vcombine.low %v9417_v26, %v9421_v34  ;;  %v13341_v59 = vcombine.low %v9418_v24, %v9422_v2 }
 0x6f2   :  { %10239 = vmatpush1.bf16.msra.mxu0 %v13285_v37  ;;  %v13340_v37 = vcombine.high %v9417_v26, %v9421_v34  ;;  %v9470_v26 = vld [vmem:[#allocation14 + $0x1bf8] sm:$0xff] }
 0x6f3   :  { %10240 = vmatprep.subr.bf16.mxu0 %v13294_v31  ;;  %10200 = vmatpush1.bf16.msra.mxu1 %v13291_v61  ;;  %v9429_v31 = vld [vmem:[#allocation14 + $0x1ab0] sm:$0xff]  ;;  %v13342_v61 = vcombine.high %v9418_v24, %v9422_v2  ;;  %v10314_v24 = vld [vmem:[#allocation14 + $0x1c20] sm:$0xff] }
 0x6f4   :  { %10201 = vmatprep.subr.bf16.mxu1 %v13300_v36  ;;  %v9430_v36 = vld [vmem:[#allocation14 + $0x1ab8] sm:$0xff]  ;;  %v13347_v30 = vcombine.low %v9425_v63, %v9429_v31 }
 0x6f5   :  { %v13349_v4 = vcombine.low %v9426_v42, %v9430_v36 }
 0x6f6   :  { %10241 = vmatpush1.bf16.msra.mxu0 %v13293_v11  ;;  %v13348_v11 = vcombine.high %v9425_v63, %v9429_v31  ;;  %v10311_v31 = vld [vmem:[#allocation14 + $0x1c08] sm:$0xff] }
 0x6f7   :  { %10242 = vmatprep.subr.bf16.mxu0 %v13302_v19  ;;  %10202 = vmatpush1.bf16.msra.mxu1 %v13299_v57  ;;  %v9437_v19 = vld [vmem:[#allocation14 + $0x1af0] sm:$0xff]  ;;  %v13350_v57 = vcombine.high %v9426_v42, %v9430_v36  ;;  %v10284_v42 = vld [vmem:[#allocation3 + $0xe8] sm:$0xf]  ;;  %v10286_v36 = vld [vmem:[#allocation3 + $0xf8] sm:$0xf] }
 0x6f8   :  { %10203 = vmatprep.subr.bf16.mxu1 %v13308_v60  ;;  %v9438_v60 = vld [vmem:[#allocation14 + $0x1af8] sm:$0xff]  ;;  %v13355_v48 = vcombine.low %v9433_v28, %v9437_v19 }
 0x6f9   :  { %v8293_v21 = vpop.f32.mrb[68].mxu1 }
 0x6fa   :  { %10243 = vmatpush1.bf16.msra.mxu0 %v13301_v15  ;;  %v16472_v6 = vadd.f32 %v8293_v21, %v16436_v29  ;;  %v8295_v9 = vpop.f32.mrb[69].mxu1  ;;  %v13324_v29 = vcombine.high %v9401_v8, %v9405_v25  ;;  %v13356_v15 = vcombine.high %v9433_v28, %v9437_v19  ;;  %v9449_v8 = vld [vmem:[#allocation14 + $0x1b50] sm:$0xff]  ;;  %v10318_v19 = vld [vmem:[#allocation14 + $0x1c40] sm:$0xff] }
 0x6fb   :  { %10244 = vmatprep.subr.bf16.mxu0 %v13310_v16  ;;  %v16475_v62 = vadd.f32 %v8295_v9, %v16439_v45  ;;  %v8297_v12 = vpop.f32.mrb[70].mxu1  ;;  %10204 = vmatpush1.bf16.msra.mxu1 %v13307_v3  ;;  %v9409_v45 = vld [vmem:[#allocation14 + $0x1a10] sm:$0xff]  ;;  %v13358_v3 = vcombine.high %v9434_v14, %v9438_v60 }
 0x6fc   :  { %v8334_v47 = vpop.f32.mrb[100].mxu0  ;;  %v8298_v53 = vpop.f32.mrb[71].mxu1  ;;  %10205 = vmatprep.subr.bf16.mxu1 %v13316_v20  ;;  %v13332_v40 = vcombine.high %v9409_v45, %v9413_v1  ;;  %v13331_v38 = vcombine.low %v9409_v45, %v9413_v1  ;;  %v9445_v16 = vld [vmem:[#allocation14 + $0x1b30] sm:$0xff]  ;;  %v9446_v20 = vld [vmem:[#allocation14 + $0x1b38] sm:$0xff] }
 0x6fd   :  { %v16478_v23 = vadd.f32 %v8334_v47, %v16442_v39  ;;  %v8336_v7 = vpop.f32.mrb[101].mxu0  ;;  %v9414_v39 = vld [vmem:[#allocation14 + $0x1a38] sm:$0xff]  ;;  %v13364_v21 = vcombine.high %v9441_v41, %v9445_v16  ;;  %v9453_v25 = vld [vmem:[#allocation14 + $0x1b70] sm:$0xff]  ;;  %v13366_v9 = vcombine.high %v9442_v5, %v9446_v20  ;;  %v13365_v50 = vcombine.low %v9442_v5, %v9446_v20 }
 0x6fe   :  { %v16481_v18 = vadd.f32 %v8336_v7, %v16445_v49  ;;  %v8338_v17 = vpop.f32.mrb[102].mxu0  ;;  %10245 = vmatpush1.bf16.msra.mxu0 %v13309_v22  ;;  %v13334_v49 = vcombine.high %v9410_v55, %v9414_v39  ;;  %v13333_v33 = vcombine.low %v9410_v55, %v9414_v39  ;;  %v13357_v22 = vcombine.low %v9434_v14, %v9438_v60  ;;  %v9450_v47 = vld [vmem:[#allocation14 + $0x1b58] sm:$0xff]  ;;  %v9461_v7 = vld [vmem:[#allocation14 + $0x1bb0] sm:$0xff]  ;;  %v10290_v39 = vld [vmem:[#allocation3 + $0xf8] sm:$0xf0] }
 0x6ff   :  { %v8339_v27 = vpop.f32.mrb[103].mxu0  ;;  %10246 = vmatprep.subr.bf16.mxu0 %v13318_v46  ;;  %10206 = vmatpush1.bf16.msra.mxu1 %v13315_v44  ;;  %v13363_v46 = vcombine.low %v9441_v41, %v9445_v16  ;;  %v9454_v12 = vld [vmem:[#allocation14 + $0x1b78] sm:$0xff]  ;;  %v13372_v44 = vcombine.high %v9449_v8, %v9453_v25  ;;  %v13380_v45 = vcombine.high %v9457_v52, %v9461_v7  ;;  %v10288_v55 = vld [vmem:[#allocation3 + $0xe8] sm:$0xf0]  ;;  %v10319_v60 = vld [vmem:[#allocation14 + $0x1c48] sm:$0xff] }
 0x700   :  { %10207 = vmatprep.subr.bf16.mxu1 %v13324_v29  ;;  %v13374_v53 = vcombine.high %v9450_v47, %v9454_v12  ;;  %v13371_v29 = vcombine.low %v9449_v8, %v9453_v25  ;;  %v9458_v17 = vld [vmem:[#allocation14 + $0x1b98] sm:$0xff]  ;;  %v13373_v1 = vcombine.low %v9450_v47, %v9454_v12  ;;  %v9465_v27 = vld [vmem:[#allocation14 + $0x1bd0] sm:$0xff]  ;;  %v10296_v2 = vrot.slane %v10288_v55, 4 }
 0x702   :  { %10247 = vmatpush1.bf16.msra.mxu0 %v13317_v58  ;;  %v9462_v58 = vld [vmem:[#allocation14 + $0x1bb8] sm:$0xff] }
 0x703   :  { %10248 = vmatprep.subr.bf16.mxu0 %v13326_v54  ;;  %10208 = vmatpush1.bf16.msra.mxu1 %v13323_v43  ;;  %v9469_v54 = vld [vmem:[#allocation14 + $0x1bf0] sm:$0xff]  ;;  %v13382_v43 = vcombine.high %v9458_v17, %v9462_v58 }
 0x704   :  { %10209 = vmatprep.subr.bf16.mxu1 %v13332_v40  ;;  %v13379_v40 = vcombine.low %v9457_v52, %v9461_v7  ;;  %v13388_v34 = vcombine.high %v9465_v27, %v9469_v54  ;;  %v13387_v63 = vcombine.low %v9465_v27, %v9469_v54  ;;  %v10350_v54 = vld [vmem:[#allocation14 + $0x1d40] sm:$0xff] }
 0x706   :  { %10249 = vmatpush1.bf16.msra.mxu0 %v13325_v10  ;;  %v9466_v10 = vld [vmem:[#allocation14 + $0x1bd8] sm:$0xff] }
 0x707   :  { %10250 = vmatprep.subr.bf16.mxu0 %v13334_v49  ;;  %10210 = vmatpush1.bf16.msra.mxu1 %v13331_v38  ;;  %v13381_v49 = vcombine.low %v9458_v17, %v9462_v58  ;;  %v10310_v38 = vld [vmem:[#allocation14 + $0x1c00] sm:$0xff]  ;;  %v10343_v58 = vld [vmem:[#allocation14 + $0x1d08] sm:$0xff] }
 0x708   :  { %10211 = vmatprep.subr.bf16.mxu1 %v13340_v37  ;;  %v10298_v37 = vrot.slane %v10290_v39, 4  ;;  %v13391_v14 = vcombine.low %v10310_v38, %v10314_v24 }
 0x70a   :  { %10251 = vmatpush1.bf16.msra.mxu0 %v13333_v33  ;;  %v13390_v33 = vcombine.high %v9466_v10, %v9470_v26  ;;  %v10306_v28 = vmax.bf16 %v10298_v37, %v10286_v36  ;;  %v10359_v37 = vld [vmem:[#allocation14 + $0x1d88] sm:$0xff] }
 0x70b   :  { %10252 = vmatprep.subr.bf16.mxu0 %v13342_v61  ;;  %10212 = vmatpush1.bf16.msra.mxu1 %v13339_v35  ;;  %v10315_v61 = vld [vmem:[#allocation14 + $0x1c28] sm:$0xff]  ;;  %v13392_v35 = vcombine.high %v10310_v38, %v10314_v24  ;;  %v10362_v38 = vld [vmem:[#allocation14 + $0x1da0] sm:$0xff] }
 0x70c   :  { %10213 = vmatprep.subr.bf16.mxu1 %v13348_v11  ;;  %v13389_v11 = vcombine.low %v9466_v10, %v9470_v26  ;;  %v13393_v41 = vcombine.low %v10311_v31, %v10315_v61  ;;  %v10355_v10 = vld [vmem:[#allocation14 + $0x1d68] sm:$0xff] }
 0x70e   :  { %10253 = vmatpush1.bf16.msra.mxu0 %v13341_v59  ;;  %v10304_v59 = vmax.bf16 %v10296_v2, %v10284_v42  ;;  %v10370_v42 = vld [vmem:[#allocation14 + $0x1de0] sm:$0xff] }
 0x70f   :  { %10254 = vmatprep.subr.bf16.mxu0 %v13350_v57  ;;  %10214 = vmatpush1.bf16.msra.mxu1 %v13347_v30  ;;  %v10322_v57 = vld [vmem:[#allocation14 + $0x1c60] sm:$0xff]  ;;  %v13394_v30 = vcombine.high %v10311_v31, %v10315_v61 }
 0x710   :  { %10215 = vmatprep.subr.bf16.mxu1 %v13356_v15  ;;  %v10323_v15 = vld [vmem:[#allocation14 + $0x1c68] sm:$0xff]  ;;  %v16483_v16 = vmax.bf16 %v10306_v28, %v10304_v59  ;;  %v13399_v20 = vcombine.low %v10318_v19, %v10322_v57 }
 0x711   :  { %v13402_v5 = vcombine.high %v10319_v60, %v10323_v15  ;;  %v13401_v25 = vcombine.low %v10319_v60, %v10323_v15  ;;  %v10371_v60 = vld [vmem:[#allocation14 + $0x1de8] sm:$0xff] }
 0x712   :  { %10255 = vmatpush1.bf16.msra.mxu0 %v13349_v4  ;;  %v13400_v4 = vcombine.high %v10318_v19, %v10322_v57 }
 0x713   :  { %10256 = vmatprep.subr.bf16.mxu0 %v13358_v3  ;;  %10216 = vmatpush1.bf16.msra.mxu1 %v13355_v48  ;;  %v10326_v3 = vld [vmem:[#allocation14 + $0x1c80] sm:$0xff] }
 0x714   :  { %10217 = vmatprep.subr.bf16.mxu1 %v13364_v21  ;;  %v10330_v48 = vld [vmem:[#allocation14 + $0x1ca0] sm:$0xff]  ;;  %v10327_v21 = vld [vmem:[#allocation14 + $0x1c88] sm:$0xff] }
 0x715   :  { %v13408_v8 = vcombine.high %v10326_v3, %v10330_v48  ;;  %v13407_v12 = vcombine.low %v10326_v3, %v10330_v48 }
 0x716   :  { %10257 = vmatpush1.bf16.msra.mxu0 %v13357_v22  ;;  %v10331_v22 = vld [vmem:[#allocation14 + $0x1ca8] sm:$0xff] }
 0x717   :  { %10258 = vmatprep.subr.bf16.mxu0 %v13366_v9  ;;  %10218 = vmatpush1.bf16.msra.mxu1 %v13363_v46  ;;  %v10334_v9 = vld [vmem:[#allocation14 + $0x1cc0] sm:$0xff]  ;;  %v13410_v47 = vcombine.high %v10327_v21, %v10331_v22  ;;  %v13409_v7 = vcombine.low %v10327_v21, %v10331_v22 }
 0x718   :  { %10219 = vmatprep.subr.bf16.mxu1 %v13372_v44  ;;  %v10338_v46 = vld [vmem:[#allocation14 + $0x1ce0] sm:$0xff]  ;;  %v10335_v44 = vld [vmem:[#allocation14 + $0x1cc8] sm:$0xff] }
 0x719   :  { %v13416_v52 = vcombine.high %v10334_v9, %v10338_v46  ;;  %v13415_v17 = vcombine.low %v10334_v9, %v10338_v46 }
 0x71a   :  { %10259 = vmatpush1.bf16.msra.mxu0 %v13365_v50  ;;  %v10339_v50 = vld [vmem:[#allocation14 + $0x1ce8] sm:$0xff] }
 0x71b   :  { %10260 = vmatprep.subr.bf16.mxu0 %v13374_v53  ;;  %10220 = vmatpush1.bf16.msra.mxu1 %v13371_v29  ;;  %v10342_v53 = vld [vmem:[#allocation14 + $0x1d00] sm:$0xff]  ;;  %v13418_v29 = vcombine.high %v10335_v44, %v10339_v50  ;;  %v13417_v27 = vcombine.low %v10335_v44, %v10339_v50  ;;  %v10383_v50 = vld [vmem:[#allocation14 + $0x1e48] sm:$0xff] }
 0x71c   :  { %10221 = vmatprep.subr.bf16.mxu1 %v13380_v45  ;;  %v10347_v45 = vld [vmem:[#allocation14 + $0x1d28] sm:$0xff] }
 0x71d   :  { %v13426_v55 = vcombine.high %v10343_v58, %v10347_v45 }
 0x71e   :  { %10261 = vmatpush1.bf16.msra.mxu0 %v13373_v1 }
 0x71f   :  { %10262 = vmatprep.subr.bf16.mxu0 %v13382_v43  ;;  %10222 = vmatpush1.bf16.msra.mxu1 %v13379_v40  ;;  %v10354_v43 = vld [vmem:[#allocation14 + $0x1d60] sm:$0xff]  ;;  %v10351_v40 = vld [vmem:[#allocation14 + $0x1d48] sm:$0xff] }
 0x720   :  { %10223 = vmatprep.subr.bf16.mxu1 %v13388_v34  ;;  %v13432_v26 = vcombine.high %v10350_v54, %v10354_v43  ;;  %v13425_v34 = vcombine.low %v10343_v58, %v10347_v45  ;;  %v13434_v24 = vcombine.high %v10351_v40, %v10355_v10  ;;  %v13431_v2 = vcombine.low %v10350_v54, %v10354_v43  ;;  %v10391_v45 = vld [vmem:[#allocation14 + $0x1e88] sm:$0xff]  ;;  %v10398_v43 = vld [vmem:[#allocation14 + $0x1ec0] sm:$0xff] }
 0x721   :  { %v13433_v61 = vcombine.low %v10351_v40, %v10355_v10  ;;  %v10399_v10 = vld [vmem:[#allocation14 + $0x1ec8] sm:$0xff] }
 0x722   :  { %10263 = vmatpush1.bf16.msra.mxu0 %v13381_v49  ;;  %v10358_v49 = vld [vmem:[#allocation14 + $0x1d80] sm:$0xff] }
 0x723   :  { %10264 = vmatprep.subr.bf16.mxu0 %v13390_v33  ;;  %10224 = vmatpush1.bf16.msra.mxu1 %v13387_v63  ;;  %v10363_v33 = vld [vmem:[#allocation14 + $0x1da8] sm:$0xff]  ;;  %v13440_v63 = vcombine.high %v10358_v49, %v10362_v38 }
 0x724   :  { %11078 = vmatprep.subr.bf16.mxu1 %v13392_v35  ;;  %v10366_v35 = vld [vmem:[#allocation14 + $0x1dc0] sm:$0xff]  ;;  %v13442_v59 = vcombine.high %v10359_v37, %v10363_v33 }
 0x726   :  { %10265 = vmatpush1.bf16.msra.mxu0 %v13389_v11  ;;  %10226 = vmatmul.mubr.bf16.vlgmr.msra.gmra.mrb[84].mxu1 %v16465_v51 }
 0x727   :  { %11119 = vmatprep.subr.bf16.mxu0 %v13394_v30  ;;  %11079 = vmatpush1.bf16.msra.mxu1 %v13391_v14  ;;  %v13439_v30 = vcombine.low %v10358_v49, %v10362_v38  ;;  %v10367_v14 = vld [vmem:[#allocation14 + $0x1dc8] sm:$0xff]  ;;  %v10406_v38 = vld [vmem:[#allocation14 + $0x1f00] sm:$0xff] }
 0x728   :  { %11110 = vmatprep.mubr.bf16.mxu1 %v16483_v16  ;;  %11080 = vmatprep.subr.bf16.mxu1 %v13400_v4  ;;  %v13450_v22 = vcombine.high %v10367_v14, %v10371_v60  ;;  %v13449_v46 = vcombine.low %v10367_v14, %v10371_v60  ;;  %v10422_v60 = vld [vmem:[#allocation14 + $0x1f80] sm:$0xff] }
 0x729   :  { %10267 = vmatmul.mubr.bf16.vlgmr.msra.gmra.mrb[116].mxu0 %v16465_v51  ;;  %v10346_v51 = vld [vmem:[#allocation14 + $0x1d20] sm:$0xff] }
 0x72a   :  { %11120 = vmatpush1.bf16.msra.mxu0 %v13393_v41  ;;  %11151 = vmatprep.mubr.bf16.mxu0 %v16483_v16  ;;  %v13424_v1 = vcombine.high %v10342_v53, %v10346_v51  ;;  %v13423_v39 = vcombine.low %v10342_v53, %v10346_v51  ;;  %v10390_v51 = vld [vmem:[#allocation14 + $0x1e80] sm:$0xff] }
 0x72b   :  { %11121 = vmatprep.subr.bf16.mxu0 %v13402_v5  ;;  %11081 = vmatpush1.bf16.msra.mxu1 %v13399_v20  ;;  %v13441_v5 = vcombine.low %v10359_v37, %v10363_v33  ;;  %v10378_v20 = vld [vmem:[#allocation14 + $0x1e20] sm:$0xff]  ;;  %v10407_v33 = vld [vmem:[#allocation14 + $0x1f08] sm:$0xff] }
 0x72c   :  { %11082 = vmatprep.subr.bf16.mxu1 %v13408_v8  ;;  %v13447_v8 = vcombine.low %v10366_v35, %v10370_v42 }
 0x72e   :  { %11122 = vmatpush1.bf16.msra.mxu0 %v13401_v25  ;;  %v10375_v25 = vld [vmem:[#allocation14 + $0x1e08] sm:$0xff] }
 0x72f   :  { %11123 = vmatprep.subr.bf16.mxu0 %v13410_v47  ;;  %11083 = vmatpush1.bf16.msra.mxu1 %v13407_v12  ;;  %v10382_v47 = vld [vmem:[#allocation14 + $0x1e40] sm:$0xff] }
 0x730   :  { %11084 = vmatprep.subr.bf16.mxu1 %v13416_v52  ;;  %v10386_v12 = vld [vmem:[#allocation14 + $0x1e60] sm:$0xff]  ;;  %v10387_v52 = vld [vmem:[#allocation14 + $0x1e68] sm:$0xff] }
 0x731   :  { %v13463_v58 = vcombine.low %v10382_v47, %v10386_v12  ;;  %v13465_v54 = vcombine.low %v10383_v50, %v10387_v52 }
 0x732   :  { %11124 = vmatpush1.bf16.msra.mxu0 %v13409_v7  ;;  %v13464_v7 = vcombine.high %v10382_v47, %v10386_v12  ;;  %v10435_v47 = vld [vmem:[#allocation14 + $0x1fe8] sm:$0xff] }
 0x733   :  { %11125 = vmatprep.subr.bf16.mxu0 %v13418_v29  ;;  %11085 = vmatpush1.bf16.msra.mxu1 %v13415_v17  ;;  %v10394_v29 = vld [vmem:[#allocation14 + $0x1ea0] sm:$0xff]  ;;  %v13466_v17 = vcombine.high %v10383_v50, %v10387_v52  ;;  %v10312_v52 = vld [vmem:[#allocation14 + $0x1c10] sm:$0xff] }
 0x734   :  { %11086 = vmatprep.subr.bf16.mxu1 %v13424_v1  ;;  %v10395_v1 = vld [vmem:[#allocation14 + $0x1ea8] sm:$0xff]  ;;  %v13471_v40 = vcombine.low %v10390_v51, %v10394_v29 }
 0x735   :  { %v13473_v49 = vcombine.low %v10391_v45, %v10395_v1 }
 0x736   :  { %11126 = vmatpush1.bf16.msra.mxu0 %v13417_v27  ;;  %v13472_v27 = vcombine.high %v10390_v51, %v10394_v29  ;;  %v10283_v51 = vld [vmem:[#allocation3 + $0xe0] sm:$0xf] }
 0x737   :  { %11127 = vmatprep.subr.bf16.mxu0 %v13426_v55  ;;  %11087 = vmatpush1.bf16.msra.mxu1 %v13423_v39  ;;  %v10402_v55 = vld [vmem:[#allocation14 + $0x1ee0] sm:$0xff]  ;;  %v13474_v39 = vcombine.high %v10391_v45, %v10395_v1  ;;  %v10317_v45 = vld [vmem:[#allocation14 + $0x1c38] sm:$0xff] }
 0x738   :  { %11088 = vmatprep.subr.bf16.mxu1 %v13432_v26  ;;  %v10403_v26 = vld [vmem:[#allocation14 + $0x1ee8] sm:$0xff]  ;;  %v13479_v37 = vcombine.low %v10398_v43, %v10402_v55 }
 0x739   :  { %v9178_v31 = vpop.f32.mrb[72].mxu1 }
 0x73a   :  { %11128 = vmatpush1.bf16.msra.mxu0 %v13425_v34  ;;  %v16490_v36 = vadd.f32 %v9178_v31, %v16454_v56  ;;  %v9180_v11 = vpop.f32.mrb[73].mxu1  ;;  %v13448_v56 = vcombine.high %v10366_v35, %v10370_v42  ;;  %v13480_v34 = vcombine.high %v10398_v43, %v10402_v55  ;;  %v10414_v35 = vld [vmem:[#allocation14 + $0x1f40] sm:$0xff]  ;;  %v10320_v55 = vld [vmem:[#allocation14 + $0x1c50] sm:$0xff] }
 0x73b   :  { %11129 = vmatprep.subr.bf16.mxu0 %v13434_v24  ;;  %v16493_v19 = vadd.f32 %v9180_v11, %v16457_v32  ;;  %v9182_v57 = vpop.f32.mrb[74].mxu1  ;;  %11089 = vmatpush1.bf16.msra.mxu1 %v13431_v2  ;;  %v10374_v32 = vld [vmem:[#allocation14 + $0x1e00] sm:$0xff]  ;;  %v13482_v2 = vcombine.high %v10399_v10, %v10403_v26 }
 0x73c   :  { %v9219_v28 = vpop.f32.mrb[104].mxu0  ;;  %v9183_v41 = vpop.f32.mrb[75].mxu1  ;;  %11090 = vmatprep.subr.bf16.mxu1 %v13440_v63  ;;  %v13456_v9 = vcombine.high %v10374_v32, %v10378_v20  ;;  %v13455_v44 = vcombine.low %v10374_v32, %v10378_v20  ;;  %v10410_v24 = vld [vmem:[#allocation14 + $0x1f20] sm:$0xff]  ;;  %v10411_v63 = vld [vmem:[#allocation14 + $0x1f28] sm:$0xff] }
 0x73d   :  { %v16496_v15 = vadd.f32 %v9219_v28, %v16460_v0  ;;  %v9221_v4 = vpop.f32.mrb[105].mxu0  ;;  %v10379_v0 = vld [vmem:[#allocation14 + $0x1e28] sm:$0xff]  ;;  %v13488_v31 = vcombine.high %v10406_v38, %v10410_v24  ;;  %v10418_v42 = vld [vmem:[#allocation14 + $0x1f60] sm:$0xff]  ;;  %v13490_v11 = vcombine.high %v10407_v33, %v10411_v63  ;;  %v13489_v14 = vcombine.low %v10407_v33, %v10411_v63 }
 0x73e   :  { %v16499_v3 = vadd.f32 %v9221_v4, %v16463_v13  ;;  %v9223_v48 = vpop.f32.mrb[106].mxu0  ;;  %11130 = vmatpush1.bf16.msra.mxu0 %v13433_v61  ;;  %v13458_v13 = vcombine.high %v10375_v25, %v10379_v0  ;;  %v13457_v53 = vcombine.low %v10375_v25, %v10379_v0  ;;  %v13481_v61 = vcombine.low %v10399_v10, %v10403_v26  ;;  %v10415_v28 = vld [vmem:[#allocation14 + $0x1f48] sm:$0xff]  ;;  %v10426_v4 = vld [vmem:[#allocation14 + $0x1fa0] sm:$0xff]  ;;  %v10289_v25 = vld [vmem:[#allocation3 + $0xf0] sm:$0xf0] }
 0x73f   :  { %v9224_v21 = vpop.f32.mrb[107].mxu0  ;;  %11131 = vmatprep.subr.bf16.mxu0 %v13442_v59  ;;  %11091 = vmatpush1.bf16.msra.mxu1 %v13439_v30  ;;  %v13487_v59 = vcombine.low %v10406_v38, %v10410_v24  ;;  %v10419_v57 = vld [vmem:[#allocation14 + $0x1f68] sm:$0xff]  ;;  %v13496_v30 = vcombine.high %v10414_v35, %v10418_v42  ;;  %v13504_v32 = vcombine.high %v10422_v60, %v10426_v4  ;;  %v10321_v26 = vld [vmem:[#allocation14 + $0x1c58] sm:$0xff] }
 0x740   :  { %11092 = vmatprep.subr.bf16.mxu1 %v13448_v56  ;;  %v13498_v41 = vcombine.high %v10415_v28, %v10419_v57  ;;  %v13495_v56 = vcombine.low %v10414_v35, %v10418_v42  ;;  %v10423_v48 = vld [vmem:[#allocation14 + $0x1f88] sm:$0xff]  ;;  %v13497_v21 = vcombine.low %v10415_v28, %v10419_v57 }
 0x741   :  { %v10287_v20 = vld [vmem:[#allocation3 + $0xe0] sm:$0xf0] }
 0x742   :  { %11132 = vmatpush1.bf16.msra.mxu0 %v13441_v5  ;;  %v10427_v5 = vld [vmem:[#allocation14 + $0x1fa8] sm:$0xff] }
 0x743   :  { %11133 = vmatprep.subr.bf16.mxu0 %v13450_v22  ;;  %11093 = vmatpush1.bf16.msra.mxu1 %v13447_v8  ;;  %v10430_v22 = vld [vmem:[#allocation14 + $0x1fc0] sm:$0xff]  ;;  %v13506_v0 = vcombine.high %v10423_v48, %v10427_v5  ;;  %v13505_v50 = vcombine.low %v10423_v48, %v10427_v5 }
 0x744   :  { %11094 = vmatprep.subr.bf16.mxu1 %v13456_v9  ;;  %v10434_v8 = vld [vmem:[#allocation14 + $0x1fe0] sm:$0xff]  ;;  %v13503_v9 = vcombine.low %v10422_v60, %v10426_v4 }
 0x745   :  { %v13512_v12 = vcombine.high %v10430_v22, %v10434_v8  ;;  %v13511_v29 = vcombine.low %v10430_v22, %v10434_v8  ;;  %v10352_v22 = vld [vmem:[#allocation14 + $0x1d50] sm:$0xff] }
 0x746   :  { %11134 = vmatpush1.bf16.msra.mxu0 %v13449_v46  ;;  %v10431_v46 = vld [vmem:[#allocation14 + $0x1fc8] sm:$0xff]  ;;  %v10356_v8 = vld [vmem:[#allocation14 + $0x1d70] sm:$0xff] }
 0x747   :  { %11135 = vmatprep.subr.bf16.mxu0 %v13458_v13  ;;  %11095 = vmatpush1.bf16.msra.mxu1 %v13455_v44  ;;  %v10295_v13 = vrot.slane %v10287_v20, 4  ;;  %v10297_v44 = vrot.slane %v10289_v25, 4  ;;  %v13513_v43 = vcombine.low %v10431_v46, %v10435_v47 }
 0x748   :  { %11096 = vmatprep.subr.bf16.mxu1 %v13464_v7  ;;  %v10316_v7 = vld [vmem:[#allocation14 + $0x1c30] sm:$0xff] }
 0x749   :  { %v10303_v1 = vmax.bf16 %v10295_v13, %v10283_v51  ;;  %v13395_v10 = vcombine.low %v10312_v52, %v10316_v7  ;;  %v10360_v13 = vld [vmem:[#allocation14 + $0x1d90] sm:$0xff] }
 0x74a   :  { %11136 = vmatpush1.bf16.msra.mxu0 %v13457_v53  ;;  %v13514_v53 = vcombine.high %v10431_v46, %v10435_v47  ;;  %v10357_v46 = vld [vmem:[#allocation14 + $0x1d78] sm:$0xff]  ;;  %v13436_v47 = vcombine.high %v10352_v22, %v10356_v8 }
 0x74b   :  { %11137 = vmatprep.subr.bf16.mxu0 %v13466_v17  ;;  %11097 = vmatpush1.bf16.msra.mxu1 %v13463_v58  ;;  %v10285_v17 = vld [vmem:[#allocation3 + $0xf0] sm:$0xf]  ;;  %v10313_v58 = vld [vmem:[#allocation14 + $0x1c18] sm:$0xff] }
 0x74c   :  { %11098 = vmatprep.subr.bf16.mxu1 %v13472_v27  ;;  %v10305_v27 = vmax.bf16 %v10297_v44, %v10285_v17  ;;  %v13397_v24 = vcombine.low %v10313_v58, %v10317_v45  ;;  %v10364_v44 = vld [vmem:[#allocation14 + $0x1db0] sm:$0xff] }
 0x74d   :  { %v13444_v51 = vcombine.high %v10360_v13, %v10364_v44 }
 0x74e   :  { %11138 = vmatpush1.bf16.msra.mxu0 %v13465_v54  ;;  %v13396_v54 = vcombine.high %v10312_v52, %v10316_v7  ;;  %v13435_v52 = vcombine.low %v10352_v22, %v10356_v8  ;;  %v10361_v7 = vld [vmem:[#allocation14 + $0x1d98] sm:$0xff]  ;;  %v10400_v8 = vld [vmem:[#allocation14 + $0x1ed0] sm:$0xff] }
 0x74f   :  { %11139 = vmatprep.subr.bf16.mxu0 %v13474_v39  ;;  %11099 = vmatpush1.bf16.msra.mxu1 %v13471_v40  ;;  %v10324_v39 = vld [vmem:[#allocation14 + $0x1c70] sm:$0xff]  ;;  %v13398_v40 = vcombine.high %v10313_v58, %v10317_v45 }
 0x750   :  { %11100 = vmatprep.subr.bf16.mxu1 %v13480_v34  ;;  %v10325_v34 = vld [vmem:[#allocation14 + $0x1c78] sm:$0xff]  ;;  %v13404_v38 = vcombine.high %v10320_v55, %v10324_v39  ;;  %v13403_v63 = vcombine.low %v10320_v55, %v10324_v39  ;;  %v10368_v58 = vld [vmem:[#allocation14 + $0x1dd0] sm:$0xff] }
 0x751   :  { %v13406_v33 = vcombine.high %v10321_v26, %v10325_v34  ;;  %v13405_v42 = vcombine.low %v10321_v26, %v10325_v34  ;;  %v10372_v45 = vld [vmem:[#allocation14 + $0x1df0] sm:$0xff]  ;;  %v10373_v26 = vld [vmem:[#allocation14 + $0x1df8] sm:$0xff] }
 0x752   :  { %11140 = vmatpush1.bf16.msra.mxu0 %v13473_v49  ;;  %v16501_v49 = vmax.bf16 %v10305_v27, %v10303_v1 }
 0x753   :  { %11141 = vmatprep.subr.bf16.mxu0 %v13482_v2  ;;  %11101 = vmatpush1.bf16.msra.mxu1 %v13479_v37  ;;  %v10328_v2 = vld [vmem:[#allocation14 + $0x1c90] sm:$0xff] }
 0x754   :  { %11102 = vmatprep.subr.bf16.mxu1 %v13488_v31  ;;  %v10332_v37 = vld [vmem:[#allocation14 + $0x1cb0] sm:$0xff]  ;;  %v10329_v31 = vld [vmem:[#allocation14 + $0x1c98] sm:$0xff] }
 0x755   :  { %v13412_v35 = vcombine.high %v10328_v2, %v10332_v37  ;;  %v13411_v57 = vcombine.low %v10328_v2, %v10332_v37 }
 0x756   :  { %11142 = vmatpush1.bf16.msra.mxu0 %v13481_v61  ;;  %v10333_v61 = vld [vmem:[#allocation14 + $0x1cb8] sm:$0xff] }
 0x757   :  { %11143 = vmatprep.subr.bf16.mxu0 %v13490_v11  ;;  %11103 = vmatpush1.bf16.msra.mxu1 %v13487_v59  ;;  %v10336_v11 = vld [vmem:[#allocation14 + $0x1cd0] sm:$0xff]  ;;  %v13414_v28 = vcombine.high %v10329_v31, %v10333_v61  ;;  %v13413_v4 = vcombine.low %v10329_v31, %v10333_v61 }
 0x758   :  { %11104 = vmatprep.subr.bf16.mxu1 %v13496_v30  ;;  %v10340_v59 = vld [vmem:[#allocation14 + $0x1cf0] sm:$0xff]  ;;  %v10337_v30 = vld [vmem:[#allocation14 + $0x1cd8] sm:$0xff] }
 0x759   :  { %v13420_v60 = vcombine.high %v10336_v11, %v10340_v59  ;;  %v13419_v5 = vcombine.low %v10336_v11, %v10340_v59 }
 0x75a   :  { %11144 = vmatpush1.bf16.msra.mxu0 %v13489_v14  ;;  %v10341_v14 = vld [vmem:[#allocation14 + $0x1cf8] sm:$0xff] }
 0x75b   :  { %11145 = vmatprep.subr.bf16.mxu0 %v13498_v41  ;;  %11105 = vmatpush1.bf16.msra.mxu1 %v13495_v56  ;;  %v10344_v41 = vld [vmem:[#allocation14 + $0x1d10] sm:$0xff]  ;;  %v13422_v48 = vcombine.high %v10337_v30, %v10341_v14 }
 0x75c   :  { %11106 = vmatprep.subr.bf16.mxu1 %v13504_v32  ;;  %v10348_v56 = vld [vmem:[#allocation14 + $0x1d30] sm:$0xff]  ;;  %v10349_v32 = vld [vmem:[#allocation14 + $0x1d38] sm:$0xff] }
 0x75d   :  { %v13428_v20 = vcombine.high %v10344_v41, %v10348_v56 }
 0x75e   :  { %11146 = vmatpush1.bf16.msra.mxu0 %v13497_v21  ;;  %v13421_v21 = vcombine.low %v10337_v30, %v10341_v14  ;;  %v10385_v14 = vld [vmem:[#allocation14 + $0x1e58] sm:$0xff] }
 0x75f   :  { %11147 = vmatprep.subr.bf16.mxu0 %v13506_v0  ;;  %11107 = vmatpush1.bf16.msra.mxu1 %v13503_v9  ;;  %v13427_v0 = vcombine.low %v10344_v41, %v10348_v56  ;;  %v10353_v9 = vld [vmem:[#allocation14 + $0x1d58] sm:$0xff]  ;;  %v10392_v56 = vld [vmem:[#allocation14 + $0x1e90] sm:$0xff] }
 0x760   :  { %11108 = vmatprep.subr.bf16.mxu1 %v13512_v12  ;;  %v13437_v17 = vcombine.low %v10353_v9, %v10357_v46 }
 0x762   :  { %11148 = vmatpush1.bf16.msra.mxu0 %v13505_v50  ;;  %v13438_v50 = vcombine.high %v10353_v9, %v10357_v46  ;;  %v10401_v46 = vld [vmem:[#allocation14 + $0x1ed8] sm:$0xff] }
 0x763   :  { %11149 = vmatprep.subr.bf16.mxu0 %v13514_v53  ;;  %11109 = vmatpush1.bf16.msra.mxu1 %v13511_v29  ;;  %v10365_v53 = vld [vmem:[#allocation14 + $0x1db8] sm:$0xff] }
 0x764   :  { %11160 = vmatprep.subr.bf16.mxu1 %v13396_v54  ;;  %v13446_v54 = vcombine.high %v10361_v7, %v10365_v53 }
 0x766   :  { %11150 = vmatpush1.bf16.msra.mxu0 %v13513_v43  ;;  %11111 = vmatmul.mubr.bf16.vlgmr.msra.gmra.mrb[88].mxu1 %v16501_v49 }
 0x767   :  { %11201 = vmatprep.subr.bf16.mxu0 %v13398_v40  ;;  %11161 = vmatpush1.bf16.msra.mxu1 %v13395_v10  ;;  %v13443_v40 = vcombine.low %v10360_v13, %v10364_v44  ;;  %v10369_v10 = vld [vmem:[#allocation14 + $0x1dd8] sm:$0xff]  ;;  %v10408_v44 = vld [vmem:[#allocation14 + $0x1f10] sm:$0xff] }
 0x768   :  { %11192 = vmatprep.mubr.bf16.mxu1 %v16483_v16  ;;  %11162 = vmatprep.subr.bf16.mxu1 %v13404_v38  ;;  %v13454_v61 = vcombine.high %v10369_v10, %v10373_v26  ;;  %v13453_v59 = vcombine.low %v10369_v10, %v10373_v26  ;;  %v10424_v26 = vld [vmem:[#allocation14 + $0x1f90] sm:$0xff] }
 0x769   :  { %11152 = vmatmul.mubr.bf16.vlgmr.msra.gmra.mrb[120].mxu0 %v16501_v49 }
 0x76a   :  { %11202 = vmatpush1.bf16.msra.mxu0 %v13397_v24  ;;  %11233 = vmatprep.mubr.bf16.mxu0 %v16483_v16  ;;  %v10345_v16 = vld [vmem:[#allocation14 + $0x1d18] sm:$0xff] }
 0x76b   :  { %11203 = vmatprep.subr.bf16.mxu0 %v13406_v33  ;;  %11163 = vmatpush1.bf16.msra.mxu1 %v13403_v63  ;;  %v13430_v25 = vcombine.high %v10345_v16, %v10349_v32  ;;  %v13429_v12 = vcombine.low %v10345_v16, %v10349_v32  ;;  %v13445_v33 = vcombine.low %v10361_v7, %v10365_v53  ;;  %v10380_v63 = vld [vmem:[#allocation14 + $0x1e30] sm:$0xff]  ;;  %v10393_v32 = vld [vmem:[#allocation14 + $0x1e98] sm:$0xff] }
 0x76c   :  { %11164 = vmatprep.subr.bf16.mxu1 %v13412_v35  ;;  %v13451_v35 = vcombine.low %v10368_v58, %v10372_v45  ;;  %v10409_v53 = vld [vmem:[#allocation14 + $0x1f18] sm:$0xff] }
 0x76e   :  { %11204 = vmatpush1.bf16.msra.mxu0 %v13405_v42  ;;  %v10377_v42 = vld [vmem:[#allocation14 + $0x1e18] sm:$0xff] }
 0x76f   :  { %11205 = vmatprep.subr.bf16.mxu0 %v13414_v28  ;;  %11165 = vmatpush1.bf16.msra.mxu1 %v13411_v57  ;;  %v10384_v28 = vld [vmem:[#allocation14 + $0x1e50] sm:$0xff] }
 0x770   :  { %11166 = vmatprep.subr.bf16.mxu1 %v13420_v60  ;;  %v10388_v57 = vld [vmem:[#allocation14 + $0x1e70] sm:$0xff]  ;;  %v10389_v60 = vld [vmem:[#allocation14 + $0x1e78] sm:$0xff] }
 0x771   :  { %v13467_v16 = vcombine.low %v10384_v28, %v10388_v57  ;;  %v13469_v22 = vcombine.low %v10385_v14, %v10389_v60 }
 0x772   :  { %11206 = vmatpush1.bf16.msra.mxu0 %v13413_v4  ;;  %v13468_v4 = vcombine.high %v10384_v28, %v10388_v57 }
 0x773   :  { %11207 = vmatprep.subr.bf16.mxu0 %v13422_v48  ;;  %11167 = vmatpush1.bf16.msra.mxu1 %v13419_v5  ;;  %v10396_v48 = vld [vmem:[#allocation14 + $0x1eb0] sm:$0xff]  ;;  %v13470_v5 = vcombine.high %v10385_v14, %v10389_v60  ;;  %v14210_v60 = vld [vmem:[#allocation17] sm:$0xff]  }
 0x774   :  { %11168 = vmatprep.subr.bf16.mxu1 %v13428_v20  ;;  %v10397_v20 = vld [vmem:[#allocation14 + $0x1eb8] sm:$0xff]  ;;  %v13475_v9 = vcombine.low %v10392_v56, %v10396_v48 }
 0x775   :  { %v13477_v13 = vcombine.low %v10393_v32, %v10397_v20 }
 0x776   :  { %11208 = vmatpush1.bf16.msra.mxu0 %v13421_v21  ;;  %v13476_v21 = vcombine.high %v10392_v56, %v10396_v48 }
 0x777   :  { %11209 = vmatprep.subr.bf16.mxu0 %v13430_v25  ;;  %11169 = vmatpush1.bf16.msra.mxu1 %v13427_v0  ;;  %v10404_v25 = vld [vmem:[#allocation14 + $0x1ef0] sm:$0xff]  ;;  %v13478_v0 = vcombine.high %v10393_v32, %v10397_v20 }
 0x778   :  { %11170 = vmatprep.subr.bf16.mxu1 %v13436_v47  ;;  %v10405_v47 = vld [vmem:[#allocation14 + $0x1ef8] sm:$0xff]  ;;  %v13483_v7 = vcombine.low %v10400_v8, %v10404_v25 }
 0x779   :  { %v9260_v29 = vpop.f32.mrb[76].mxu1 }
 0x77a   :  { %11210 = vmatpush1.bf16.msra.mxu0 %v13429_v12  ;;  %v16508_v1 = vadd.f32 %v9260_v29, %v16472_v6  ;;  %v9262_v27 = vpop.f32.mrb[77].mxu1  ;;  %v13452_v6 = vcombine.high %v10368_v58, %v10372_v45  ;;  %v13484_v12 = vcombine.high %v10400_v8, %v10404_v25  ;;  %v10416_v58 = vld [vmem:[#allocation14 + $0x1f50] sm:$0xff] }
 0x77b   :  { %11211 = vmatprep.subr.bf16.mxu0 %v13438_v50  ;;  %v16511_v55 = vadd.f32 %v9262_v27, %v16475_v62  ;;  %v9264_v39 = vpop.f32.mrb[78].mxu1  ;;  %11171 = vmatpush1.bf16.msra.mxu1 %v13435_v52  ;;  %v10376_v62 = vld [vmem:[#allocation14 + $0x1e10] sm:$0xff]  ;;  %v13486_v52 = vcombine.high %v10401_v46, %v10405_v47 }
 0x77c   :  { %v9301_v43 = vpop.f32.mrb[108].mxu0  ;;  %v9265_v24 = vpop.f32.mrb[79].mxu1  ;;  %11172 = vmatprep.subr.bf16.mxu1 %v13444_v51  ;;  %v13460_v11 = vcombine.high %v10376_v62, %v10380_v63  ;;  %v13459_v30 = vcombine.low %v10376_v62, %v10380_v63  ;;  %v10412_v50 = vld [vmem:[#allocation14 + $0x1f30] sm:$0xff]  ;;  %v10413_v51 = vld [vmem:[#allocation14 + $0x1f38] sm:$0xff] }
 0x77d   :  { %v16514_v34 = vadd.f32 %v9301_v43, %v16478_v23  ;;  %v9303_v38 = vpop.f32.mrb[109].mxu0  ;;  %v10381_v23 = vld [vmem:[#allocation14 + $0x1e38] sm:$0xff]  ;;  %v13492_v29 = vcombine.high %v10408_v44, %v10412_v50  ;;  %v10420_v45 = vld [vmem:[#allocation14 + $0x1f70] sm:$0xff]  ;;  %v13494_v27 = vcombine.high %v10409_v53, %v10413_v51  ;;  %v13493_v10 = vcombine.low %v10409_v53, %v10413_v51  ;;  %v14241_v53 = vld [vmem:[#allocation17 + $0x140] sm:$0xff]  }
 0x77e   :  { %v16517_v2 = vadd.f32 %v9303_v38, %v16481_v18  ;;  %v9305_v37 = vpop.f32.mrb[110].mxu0  ;;  %11212 = vmatpush1.bf16.msra.mxu0 %v13437_v17  ;;  %v13462_v18 = vcombine.high %v10377_v42, %v10381_v23  ;;  %v13461_v41 = vcombine.low %v10377_v42, %v10381_v23  ;;  %v13485_v17 = vcombine.low %v10401_v46, %v10405_v47  ;;  %v10417_v43 = vld [vmem:[#allocation14 + $0x1f58] sm:$0xff]  ;;  %v10428_v38 = vld [vmem:[#allocation14 + $0x1fb0] sm:$0xff]  ;;  %v14216_v47 = vld [vmem:[#allocation17 + $0x18] sm:$0xff]  }
 0x77f   :  { %v9306_v31 = vpop.f32.mrb[111].mxu0  ;;  %11213 = vmatprep.subr.bf16.mxu0 %v13446_v54  ;;  %11173 = vmatpush1.bf16.msra.mxu1 %v13443_v40  ;;  %v13491_v54 = vcombine.low %v10408_v44, %v10412_v50  ;;  %v10421_v39 = vld [vmem:[#allocation14 + $0x1f78] sm:$0xff]  ;;  %v13500_v40 = vcombine.high %v10416_v58, %v10420_v45  ;;  %v13508_v62 = vcombine.high %v10424_v26, %v10428_v38  ;;  %v14223_v50 = vld [vmem:[#allocation17 + $0x78] sm:$0xff]   ;;  %v14243_v51 = vld [vmem:[#allocation17 + $0x100] sm:$0xff]  }
 0x780   :  { %11174 = vmatprep.subr.bf16.mxu1 %v13452_v6  ;;  %v13502_v24 = vcombine.high %v10417_v43, %v10421_v39  ;;  %v13499_v6 = vcombine.low %v10416_v58, %v10420_v45  ;;  %v10425_v37 = vld [vmem:[#allocation14 + $0x1f98] sm:$0xff]  ;;  %v13501_v63 = vcombine.low %v10417_v43, %v10421_v39  ;;  %v10432_v31 = vld [vmem:[#allocation14 + $0x1fd0] sm:$0xff]  ;;  %v13507_v42 = vcombine.low %v10424_v26, %v10428_v38 }
 0x781   :  { %v10433_v23 = vld [vmem:[#allocation14 + $0x1fd8] sm:$0xff] }
 0x782   :  { %11214 = vmatpush1.bf16.msra.mxu0 %v13445_v33  ;;  %v10429_v33 = vld [vmem:[#allocation14 + $0x1fb8] sm:$0xff] }
 0x783   :  { %11215 = vmatprep.subr.bf16.mxu0 %v13454_v61  ;;  %11175 = vmatpush1.bf16.msra.mxu1 %v13451_v35  ;;  %v10436_v61 = vld [vmem:[#allocation14 + $0x1ff0] sm:$0xff]  ;;  %v13510_v35 = vcombine.high %v10425_v37, %v10429_v33  ;;  %v13509_v28 = vcombine.low %v10425_v37, %v10429_v33  ;;  %v14214_v46 = vld [vmem:[#allocation17 + $0x10] sm:$0xff]   ;;  %v14253_v33 = vld [vmem:[#allocation17 + $0x158] sm:$0xff]  }
 0x784   :  { %11176 = vmatprep.subr.bf16.mxu1 %v13460_v11  ;;  %v10437_v11 = vld [vmem:[#allocation14 + $0x1ff8] sm:$0xff] }
 0x785   :  { %v13518_v57 = vcombine.high %v10433_v23, %v10437_v11  ;;  %v13517_v14 = vcombine.low %v10433_v23, %v10437_v11  ;;  %v14221_v44 = vld [vmem:[#allocation17 + $0x70] sm:$0xff]   ;;  %v16545_v23 = vld [vmem:[#allocation15] sm:$0xff] }
 0x786   :  { %11216 = vmatpush1.bf16.msra.mxu0 %v13453_v59  ;;  %v13516_v59 = vcombine.high %v10432_v31, %v10436_v61  ;;  %v14249_v37 = vld [vmem:[#allocation17 + $0x150] sm:$0xff]  }
 0x787   :  { %11217 = vmatprep.subr.bf16.mxu0 %v13462_v18  ;;  %11177 = vmatpush1.bf16.msra.mxu1 %v13459_v30  ;;  %v13515_v18 = vcombine.low %v10432_v31, %v10436_v61  ;;  %v14209_v30 = vld [vmem:[#allocation17 + $0x40] sm:$0xff]   ;;  %v14263_v31 = vld [vmem:[#allocation17 + $0x128] sm:$0xff]   ;;  %v14267_v61 = vld [vmem:[#allocation17 + $0x130] sm:$0xff]  }
 0x788   :  { %11178 = vmatprep.subr.bf16.mxu1 %v13468_v4  ;;  %v14211_v4 = vld [vmem:[#allocation17 + $0x48] sm:$0xff]  }
 0x789   :  { %v16623_v11 = vld [vmem:[#allocation31_spill] sm:$0xff] }
 0x78a   :  { %11218 = vmatpush1.bf16.msra.mxu0 %v13461_v41  ;;  %v14212_v41 = vld [vmem:[#allocation17 + $0x8] sm:$0xff]  }
 0x78b   :  { %11219 = vmatprep.subr.bf16.mxu0 %v13470_v5  ;;  %11179 = vmatpush1.bf16.msra.mxu1 %v13467_v16 }
 0x78c   :  { %11180 = vmatprep.subr.bf16.mxu1 %v13476_v21 }
 0x78e   :  { %11220 = vmatpush1.bf16.msra.mxu0 %v13469_v22 }
 0x78f   :  { %11221 = vmatprep.subr.bf16.mxu0 %v13478_v0  ;;  %11181 = vmatpush1.bf16.msra.mxu1 %v13475_v9  ;;  %v14213_v9 = vld [vmem:[#allocation17 + $0x50] sm:$0xff]  }
 0x790   :  { %11182 = vmatprep.subr.bf16.mxu1 %v13484_v12  ;;  %v14218_v12 = vld [vmem:[#allocation17 + $0x20] sm:$0xff]  }
 0x792   :  { %11222 = vmatpush1.bf16.msra.mxu0 %v13477_v13  ;;  %v14220_v13 = vld [vmem:[#allocation17 + $0x28] sm:$0xff]  }
 0x793   :  { %11223 = vmatprep.subr.bf16.mxu0 %v13486_v52  ;;  %11183 = vmatpush1.bf16.msra.mxu1 %v13483_v7  ;;  %v14224_v52 = vld [vmem:[#allocation17 + $0x38] sm:$0xff]   ;;  %v14225_v7 = vld [vmem:[#allocation17 + $0xc0] sm:$0xff]  }
 0x794   :  { %11184 = vmatprep.subr.bf16.mxu1 %v13492_v29  ;;  %v14245_v29 = vld [vmem:[#allocation17 + $0x148] sm:$0xff]  }
 0x796   :  { %11224 = vmatpush1.bf16.msra.mxu0 %v13485_v17 }
 0x797   :  { %11225 = vmatprep.subr.bf16.mxu0 %v13494_v27  ;;  %11185 = vmatpush1.bf16.msra.mxu1 %v13491_v54 }
 0x798   :  { %11186 = vmatprep.subr.bf16.mxu1 %v13500_v40 }
 0x79a   :  { %11226 = vmatpush1.bf16.msra.mxu0 %v13493_v10 }
 0x79b   :  { %11227 = vmatprep.subr.bf16.mxu0 %v13502_v24  ;;  %11187 = vmatpush1.bf16.msra.mxu1 %v13499_v6  ;;  %v14247_v6 = vld [vmem:[#allocation17 + $0x108] sm:$0xff]  }
 0x79c   :  { %11188 = vmatprep.subr.bf16.mxu1 %v13508_v62  ;;  %v14257_v62 = vld [vmem:[#allocation17 + $0x160] sm:$0xff]  }
 0x79e   :  { %11228 = vmatpush1.bf16.msra.mxu0 %v13501_v63  ;;  %v14261_v63 = vld [vmem:[#allocation17 + $0x168] sm:$0xff]  }
 0x79f   :  { %11229 = vmatprep.subr.bf16.mxu0 %v13510_v35  ;;  %11189 = vmatpush1.bf16.msra.mxu1 %v13507_v42  ;;  %v14269_v35 = vld [vmem:[#allocation17 + $0x178] sm:$0xff]  }
 0x7a0   :  { %11190 = vmatprep.subr.bf16.mxu1 %v13516_v59  ;;  %v14271_v42 = vld [vmem:[#allocation17 + $0x138] sm:$0xff]   ;;  %v11255_v59 = vrot.slane %v16545_v23, %v16623_v11 }
 0x7a2   :  { %11230 = vmatpush1.bf16.msra.mxu0 %v13509_v28 }
 0x7a3   :  { %11231 = vmatprep.subr.bf16.mxu0 %v13518_v57  ;;  %11191 = vmatpush1.bf16.msra.mxu1 %v13515_v18  ;;  %v16624_v57 = vld [vmem:[#allocation32_spill] sm:$0xff] }
 0x7a4   :  { %13602 = vmatprep.subr.bf16.mxu1 %v14209_v30  ;;  %v11259_v18 = vrot.slane %v16545_v23, %v16624_v57 }
 0x7a6   :  { %11232 = vmatpush1.bf16.msra.mxu0 %v13517_v14  ;;  %11193 = vmatmul.mubr.bf16.vlgmr.msra.gmra.mrb[92].mxu1 %v16501_v49 }
 0x7a7   :  { %13603 = vmatpush3.bf16.msra.mxu1 %v14210_v60  ;;  %13646 = vmatprep.subr.bf16.mxu0 %v14241_v53 }
 0x7a8   :  { %13604 = vmatprep.subr.bf16.mxu1 %v14211_v4 }
 0x7a9   :  { %11234 = vmatmul.mubr.bf16.vlgmr.msra.gmra.mrb[124].mxu0 %v16501_v49 }
 0x7aa   :  { %13647 = vmatpush3.bf16.msra.mxu0 %v14243_v51 }
 0x7ab   :  { %13605 = vmatpush3.bf16.msra.mxu1 %v14212_v41  ;;  %13648 = vmatprep.subr.bf16.mxu0 %v14245_v29  ;;  %v16625_v41 = vld [vmem:[#allocation38_spill] sm:$0xff] }
 0x7ac   :  { %13606 = vmatprep.subr.bf16.mxu1 %v14213_v9 }
 0x7ae   :  { %13649 = vmatpush3.bf16.msra.mxu0 %v14247_v6  ;;  %v14229_v6 = vld [vmem:[#allocation17 + $0xd0] sm:$0xff]  }
 0x7af   :  { %13607 = vmatpush3.bf16.msra.mxu1 %v14214_v46  ;;  %13650 = vmatprep.subr.bf16.mxu0 %v14249_v37  ;;  %v14230_v37 = vld [vmem:[#allocation17 + $0x90] sm:$0xff]  }
 0x7b9   :  { %v10145_v56 = vpop.f32.mrb[80].mxu1 }
 0x7ba   :  { %v16522_v48 = vadd.f32 %v10145_v56, %v16490_v36  ;;  %v10147_v5 = vpop.f32.mrb[81].mxu1  ;;  %v14215_v36 = vld [vmem:[#allocation17 + $0x58] sm:$0xff]   ;;  %v11267_v56 = vrot.slane %v16545_v23, %v16625_v41  ;;  %v14248_v41 = vld [vmem:[#allocation17 + $0x188] sm:$0xff]  }
 0x7bb   :  { %v16525_v32 = vadd.f32 %v10147_v5, %v16493_v19  ;;  %v10149_v20 = vpop.f32.mrb[82].mxu1  ;;  %13608 = vmatprep.subr.bf16.mxu1 %v14215_v36  ;;  %v14217_v19 = vld [vmem:[#allocation17 + $0x60] sm:$0xff]  }
 0x7bc   :  { %v10186_v16 = vpop.f32.mrb[112].mxu0  ;;  %v10150_v8 = vpop.f32.mrb[83].mxu1  ;;  %13609 = vmatpush3.bf16.msra.mxu1 %v14216_v47 }
 0x7bd   :  { %v16528_v21 = vadd.f32 %v10186_v16, %v16496_v15  ;;  %v10188_v22 = vpop.f32.mrb[113].mxu0  ;;  %13610 = vmatprep.subr.bf16.mxu1 %v14217_v19  ;;  %v14219_v15 = vld [vmem:[#allocation17 + $0x68] sm:$0xff]  }
 0x7be   :  { %v16531_v25 = vadd.f32 %v10188_v22, %v16499_v3  ;;  %v10190_v49 = vpop.f32.mrb[114].mxu0  ;;  %v14222_v3 = vld [vmem:[#allocation17 + $0x30] sm:$0xff]  }
 0x7bf   :  { %v10191_v0 = vpop.f32.mrb[115].mxu0 }
 0x7c0   :  { %13611 = vmatpush3.bf16.msra.mxu1 %v14218_v12 }
 0x7c1   :  { %13612 = vmatprep.subr.bf16.mxu1 %v14219_v15 }
 0x7c4   :  { %13613 = vmatpush3.bf16.msra.mxu1 %v14220_v13 }
 0x7c5   :  { %13614 = vmatprep.subr.bf16.mxu1 %v14221_v44 }
 0x7c8   :  { %13615 = vmatpush3.bf16.msra.mxu1 %v14222_v3  ;;  %v16626_v3 = vld [vmem:[#allocation37_spill] sm:$0xff] }
 0x7c9   :  { %13616 = vmatprep.subr.bf16.mxu1 %v14223_v50  ;;  %v11263_v50 = vrot.slane %v16545_v23, %v16626_v3 }
 0x7cc   :  { %13617 = vmatpush3.bf16.msra.mxu1 %v14224_v52 }
 0x7cd   :  { %13624 = vmatprep.subr.bf16.mxu1 %v14225_v7 }
 0x7f9   :  { %v10227_v17 = vpop.f32.mrb[84].mxu1 }
 0x7fa   :  { %v16534_v58 = vadd.f32 %v10227_v17, %v16508_v1  ;;  %v10229_v45 = vpop.f32.mrb[85].mxu1  ;;  %v14251_v1 = vld [vmem:[#allocation17 + $0x110] sm:$0xff]   ;;  %v14226_v17 = vld [vmem:[#allocation17 + $0x80] sm:$0xff]  }
 0x7fb   :  { %v16537_v54 = vadd.f32 %v10229_v45, %v16511_v55  ;;  %v10231_v43 = vpop.f32.mrb[86].mxu1  ;;  %13651 = vmatpush3.bf16.msra.mxu0 %v14251_v1  ;;  %v14255_v55 = vld [vmem:[#allocation17 + $0x118] sm:$0xff]  }
 0x7fc   :  { %v10268_v27 = vpop.f32.mrb[116].mxu0  ;;  %v10232_v10 = vpop.f32.mrb[87].mxu1  ;;  %13652 = vmatprep.subr.bf16.mxu0 %v14253_v33  ;;  %v14231_v33 = vld [vmem:[#allocation17 + $0xd8] sm:$0xff]  }
 0x7fd   :  { %v16540_v39 = vadd.f32 %v10268_v27, %v16514_v34  ;;  %v10270_v40 = vpop.f32.mrb[117].mxu0  ;;  %v14259_v34 = vld [vmem:[#allocation17 + $0x120] sm:$0xff]  }
 0x7fe   :  { %v16543_v26 = vadd.f32 %v10270_v40, %v16517_v2  ;;  %v10272_v38 = vpop.f32.mrb[118].mxu0  ;;  %v14265_v2 = vld [vmem:[#allocation17 + $0x170] sm:$0xff]   ;;  %v14227_v40 = vld [vmem:[#allocation17 + $0xc8] sm:$0xff]  }
 0x7ff   :  { %v10273_v24 = vpop.f32.mrb[119].mxu0  ;;  %13653 = vmatpush3.bf16.msra.mxu0 %v14255_v55  ;;  %v14228_v38 = vld [vmem:[#allocation17 + $0x88] sm:$0xff]   ;;  %v14232_v55 = vld [vmem:[#allocation17 + $0x98] sm:$0xff]  }
 0x800   :  { %13654 = vmatprep.subr.bf16.mxu0 %v14257_v62  ;;  %v14233_v62 = vld [vmem:[#allocation17 + $0xe0] sm:$0xff]  }
 0x803   :  { %13655 = vmatpush3.bf16.msra.mxu0 %v14259_v34  ;;  %v14234_v34 = vld [vmem:[#allocation17 + $0xa0] sm:$0xff]  }
 0x804   :  { %13656 = vmatprep.subr.bf16.mxu0 %v14261_v63  ;;  %v14235_v63 = vld [vmem:[#allocation17 + $0xe8] sm:$0xff]  }
 0x807   :  { %13657 = vmatpush3.bf16.msra.mxu0 %v14263_v31  ;;  %v14236_v31 = vld [vmem:[#allocation17 + $0xa8] sm:$0xff]  }
 0x808   :  { %13658 = vmatprep.subr.bf16.mxu0 %v14265_v2  ;;  %v14237_v2 = vld [vmem:[#allocation17 + $0xf0] sm:$0xff]  }
 0x80b   :  { %13659 = vmatpush3.bf16.msra.mxu0 %v14267_v61 }
 0x80c   :  { %13660 = vmatprep.subr.bf16.mxu0 %v14269_v35  ;;  %v14238_v35 = vld [vmem:[#allocation17 + $0xb0] sm:$0xff]  }
 0x80f   :  { %13661 = vmatpush3.bf16.msra.mxu0 %v14271_v42  ;;  %v14239_v42 = vld [vmem:[#allocation17 + $0xf8] sm:$0xff]  }
 0x839   :  { %v11112_v28 = vpop.f32.mrb[88].mxu1 }
 0x83a   :  { %v11242_v30 = vadd.f32 %v11112_v28, %v16522_v48  ;;  %v11114_v14 = vpop.f32.mrb[89].mxu1  ;;  %v14242_v28 = vld [vmem:[#allocation17 + $0x1c0] sm:$0xff]  }
 0x83b   :  { %v11243_v4 = vadd.f32 %v11114_v14, %v16525_v32  ;;  %v11116_v5 = vpop.f32.mrb[90].mxu1  ;;  %v14246_v14 = vld [vmem:[#allocation17 + $0x1c8] sm:$0xff]  }
 0x83c   :  { %v11153_v60 = vpop.f32.mrb[120].mxu0  ;;  %v11292_v16 = vadd.f32 %v11255_v59, %v11242_v30  ;;  %v11117_v8 = vpop.f32.mrb[91].mxu1  ;;  %v14240_v59 = vld [vmem:[#allocation17 + $0xb8] sm:$0xff]  }
 0x83d   :  { %v11244_v20 = vadd.f32 %v11153_v60, %v16528_v21  ;;  %v11155_v22 = vpop.f32.mrb[121].mxu0  ;;  %v11293_v49 = vadd.f32 %v11259_v18, %v11243_v4  ;;  %v14244_v18 = vld [vmem:[#allocation17 + $0x180] sm:$0xff]  }
 0x83e   :  { %v11245_v0 = vadd.f32 %v11155_v22, %v16531_v25  ;;  %v11157_v9 = vpop.f32.mrb[122].mxu0  ;;  %v11308_v46 = vmin.f32 %v11292_v16, 0.0  ;;  %vm11300_vm6 = vcmp.gt.f32.partialorder %v11292_v16, 0.0  ;;  %v16627_v60 = vld [vmem:[#allocation30_spill] sm:$0xff] }
 0x83f   :  { %v11158_v36 = vpop.f32.mrb[123].mxu0  ;;  %v11309_v48 = vmin.f32 %v11293_v49, 0.0  ;;  %vm11301_vm3 = vcmp.gt.f32.partialorder %v11293_v49, 0.0  ;;  %v11294_v27 = vadd.f32 %v11263_v50, %v11244_v20  ;;  %v11270_v4 = vsub.s32 4, %v16627_v60 }
 0x840   :  { %v11295_v47 = vadd.f32 %v11267_v56, %v11245_v0  ;;  %v11316_v19 = vmul.f32 1.442695, %v11308_v46  ;;  %v11274_v56 = vsub.s32 5, %v16627_v60  ;;  %v11278_v5 = vsub.s32 6, %v16627_v60  ;;  %v14252_v0 = vld [vmem:[#allocation17 + $0x190] sm:$0xff]  }
 0x841   :  { %v11318_v12 = vmul.f32 1.442695, %v11309_v48  ;;  %v11310_v24 = vmin.f32 %v11294_v27, 0.0  ;;  %vm11302_vm5 = vcmp.gt.f32.partialorder %v11294_v27, 0.0  ;;  %v11282_v20 = vsub.s32 7, %v16627_v60  ;;  %v14254_v48 = vld [vmem:[#allocation17 + $0x1d8] sm:$0xff]  }
 0x842   :  { %v11311_v32 = vmin.f32 %v11295_v47, 0.0  ;;  %14473 = vpow2.f32 %v11316_v19  ;;  %vm11303_vm4 = vcmp.gt.f32.partialorder %v11295_v47, 0.0  ;;  %v11271_v22 = vrot.slane %v16545_v23, %v11270_v4  ;;  %v14274_v60 = vld [vmem:[#allocation20 + $0x8] sm:$0xff]   ;;  %v14275_v4 = vld [vmem:[#allocation20 + $0x10] sm:$0xff]  }
 0x843   :  { %14475 = vpow2.f32 %v11318_v12  ;;  %v11320_v1 = vmul.f32 1.442695, %v11310_v24  ;;  %v11279_v46 = vrot.slane %v16545_v23, %v11278_v5  ;;  %v11283_v12 = vrot.slane %v16545_v23, %v11282_v20  ;;  %v14268_v24 = vld [vmem:[#allocation17 + $0x1b0] sm:$0xff]   ;;  %v14280_v20 = vld [vmem:[#allocation20 + $0x38] sm:$0xff]  }
 0x844   :  { %v11322_v15 = vmul.f32 1.442695, %v11311_v32  ;;  %v14278_v5 = vld [vmem:[#allocation20 + $0x28] sm:$0xff]  }
 0x846   :  { %14477 = vpow2.f32 %v11322_v15 }
 0x847   :  { %14479 = vpow2.f32 %v11320_v1 }
 0x84c   :  { %v14474_v13 = vpop.eup %14473 }
 0x84d   :  { %v14476_v44 = vpop.eup %14475  ;;  %v13519_v21 = vadd.f32 -1.0, %v14474_v13 }
 0x84e   :  { %v13520_v25 = vadd.f32 -1.0, %v14476_v44 }
 0x84f   :  { %v11340_v7 = vsel %vm11300_vm6, %v11292_v16, %v13519_v21  ;;  %v14250_v16 = vld [vmem:[#allocation17 + $0x1d0] sm:$0xff]  }
 0x850   :  { %v14478_v52 = vpop.eup %14477  ;;  %v11341_v53 = vsel %vm11301_vm3, %v11293_v49, %v13520_v25  ;;  %v11348_v45 = vpack.c.bf16 %v11340_v7, %v11340_v7  ;;  %v11275_v49 = vrot.slane %v16545_v23, %v11274_v56  ;;  %v14256_v25 = vld [vmem:[#allocation17 + $0x198] sm:$0xff]   ;;  %v14277_v56 = vld [vmem:[#allocation20 + $0x20] sm:$0xff]  }
 0x851   :  { %v13522_v51 = vadd.f32 -1.0, %v14478_v52  ;;  %v11349_v29 = vpack.c.bf16 %v11341_v53, %v11341_v53  ;;  %v14480_v61 = vpop.eup %14479 }
 0x852   :  { %v13521_v11 = vadd.f32 -1.0, %v14480_v61 }
 0x853   :  { %v11343_v43 = vsel %vm11303_vm4, %v11295_v47, %v13522_v51  ;;  %11907 = vmatprep.mubr.bf16.mxu1 %v11349_v29  ;;  %v14258_v51 = vld [vmem:[#allocation17 + $0x1e0] sm:$0xff]  }
 0x854   :  { %v11351_v10 = vpack.c.bf16 %v11343_v43, %v11343_v43  ;;  %11908 = vmatmul.mubr.bf16.vlgmr.msra.gmra.mrb[96].mxu1 %v11348_v45  ;;  %v11342_v57 = vsel %vm11302_vm5, %v11294_v27, %v13521_v11 }
 0x855   :  { %13625 = vmatpush3.bf16.msra.mxu1 %v14226_v17  ;;  %v11350_v30 = vpack.c.bf16 %v11342_v57, %v11342_v57 }
 0x856   :  { %11947 = vmatprep.mubr.bf16.mxu1 %v11351_v10  ;;  %13626 = vmatprep.subr.bf16.mxu1 %v14227_v40  ;;  %v14264_v10 = vld [vmem:[#allocation17 + $0x1a8] sm:$0xff]  }
 0x859   :  { %13627 = vmatpush3.bf16.msra.mxu1 %v14228_v38  ;;  %v14266_v38 = vld [vmem:[#allocation17 + $0x1f0] sm:$0xff]  }
 0x85a   :  { %13628 = vmatprep.subr.bf16.mxu1 %v14229_v6  ;;  %v14270_v6 = vld [vmem:[#allocation17 + $0x1f8] sm:$0xff]  }
 0x85d   :  { %13629 = vmatpush3.bf16.msra.mxu1 %v14230_v37 }
 0x85e   :  { %13630 = vmatprep.subr.bf16.mxu1 %v14231_v33 }
 0x861   :  { %13631 = vmatpush3.bf16.msra.mxu1 %v14232_v55  ;;  %v14272_v55 = vld [vmem:[#allocation17 + $0x1b8] sm:$0xff]  }
 0x862   :  { %13632 = vmatprep.subr.bf16.mxu1 %v14233_v62 }
 0x865   :  { %13633 = vmatpush3.bf16.msra.mxu1 %v14234_v34 }
 0x866   :  { %13634 = vmatprep.subr.bf16.mxu1 %v14235_v63 }
 0x869   :  { %13635 = vmatpush3.bf16.msra.mxu1 %v14236_v31 }
 0x86a   :  { %13636 = vmatprep.subr.bf16.mxu1 %v14237_v2 }
 0x86d   :  { %13637 = vmatpush3.bf16.msra.mxu1 %v14238_v35 }
 0x86e   :  { %13638 = vmatprep.subr.bf16.mxu1 %v14239_v42 }
 0x871   :  { %13639 = vmatpush3.bf16.msra.mxu1 %v14240_v59 }
 0x872   :  { %13668 = vmatprep.subr.bf16.mxu1 %v14242_v28 }
 0x874   :  { %11948 = vmatmul.mubr.bf16.vlgmr.msra.gmra.mrb[100].mxu1 %v11350_v30  ;;  %v14273_v30 = vld [vmem:[#allocation20] sm:$0xff]  }
 0x875   :  { %13669 = vmatpush3.bf16.msra.mxu1 %v14244_v18 }
 0x876   :  { %13670 = vmatprep.subr.bf16.mxu1 %v14246_v14  ;;  %v14797_v14 = vmov 0.0  }
 0x877   :  { %13699 = vmatprep.subr.bf16.mxu0 %v14797_v14 }
 0x879   :  { %v11194_v8 = vpop.f32.mrb[92].mxu1  ;;  %13671 = vmatpush3.bf16.msra.mxu1 %v14248_v41  ;;  %v14276_v41 = vld [vmem:[#allocation20 + $0x18] sm:$0xff]  }
 0x87a   :  { %v11246_v9 = vadd.f32 %v11194_v8, %v16534_v58  ;;  %v11196_v36 = vpop.f32.mrb[93].mxu1  ;;  %13672 = vmatprep.subr.bf16.mxu1 %v14250_v16  ;;  %v14279_v16 = vld [vmem:[#allocation20 + $0x30] sm:$0xff]  }
 0x87b   :  { %v11247_v19 = vadd.f32 %v11196_v36, %v16537_v54  ;;  %v11198_v32 = vpop.f32.mrb[94].mxu1 }
 0x87c   :  { %v11235_v47 = vpop.f32.mrb[124].mxu0  ;;  %v11296_v15 = vadd.f32 %v11271_v22, %v11246_v9  ;;  %v11199_v21 = vpop.f32.mrb[95].mxu1 }
 0x87d   :  { %v11248_v13 = vadd.f32 %v11235_v47, %v16540_v39  ;;  %v11237_v44 = vpop.f32.mrb[125].mxu0  ;;  %v11297_v3 = vadd.f32 %v11275_v49, %v11247_v19  ;;  %13673 = vmatpush3.bf16.msra.mxu1 %v14252_v0  ;;  %v14260_v39 = vld [vmem:[#allocation17 + $0x1a0] sm:$0xff]  }
 0x87e   :  { %v11249_v50 = vadd.f32 %v11237_v44, %v16543_v26  ;;  %v11239_v58 = vpop.f32.mrb[126].mxu0  ;;  %v11312_v52 = vmin.f32 %v11296_v15, 0.0  ;;  %13674 = vmatprep.subr.bf16.mxu1 %v14254_v48  ;;  %v14262_v26 = vld [vmem:[#allocation17 + $0x1e8] sm:$0xff]   ;;  %vm11304_vm7 = vcmp.gt.f32.partialorder %v11296_v15, 0.0 }
 0x87f   :  { %v11298_v7 = vadd.f32 %v11279_v46, %v11248_v13  ;;  %v11240_v53 = vpop.f32.mrb[127].mxu0  ;;  %v11313_v54 = vmin.f32 %v11297_v3, 0.0  ;;  %vm11305_vm8 = vcmp.gt.f32.partialorder %v11297_v3, 0.0  ;;  %v13527_v46 = vld [vmem:[#allocation18] ss:$0 sm:$0xff] }
 0x880   :  { %v11299_v29 = vadd.f32 %v11283_v12, %v11249_v50  ;;  %v11324_v23 = vmul.f32 1.442695, %v11312_v52 }
 0x881   :  { %v11314_v17 = vmin.f32 %v11298_v7, 0.0  ;;  %v11326_v45 = vmul.f32 1.442695, %v11313_v54  ;;  %13675 = vmatpush3.bf16.msra.mxu1 %v14256_v25  ;;  %vm11306_vm9 = vcmp.gt.f32.partialorder %v11298_v7, 0.0 }
 0x882   :  { %v11315_v27 = vmin.f32 %v11299_v29, 0.0  ;;  %14481 = vpow2.f32 %v11324_v23  ;;  %13676 = vmatprep.subr.bf16.mxu1 %v14258_v51  ;;  %vm11307_vm10 = vcmp.gt.f32.partialorder %v11299_v29, 0.0 }
 0x883   :  { %v11328_v43 = vmul.f32 1.442695, %v11314_v17  ;;  %14483 = vpow2.f32 %v11326_v45 }
 0x884   :  { %v11330_v40 = vmul.f32 1.442695, %v11315_v27 }
 0x885   :  { %14485 = vpow2.f32 %v11328_v43  ;;  %13677 = vmatpush3.bf16.msra.mxu1 %v14260_v39  ;;  %v13593_v43 = vld [vmem:[#allocation21] ss:$0 sm:$0xff] }
 0x886   :  { %14487 = vpow2.f32 %v11330_v40  ;;  %13678 = vmatprep.subr.bf16.mxu1 %v14262_v26 }
 0x889   :  { %13679 = vmatpush3.bf16.msra.mxu1 %v14264_v10 }
 0x88a   :  { %13680 = vmatprep.subr.bf16.mxu1 %v14266_v38 }
 0x88c   :  { %v14482_v37 = vpop.eup %14481 }
 0x88d   :  { %v14484_v1 = vpop.eup %14483  ;;  %v13523_v33 = vadd.f32 -1.0, %v14482_v37  ;;  %13681 = vmatpush3.bf16.msra.mxu1 %v14268_v24 }
 0x88e   :  { %13682 = vmatprep.subr.bf16.mxu1 %v14270_v6  ;;  %v13524_v34 = vadd.f32 -1.0, %v14484_v1 }
 0x88f   :  { %v14486_v62 = vpop.eup %14485  ;;  %v11344_v31 = vsel %vm11304_vm7, %v11296_v15, %v13523_v33 }
 0x890   :  { %v14488_v63 = vpop.eup %14487  ;;  %v13525_v2 = vadd.f32 -1.0, %v14486_v62  ;;  %v11345_v61 = vsel %vm11305_vm8, %v11297_v3, %v13524_v34  ;;  %v11352_v59 = vpack.c.bf16 %v11344_v31, %v11344_v31 }
 0x891   :  { %v13526_v35 = vadd.f32 -1.0, %v14488_v63  ;;  %13683 = vmatpush3.bf16.msra.mxu1 %v14272_v55  ;;  %v11353_v11 = vpack.c.bf16 %v11345_v61, %v11345_v61 }
 0x892   :  { %v11346_v42 = vsel %vm11306_vm9, %v11298_v7, %v13525_v2 }
 0x893   :  { %v11347_v28 = vsel %vm11307_vm10, %v11299_v29, %v13526_v35  ;;  %11987 = vmatprep.mubr.bf16.mxu0 %v11353_v11  ;;  %v11354_v18 = vpack.c.bf16 %v11346_v42, %v11346_v42 }
 0x894   :  { %v11355_v57 = vpack.c.bf16 %v11347_v28, %v11347_v28  ;;  %11988 = vmatmul.mubr.bf16.vlgmr.msra.gmra.mrb[128].mxu0 %v11352_v59 }
 0x895   :  { %13700 = vmatpush3.bf16.msra.mxu0 %v14273_v30  ;;  %13715 = vmatprep.mubr.msk.bf16.mxu0 %vm14798_vm11, %v14797_v14 }
 0x896   :  { %12027 = vmatprep.mubr.bf16.mxu1 %v11355_v57  ;;  %13701 = vmatprep.subr.bf16.mxu0 %v14797_v14 }
 0x897   :  { %12028 = vmatmul.mubr.bf16.vlgmr.msra.gmra.mrb[104].mxu1 %v11354_v18 }
 0x899   :  { %13702 = vmatpush3.bf16.msra.mxu0 %v14274_v60 }
 0x89a   :  { %13703 = vmatprep.subr.bf16.mxu0 %v14797_v14 }
 0x89d   :  { %13704 = vmatpush3.bf16.msra.mxu0 %v14275_v4 }
 0x89e   :  { %13705 = vmatprep.subr.bf16.mxu0 %v14797_v14 }
 0x8a1   :  { %13706 = vmatpush3.bf16.msra.mxu0 %v14276_v41 }
 0x8a2   :  { %13707 = vmatprep.subr.bf16.mxu0 %v14797_v14 }
 0x8a5   :  { %13708 = vmatpush3.bf16.msra.mxu0 %v14277_v56 }
 0x8a6   :  { %13709 = vmatprep.subr.bf16.mxu0 %v14797_v14 }
 0x8a9   :  { %13710 = vmatpush3.bf16.msra.mxu0 %v14278_v5 }
 0x8aa   :  { %13711 = vmatprep.subr.bf16.mxu0 %v14797_v14 }
 0x8ad   :  { %13712 = vmatpush3.bf16.msra.mxu0 %v14279_v16 }
 0x8ae   :  { %13713 = vmatprep.subr.bf16.mxu0 %v14797_v14 }
 0x8b1   :  { %13714 = vmatpush3.bf16.msra.mxu0 %v14280_v20 }
 0x927   :  { %v13618_v22 = vpop.f32.mrb[96].mxu1 }
 0x928   :  { %v13619_v8 = vpop.f32.mrb[97].mxu1 }
 0x929   :  { %v13620_v49 = vadd.f32 %v13619_v8, %v13618_v22  ;;  %v13621_v0 = vpop.f32.mrb[98].mxu1 }
 0x92a   :  { %v13622_v9 = vpop.f32.mrb[99].mxu1 }
 0x92b   :  { %v11910_v47 = vadd.f32 %v13620_v49, %v13527_v46 }
 0x947   :  { %v13640_v36 = vpop.f32.mrb[100].mxu1 }
 0x948   :  { %v13641_v48 = vpop.f32.mrb[101].mxu1 }
 0x949   :  { %v13642_v19 = vadd.f32 %v13641_v48, %v13640_v36  ;;  %v13643_v12 = vpop.f32.mrb[102].mxu1 }
 0x94a   :  { %v13644_v32 = vpop.f32.mrb[103].mxu1 }
 0x94b   :  { %v11950_v15 = vadd.f32 %v13642_v19, %v11910_v47 }
 0x967   :  { %v13662_v13 = vpop.f32.mrb[128].mxu0 }
 0x968   :  { %v13663_v44 = vpop.f32.mrb[129].mxu0 }
 0x969   :  { %v13664_v3 = vadd.f32 %v13663_v44, %v13662_v13  ;;  %v13665_v50 = vpop.f32.mrb[130].mxu0 }
 0x96a   :  { %v13684_v21 = vpop.f32.mrb[104].mxu1  ;;  %v13666_v25 = vpop.f32.mrb[131].mxu0 }
 0x96b   :  { %v13685_v58 = vpop.f32.mrb[105].mxu1  ;;  %v11990_v52 = vadd.f32 %v13664_v3, %v11950_v15 }
 0x96c   :  { %v13686_v7 = vadd.f32 %v13685_v58, %v13684_v21  ;;  %v13687_v53 = vpop.f32.mrb[106].mxu1 }
 0x96d   :  { %v13688_v51 = vpop.f32.mrb[107].mxu1 }
 0x96e   :  { %v12030_v54 = vadd.f32 %v13686_v7, %v11990_v52 }
 0x970   :  { %v12036_v29 = vmin.f32 %v12030_v54, 0.0  ;;  %vm12035_vm12 = vcmp.gt.f32.partialorder %v12030_v54, 0.0 }
 0x972   :  { %v12037_v23 = vmul.f32 1.442695, %v12036_v29 }
 0x974   :  { %14489 = vpow2.f32 %v12037_v23 }
 0x97e   :  { %v14490_v17 = vpop.eup %14489 }
 0x97f   :  { %v13592_v45 = vadd.f32 -1.0, %v14490_v17 }
 0x981   :  { %v12040_v27 = vsel %vm12035_vm12, %v12030_v54, %v13592_v45 }
 0x982   :  { %v12041_v39 = vpack.c.bf16 %v12040_v27, %v12040_v27 }
 0x984   :  { %13716 = vmatmul.mubr.bf16.vlgmr.msra.gmra.mrb[132].mxu0 %v12041_v39 }
 0xa57   :  { %v12147_v26 = vpop.f32.mrb[132].mxu0 }
 0xa58   :  { %v12148_v40 = vadd.f32 %v13593_v43, %v12147_v26  ;;  %v13717_v10 = vpop.f32.mrb[133].mxu0 }
 0xa59   :  { %v12150_v38 = vpop.f32.mrb[134].mxu0 }
 0xa5a   :  { %12153 = vst [vmem:[%s16587_s13] sm:$0xff] %v12148_v40  ;;  %v13718_v24 = vpop.f32.mrb[135].mxu0 }
 0xa5b   :  { %12158 = vsyncpa [#allocation5], 1 }
 0xa5c   :  { %12159 = vsyncpa [#allocation7], 1 }
 0xa5d   :  { %12160 = vsyncpa [#allocation10], 1 }
 0xa5e   :  { %12161 = vsyncpa [#allocation13], 1 }
 0xa5f   :  { %12162 = vsyncpa [#allocation16], 1 }
 0xa60   :  { %12163 = vsyncpa [#allocation19], 1 }
 0xa61   :  { %12164 = vsyncpa [#allocation22], 1 }

</bundles_post_ra>
